<compile_context>
chip_gen: v5e
topology: v5e:2x2
jax: 0.10.0
libtpu: 0.0.40
codegen_flags: <defaults>
</compile_context>

<pallas_src>
import math
from functools import partial

import jax
import jax.numpy as jnp
from jax.experimental import pallas as pl
from jax.experimental.pallas import tpu as pltpu


# -----------------------------------------------------------------------------
# helpers
# -----------------------------------------------------------------------------
def _round_up(x, m):
    return (x + m - 1) // m * m


def _pick_row_tile(M, cap=512):
    """Largest tile <= cap that divides M (M is always a multiple of 8 here)."""
    tm = min(M, cap)
    while M % tm != 0:
        tm -= 8
    return tm, M // tm


# -----------------------------------------------------------------------------
# Dense kernels (row-tiled, 'parallel' grid axis)
# -----------------------------------------------------------------------------
def _linear_kernel(x_ref, w_ref, b_ref, o_ref, *, activation):
    y = jnp.dot(x_ref[...], w_ref[...], preferred_element_type=jnp.float32)
    y = y + b_ref[...]
    if activation == "relu":
        y = jnp.maximum(y, 0.0)
    elif activation == "tanh":
        y = jnp.tanh(y)
    o_ref[...] = y.astype(o_ref.dtype)


def linear(x2d, w, b, activation=None):
    """x2d: [M, K], w: [K, N], b: [1, N] -> [M, N]; tiled over M."""
    M, K = x2d.shape
    N = w.shape[1]
    TM, nm = _pick_row_tile(M)
    return pl.pallas_call(
        partial(_linear_kernel, activation=activation),
        out_shape=jax.ShapeDtypeStruct((M, N), jnp.float32),
        grid_spec=pltpu.PrefetchScalarGridSpec(
            num_scalar_prefetch=0,
            grid=(nm,),
            in_specs=[pl.BlockSpec((TM, K), lambda i: (i, 0)),
                      pl.BlockSpec((K, N), lambda i: (0, 0)),
                      pl.BlockSpec((1, N), lambda i: (0, 0))],
            out_specs=pl.BlockSpec((TM, N), lambda i: (i, 0))),
        compiler_params=pltpu.CompilerParams(dimension_semantics=("parallel",)),
    )(x2d, w, b)


def _gx_layer0_kernel(x_ref, wfc_ref, bfc_ref, wih_ref, bih_ref, gf_ref, gr_ref):
    """gx = relu(x @ Wfc + bfc) @ [Wih_fwd | Wih_rev] + bih, split per direction."""
    h = jnp.dot(x_ref[...], wfc_ref[...], preferred_element_type=jnp.float32)
    h = jnp.maximum(h + bfc_ref[...], 0.0)
    g = jnp.dot(h, wih_ref[...], preferred_element_type=jnp.float32) + bih_ref[...]
    g3 = gf_ref.shape[-1]
    gf_ref[...] = g[:, :g3]
    gr_ref[...] = g[:, g3:]


def gx_layer0(x2d, wfc, bfc, wih, bih):
    M, K = x2d.shape
    G3 = wih.shape[1] // 2
    TM, nm = _pick_row_tile(M)
    return pl.pallas_call(
        _gx_layer0_kernel,
        out_shape=(jax.ShapeDtypeStruct((M, G3), jnp.float32),
                   jax.ShapeDtypeStruct((M, G3), jnp.float32)),
        grid_spec=pltpu.PrefetchScalarGridSpec(
            num_scalar_prefetch=0,
            grid=(nm,),
            in_specs=[pl.BlockSpec((TM, K), lambda i: (i, 0)),
                      pl.BlockSpec(wfc.shape, lambda i: (0, 0)),
                      pl.BlockSpec(bfc.shape, lambda i: (0, 0)),
                      pl.BlockSpec(wih.shape, lambda i: (0, 0)),
                      pl.BlockSpec(bih.shape, lambda i: (0, 0))],
            out_specs=(pl.BlockSpec((TM, G3), lambda i: (i, 0)),
                       pl.BlockSpec((TM, G3), lambda i: (i, 0)))),
        compiler_params=pltpu.CompilerParams(dimension_semantics=("parallel",)),
    )(x2d, wfc, bfc, wih, bih)


def _gx_dual_kernel(a_ref, b_ref, wa_ref, wb_ref, bias_ref, gf_ref, gr_ref):
    """gx = a @ Wa + b @ Wb + bias (both directions, N = 6*Hp), split per direction."""
    g = (jnp.dot(a_ref[...], wa_ref[...], preferred_element_type=jnp.float32)
         + jnp.dot(b_ref[...], wb_ref[...], preferred_element_type=jnp.float32)
         + bias_ref[...])
    g3 = gf_ref.shape[-1]
    gf_ref[...] = g[:, :g3]
    gr_ref[...] = g[:, g3:]


def gx_dual(a2d, b2d, wa, wb, bias):
    M, K = a2d.shape
    G3 = wa.shape[1] // 2
    TM, nm = _pick_row_tile(M)
    return pl.pallas_call(
        _gx_dual_kernel,
        out_shape=(jax.ShapeDtypeStruct((M, G3), jnp.float32),
                   jax.ShapeDtypeStruct((M, G3), jnp.float32)),
        grid_spec=pltpu.PrefetchScalarGridSpec(
            num_scalar_prefetch=0,
            grid=(nm,),
            in_specs=[pl.BlockSpec((TM, K), lambda i: (i, 0)),
                      pl.BlockSpec((TM, K), lambda i: (i, 0)),
                      pl.BlockSpec(wa.shape, lambda i: (0, 0)),
                      pl.BlockSpec(wb.shape, lambda i: (0, 0)),
                      pl.BlockSpec(bias.shape, lambda i: (0, 0))],
            out_specs=(pl.BlockSpec((TM, G3), lambda i: (i, 0)),
                       pl.BlockSpec((TM, G3), lambda i: (i, 0)))),
        compiler_params=pltpu.CompilerParams(dimension_semantics=("parallel",)),
    )(a2d, b2d, wa, wb, bias)


# -----------------------------------------------------------------------------
# Fused bidirectional GRU: one sequential grid over time chunks, TS steps / chunk.
# PyTorch gate order: r, z, n.  gx already contains b_ih + (b_hh for r,z); only the
# n-gate hidden bias (bhn) is applied in-recurrence (inside the r*(.) term).
# -----------------------------------------------------------------------------
def _bigru_kernel(gxf_ref, gxr_ref, whhf_ref, whhr_ref, bnf_ref, bnr_ref,
                  outf_ref, outr_ref, h_scr, *, ts, hp, bp):
    c = pl.program_id(0)

    @pl.when(c == 0)
    def _():
        h_scr[...] = jnp.zeros_like(h_scr)

    whhf = whhf_ref[...]
    whhr = whhr_ref[...]
    # hoist the [1,Hp] -> [Bp,Hp] bias broadcasts out of the per-timestep loop
    bnf = jnp.broadcast_to(bnf_ref[...], (bp, hp))
    bnr = jnp.broadcast_to(bnr_ref[...], (bp, hp))

    def cell(gx, h_prev, whh, bn):
        gh = jnp.dot(h_prev, whh, preferred_element_type=jnp.float32)
        r = jax.nn.sigmoid(gx[:, 0 * hp:1 * hp] + gh[:, 0 * hp:1 * hp])
        z = jax.nn.sigmoid(gx[:, 1 * hp:2 * hp] + gh[:, 1 * hp:2 * hp])
        n = jnp.tanh(gx[:, 2 * hp:3 * hp] + r * (gh[:, 2 * hp:3 * hp] + bn))
        return (1.0 - z) * n + z * h_prev

    hf = h_scr[0]
    hr = h_scr[1]
    # statically unrolled inner loop over the TS timesteps of this chunk
    for s in range(ts):
        hf = cell(gxf_ref[s], hf, whhf, bnf)            # forward: local step s
        outf_ref[s] = hf
        sr = ts - 1 - s                                  # reverse: local step ts-1-s
        hr = cell(gxr_ref[sr], hr, whhr, bnr)
        outr_ref[sr] = hr
    h_scr[0] = hf
    h_scr[1] = hr


def bigru(gx_f, gx_r, whh_f, whh_r, bhn_f, bhn_r, ts):
    """gx_*: [T, Bp, 3Hp] time-major -> (out_f [T,Bp,Hp], out_r [T,Bp,Hp])."""
    T, Bp, G3 = gx_f.shape
    Hp = whh_f.shape[0]
    Tc = T // ts
    return pl.pallas_call(
        partial(_bigru_kernel, ts=ts, hp=Hp, bp=Bp),
        out_shape=(jax.ShapeDtypeStruct((T, Bp, Hp), jnp.float32),
                   jax.ShapeDtypeStruct((T, Bp, Hp), jnp.float32)),
        grid_spec=pltpu.PrefetchScalarGridSpec(
            num_scalar_prefetch=0,
            grid=(Tc,),
            in_specs=[
                pl.BlockSpec((ts, Bp, G3), lambda c: (c, 0, 0)),            # fwd chunk
                pl.BlockSpec((ts, Bp, G3), lambda c: (Tc - 1 - c, 0, 0)),   # rev chunk
                pl.BlockSpec((Hp, G3), lambda c: (0, 0)),
                pl.BlockSpec((Hp, G3), lambda c: (0, 0)),
                pl.BlockSpec((1, Hp), lambda c: (0, 0)),
                pl.BlockSpec((1, Hp), lambda c: (0, 0)),
            ],
            out_specs=(pl.BlockSpec((ts, Bp, Hp), lambda c: (c, 0, 0)),
                       pl.BlockSpec((ts, Bp, Hp), lambda c: (Tc - 1 - c, 0, 0))),
            scratch_shapes=[pltpu.VMEM((2, Bp, Hp), jnp.float32)]),
        compiler_params=pltpu.CompilerParams(dimension_semantics=("arbitrary",)),
    )(gx_f, gx_r, whh_f, whh_r, bhn_f, bhn_r)


# -----------------------------------------------------------------------------
# Parameter init (deterministic, PyTorch-style uniform bounds) — real shapes
# -----------------------------------------------------------------------------
def init_encoder_params(key, n_x, n_hid, num_layers):
    H = n_hid

    def uniform(k, shape, bound):
        return jax.random.uniform(k, shape, jnp.float32, -bound, bound)

    keys = iter(jax.random.split(key, 4 + num_layers * 2 * 4))
    params = {}

    kb = 1.0 / math.sqrt(n_x)
    params["fc_w_t"] = uniform(next(keys), (n_x, H), kb)       # Linear(n_x, H) weight^T
    params["fc_b"] = uniform(next(keys), (1, H), kb)

    kg = 1.0 / math.sqrt(H)
    gru = []
    for layer in range(num_layers):
        in_size = H if layer == 0 else 2 * H
        dirs = []
        for _d in range(2):  # forward, reverse
            dirs.append({
                "w_ih_t": uniform(next(keys), (in_size, 3 * H), kg),  # W_ih^T
                "w_hh_t": uniform(next(keys), (H, 3 * H), kg),        # W_hh^T
                "b_ih": uniform(next(keys), (1, 3 * H), kg),
                "b_hh": uniform(next(keys), (1, 3 * H), kg),
            })
        gru.append(dirs)
    params["gru"] = gru

    kt = 1.0 / math.sqrt(2 * H)
    params["tr_w_t"] = uniform(next(keys), (2 * H, H), kt)     # Linear(2H, H) weight^T
    params["tr_b"] = uniform(next(keys), (1, H), kt)
    return params


# -----------------------------------------------------------------------------
# Pad real-shaped params into lane-dense kernel-space params (H -> Hp per gate)
# -----------------------------------------------------------------------------
def _pad_gate_cols(w, H, Hp):
    """[..., 3H] -> [..., 3Hp], zero-padding each gate slab to Hp lanes."""
    parts = [w[..., g * H:(g + 1) * H] for g in range(3)]
    pad = [(0, 0)] * (w.ndim - 1) + [(0, Hp - H)]
    return jnp.concatenate([jnp.pad(p, pad) for p in parts], axis=-1)


def _pad_rows(w, Kp):
    return jnp.pad(w, ((0, Kp - w.shape[0]), (0, 0)))


def pad_params_for_kernels(params, n_x, H, num_layers, Hp):
    kp = {}
    kp["fc_w_t"] = jnp.pad(params["fc_w_t"], ((0, 0), (0, Hp - H)))   # [n_x, Hp]
    kp["fc_b"] = jnp.pad(params["fc_b"], ((0, 0), (0, Hp - H)))       # [1, Hp]

    zeros_h = jnp.zeros((1, Hp), jnp.float32)
    layers = []
    for layer in range(num_layers):
        pf, pr = params["gru"][layer]
        bhh_f = _pad_gate_cols(pf["b_hh"], H, Hp)                     # [1, 3Hp]
        bhh_r = _pad_gate_cols(pr["b_hh"], H, Hp)
        bih_f = _pad_gate_cols(pf["b_ih"], H, Hp)
        bih_r = _pad_gate_cols(pr["b_ih"], H, Hp)
        # fold the r/z hidden-to-hidden biases into the (precomputed) input-gate bias;
        # the n-gate hidden bias must stay inside r*(.) so it is kept separate.
        bih_f = bih_f + jnp.concatenate(
            [bhh_f[:, 0:Hp], bhh_f[:, Hp:2 * Hp], zeros_h], axis=-1)
        bih_r = bih_r + jnp.concatenate(
            [bhh_r[:, 0:Hp], bhh_r[:, Hp:2 * Hp], zeros_h], axis=-1)
        entry = {
            "whh_f": _pad_rows(_pad_gate_cols(pf["w_hh_t"], H, Hp), Hp),  # [Hp, 3Hp]
            "whh_r": _pad_rows(_pad_gate_cols(pr["w_hh_t"], H, Hp), Hp),
            "bhn_f": bhh_f[:, 2 * Hp:3 * Hp],                             # [1, Hp]
            "bhn_r": bhh_r[:, 2 * Hp:3 * Hp],
            "bih": jnp.concatenate([bih_f, bih_r], axis=-1),              # [1, 6Hp]
        }
        if layer == 0:
            wih_f = _pad_rows(_pad_gate_cols(pf["w_ih_t"], H, Hp), Hp)    # [Hp, 3Hp]
            wih_r = _pad_rows(_pad_gate_cols(pr["w_ih_t"], H, Hp), Hp)
            entry["wih"] = jnp.concatenate([wih_f, wih_r], axis=-1)       # [Hp, 6Hp]
        else:
            # w_ih_t: [2H, 3H]; rows 0:H consume forward-half features, rows H:2H reverse.
            wa_f = _pad_rows(_pad_gate_cols(pf["w_ih_t"][:H], H, Hp), Hp)
            wb_f = _pad_rows(_pad_gate_cols(pf["w_ih_t"][H:], H, Hp), Hp)
            wa_r = _pad_rows(_pad_gate_cols(pr["w_ih_t"][:H], H, Hp), Hp)
            wb_r = _pad_rows(_pad_gate_cols(pr["w_ih_t"][H:], H, Hp), Hp)
            entry["wa"] = jnp.concatenate([wa_f, wa_r], axis=-1)          # [Hp, 6Hp]
            entry["wb"] = jnp.concatenate([wb_f, wb_r], axis=-1)          # [Hp, 6Hp]
        layers.append(entry)
    kp["layers"] = layers

    trw = jnp.zeros((2 * Hp, Hp), jnp.float32)
    trw = trw.at[0:H, 0:H].set(params["tr_w_t"][0:H])            # fwd-hidden rows
    trw = trw.at[Hp:Hp + H, 0:H].set(params["tr_w_t"][H:2 * H])  # rev-hidden rows
    kp["tr_w"] = trw                                             # [2Hp, Hp]
    kp["tr_b"] = jnp.pad(params["tr_b"], ((0, 0), (0, Hp - H)))  # [1, Hp]
    return kp


# -----------------------------------------------------------------------------
# Forward pass matching the PyTorch Encoder.forward semantics
# -----------------------------------------------------------------------------
def encoder_forward(kp, x_past, n_hid, num_layers):
    B, T, n_x = x_past.shape
    H = n_hid
    Hp = kp["fc_w_t"].shape[1]
    Bp = _round_up(B, 8)
    G3 = 3 * Hp

    TS = max(t for t in (8, 4, 2, 1) if T % t == 0)   # timesteps per grid step
    M = T * Bp

    # single small transpose to time-major + batch pad; all layers stay [T, Bp, *]
    x_tm = jnp.transpose(x_past, (1, 0, 2))
    if Bp != B:
        x_tm = jnp.pad(x_tm, ((0, 0), (0, Bp - B), (0, 0)))

    # layer 0: fc Linear+ReLU fused with both directions' input-gate matmul
    l0 = kp["layers"][0]
    gx_f, gx_r = gx_layer0(x_tm.reshape(M, n_x), kp["fc_w_t"], kp["fc_b"],
                           l0["wih"], l0["bih"])
    out_f, out_r = bigru(gx_f.reshape(T, Bp, G3), gx_r.reshape(T, Bp, G3),
                         l0["whh_f"], l0["whh_r"], l0["bhn_f"], l0["bhn_r"], TS)
    h_last = [(out_f[T - 1], out_r[0])]   # final hiddens per direction (padded)

    for layer in range(1, num_layers):
        lp = kp["layers"][layer]
        gx_f, gx_r = gx_dual(out_f.reshape(M, Hp), out_r.reshape(M, Hp),
                             lp["wa"], lp["wb"], lp["bih"])
        out_f, out_r = bigru(gx_f.reshape(T, Bp, G3), gx_r.reshape(T, Bp, G3),
                             lp["whh_f"], lp["whh_r"], lp["bhn_f"], lp["bhn_r"], TS)
        h_last.append((out_f[T - 1], out_r[0]))

    # enc_output: strip padding, back to batch-first [B, T, 2H]
    enc_output = jnp.concatenate([out_f[:, :B, :H], out_r[:, :B, :H]], axis=-1)
    enc_output = jnp.transpose(enc_output, (1, 0, 2))

    # h = tanh(transform(concat(fwd_final, rev_final) per layer)) -> [L, B, H]
    tr_in = jnp.stack([jnp.concatenate([hf, hr], axis=-1) for hf, hr in h_last], axis=0)
    h = linear(tr_in.reshape(num_layers * Bp, 2 * Hp), kp["tr_w"], kp["tr_b"],
               activation="tanh")
    h = h.reshape(num_layers, Bp, Hp)[:, :B, :H]
    return enc_output, h


if __name__ == "__main__":
    B, T, n_x, n_hid, num_layers = 2, 8, 4, 32, 2

    key = jax.random.PRNGKey(0)
    k_param, k_x = jax.random.split(key)
    params = init_encoder_params(k_param, n_x, n_hid, num_layers)
    Hp = max(128, _round_up(n_hid, 128))          # lane-dense hidden width
    kp = pad_params_for_kernels(params, n_x, n_hid, num_layers, Hp)
    x_past = jax.random.normal(k_x, (B, T, n_x), dtype=jnp.float32)

    fwd = jax.jit(partial(encoder_forward, n_hid=n_hid, num_layers=num_layers))
    enc_output, h = fwd(kp, x_past)
    enc_output = jax.block_until_ready(enc_output)
    h = jax.block_until_ready(h)

    assert enc_output.shape == (B, T, 2 * n_hid), enc_output.shape
    assert h.shape == (num_layers, B, n_hid), h.shape
    assert bool(jnp.all(jnp.isfinite(enc_output))) and bool(jnp.all(jnp.isfinite(h)))

    print("KERNEL_OK")
</pallas_src>

<mosaic_0001>
module attributes {stable_mosaic.version = 11 : i64} {
  func.func @_gx_layer0_kernel(%arg0: i32, %arg1: memref<64x4xf32, #tpu.memory_space<vmem>>, %arg2: memref<4x128xf32, #tpu.memory_space<vmem>>, %arg3: memref<1x128xf32, #tpu.memory_space<vmem>>, %arg4: memref<128x768xf32, #tpu.memory_space<vmem>>, %arg5: memref<1x768xf32, #tpu.memory_space<vmem>>, %arg6: memref<64x384xf32, #tpu.memory_space<vmem>>, %arg7: memref<64x384xf32, #tpu.memory_space<vmem>>) attributes {dimension_semantics = [#tpu.dimension_semantics<parallel>], iteration_bounds = array<i64: 1>, scalar_prefetch = 0 : i64, scratch_operands = 0 : i64, tpu.core_type = #tpu.core_type<tc>, window_params = [{transform_indices = @transform_0, window_bounds = array<i64: 64, 4>}, {pipeline_mode = #tpu.pipeline_mode<synchronous>, transform_indices = @transform_1, window_bounds = array<i64: 4, 128>}, {pipeline_mode = #tpu.pipeline_mode<synchronous>, transform_indices = @transform_2, window_bounds = array<i64: 1, 128>}, {pipeline_mode = #tpu.pipeline_mode<synchronous>, transform_indices = @transform_3, window_bounds = array<i64: 128, 768>}, {pipeline_mode = #tpu.pipeline_mode<synchronous>, transform_indices = @transform_4, window_bounds = array<i64: 1, 768>}, {transform_indices = @transform_5, window_bounds = array<i64: 64, 384>}, {transform_indices = @transform_6, window_bounds = array<i64: 64, 384>}]} {
    %c0 = arith.constant 0 : index
    %c0_0 = arith.constant 0 : index
    %0 = vector.load %arg1[%c0, %c0_0] : memref<64x4xf32, #tpu.memory_space<vmem>>, vector<64x4xf32>
    %c0_1 = arith.constant 0 : index
    %c0_2 = arith.constant 0 : index
    %1 = vector.load %arg2[%c0_1, %c0_2] : memref<4x128xf32, #tpu.memory_space<vmem>>, vector<4x128xf32>
    %cst = arith.constant dense<0.000000e+00> : vector<64x128xf32>
    %2 = tpu.matmul %0, %1, %cst {dimension_numbers = #tpu.dot_dimension_numbers<[1], [0], [0], [1], [0, 0, 1, 1], [], []>} : vector<64x4xf32>, vector<4x128xf32>, vector<64x128xf32> -> vector<64x128xf32>
    %c0_3 = arith.constant 0 : index
    %c0_4 = arith.constant 0 : index
    %3 = vector.load %arg3[%c0_3, %c0_4] : memref<1x128xf32, #tpu.memory_space<vmem>>, vector<1x128xf32>
    %4 = vector.broadcast %3 : vector<1x128xf32> to vector<64x128xf32>
    %5 = arith.addf %2, %4 : vector<64x128xf32>
    %cst_5 = arith.constant 0.000000e+00 : f32
    %6 = vector.broadcast %cst_5 : f32 to vector<64x128xf32>
    %7 = arith.maximumf %5, %6 : vector<64x128xf32>
    %c0_6 = arith.constant 0 : index
    %c0_7 = arith.constant 0 : index
    %8 = vector.load %arg4[%c0_6, %c0_7] : memref<128x768xf32, #tpu.memory_space<vmem>>, vector<128x768xf32>
    %cst_8 = arith.constant dense<0.000000e+00> : vector<64x768xf32>
    %9 = tpu.matmul %7, %8, %cst_8 {dimension_numbers = #tpu.dot_dimension_numbers<[1], [0], [0], [1], [0, 0, 1, 1], [], []>} : vector<64x128xf32>, vector<128x768xf32>, vector<64x768xf32> -> vector<64x768xf32>
    %c0_9 = arith.constant 0 : index
    %c0_10 = arith.constant 0 : index
    %10 = vector.load %arg5[%c0_9, %c0_10] : memref<1x768xf32, #tpu.memory_space<vmem>>, vector<1x768xf32>
    %11 = vector.broadcast %10 : vector<1x768xf32> to vector<64x768xf32>
    %12 = arith.addf %9, %11 : vector<64x768xf32>
    %13 = vector.extract_strided_slice %12 {offsets = [0, 0], sizes = [64, 384], strides = [1, 1]} : vector<64x768xf32> to vector<64x384xf32>
    %c0_11 = arith.constant 0 : index
    %c0_12 = arith.constant 0 : index
    %14 = vector.load %arg6[%c0_11, %c0_12] : memref<64x384xf32, #tpu.memory_space<vmem>>, vector<64x384xf32>
    tpu.vector_store %arg6[%c0_11, %c0_12], %13 {strides = array<i32>} : memref<64x384xf32, #tpu.memory_space<vmem>>, vector<64x384xf32>,
    %15 = vector.extract_strided_slice %12 {offsets = [0, 384], sizes = [64, 384], strides = [1, 1]} : vector<64x768xf32> to vector<64x384xf32>
    %c0_13 = arith.constant 0 : index
    %c0_14 = arith.constant 0 : index
    %16 = vector.load %arg7[%c0_13, %c0_14] : memref<64x384xf32, #tpu.memory_space<vmem>>, vector<64x384xf32>
    tpu.vector_store %arg7[%c0_13, %c0_14], %15 {strides = array<i32>} : memref<64x384xf32, #tpu.memory_space<vmem>>, vector<64x384xf32>,
    return
  }
  func.func @transform_0(%arg0: i32) -> (i32, i32) {
    %c0_i32 = arith.constant 0 : i32
    %c0_i32_0 = arith.constant 0 : i32
    return %arg0, %c0_i32 : i32, i32
  }
  func.func @transform_1(%arg0: i32) -> (i32, i32) {
    %c0_i32 = arith.constant 0 : i32
    %c0_i32_0 = arith.constant 0 : i32
    %c0_i32_1 = arith.constant 0 : i32
    return %c0_i32, %c0_i32_0 : i32, i32
  }
  func.func @transform_2(%arg0: i32) -> (i32, i32) {
    %c0_i32 = arith.constant 0 : i32
    %c0_i32_0 = arith.constant 0 : i32
    %c0_i32_1 = arith.constant 0 : i32
    return %c0_i32, %c0_i32_0 : i32, i32
  }
  func.func @transform_3(%arg0: i32) -> (i32, i32) {
    %c0_i32 = arith.constant 0 : i32
    %c0_i32_0 = arith.constant 0 : i32
    %c0_i32_1 = arith.constant 0 : i32
    return %c0_i32, %c0_i32_0 : i32, i32
  }
  func.func @transform_4(%arg0: i32) -> (i32, i32) {
    %c0_i32 = arith.constant 0 : i32
    %c0_i32_0 = arith.constant 0 : i32
    %c0_i32_1 = arith.constant 0 : i32
    return %c0_i32, %c0_i32_0 : i32, i32
  }
  func.func @transform_5(%arg0: i32) -> (i32, i32) {
    %c0_i32 = arith.constant 0 : i32
    %c0_i32_0 = arith.constant 0 : i32
    return %arg0, %c0_i32 : i32, i32
  }
  func.func @transform_6(%arg0: i32) -> (i32, i32) {
    %c0_i32 = arith.constant 0 : i32
    %c0_i32_0 = arith.constant 0 : i32
    return %arg0, %c0_i32 : i32, i32
  }
}

module attributes {stable_mosaic.version = 11 : i64} {
  func.func @_bigru_kernel(%arg0: i32, %arg1: memref<8x8x384xf32, #tpu.memory_space<vmem>>, %arg2: memref<8x8x384xf32, #tpu.memory_space<vmem>>, %arg3: memref<128x384xf32, #tpu.memory_space<vmem>>, %arg4: memref<128x384xf32, #tpu.memory_space<vmem>>, %arg5: memref<1x128xf32, #tpu.memory_space<vmem>>, %arg6: memref<1x128xf32, #tpu.memory_space<vmem>>, %arg7: memref<8x8x128xf32, #tpu.memory_space<vmem>>, %arg8: memref<8x8x128xf32, #tpu.memory_space<vmem>>, %arg9: memref<2x8x128xf32, #tpu.memory_space<vmem>>) attributes {dimension_semantics = [#tpu.dimension_semantics<arbitrary>], iteration_bounds = array<i64: 1>, scalar_prefetch = 0 : i64, scratch_operands = 1 : i64, tpu.core_type = #tpu.core_type<tc>, window_params = [{transform_indices = @transform_0, window_bounds = array<i64: 8, 8, 384>}, {transform_indices = @transform_1, window_bounds = array<i64: 8, 8, 384>}, {pipeline_mode = #tpu.pipeline_mode<synchronous>, transform_indices = @transform_2, window_bounds = array<i64: 128, 384>}, {pipeline_mode = #tpu.pipeline_mode<synchronous>, transform_indices = @transform_3, window_bounds = array<i64: 128, 384>}, {pipeline_mode = #tpu.pipeline_mode<synchronous>, transform_indices = @transform_4, window_bounds = array<i64: 1, 128>}, {pipeline_mode = #tpu.pipeline_mode<synchronous>, transform_indices = @transform_5, window_bounds = array<i64: 1, 128>}, {transform_indices = @transform_6, window_bounds = array<i64: 8, 8, 128>}, {transform_indices = @transform_7, window_bounds = array<i64: 8, 8, 128>}]} {
    %c0_i32 = arith.constant 0 : i32
    %0 = arith.cmpi eq, %arg0, %c0_i32 : i32
    %1 = arith.extui %0 : i1 to i32
    %c0_i32_0 = arith.constant 0 : i32
    %2 = arith.cmpi ne, %1, %c0_i32_0 : i32
    scf.if %2 {
      %cst_172 = arith.constant 0.000000e+00 : f32
      %549 = vector.broadcast %cst_172 : f32 to vector<2x8x128xf32>
      %c0_173 = arith.constant 0 : index
      %c0_174 = arith.constant 0 : index
      %c0_175 = arith.constant 0 : index
      %550 = vector.load %arg9[%c0_173, %c0_174, %c0_175] : memref<2x8x128xf32, #tpu.memory_space<vmem>>, vector<2x8x128xf32>
      tpu.vector_store %arg9[%c0_173, %c0_174, %c0_175], %549 {strides = array<i32>} : memref<2x8x128xf32, #tpu.memory_space<vmem>>, vector<2x8x128xf32>,
    } else {
    }
    %c0 = arith.constant 0 : index
    %c0_1 = arith.constant 0 : index
    %3 = vector.load %arg3[%c0, %c0_1] : memref<128x384xf32, #tpu.memory_space<vmem>>, vector<128x384xf32>
    %c0_2 = arith.constant 0 : index
    %c0_3 = arith.constant 0 : index
    %4 = vector.load %arg4[%c0_2, %c0_3] : memref<128x384xf32, #tpu.memory_space<vmem>>, vector<128x384xf32>
    %c0_4 = arith.constant 0 : index
    %c0_5 = arith.constant 0 : index
    %5 = vector.load %arg5[%c0_4, %c0_5] : memref<1x128xf32, #tpu.memory_space<vmem>>, vector<1x128xf32>
    %6 = vector.shape_cast %5 : vector<1x128xf32> to vector<1x128xf32>
    %7 = vector.broadcast %6 : vector<1x128xf32> to vector<8x128xf32>
    %c0_6 = arith.constant 0 : index
    %c0_7 = arith.constant 0 : index
    %8 = vector.load %arg6[%c0_6, %c0_7] : memref<1x128xf32, #tpu.memory_space<vmem>>, vector<1x128xf32>
    %9 = vector.shape_cast %8 : vector<1x128xf32> to vector<1x128xf32>
    %10 = vector.broadcast %9 : vector<1x128xf32> to vector<8x128xf32>
    %c0_8 = arith.constant 0 : index
    %c0_9 = arith.constant 0 : index
    %c0_10 = arith.constant 0 : index
    %11 = vector.load %arg9[%c0_8, %c0_9, %c0_10] : memref<2x8x128xf32, #tpu.memory_space<vmem>>, vector<1x8x128xf32>
    %12 = vector.shape_cast %11 : vector<1x8x128xf32> to vector<8x128xf32>
    %c1 = arith.constant 1 : index
    %c0_11 = arith.constant 0 : index
    %c0_12 = arith.constant 0 : index
    %13 = vector.load %arg9[%c1, %c0_11, %c0_12] : memref<2x8x128xf32, #tpu.memory_space<vmem>>, vector<1x8x128xf32>
    %14 = vector.shape_cast %13 : vector<1x8x128xf32> to vector<8x128xf32>
    %c0_13 = arith.constant 0 : index
    %c0_14 = arith.constant 0 : index
    %c0_15 = arith.constant 0 : index
    %15 = vector.load %arg1[%c0_13, %c0_14, %c0_15] : memref<8x8x384xf32, #tpu.memory_space<vmem>>, vector<1x8x384xf32>
    %16 = vector.shape_cast %15 : vector<1x8x384xf32> to vector<8x384xf32>
    %cst = arith.constant dense<0.000000e+00> : vector<8x384xf32>
    %17 = tpu.matmul %12, %3, %cst {dimension_numbers = #tpu.dot_dimension_numbers<[1], [0], [0], [1], [0, 0, 1, 1], [], []>} : vector<8x128xf32>, vector<128x384xf32>, vector<8x384xf32> -> vector<8x384xf32>
    %18 = vector.extract_strided_slice %16 {offsets = [0, 0], sizes = [8, 128], strides = [1, 1]} : vector<8x384xf32> to vector<8x128xf32>
    %19 = vector.extract_strided_slice %17 {offsets = [0, 0], sizes = [8, 128], strides = [1, 1]} : vector<8x384xf32> to vector<8x128xf32>
    %20 = arith.addf %18, %19 : vector<8x128xf32>
    %21 = arith.negf %20 : vector<8x128xf32>
    %22 = math.exp %21 : vector<8x128xf32>
    %cst_16 = arith.constant 1.000000e+00 : f32
    %23 = vector.broadcast %cst_16 : f32 to vector<8x128xf32>
    %24 = arith.addf %23, %22 : vector<8x128xf32>
    %25 = arith.divf %23, %24 : vector<8x128xf32>
    %26 = vector.extract_strided_slice %16 {offsets = [0, 128], sizes = [8, 128], strides = [1, 1]} : vector<8x384xf32> to vector<8x128xf32>
    %27 = vector.extract_strided_slice %17 {offsets = [0, 128], sizes = [8, 128], strides = [1, 1]} : vector<8x384xf32> to vector<8x128xf32>
    %28 = arith.addf %26, %27 : vector<8x128xf32>
    %29 = arith.negf %28 : vector<8x128xf32>
    %30 = math.exp %29 : vector<8x128xf32>
    %cst_17 = arith.constant 1.000000e+00 : f32
    %31 = vector.broadcast %cst_17 : f32 to vector<8x128xf32>
    %32 = arith.addf %31, %30 : vector<8x128xf32>
    %33 = arith.divf %31, %32 : vector<8x128xf32>
    %34 = vector.extract_strided_slice %16 {offsets = [0, 256], sizes = [8, 128], strides = [1, 1]} : vector<8x384xf32> to vector<8x128xf32>
    %35 = vector.extract_strided_slice %17 {offsets = [0, 256], sizes = [8, 128], strides = [1, 1]} : vector<8x384xf32> to vector<8x128xf32>
    %36 = arith.addf %35, %7 : vector<8x128xf32>
    %37 = arith.mulf %25, %36 : vector<8x128xf32>
    %38 = arith.addf %34, %37 : vector<8x128xf32>
    %39 = math.tanh %38 : vector<8x128xf32>
    %cst_18 = arith.constant 1.000000e+00 : f32
    %40 = vector.broadcast %cst_18 : f32 to vector<8x128xf32>
    %41 = arith.subf %40, %33 : vector<8x128xf32>
    %42 = arith.mulf %41, %39 : vector<8x128xf32>
    %43 = arith.mulf %33, %12 : vector<8x128xf32>
    %44 = arith.addf %42, %43 : vector<8x128xf32>
    %c0_19 = arith.constant 0 : index
    %c0_20 = arith.constant 0 : index
    %c0_21 = arith.constant 0 : index
    %45 = vector.load %arg7[%c0_19, %c0_20, %c0_21] : memref<8x8x128xf32, #tpu.memory_space<vmem>>, vector<1x8x128xf32>
    %46 = vector.shape_cast %45 : vector<1x8x128xf32> to vector<8x128xf32>
    %47 = vector.shape_cast %44 : vector<8x128xf32> to vector<1x8x128xf32>
    tpu.vector_store %arg7[%c0_19, %c0_20, %c0_21], %47 {strides = array<i32>} : memref<8x8x128xf32, #tpu.memory_space<vmem>>, vector<1x8x128xf32>,
    %c7 = arith.constant 7 : index
    %c0_22 = arith.constant 0 : index
    %c0_23 = arith.constant 0 : index
    %48 = vector.load %arg2[%c7, %c0_22, %c0_23] : memref<8x8x384xf32, #tpu.memory_space<vmem>>, vector<1x8x384xf32>
    %49 = vector.shape_cast %48 : vector<1x8x384xf32> to vector<8x384xf32>
    %cst_24 = arith.constant dense<0.000000e+00> : vector<8x384xf32>
    %50 = tpu.matmul %14, %4, %cst_24 {dimension_numbers = #tpu.dot_dimension_numbers<[1], [0], [0], [1], [0, 0, 1, 1], [], []>} : vector<8x128xf32>, vector<128x384xf32>, vector<8x384xf32> -> vector<8x384xf32>
    %51 = vector.extract_strided_slice %49 {offsets = [0, 0], sizes = [8, 128], strides = [1, 1]} : vector<8x384xf32> to vector<8x128xf32>
    %52 = vector.extract_strided_slice %50 {offsets = [0, 0], sizes = [8, 128], strides = [1, 1]} : vector<8x384xf32> to vector<8x128xf32>
    %53 = arith.addf %51, %52 : vector<8x128xf32>
    %54 = arith.negf %53 : vector<8x128xf32>
    %55 = math.exp %54 : vector<8x128xf32>
    %cst_25 = arith.constant 1.000000e+00 : f32
    %56 = vector.broadcast %cst_25 : f32 to vector<8x128xf32>
    %57 = arith.addf %56, %55 : vector<8x128xf32>
    %58 = arith.divf %56, %57 : vector<8x128xf32>
    %59 = vector.extract_strided_slice %49 {offsets = [0, 128], sizes = [8, 128], strides = [1, 1]} : vector<8x384xf32> to vector<8x128xf32>
    %60 = vector.extract_strided_slice %50 {offsets = [0, 128], sizes = [8, 128], strides = [1, 1]} : vector<8x384xf32> to vector<8x128xf32>
    %61 = arith.addf %59, %60 : vector<8x128xf32>
    %62 = arith.negf %61 : vector<8x128xf32>
    %63 = math.exp %62 : vector<8x128xf32>
    %cst_26 = arith.constant 1.000000e+00 : f32
    %64 = vector.broadcast %cst_26 : f32 to vector<8x128xf32>
    %65 = arith.addf %64, %63 : vector<8x128xf32>
    %66 = arith.divf %64, %65 : vector<8x128xf32>
    %67 = vector.extract_strided_slice %49 {offsets = [0, 256], sizes = [8, 128], strides = [1, 1]} : vector<8x384xf32> to vector<8x128xf32>
    %68 = vector.extract_strided_slice %50 {offsets = [0, 256], sizes = [8, 128], strides = [1, 1]} : vector<8x384xf32> to vector<8x128xf32>
    %69 = arith.addf %68, %10 : vector<8x128xf32>
    %70 = arith.mulf %58, %69 : vector<8x128xf32>
    %71 = arith.addf %67, %70 : vector<8x128xf32>
    %72 = math.tanh %71 : vector<8x128xf32>
    %cst_27 = arith.constant 1.000000e+00 : f32
    %73 = vector.broadcast %cst_27 : f32 to vector<8x128xf32>
    %74 = arith.subf %73, %66 : vector<8x128xf32>
    %75 = arith.mulf %74, %72 : vector<8x128xf32>
    %76 = arith.mulf %66, %14 : vector<8x128xf32>
    %77 = arith.addf %75, %76 : vector<8x128xf32>
    %c7_28 = arith.constant 7 : index
    %c0_29 = arith.constant 0 : index
    %c0_30 = arith.constant 0 : index
    %78 = vector.load %arg8[%c7_28, %c0_29, %c0_30] : memref<8x8x128xf32, #tpu.memory_space<vmem>>, vector<1x8x128xf32>
    %79 = vector.shape_cast %78 : vector<1x8x128xf32> to vector<8x128xf32>
    %80 = vector.shape_cast %77 : vector<8x128xf32> to vector<1x8x128xf32>
    tpu.vector_store %arg8[%c7_28, %c0_29, %c0_30], %80 {strides = array<i32>} : memref<8x8x128xf32, #tpu.memory_space<vmem>>, vector<1x8x128xf32>,
    %c1_31 = arith.constant 1 : index
    %c0_32 = arith.constant 0 : index
    %c0_33 = arith.constant 0 : index
    %81 = vector.load %arg1[%c1_31, %c0_32, %c0_33] : memref<8x8x384xf32, #tpu.memory_space<vmem>>, vector<1x8x384xf32>
    %82 = vector.shape_cast %81 : vector<1x8x384xf32> to vector<8x384xf32>
    %cst_34 = arith.constant dense<0.000000e+00> : vector<8x384xf32>
    %83 = tpu.matmul %44, %3, %cst_34 {dimension_numbers = #tpu.dot_dimension_numbers<[1], [0], [0], [1], [0, 0, 1, 1], [], []>} : vector<8x128xf32>, vector<128x384xf32>, vector<8x384xf32> -> vector<8x384xf32>
    %84 = vector.extract_strided_slice %82 {offsets = [0, 0], sizes = [8, 128], strides = [1, 1]} : vector<8x384xf32> to vector<8x128xf32>
    %85 = vector.extract_strided_slice %83 {offsets = [0, 0], sizes = [8, 128], strides = [1, 1]} : vector<8x384xf32> to vector<8x128xf32>
    %86 = arith.addf %84, %85 : vector<8x128xf32>
    %87 = arith.negf %86 : vector<8x128xf32>
    %88 = math.exp %87 : vector<8x128xf32>
    %cst_35 = arith.constant 1.000000e+00 : f32
    %89 = vector.broadcast %cst_35 : f32 to vector<8x128xf32>
    %90 = arith.addf %89, %88 : vector<8x128xf32>
    %91 = arith.divf %89, %90 : vector<8x128xf32>
    %92 = vector.extract_strided_slice %82 {offsets = [0, 128], sizes = [8, 128], strides = [1, 1]} : vector<8x384xf32> to vector<8x128xf32>
    %93 = vector.extract_strided_slice %83 {offsets = [0, 128], sizes = [8, 128], strides = [1, 1]} : vector<8x384xf32> to vector<8x128xf32>
    %94 = arith.addf %92, %93 : vector<8x128xf32>
    %95 = arith.negf %94 : vector<8x128xf32>
    %96 = math.exp %95 : vector<8x128xf32>
    %cst_36 = arith.constant 1.000000e+00 : f32
    %97 = vector.broadcast %cst_36 : f32 to vector<8x128xf32>
    %98 = arith.addf %97, %96 : vector<8x128xf32>
    %99 = arith.divf %97, %98 : vector<8x128xf32>
    %100 = vector.extract_strided_slice %82 {offsets = [0, 256], sizes = [8, 128], strides = [1, 1]} : vector<8x384xf32> to vector<8x128xf32>
    %101 = vector.extract_strided_slice %83 {offsets = [0, 256], sizes = [8, 128], strides = [1, 1]} : vector<8x384xf32> to vector<8x128xf32>
    %102 = arith.addf %101, %7 : vector<8x128xf32>
    %103 = arith.mulf %91, %102 : vector<8x128xf32>
    %104 = arith.addf %100, %103 : vector<8x128xf32>
    %105 = math.tanh %104 : vector<8x128xf32>
    %cst_37 = arith.constant 1.000000e+00 : f32
    %106 = vector.broadcast %cst_37 : f32 to vector<8x128xf32>
    %107 = arith.subf %106, %99 : vector<8x128xf32>
    %108 = arith.mulf %107, %105 : vector<8x128xf32>
    %109 = arith.mulf %99, %44 : vector<8x128xf32>
    %110 = arith.addf %108, %109 : vector<8x128xf32>
    %c1_38 = arith.constant 1 : index
    %c0_39 = arith.constant 0 : index
    %c0_40 = arith.constant 0 : index
    %111 = vector.load %arg7[%c1_38, %c0_39, %c0_40] : memref<8x8x128xf32, #tpu.memory_space<vmem>>, vector<1x8x128xf32>
    %112 = vector.shape_cast %111 : vector<1x8x128xf32> to vector<8x128xf32>
    %113 = vector.shape_cast %110 : vector<8x128xf32> to vector<1x8x128xf32>
    tpu.vector_store %arg7[%c1_38, %c0_39, %c0_40], %113 {strides = array<i32>} : memref<8x8x128xf32, #tpu.memory_space<vmem>>, vector<1x8x128xf32>,
    %c6 = arith.constant 6 : index
    %c0_41 = arith.constant 0 : index
    %c0_42 = arith.constant 0 : index
    %114 = vector.load %arg2[%c6, %c0_41, %c0_42] : memref<8x8x384xf32, #tpu.memory_space<vmem>>, vector<1x8x384xf32>
    %115 = vector.shape_cast %114 : vector<1x8x384xf32> to vector<8x384xf32>
    %cst_43 = arith.constant dense<0.000000e+00> : vector<8x384xf32>
    %116 = tpu.matmul %77, %4, %cst_43 {dimension_numbers = #tpu.dot_dimension_numbers<[1], [0], [0], [1], [0, 0, 1, 1], [], []>} : vector<8x128xf32>, vector<128x384xf32>, vector<8x384xf32> -> vector<8x384xf32>
    %117 = vector.extract_strided_slice %115 {offsets = [0, 0], sizes = [8, 128], strides = [1, 1]} : vector<8x384xf32> to vector<8x128xf32>
    %118 = vector.extract_strided_slice %116 {offsets = [0, 0], sizes = [8, 128], strides = [1, 1]} : vector<8x384xf32> to vector<8x128xf32>
    %119 = arith.addf %117, %118 : vector<8x128xf32>
    %120 = arith.negf %119 : vector<8x128xf32>
    %121 = math.exp %120 : vector<8x128xf32>
    %cst_44 = arith.constant 1.000000e+00 : f32
    %122 = vector.broadcast %cst_44 : f32 to vector<8x128xf32>
    %123 = arith.addf %122, %121 : vector<8x128xf32>
    %124 = arith.divf %122, %123 : vector<8x128xf32>
    %125 = vector.extract_strided_slice %115 {offsets = [0, 128], sizes = [8, 128], strides = [1, 1]} : vector<8x384xf32> to vector<8x128xf32>
    %126 = vector.extract_strided_slice %116 {offsets = [0, 128], sizes = [8, 128], strides = [1, 1]} : vector<8x384xf32> to vector<8x128xf32>
    %127 = arith.addf %125, %126 : vector<8x128xf32>
    %128 = arith.negf %127 : vector<8x128xf32>
    %129 = math.exp %128 : vector<8x128xf32>
    %cst_45 = arith.constant 1.000000e+00 : f32
    %130 = vector.broadcast %cst_45 : f32 to vector<8x128xf32>
    %131 = arith.addf %130, %129 : vector<8x128xf32>
    %132 = arith.divf %130, %131 : vector<8x128xf32>
    %133 = vector.extract_strided_slice %115 {offsets = [0, 256], sizes = [8, 128], strides = [1, 1]} : vector<8x384xf32> to vector<8x128xf32>
    %134 = vector.extract_strided_slice %116 {offsets = [0, 256], sizes = [8, 128], strides = [1, 1]} : vector<8x384xf32> to vector<8x128xf32>
    %135 = arith.addf %134, %10 : vector<8x128xf32>
    %136 = arith.mulf %124, %135 : vector<8x128xf32>
    %137 = arith.addf %133, %136 : vector<8x128xf32>
    %138 = math.tanh %137 : vector<8x128xf32>
    %cst_46 = arith.constant 1.000000e+00 : f32
    %139 = vector.broadcast %cst_46 : f32 to vector<8x128xf32>
    %140 = arith.subf %139, %132 : vector<8x128xf32>
    %141 = arith.mulf %140, %138 : vector<8x128xf32>
    %142 = arith.mulf %132, %77 : vector<8x128xf32>
    %143 = arith.addf %141, %142 : vector<8x128xf32>
    %c6_47 = arith.constant 6 : index
    %c0_48 = arith.constant 0 : index
    %c0_49 = arith.constant 0 : index
    %144 = vector.load %arg8[%c6_47, %c0_48, %c0_49] : memref<8x8x128xf32, #tpu.memory_space<vmem>>, vector<1x8x128xf32>
    %145 = vector.shape_cast %144 : vector<1x8x128xf32> to vector<8x128xf32>
    %146 = vector.shape_cast %143 : vector<8x128xf32> to vector<1x8x128xf32>
    tpu.vector_store %arg8[%c6_47, %c0_48, %c0_49], %146 {strides = array<i32>} : memref<8x8x128xf32, #tpu.memory_space<vmem>>, vector<1x8x128xf32>,
    %c2 = arith.constant 2 : index
    %c0_50 = arith.constant 0 : index
    %c0_51 = arith.constant 0 : index
    %147 = vector.load %arg1[%c2, %c0_50, %c0_51] : memref<8x8x384xf32, #tpu.memory_space<vmem>>, vector<1x8x384xf32>
    %148 = vector.shape_cast %147 : vector<1x8x384xf32> to vector<8x384xf32>
    %cst_52 = arith.constant dense<0.000000e+00> : vector<8x384xf32>
    %149 = tpu.matmul %110, %3, %cst_52 {dimension_numbers = #tpu.dot_dimension_numbers<[1], [0], [0], [1], [0, 0, 1, 1], [], []>} : vector<8x128xf32>, vector<128x384xf32>, vector<8x384xf32> -> vector<8x384xf32>
    %150 = vector.extract_strided_slice %148 {offsets = [0, 0], sizes = [8, 128], strides = [1, 1]} : vector<8x384xf32> to vector<8x128xf32>
    %151 = vector.extract_strided_slice %149 {offsets = [0, 0], sizes = [8, 128], strides = [1, 1]} : vector<8x384xf32> to vector<8x128xf32>
    %152 = arith.addf %150, %151 : vector<8x128xf32>
    %153 = arith.negf %152 : vector<8x128xf32>
    %154 = math.exp %153 : vector<8x128xf32>
    %cst_53 = arith.constant 1.000000e+00 : f32
    %155 = vector.broadcast %cst_53 : f32 to vector<8x128xf32>
    %156 = arith.addf %155, %154 : vector<8x128xf32>
    %157 = arith.divf %155, %156 : vector<8x128xf32>
    %158 = vector.extract_strided_slice %148 {offsets = [0, 128], sizes = [8, 128], strides = [1, 1]} : vector<8x384xf32> to vector<8x128xf32>
    %159 = vector.extract_strided_slice %149 {offsets = [0, 128], sizes = [8, 128], strides = [1, 1]} : vector<8x384xf32> to vector<8x128xf32>
    %160 = arith.addf %158, %159 : vector<8x128xf32>
    %161 = arith.negf %160 : vector<8x128xf32>
    %162 = math.exp %161 : vector<8x128xf32>
    %cst_54 = arith.constant 1.000000e+00 : f32
    %163 = vector.broadcast %cst_54 : f32 to vector<8x128xf32>
    %164 = arith.addf %163, %162 : vector<8x128xf32>
    %165 = arith.divf %163, %164 : vector<8x128xf32>
    %166 = vector.extract_strided_slice %148 {offsets = [0, 256], sizes = [8, 128], strides = [1, 1]} : vector<8x384xf32> to vector<8x128xf32>
    %167 = vector.extract_strided_slice %149 {offsets = [0, 256], sizes = [8, 128], strides = [1, 1]} : vector<8x384xf32> to vector<8x128xf32>
    %168 = arith.addf %167, %7 : vector<8x128xf32>
    %169 = arith.mulf %157, %168 : vector<8x128xf32>
    %170 = arith.addf %166, %169 : vector<8x128xf32>
    %171 = math.tanh %170 : vector<8x128xf32>
    %cst_55 = arith.constant 1.000000e+00 : f32
    %172 = vector.broadcast %cst_55 : f32 to vector<8x128xf32>
    %173 = arith.subf %172, %165 : vector<8x128xf32>
    %174 = arith.mulf %173, %171 : vector<8x128xf32>
    %175 = arith.mulf %165, %110 : vector<8x128xf32>
    %176 = arith.addf %174, %175 : vector<8x128xf32>
    %c2_56 = arith.constant 2 : index
    %c0_57 = arith.constant 0 : index
    %c0_58 = arith.constant 0 : index
    %177 = vector.load %arg7[%c2_56, %c0_57, %c0_58] : memref<8x8x128xf32, #tpu.memory_space<vmem>>, vector<1x8x128xf32>
    %178 = vector.shape_cast %177 : vector<1x8x128xf32> to vector<8x128xf32>
    %179 = vector.shape_cast %176 : vector<8x128xf32> to vector<1x8x128xf32>
    tpu.vector_store %arg7[%c2_56, %c0_57, %c0_58], %179 {strides = array<i32>} : memref<8x8x128xf32, #tpu.memory_space<vmem>>, vector<1x8x128xf32>,
    %c5 = arith.constant 5 : index
    %c0_59 = arith.constant 0 : index
    %c0_60 = arith.constant 0 : index
    %180 = vector.load %arg2[%c5, %c0_59, %c0_60] : memref<8x8x384xf32, #tpu.memory_space<vmem>>, vector<1x8x384xf32>
    %181 = vector.shape_cast %180 : vector<1x8x384xf32> to vector<8x384xf32>
    %cst_61 = arith.constant dense<0.000000e+00> : vector<8x384xf32>
    %182 = tpu.matmul %143, %4, %cst_61 {dimension_numbers = #tpu.dot_dimension_numbers<[1], [0], [0], [1], [0, 0, 1, 1], [], []>} : vector<8x128xf32>, vector<128x384xf32>, vector<8x384xf32> -> vector<8x384xf32>
    %183 = vector.extract_strided_slice %181 {offsets = [0, 0], sizes = [8, 128], strides = [1, 1]} : vector<8x384xf32> to vector<8x128xf32>
    %184 = vector.extract_strided_slice %182 {offsets = [0, 0], sizes = [8, 128], strides = [1, 1]} : vector<8x384xf32> to vector<8x128xf32>
    %185 = arith.addf %183, %184 : vector<8x128xf32>
    %186 = arith.negf %185 : vector<8x128xf32>
    %187 = math.exp %186 : vector<8x128xf32>
    %cst_62 = arith.constant 1.000000e+00 : f32
    %188 = vector.broadcast %cst_62 : f32 to vector<8x128xf32>
    %189 = arith.addf %188, %187 : vector<8x128xf32>
    %190 = arith.divf %188, %189 : vector<8x128xf32>
    %191 = vector.extract_strided_slice %181 {offsets = [0, 128], sizes = [8, 128], strides = [1, 1]} : vector<8x384xf32> to vector<8x128xf32>
    %192 = vector.extract_strided_slice %182 {offsets = [0, 128], sizes = [8, 128], strides = [1, 1]} : vector<8x384xf32> to vector<8x128xf32>
    %193 = arith.addf %191, %192 : vector<8x128xf32>
    %194 = arith.negf %193 : vector<8x128xf32>
    %195 = math.exp %194 : vector<8x128xf32>
    %cst_63 = arith.constant 1.000000e+00 : f32
    %196 = vector.broadcast %cst_63 : f32 to vector<8x128xf32>
    %197 = arith.addf %196, %195 : vector<8x128xf32>
    %198 = arith.divf %196, %197 : vector<8x128xf32>
    %199 = vector.extract_strided_slice %181 {offsets = [0, 256], sizes = [8, 128], strides = [1, 1]} : vector<8x384xf32> to vector<8x128xf32>
    %200 = vector.extract_strided_slice %182 {offsets = [0, 256], sizes = [8, 128], strides = [1, 1]} : vector<8x384xf32> to vector<8x128xf32>
    %201 = arith.addf %200, %10 : vector<8x128xf32>
    %202 = arith.mulf %190, %201 : vector<8x128xf32>
    %203 = arith.addf %199, %202 : vector<8x128xf32>
    %204 = math.tanh %203 : vector<8x128xf32>
    %cst_64 = arith.constant 1.000000e+00 : f32
    %205 = vector.broadcast %cst_64 : f32 to vector<8x128xf32>
    %206 = arith.subf %205, %198 : vector<8x128xf32>
    %207 = arith.mulf %206, %204 : vector<8x128xf32>
    %208 = arith.mulf %198, %143 : vector<8x128xf32>
    %209 = arith.addf %207, %208 : vector<8x128xf32>
    %c5_65 = arith.constant 5 : index
    %c0_66 = arith.constant 0 : index
    %c0_67 = arith.constant 0 : index
    %210 = vector.load %arg8[%c5_65, %c0_66, %c0_67] : memref<8x8x128xf32, #tpu.memory_space<vmem>>, vector<1x8x128xf32>
    %211 = vector.shape_cast %210 : vector<1x8x128xf32> to vector<8x128xf32>
    %212 = vector.shape_cast %209 : vector<8x128xf32> to vector<1x8x128xf32>
    tpu.vector_store %arg8[%c5_65, %c0_66, %c0_67], %212 {strides = array<i32>} : memref<8x8x128xf32, #tpu.memory_space<vmem>>, vector<1x8x128xf32>,
    %c3 = arith.constant 3 : index
    %c0_68 = arith.constant 0 : index
    %c0_69 = arith.constant 0 : index
    %213 = vector.load %arg1[%c3, %c0_68, %c0_69] : memref<8x8x384xf32, #tpu.memory_space<vmem>>, vector<1x8x384xf32>
    %214 = vector.shape_cast %213 : vector<1x8x384xf32> to vector<8x384xf32>
    %cst_70 = arith.constant dense<0.000000e+00> : vector<8x384xf32>
    %215 = tpu.matmul %176, %3, %cst_70 {dimension_numbers = #tpu.dot_dimension_numbers<[1], [0], [0], [1], [0, 0, 1, 1], [], []>} : vector<8x128xf32>, vector<128x384xf32>, vector<8x384xf32> -> vector<8x384xf32>
    %216 = vector.extract_strided_slice %214 {offsets = [0, 0], sizes = [8, 128], strides = [1, 1]} : vector<8x384xf32> to vector<8x128xf32>
    %217 = vector.extract_strided_slice %215 {offsets = [0, 0], sizes = [8, 128], strides = [1, 1]} : vector<8x384xf32> to vector<8x128xf32>
    %218 = arith.addf %216, %217 : vector<8x128xf32>
    %219 = arith.negf %218 : vector<8x128xf32>
    %220 = math.exp %219 : vector<8x128xf32>
    %cst_71 = arith.constant 1.000000e+00 : f32
    %221 = vector.broadcast %cst_71 : f32 to vector<8x128xf32>
    %222 = arith.addf %221, %220 : vector<8x128xf32>
    %223 = arith.divf %221, %222 : vector<8x128xf32>
    %224 = vector.extract_strided_slice %214 {offsets = [0, 128], sizes = [8, 128], strides = [1, 1]} : vector<8x384xf32> to vector<8x128xf32>
    %225 = vector.extract_strided_slice %215 {offsets = [0, 128], sizes = [8, 128], strides = [1, 1]} : vector<8x384xf32> to vector<8x128xf32>
    %226 = arith.addf %224, %225 : vector<8x128xf32>
    %227 = arith.negf %226 : vector<8x128xf32>
    %228 = math.exp %227 : vector<8x128xf32>
    %cst_72 = arith.constant 1.000000e+00 : f32
    %229 = vector.broadcast %cst_72 : f32 to vector<8x128xf32>
    %230 = arith.addf %229, %228 : vector<8x128xf32>
    %231 = arith.divf %229, %230 : vector<8x128xf32>
    %232 = vector.extract_strided_slice %214 {offsets = [0, 256], sizes = [8, 128], strides = [1, 1]} : vector<8x384xf32> to vector<8x128xf32>
    %233 = vector.extract_strided_slice %215 {offsets = [0, 256], sizes = [8, 128], strides = [1, 1]} : vector<8x384xf32> to vector<8x128xf32>
    %234 = arith.addf %233, %7 : vector<8x128xf32>
    %235 = arith.mulf %223, %234 : vector<8x128xf32>
    %236 = arith.addf %232, %235 : vector<8x128xf32>
    %237 = math.tanh %236 : vector<8x128xf32>
    %cst_73 = arith.constant 1.000000e+00 : f32
    %238 = vector.broadcast %cst_73 : f32 to vector<8x128xf32>
    %239 = arith.subf %238, %231 : vector<8x128xf32>
    %240 = arith.mulf %239, %237 : vector<8x128xf32>
    %241 = arith.mulf %231, %176 : vector<8x128xf32>
    %242 = arith.addf %240, %241 : vector<8x128xf32>
    %c3_74 = arith.constant 3 : index
    %c0_75 = arith.constant 0 : index
    %c0_76 = arith.constant 0 : index
    %243 = vector.load %arg7[%c3_74, %c0_75, %c0_76] : memref<8x8x128xf32, #tpu.memory_space<vmem>>, vector<1x8x128xf32>
    %244 = vector.shape_cast %243 : vector<1x8x128xf32> to vector<8x128xf32>
    %245 = vector.shape_cast %242 : vector<8x128xf32> to vector<1x8x128xf32>
    tpu.vector_store %arg7[%c3_74, %c0_75, %c0_76], %245 {strides = array<i32>} : memref<8x8x128xf32, #tpu.memory_space<vmem>>, vector<1x8x128xf32>,
    %c4 = arith.constant 4 : index
    %c0_77 = arith.constant 0 : index
    %c0_78 = arith.constant 0 : index
    %246 = vector.load %arg2[%c4, %c0_77, %c0_78] : memref<8x8x384xf32, #tpu.memory_space<vmem>>, vector<1x8x384xf32>
    %247 = vector.shape_cast %246 : vector<1x8x384xf32> to vector<8x384xf32>
    %cst_79 = arith.constant dense<0.000000e+00> : vector<8x384xf32>
    %248 = tpu.matmul %209, %4, %cst_79 {dimension_numbers = #tpu.dot_dimension_numbers<[1], [0], [0], [1], [0, 0, 1, 1], [], []>} : vector<8x128xf32>, vector<128x384xf32>, vector<8x384xf32> -> vector<8x384xf32>
    %249 = vector.extract_strided_slice %247 {offsets = [0, 0], sizes = [8, 128], strides = [1, 1]} : vector<8x384xf32> to vector<8x128xf32>
    %250 = vector.extract_strided_slice %248 {offsets = [0, 0], sizes = [8, 128], strides = [1, 1]} : vector<8x384xf32> to vector<8x128xf32>
    %251 = arith.addf %249, %250 : vector<8x128xf32>
    %252 = arith.negf %251 : vector<8x128xf32>
    %253 = math.exp %252 : vector<8x128xf32>
    %cst_80 = arith.constant 1.000000e+00 : f32
    %254 = vector.broadcast %cst_80 : f32 to vector<8x128xf32>
    %255 = arith.addf %254, %253 : vector<8x128xf32>
    %256 = arith.divf %254, %255 : vector<8x128xf32>
    %257 = vector.extract_strided_slice %247 {offsets = [0, 128], sizes = [8, 128], strides = [1, 1]} : vector<8x384xf32> to vector<8x128xf32>
    %258 = vector.extract_strided_slice %248 {offsets = [0, 128], sizes = [8, 128], strides = [1, 1]} : vector<8x384xf32> to vector<8x128xf32>
    %259 = arith.addf %257, %258 : vector<8x128xf32>
    %260 = arith.negf %259 : vector<8x128xf32>
    %261 = math.exp %260 : vector<8x128xf32>
    %cst_81 = arith.constant 1.000000e+00 : f32
    %262 = vector.broadcast %cst_81 : f32 to vector<8x128xf32>
    %263 = arith.addf %262, %261 : vector<8x128xf32>
    %264 = arith.divf %262, %263 : vector<8x128xf32>
    %265 = vector.extract_strided_slice %247 {offsets = [0, 256], sizes = [8, 128], strides = [1, 1]} : vector<8x384xf32> to vector<8x128xf32>
    %266 = vector.extract_strided_slice %248 {offsets = [0, 256], sizes = [8, 128], strides = [1, 1]} : vector<8x384xf32> to vector<8x128xf32>
    %267 = arith.addf %266, %10 : vector<8x128xf32>
    %268 = arith.mulf %256, %267 : vector<8x128xf32>
    %269 = arith.addf %265, %268 : vector<8x128xf32>
    %270 = math.tanh %269 : vector<8x128xf32>
    %cst_82 = arith.constant 1.000000e+00 : f32
    %271 = vector.broadcast %cst_82 : f32 to vector<8x128xf32>
    %272 = arith.subf %271, %264 : vector<8x128xf32>
    %273 = arith.mulf %272, %270 : vector<8x128xf32>
    %274 = arith.mulf %264, %209 : vector<8x128xf32>
    %275 = arith.addf %273, %274 : vector<8x128xf32>
    %c4_83 = arith.constant 4 : index
    %c0_84 = arith.constant 0 : index
    %c0_85 = arith.constant 0 : index
    %276 = vector.load %arg8[%c4_83, %c0_84, %c0_85] : memref<8x8x128xf32, #tpu.memory_space<vmem>>, vector<1x8x128xf32>
    %277 = vector.shape_cast %276 : vector<1x8x128xf32> to vector<8x128xf32>
    %278 = vector.shape_cast %275 : vector<8x128xf32> to vector<1x8x128xf32>
    tpu.vector_store %arg8[%c4_83, %c0_84, %c0_85], %278 {strides = array<i32>} : memref<8x8x128xf32, #tpu.memory_space<vmem>>, vector<1x8x128xf32>,
    %c4_86 = arith.constant 4 : index
    %c0_87 = arith.constant 0 : index
    %c0_88 = arith.constant 0 : index
    %279 = vector.load %arg1[%c4_86, %c0_87, %c0_88] : memref<8x8x384xf32, #tpu.memory_space<vmem>>, vector<1x8x384xf32>
    %280 = vector.shape_cast %279 : vector<1x8x384xf32> to vector<8x384xf32>
    %cst_89 = arith.constant dense<0.000000e+00> : vector<8x384xf32>
    %281 = tpu.matmul %242, %3, %cst_89 {dimension_numbers = #tpu.dot_dimension_numbers<[1], [0], [0], [1], [0, 0, 1, 1], [], []>} : vector<8x128xf32>, vector<128x384xf32>, vector<8x384xf32> -> vector<8x384xf32>
    %282 = vector.extract_strided_slice %280 {offsets = [0, 0], sizes = [8, 128], strides = [1, 1]} : vector<8x384xf32> to vector<8x128xf32>
    %283 = vector.extract_strided_slice %281 {offsets = [0, 0], sizes = [8, 128], strides = [1, 1]} : vector<8x384xf32> to vector<8x128xf32>
    %284 = arith.addf %282, %283 : vector<8x128xf32>
    %285 = arith.negf %284 : vector<8x128xf32>
    %286 = math.exp %285 : vector<8x128xf32>
    %cst_90 = arith.constant 1.000000e+00 : f32
    %287 = vector.broadcast %cst_90 : f32 to vector<8x128xf32>
    %288 = arith.addf %287, %286 : vector<8x128xf32>
    %289 = arith.divf %287, %288 : vector<8x128xf32>
    %290 = vector.extract_strided_slice %280 {offsets = [0, 128], sizes = [8, 128], strides = [1, 1]} : vector<8x384xf32> to vector<8x128xf32>
    %291 = vector.extract_strided_slice %281 {offsets = [0, 128], sizes = [8, 128], strides = [1, 1]} : vector<8x384xf32> to vector<8x128xf32>
    %292 = arith.addf %290, %291 : vector<8x128xf32>
    %293 = arith.negf %292 : vector<8x128xf32>
    %294 = math.exp %293 : vector<8x128xf32>
    %cst_91 = arith.constant 1.000000e+00 : f32
    %295 = vector.broadcast %cst_91 : f32 to vector<8x128xf32>
    %296 = arith.addf %295, %294 : vector<8x128xf32>
    %297 = arith.divf %295, %296 : vector<8x128xf32>
    %298 = vector.extract_strided_slice %280 {offsets = [0, 256], sizes = [8, 128], strides = [1, 1]} : vector<8x384xf32> to vector<8x128xf32>
    %299 = vector.extract_strided_slice %281 {offsets = [0, 256], sizes = [8, 128], strides = [1, 1]} : vector<8x384xf32> to vector<8x128xf32>
    %300 = arith.addf %299, %7 : vector<8x128xf32>
    %301 = arith.mulf %289, %300 : vector<8x128xf32>
    %302 = arith.addf %298, %301 : vector<8x128xf32>
    %303 = math.tanh %302 : vector<8x128xf32>
    %cst_92 = arith.constant 1.000000e+00 : f32
    %304 = vector.broadcast %cst_92 : f32 to vector<8x128xf32>
    %305 = arith.subf %304, %297 : vector<8x128xf32>
    %306 = arith.mulf %305, %303 : vector<8x128xf32>
    %307 = arith.mulf %297, %242 : vector<8x128xf32>
    %308 = arith.addf %306, %307 : vector<8x128xf32>
    %c4_93 = arith.constant 4 : index
    %c0_94 = arith.constant 0 : index
    %c0_95 = arith.constant 0 : index
    %309 = vector.load %arg7[%c4_93, %c0_94, %c0_95] : memref<8x8x128xf32, #tpu.memory_space<vmem>>, vector<1x8x128xf32>
    %310 = vector.shape_cast %309 : vector<1x8x128xf32> to vector<8x128xf32>
    %311 = vector.shape_cast %308 : vector<8x128xf32> to vector<1x8x128xf32>
    tpu.vector_store %arg7[%c4_93, %c0_94, %c0_95], %311 {strides = array<i32>} : memref<8x8x128xf32, #tpu.memory_space<vmem>>, vector<1x8x128xf32>,
    %c3_96 = arith.constant 3 : index
    %c0_97 = arith.constant 0 : index
    %c0_98 = arith.constant 0 : index
    %312 = vector.load %arg2[%c3_96, %c0_97, %c0_98] : memref<8x8x384xf32, #tpu.memory_space<vmem>>, vector<1x8x384xf32>
    %313 = vector.shape_cast %312 : vector<1x8x384xf32> to vector<8x384xf32>
    %cst_99 = arith.constant dense<0.000000e+00> : vector<8x384xf32>
    %314 = tpu.matmul %275, %4, %cst_99 {dimension_numbers = #tpu.dot_dimension_numbers<[1], [0], [0], [1], [0, 0, 1, 1], [], []>} : vector<8x128xf32>, vector<128x384xf32>, vector<8x384xf32> -> vector<8x384xf32>
    %315 = vector.extract_strided_slice %313 {offsets = [0, 0], sizes = [8, 128], strides = [1, 1]} : vector<8x384xf32> to vector<8x128xf32>
    %316 = vector.extract_strided_slice %314 {offsets = [0, 0], sizes = [8, 128], strides = [1, 1]} : vector<8x384xf32> to vector<8x128xf32>
    %317 = arith.addf %315, %316 : vector<8x128xf32>
    %318 = arith.negf %317 : vector<8x128xf32>
    %319 = math.exp %318 : vector<8x128xf32>
    %cst_100 = arith.constant 1.000000e+00 : f32
    %320 = vector.broadcast %cst_100 : f32 to vector<8x128xf32>
    %321 = arith.addf %320, %319 : vector<8x128xf32>
    %322 = arith.divf %320, %321 : vector<8x128xf32>
    %323 = vector.extract_strided_slice %313 {offsets = [0, 128], sizes = [8, 128], strides = [1, 1]} : vector<8x384xf32> to vector<8x128xf32>
    %324 = vector.extract_strided_slice %314 {offsets = [0, 128], sizes = [8, 128], strides = [1, 1]} : vector<8x384xf32> to vector<8x128xf32>
    %325 = arith.addf %323, %324 : vector<8x128xf32>
    %326 = arith.negf %325 : vector<8x128xf32>
    %327 = math.exp %326 : vector<8x128xf32>
    %cst_101 = arith.constant 1.000000e+00 : f32
    %328 = vector.broadcast %cst_101 : f32 to vector<8x128xf32>
    %329 = arith.addf %328, %327 : vector<8x128xf32>
    %330 = arith.divf %328, %329 : vector<8x128xf32>
    %331 = vector.extract_strided_slice %313 {offsets = [0, 256], sizes = [8, 128], strides = [1, 1]} : vector<8x384xf32> to vector<8x128xf32>
    %332 = vector.extract_strided_slice %314 {offsets = [0, 256], sizes = [8, 128], strides = [1, 1]} : vector<8x384xf32> to vector<8x128xf32>
    %333 = arith.addf %332, %10 : vector<8x128xf32>
    %334 = arith.mulf %322, %333 : vector<8x128xf32>
    %335 = arith.addf %331, %334 : vector<8x128xf32>
    %336 = math.tanh %335 : vector<8x128xf32>
    %cst_102 = arith.constant 1.000000e+00 : f32
    %337 = vector.broadcast %cst_102 : f32 to vector<8x128xf32>
    %338 = arith.subf %337, %330 : vector<8x128xf32>
    %339 = arith.mulf %338, %336 : vector<8x128xf32>
    %340 = arith.mulf %330, %275 : vector<8x128xf32>
    %341 = arith.addf %339, %340 : vector<8x128xf32>
    %c3_103 = arith.constant 3 : index
    %c0_104 = arith.constant 0 : index
    %c0_105 = arith.constant 0 : index
    %342 = vector.load %arg8[%c3_103, %c0_104, %c0_105] : memref<8x8x128xf32, #tpu.memory_space<vmem>>, vector<1x8x128xf32>
    %343 = vector.shape_cast %342 : vector<1x8x128xf32> to vector<8x128xf32>
    %344 = vector.shape_cast %341 : vector<8x128xf32> to vector<1x8x128xf32>
    tpu.vector_store %arg8[%c3_103, %c0_104, %c0_105], %344 {strides = array<i32>} : memref<8x8x128xf32, #tpu.memory_space<vmem>>, vector<1x8x128xf32>,
    %c5_106 = arith.constant 5 : index
    %c0_107 = arith.constant 0 : index
    %c0_108 = arith.constant 0 : index
    %345 = vector.load %arg1[%c5_106, %c0_107, %c0_108] : memref<8x8x384xf32, #tpu.memory_space<vmem>>, vector<1x8x384xf32>
    %346 = vector.shape_cast %345 : vector<1x8x384xf32> to vector<8x384xf32>
    %cst_109 = arith.constant dense<0.000000e+00> : vector<8x384xf32>
    %347 = tpu.matmul %308, %3, %cst_109 {dimension_numbers = #tpu.dot_dimension_numbers<[1], [0], [0], [1], [0, 0, 1, 1], [], []>} : vector<8x128xf32>, vector<128x384xf32>, vector<8x384xf32> -> vector<8x384xf32>
    %348 = vector.extract_strided_slice %346 {offsets = [0, 0], sizes = [8, 128], strides = [1, 1]} : vector<8x384xf32> to vector<8x128xf32>
    %349 = vector.extract_strided_slice %347 {offsets = [0, 0], sizes = [8, 128], strides = [1, 1]} : vector<8x384xf32> to vector<8x128xf32>
    %350 = arith.addf %348, %349 : vector<8x128xf32>
    %351 = arith.negf %350 : vector<8x128xf32>
    %352 = math.exp %351 : vector<8x128xf32>
    %cst_110 = arith.constant 1.000000e+00 : f32
    %353 = vector.broadcast %cst_110 : f32 to vector<8x128xf32>
    %354 = arith.addf %353, %352 : vector<8x128xf32>
    %355 = arith.divf %353, %354 : vector<8x128xf32>
    %356 = vector.extract_strided_slice %346 {offsets = [0, 128], sizes = [8, 128], strides = [1, 1]} : vector<8x384xf32> to vector<8x128xf32>
    %357 = vector.extract_strided_slice %347 {offsets = [0, 128], sizes = [8, 128], strides = [1, 1]} : vector<8x384xf32> to vector<8x128xf32>
    %358 = arith.addf %356, %357 : vector<8x128xf32>
    %359 = arith.negf %358 : vector<8x128xf32>
    %360 = math.exp %359 : vector<8x128xf32>
    %cst_111 = arith.constant 1.000000e+00 : f32
    %361 = vector.broadcast %cst_111 : f32 to vector<8x128xf32>
    %362 = arith.addf %361, %360 : vector<8x128xf32>
    %363 = arith.divf %361, %362 : vector<8x128xf32>
    %364 = vector.extract_strided_slice %346 {offsets = [0, 256], sizes = [8, 128], strides = [1, 1]} : vector<8x384xf32> to vector<8x128xf32>
    %365 = vector.extract_strided_slice %347 {offsets = [0, 256], sizes = [8, 128], strides = [1, 1]} : vector<8x384xf32> to vector<8x128xf32>
    %366 = arith.addf %365, %7 : vector<8x128xf32>
    %367 = arith.mulf %355, %366 : vector<8x128xf32>
    %368 = arith.addf %364, %367 : vector<8x128xf32>
    %369 = math.tanh %368 : vector<8x128xf32>
    %cst_112 = arith.constant 1.000000e+00 : f32
    %370 = vector.broadcast %cst_112 : f32 to vector<8x128xf32>
    %371 = arith.subf %370, %363 : vector<8x128xf32>
    %372 = arith.mulf %371, %369 : vector<8x128xf32>
    %373 = arith.mulf %363, %308 : vector<8x128xf32>
    %374 = arith.addf %372, %373 : vector<8x128xf32>
    %c5_113 = arith.constant 5 : index
    %c0_114 = arith.constant 0 : index
    %c0_115 = arith.constant 0 : index
    %375 = vector.load %arg7[%c5_113, %c0_114, %c0_115] : memref<8x8x128xf32, #tpu.memory_space<vmem>>, vector<1x8x128xf32>
    %376 = vector.shape_cast %375 : vector<1x8x128xf32> to vector<8x128xf32>
    %377 = vector.shape_cast %374 : vector<8x128xf32> to vector<1x8x128xf32>
    tpu.vector_store %arg7[%c5_113, %c0_114, %c0_115], %377 {strides = array<i32>} : memref<8x8x128xf32, #tpu.memory_space<vmem>>, vector<1x8x128xf32>,
    %c2_116 = arith.constant 2 : index
    %c0_117 = arith.constant 0 : index
    %c0_118 = arith.constant 0 : index
    %378 = vector.load %arg2[%c2_116, %c0_117, %c0_118] : memref<8x8x384xf32, #tpu.memory_space<vmem>>, vector<1x8x384xf32>
    %379 = vector.shape_cast %378 : vector<1x8x384xf32> to vector<8x384xf32>
    %cst_119 = arith.constant dense<0.000000e+00> : vector<8x384xf32>
    %380 = tpu.matmul %341, %4, %cst_119 {dimension_numbers = #tpu.dot_dimension_numbers<[1], [0], [0], [1], [0, 0, 1, 1], [], []>} : vector<8x128xf32>, vector<128x384xf32>, vector<8x384xf32> -> vector<8x384xf32>
    %381 = vector.extract_strided_slice %379 {offsets = [0, 0], sizes = [8, 128], strides = [1, 1]} : vector<8x384xf32> to vector<8x128xf32>
    %382 = vector.extract_strided_slice %380 {offsets = [0, 0], sizes = [8, 128], strides = [1, 1]} : vector<8x384xf32> to vector<8x128xf32>
    %383 = arith.addf %381, %382 : vector<8x128xf32>
    %384 = arith.negf %383 : vector<8x128xf32>
    %385 = math.exp %384 : vector<8x128xf32>
    %cst_120 = arith.constant 1.000000e+00 : f32
    %386 = vector.broadcast %cst_120 : f32 to vector<8x128xf32>
    %387 = arith.addf %386, %385 : vector<8x128xf32>
    %388 = arith.divf %386, %387 : vector<8x128xf32>
    %389 = vector.extract_strided_slice %379 {offsets = [0, 128], sizes = [8, 128], strides = [1, 1]} : vector<8x384xf32> to vector<8x128xf32>
    %390 = vector.extract_strided_slice %380 {offsets = [0, 128], sizes = [8, 128], strides = [1, 1]} : vector<8x384xf32> to vector<8x128xf32>
    %391 = arith.addf %389, %390 : vector<8x128xf32>
    %392 = arith.negf %391 : vector<8x128xf32>
    %393 = math.exp %392 : vector<8x128xf32>
    %cst_121 = arith.constant 1.000000e+00 : f32
    %394 = vector.broadcast %cst_121 : f32 to vector<8x128xf32>
    %395 = arith.addf %394, %393 : vector<8x128xf32>
    %396 = arith.divf %394, %395 : vector<8x128xf32>
    %397 = vector.extract_strided_slice %379 {offsets = [0, 256], sizes = [8, 128], strides = [1, 1]} : vector<8x384xf32> to vector<8x128xf32>
    %398 = vector.extract_strided_slice %380 {offsets = [0, 256], sizes = [8, 128], strides = [1, 1]} : vector<8x384xf32> to vector<8x128xf32>
    %399 = arith.addf %398, %10 : vector<8x128xf32>
    %400 = arith.mulf %388, %399 : vector<8x128xf32>
    %401 = arith.addf %397, %400 : vector<8x128xf32>
    %402 = math.tanh %401 : vector<8x128xf32>
    %cst_122 = arith.constant 1.000000e+00 : f32
    %403 = vector.broadcast %cst_122 : f32 to vector<8x128xf32>
    %404 = arith.subf %403, %396 : vector<8x128xf32>
    %405 = arith.mulf %404, %402 : vector<8x128xf32>
    %406 = arith.mulf %396, %341 : vector<8x128xf32>
    %407 = arith.addf %405, %406 : vector<8x128xf32>
    %c2_123 = arith.constant 2 : index
    %c0_124 = arith.constant 0 : index
    %c0_125 = arith.constant 0 : index
    %408 = vector.load %arg8[%c2_123, %c0_124, %c0_125] : memref<8x8x128xf32, #tpu.memory_space<vmem>>, vector<1x8x128xf32>
    %409 = vector.shape_cast %408 : vector<1x8x128xf32> to vector<8x128xf32>
    %410 = vector.shape_cast %407 : vector<8x128xf32> to vector<1x8x128xf32>
    tpu.vector_store %arg8[%c2_123, %c0_124, %c0_125], %410 {strides = array<i32>} : memref<8x8x128xf32, #tpu.memory_space<vmem>>, vector<1x8x128xf32>,
    %c6_126 = arith.constant 6 : index
    %c0_127 = arith.constant 0 : index
    %c0_128 = arith.constant 0 : index
    %411 = vector.load %arg1[%c6_126, %c0_127, %c0_128] : memref<8x8x384xf32, #tpu.memory_space<vmem>>, vector<1x8x384xf32>
    %412 = vector.shape_cast %411 : vector<1x8x384xf32> to vector<8x384xf32>
    %cst_129 = arith.constant dense<0.000000e+00> : vector<8x384xf32>
    %413 = tpu.matmul %374, %3, %cst_129 {dimension_numbers = #tpu.dot_dimension_numbers<[1], [0], [0], [1], [0, 0, 1, 1], [], []>} : vector<8x128xf32>, vector<128x384xf32>, vector<8x384xf32> -> vector<8x384xf32>
    %414 = vector.extract_strided_slice %412 {offsets = [0, 0], sizes = [8, 128], strides = [1, 1]} : vector<8x384xf32> to vector<8x128xf32>
    %415 = vector.extract_strided_slice %413 {offsets = [0, 0], sizes = [8, 128], strides = [1, 1]} : vector<8x384xf32> to vector<8x128xf32>
    %416 = arith.addf %414, %415 : vector<8x128xf32>
    %417 = arith.negf %416 : vector<8x128xf32>
    %418 = math.exp %417 : vector<8x128xf32>
    %cst_130 = arith.constant 1.000000e+00 : f32
    %419 = vector.broadcast %cst_130 : f32 to vector<8x128xf32>
    %420 = arith.addf %419, %418 : vector<8x128xf32>
    %421 = arith.divf %419, %420 : vector<8x128xf32>
    %422 = vector.extract_strided_slice %412 {offsets = [0, 128], sizes = [8, 128], strides = [1, 1]} : vector<8x384xf32> to vector<8x128xf32>
    %423 = vector.extract_strided_slice %413 {offsets = [0, 128], sizes = [8, 128], strides = [1, 1]} : vector<8x384xf32> to vector<8x128xf32>
    %424 = arith.addf %422, %423 : vector<8x128xf32>
    %425 = arith.negf %424 : vector<8x128xf32>
    %426 = math.exp %425 : vector<8x128xf32>
    %cst_131 = arith.constant 1.000000e+00 : f32
    %427 = vector.broadcast %cst_131 : f32 to vector<8x128xf32>
    %428 = arith.addf %427, %426 : vector<8x128xf32>
    %429 = arith.divf %427, %428 : vector<8x128xf32>
    %430 = vector.extract_strided_slice %412 {offsets = [0, 256], sizes = [8, 128], strides = [1, 1]} : vector<8x384xf32> to vector<8x128xf32>
    %431 = vector.extract_strided_slice %413 {offsets = [0, 256], sizes = [8, 128], strides = [1, 1]} : vector<8x384xf32> to vector<8x128xf32>
    %432 = arith.addf %431, %7 : vector<8x128xf32>
    %433 = arith.mulf %421, %432 : vector<8x128xf32>
    %434 = arith.addf %430, %433 : vector<8x128xf32>
    %435 = math.tanh %434 : vector<8x128xf32>
    %cst_132 = arith.constant 1.000000e+00 : f32
    %436 = vector.broadcast %cst_132 : f32 to vector<8x128xf32>
    %437 = arith.subf %436, %429 : vector<8x128xf32>
    %438 = arith.mulf %437, %435 : vector<8x128xf32>
    %439 = arith.mulf %429, %374 : vector<8x128xf32>
    %440 = arith.addf %438, %439 : vector<8x128xf32>
    %c6_133 = arith.constant 6 : index
    %c0_134 = arith.constant 0 : index
    %c0_135 = arith.constant 0 : index
    %441 = vector.load %arg7[%c6_133, %c0_134, %c0_135] : memref<8x8x128xf32, #tpu.memory_space<vmem>>, vector<1x8x128xf32>
    %442 = vector.shape_cast %441 : vector<1x8x128xf32> to vector<8x128xf32>
    %443 = vector.shape_cast %440 : vector<8x128xf32> to vector<1x8x128xf32>
    tpu.vector_store %arg7[%c6_133, %c0_134, %c0_135], %443 {strides = array<i32>} : memref<8x8x128xf32, #tpu.memory_space<vmem>>, vector<1x8x128xf32>,
    %c1_136 = arith.constant 1 : index
    %c0_137 = arith.constant 0 : index
    %c0_138 = arith.constant 0 : index
    %444 = vector.load %arg2[%c1_136, %c0_137, %c0_138] : memref<8x8x384xf32, #tpu.memory_space<vmem>>, vector<1x8x384xf32>
    %445 = vector.shape_cast %444 : vector<1x8x384xf32> to vector<8x384xf32>
    %cst_139 = arith.constant dense<0.000000e+00> : vector<8x384xf32>
    %446 = tpu.matmul %407, %4, %cst_139 {dimension_numbers = #tpu.dot_dimension_numbers<[1], [0], [0], [1], [0, 0, 1, 1], [], []>} : vector<8x128xf32>, vector<128x384xf32>, vector<8x384xf32> -> vector<8x384xf32>
    %447 = vector.extract_strided_slice %445 {offsets = [0, 0], sizes = [8, 128], strides = [1, 1]} : vector<8x384xf32> to vector<8x128xf32>
    %448 = vector.extract_strided_slice %446 {offsets = [0, 0], sizes = [8, 128], strides = [1, 1]} : vector<8x384xf32> to vector<8x128xf32>
    %449 = arith.addf %447, %448 : vector<8x128xf32>
    %450 = arith.negf %449 : vector<8x128xf32>
    %451 = math.exp %450 : vector<8x128xf32>
    %cst_140 = arith.constant 1.000000e+00 : f32
    %452 = vector.broadcast %cst_140 : f32 to vector<8x128xf32>
    %453 = arith.addf %452, %451 : vector<8x128xf32>
    %454 = arith.divf %452, %453 : vector<8x128xf32>
    %455 = vector.extract_strided_slice %445 {offsets = [0, 128], sizes = [8, 128], strides = [1, 1]} : vector<8x384xf32> to vector<8x128xf32>
    %456 = vector.extract_strided_slice %446 {offsets = [0, 128], sizes = [8, 128], strides = [1, 1]} : vector<8x384xf32> to vector<8x128xf32>
    %457 = arith.addf %455, %456 : vector<8x128xf32>
    %458 = arith.negf %457 : vector<8x128xf32>
    %459 = math.exp %458 : vector<8x128xf32>
    %cst_141 = arith.constant 1.000000e+00 : f32
    %460 = vector.broadcast %cst_141 : f32 to vector<8x128xf32>
    %461 = arith.addf %460, %459 : vector<8x128xf32>
    %462 = arith.divf %460, %461 : vector<8x128xf32>
    %463 = vector.extract_strided_slice %445 {offsets = [0, 256], sizes = [8, 128], strides = [1, 1]} : vector<8x384xf32> to vector<8x128xf32>
    %464 = vector.extract_strided_slice %446 {offsets = [0, 256], sizes = [8, 128], strides = [1, 1]} : vector<8x384xf32> to vector<8x128xf32>
    %465 = arith.addf %464, %10 : vector<8x128xf32>
    %466 = arith.mulf %454, %465 : vector<8x128xf32>
    %467 = arith.addf %463, %466 : vector<8x128xf32>
    %468 = math.tanh %467 : vector<8x128xf32>
    %cst_142 = arith.constant 1.000000e+00 : f32
    %469 = vector.broadcast %cst_142 : f32 to vector<8x128xf32>
    %470 = arith.subf %469, %462 : vector<8x128xf32>
    %471 = arith.mulf %470, %468 : vector<8x128xf32>
    %472 = arith.mulf %462, %407 : vector<8x128xf32>
    %473 = arith.addf %471, %472 : vector<8x128xf32>
    %c1_143 = arith.constant 1 : index
    %c0_144 = arith.constant 0 : index
    %c0_145 = arith.constant 0 : index
    %474 = vector.load %arg8[%c1_143, %c0_144, %c0_145] : memref<8x8x128xf32, #tpu.memory_space<vmem>>, vector<1x8x128xf32>
    %475 = vector.shape_cast %474 : vector<1x8x128xf32> to vector<8x128xf32>
    %476 = vector.shape_cast %473 : vector<8x128xf32> to vector<1x8x128xf32>
    tpu.vector_store %arg8[%c1_143, %c0_144, %c0_145], %476 {strides = array<i32>} : memref<8x8x128xf32, #tpu.memory_space<vmem>>, vector<1x8x128xf32>,
    %c7_146 = arith.constant 7 : index
    %c0_147 = arith.constant 0 : index
    %c0_148 = arith.constant 0 : index
    %477 = vector.load %arg1[%c7_146, %c0_147, %c0_148] : memref<8x8x384xf32, #tpu.memory_space<vmem>>, vector<1x8x384xf32>
    %478 = vector.shape_cast %477 : vector<1x8x384xf32> to vector<8x384xf32>
    %cst_149 = arith.constant dense<0.000000e+00> : vector<8x384xf32>
    %479 = tpu.matmul %440, %3, %cst_149 {dimension_numbers = #tpu.dot_dimension_numbers<[1], [0], [0], [1], [0, 0, 1, 1], [], []>} : vector<8x128xf32>, vector<128x384xf32>, vector<8x384xf32> -> vector<8x384xf32>
    %480 = vector.extract_strided_slice %478 {offsets = [0, 0], sizes = [8, 128], strides = [1, 1]} : vector<8x384xf32> to vector<8x128xf32>
    %481 = vector.extract_strided_slice %479 {offsets = [0, 0], sizes = [8, 128], strides = [1, 1]} : vector<8x384xf32> to vector<8x128xf32>
    %482 = arith.addf %480, %481 : vector<8x128xf32>
    %483 = arith.negf %482 : vector<8x128xf32>
    %484 = math.exp %483 : vector<8x128xf32>
    %cst_150 = arith.constant 1.000000e+00 : f32
    %485 = vector.broadcast %cst_150 : f32 to vector<8x128xf32>
    %486 = arith.addf %485, %484 : vector<8x128xf32>
    %487 = arith.divf %485, %486 : vector<8x128xf32>
    %488 = vector.extract_strided_slice %478 {offsets = [0, 128], sizes = [8, 128], strides = [1, 1]} : vector<8x384xf32> to vector<8x128xf32>
    %489 = vector.extract_strided_slice %479 {offsets = [0, 128], sizes = [8, 128], strides = [1, 1]} : vector<8x384xf32> to vector<8x128xf32>
    %490 = arith.addf %488, %489 : vector<8x128xf32>
    %491 = arith.negf %490 : vector<8x128xf32>
    %492 = math.exp %491 : vector<8x128xf32>
    %cst_151 = arith.constant 1.000000e+00 : f32
    %493 = vector.broadcast %cst_151 : f32 to vector<8x128xf32>
    %494 = arith.addf %493, %492 : vector<8x128xf32>
    %495 = arith.divf %493, %494 : vector<8x128xf32>
    %496 = vector.extract_strided_slice %478 {offsets = [0, 256], sizes = [8, 128], strides = [1, 1]} : vector<8x384xf32> to vector<8x128xf32>
    %497 = vector.extract_strided_slice %479 {offsets = [0, 256], sizes = [8, 128], strides = [1, 1]} : vector<8x384xf32> to vector<8x128xf32>
    %498 = arith.addf %497, %7 : vector<8x128xf32>
    %499 = arith.mulf %487, %498 : vector<8x128xf32>
    %500 = arith.addf %496, %499 : vector<8x128xf32>
    %501 = math.tanh %500 : vector<8x128xf32>
    %cst_152 = arith.constant 1.000000e+00 : f32
    %502 = vector.broadcast %cst_152 : f32 to vector<8x128xf32>
    %503 = arith.subf %502, %495 : vector<8x128xf32>
    %504 = arith.mulf %503, %501 : vector<8x128xf32>
    %505 = arith.mulf %495, %440 : vector<8x128xf32>
    %506 = arith.addf %504, %505 : vector<8x128xf32>
    %c7_153 = arith.constant 7 : index
    %c0_154 = arith.constant 0 : index
    %c0_155 = arith.constant 0 : index
    %507 = vector.load %arg7[%c7_153, %c0_154, %c0_155] : memref<8x8x128xf32, #tpu.memory_space<vmem>>, vector<1x8x128xf32>
    %508 = vector.shape_cast %507 : vector<1x8x128xf32> to vector<8x128xf32>
    %509 = vector.shape_cast %506 : vector<8x128xf32> to vector<1x8x128xf32>
    tpu.vector_store %arg7[%c7_153, %c0_154, %c0_155], %509 {strides = array<i32>} : memref<8x8x128xf32, #tpu.memory_space<vmem>>, vector<1x8x128xf32>,
    %c0_156 = arith.constant 0 : index
    %c0_157 = arith.constant 0 : index
    %c0_158 = arith.constant 0 : index
    %510 = vector.load %arg2[%c0_156, %c0_157, %c0_158] : memref<8x8x384xf32, #tpu.memory_space<vmem>>, vector<1x8x384xf32>
    %511 = vector.shape_cast %510 : vector<1x8x384xf32> to vector<8x384xf32>
    %cst_159 = arith.constant dense<0.000000e+00> : vector<8x384xf32>
    %512 = tpu.matmul %473, %4, %cst_159 {dimension_numbers = #tpu.dot_dimension_numbers<[1], [0], [0], [1], [0, 0, 1, 1], [], []>} : vector<8x128xf32>, vector<128x384xf32>, vector<8x384xf32> -> vector<8x384xf32>
    %513 = vector.extract_strided_slice %511 {offsets = [0, 0], sizes = [8, 128], strides = [1, 1]} : vector<8x384xf32> to vector<8x128xf32>
    %514 = vector.extract_strided_slice %512 {offsets = [0, 0], sizes = [8, 128], strides = [1, 1]} : vector<8x384xf32> to vector<8x128xf32>
    %515 = arith.addf %513, %514 : vector<8x128xf32>
    %516 = arith.negf %515 : vector<8x128xf32>
    %517 = math.exp %516 : vector<8x128xf32>
    %cst_160 = arith.constant 1.000000e+00 : f32
    %518 = vector.broadcast %cst_160 : f32 to vector<8x128xf32>
    %519 = arith.addf %518, %517 : vector<8x128xf32>
    %520 = arith.divf %518, %519 : vector<8x128xf32>
    %521 = vector.extract_strided_slice %511 {offsets = [0, 128], sizes = [8, 128], strides = [1, 1]} : vector<8x384xf32> to vector<8x128xf32>
    %522 = vector.extract_strided_slice %512 {offsets = [0, 128], sizes = [8, 128], strides = [1, 1]} : vector<8x384xf32> to vector<8x128xf32>
    %523 = arith.addf %521, %522 : vector<8x128xf32>
    %524 = arith.negf %523 : vector<8x128xf32>
    %525 = math.exp %524 : vector<8x128xf32>
    %cst_161 = arith.constant 1.000000e+00 : f32
    %526 = vector.broadcast %cst_161 : f32 to vector<8x128xf32>
    %527 = arith.addf %526, %525 : vector<8x128xf32>
    %528 = arith.divf %526, %527 : vector<8x128xf32>
    %529 = vector.extract_strided_slice %511 {offsets = [0, 256], sizes = [8, 128], strides = [1, 1]} : vector<8x384xf32> to vector<8x128xf32>
    %530 = vector.extract_strided_slice %512 {offsets = [0, 256], sizes = [8, 128], strides = [1, 1]} : vector<8x384xf32> to vector<8x128xf32>
    %531 = arith.addf %530, %10 : vector<8x128xf32>
    %532 = arith.mulf %520, %531 : vector<8x128xf32>
    %533 = arith.addf %529, %532 : vector<8x128xf32>
    %534 = math.tanh %533 : vector<8x128xf32>
    %cst_162 = arith.constant 1.000000e+00 : f32
    %535 = vector.broadcast %cst_162 : f32 to vector<8x128xf32>
    %536 = arith.subf %535, %528 : vector<8x128xf32>
    %537 = arith.mulf %536, %534 : vector<8x128xf32>
    %538 = arith.mulf %528, %473 : vector<8x128xf32>
    %539 = arith.addf %537, %538 : vector<8x128xf32>
    %c0_163 = arith.constant 0 : index
    %c0_164 = arith.constant 0 : index
    %c0_165 = arith.constant 0 : index
    %540 = vector.load %arg8[%c0_163, %c0_164, %c0_165] : memref<8x8x128xf32, #tpu.memory_space<vmem>>, vector<1x8x128xf32>
    %541 = vector.shape_cast %540 : vector<1x8x128xf32> to vector<8x128xf32>
    %542 = vector.shape_cast %539 : vector<8x128xf32> to vector<1x8x128xf32>
    tpu.vector_store %arg8[%c0_163, %c0_164, %c0_165], %542 {strides = array<i32>} : memref<8x8x128xf32, #tpu.memory_space<vmem>>, vector<1x8x128xf32>,
    %c0_166 = arith.constant 0 : index
    %c0_167 = arith.constant 0 : index
    %c0_168 = arith.constant 0 : index
    %543 = vector.load %arg9[%c0_166, %c0_167, %c0_168] : memref<2x8x128xf32, #tpu.memory_space<vmem>>, vector<1x8x128xf32>
    %544 = vector.shape_cast %543 : vector<1x8x128xf32> to vector<8x128xf32>
    %545 = vector.shape_cast %506 : vector<8x128xf32> to vector<1x8x128xf32>
    tpu.vector_store %arg9[%c0_166, %c0_167, %c0_168], %545 {strides = array<i32>} : memref<2x8x128xf32, #tpu.memory_space<vmem>>, vector<1x8x128xf32>,
    %c1_169 = arith.constant 1 : index
    %c0_170 = arith.constant 0 : index
    %c0_171 = arith.constant 0 : index
    %546 = vector.load %arg9[%c1_169, %c0_170, %c0_171] : memref<2x8x128xf32, #tpu.memory_space<vmem>>, vector<1x8x128xf32>
    %547 = vector.shape_cast %546 : vector<1x8x128xf32> to vector<8x128xf32>
    %548 = vector.shape_cast %539 : vector<8x128xf32> to vector<1x8x128xf32>
    tpu.vector_store %arg9[%c1_169, %c0_170, %c0_171], %548 {strides = array<i32>} : memref<2x8x128xf32, #tpu.memory_space<vmem>>, vector<1x8x128xf32>,
    return
  }
  func.func @transform_0(%arg0: i32) -> (i32, i32, i32) {
    %c0_i32 = arith.constant 0 : i32
    %c0_i32_0 = arith.constant 0 : i32
    %c0_i32_1 = arith.constant 0 : i32
    return %arg0, %c0_i32, %c0_i32_0 : i32, i32, i32
  }
  func.func @transform_1(%arg0: i32) -> (i32, i32, i32) {
    %c0_i32 = arith.constant 0 : i32
    %0 = arith.subi %c0_i32, %arg0 : i32
    %c0_i32_0 = arith.constant 0 : i32
    %c0_i32_1 = arith.constant 0 : i32
    %c0_i32_2 = arith.constant 0 : i32
    return %0, %c0_i32_0, %c0_i32_1 : i32, i32, i32
  }
  func.func @transform_2(%arg0: i32) -> (i32, i32) {
    %c0_i32 = arith.constant 0 : i32
    %c0_i32_0 = arith.constant 0 : i32
    %c0_i32_1 = arith.constant 0 : i32
    return %c0_i32, %c0_i32_0 : i32, i32
  }
  func.func @transform_3(%arg0: i32) -> (i32, i32) {
    %c0_i32 = arith.constant 0 : i32
    %c0_i32_0 = arith.constant 0 : i32
    %c0_i32_1 = arith.constant 0 : i32
    return %c0_i32, %c0_i32_0 : i32, i32
  }
  func.func @transform_4(%arg0: i32) -> (i32, i32) {
    %c0_i32 = arith.constant 0 : i32
    %c0_i32_0 = arith.constant 0 : i32
    %c0_i32_1 = arith.constant 0 : i32
    return %c0_i32, %c0_i32_0 : i32, i32
  }
  func.func @transform_5(%arg0: i32) -> (i32, i32) {
    %c0_i32 = arith.constant 0 : i32
    %c0_i32_0 = arith.constant 0 : i32
    %c0_i32_1 = arith.constant 0 : i32
    return %c0_i32, %c0_i32_0 : i32, i32
  }
  func.func @transform_6(%arg0: i32) -> (i32, i32, i32) {
    %c0_i32 = arith.constant 0 : i32
    %c0_i32_0 = arith.constant 0 : i32
    %c0_i32_1 = arith.constant 0 : i32
    return %arg0, %c0_i32, %c0_i32_0 : i32, i32, i32
  }
  func.func @transform_7(%arg0: i32) -> (i32, i32, i32) {
    %c0_i32 = arith.constant 0 : i32
    %0 = arith.subi %c0_i32, %arg0 : i32
    %c0_i32_0 = arith.constant 0 : i32
    %c0_i32_1 = arith.constant 0 : i32
    %c0_i32_2 = arith.constant 0 : i32
    return %0, %c0_i32_0, %c0_i32_1 : i32, i32, i32
  }
}

module attributes {stable_mosaic.version = 11 : i64} {
  func.func @_linear_kernel(%arg0: i32, %arg1: memref<16x256xf32, #tpu.memory_space<vmem>>, %arg2: memref<256x128xf32, #tpu.memory_space<vmem>>, %arg3: memref<1x128xf32, #tpu.memory_space<vmem>>, %arg4: memref<16x128xf32, #tpu.memory_space<vmem>>) attributes {dimension_semantics = [#tpu.dimension_semantics<parallel>], iteration_bounds = array<i64: 1>, scalar_prefetch = 0 : i64, scratch_operands = 0 : i64, tpu.core_type = #tpu.core_type<tc>, window_params = [{transform_indices = @transform_0, window_bounds = array<i64: 16, 256>}, {pipeline_mode = #tpu.pipeline_mode<synchronous>, transform_indices = @transform_1, window_bounds = array<i64: 256, 128>}, {pipeline_mode = #tpu.pipeline_mode<synchronous>, transform_indices = @transform_2, window_bounds = array<i64: 1, 128>}, {transform_indices = @transform_3, window_bounds = array<i64: 16, 128>}]} {
    %c0 = arith.constant 0 : index
    %c0_0 = arith.constant 0 : index
    %0 = vector.load %arg1[%c0, %c0_0] : memref<16x256xf32, #tpu.memory_space<vmem>>, vector<16x256xf32>
    %c0_1 = arith.constant 0 : index
    %c0_2 = arith.constant 0 : index
    %1 = vector.load %arg2[%c0_1, %c0_2] : memref<256x128xf32, #tpu.memory_space<vmem>>, vector<256x128xf32>
    %cst = arith.constant dense<0.000000e+00> : vector<16x128xf32>
    %2 = tpu.matmul %0, %1, %cst {dimension_numbers = #tpu.dot_dimension_numbers<[1], [0], [0], [1], [0, 0, 1, 1], [], []>} : vector<16x256xf32>, vector<256x128xf32>, vector<16x128xf32> -> vector<16x128xf32>
    %c0_3 = arith.constant 0 : index
    %c0_4 = arith.constant 0 : index
    %3 = vector.load %arg3[%c0_3, %c0_4] : memref<1x128xf32, #tpu.memory_space<vmem>>, vector<1x128xf32>
    %4 = vector.broadcast %3 : vector<1x128xf32> to vector<16x128xf32>
    %5 = arith.addf %2, %4 : vector<16x128xf32>
    %6 = math.tanh %5 : vector<16x128xf32>
    %c0_5 = arith.constant 0 : index
    %c0_6 = arith.constant 0 : index
    %7 = vector.load %arg4[%c0_5, %c0_6] : memref<16x128xf32, #tpu.memory_space<vmem>>, vector<16x128xf32>
    tpu.vector_store %arg4[%c0_5, %c0_6], %6 {strides = array<i32>} : memref<16x128xf32, #tpu.memory_space<vmem>>, vector<16x128xf32>,
    return
  }
  func.func @transform_0(%arg0: i32) -> (i32, i32) {
    %c0_i32 = arith.constant 0 : i32
    %c0_i32_0 = arith.constant 0 : i32
    return %arg0, %c0_i32 : i32, i32
  }
  func.func @transform_1(%arg0: i32) -> (i32, i32) {
    %c0_i32 = arith.constant 0 : i32
    %c0_i32_0 = arith.constant 0 : i32
    %c0_i32_1 = arith.constant 0 : i32
    return %c0_i32, %c0_i32_0 : i32, i32
  }
  func.func @transform_2(%arg0: i32) -> (i32, i32) {
    %c0_i32 = arith.constant 0 : i32
    %c0_i32_0 = arith.constant 0 : i32
    %c0_i32_1 = arith.constant 0 : i32
    return %c0_i32, %c0_i32_0 : i32, i32
  }
  func.func @transform_3(%arg0: i32) -> (i32, i32) {
    %c0_i32 = arith.constant 0 : i32
    %c0_i32_0 = arith.constant 0 : i32
    return %arg0, %c0_i32 : i32, i32
  }
}

module attributes {stable_mosaic.version = 11 : i64} {
  func.func @_gx_dual_kernel(%arg0: i32, %arg1: memref<64x128xf32, #tpu.memory_space<vmem>>, %arg2: memref<64x128xf32, #tpu.memory_space<vmem>>, %arg3: memref<128x768xf32, #tpu.memory_space<vmem>>, %arg4: memref<128x768xf32, #tpu.memory_space<vmem>>, %arg5: memref<1x768xf32, #tpu.memory_space<vmem>>, %arg6: memref<64x384xf32, #tpu.memory_space<vmem>>, %arg7: memref<64x384xf32, #tpu.memory_space<vmem>>) attributes {dimension_semantics = [#tpu.dimension_semantics<parallel>], iteration_bounds = array<i64: 1>, scalar_prefetch = 0 : i64, scratch_operands = 0 : i64, tpu.core_type = #tpu.core_type<tc>, window_params = [{transform_indices = @transform_0, window_bounds = array<i64: 64, 128>}, {transform_indices = @transform_1, window_bounds = array<i64: 64, 128>}, {pipeline_mode = #tpu.pipeline_mode<synchronous>, transform_indices = @transform_2, window_bounds = array<i64: 128, 768>}, {pipeline_mode = #tpu.pipeline_mode<synchronous>, transform_indices = @transform_3, window_bounds = array<i64: 128, 768>}, {pipeline_mode = #tpu.pipeline_mode<synchronous>, transform_indices = @transform_4, window_bounds = array<i64: 1, 768>}, {transform_indices = @transform_5, window_bounds = array<i64: 64, 384>}, {transform_indices = @transform_6, window_bounds = array<i64: 64, 384>}]} {
    %c0 = arith.constant 0 : index
    %c0_0 = arith.constant 0 : index
    %0 = vector.load %arg1[%c0, %c0_0] : memref<64x128xf32, #tpu.memory_space<vmem>>, vector<64x128xf32>
    %c0_1 = arith.constant 0 : index
    %c0_2 = arith.constant 0 : index
    %1 = vector.load %arg3[%c0_1, %c0_2] : memref<128x768xf32, #tpu.memory_space<vmem>>, vector<128x768xf32>
    %cst = arith.constant dense<0.000000e+00> : vector<64x768xf32>
    %2 = tpu.matmul %0, %1, %cst {dimension_numbers = #tpu.dot_dimension_numbers<[1], [0], [0], [1], [0, 0, 1, 1], [], []>} : vector<64x128xf32>, vector<128x768xf32>, vector<64x768xf32> -> vector<64x768xf32>
    %c0_3 = arith.constant 0 : index
    %c0_4 = arith.constant 0 : index
    %3 = vector.load %arg2[%c0_3, %c0_4] : memref<64x128xf32, #tpu.memory_space<vmem>>, vector<64x128xf32>
    %c0_5 = arith.constant 0 : index
    %c0_6 = arith.constant 0 : index
    %4 = vector.load %arg4[%c0_5, %c0_6] : memref<128x768xf32, #tpu.memory_space<vmem>>, vector<128x768xf32>
    %cst_7 = arith.constant dense<0.000000e+00> : vector<64x768xf32>
    %5 = tpu.matmul %3, %4, %cst_7 {dimension_numbers = #tpu.dot_dimension_numbers<[1], [0], [0], [1], [0, 0, 1, 1], [], []>} : vector<64x128xf32>, vector<128x768xf32>, vector<64x768xf32> -> vector<64x768xf32>
    %6 = arith.addf %2, %5 : vector<64x768xf32>
    %c0_8 = arith.constant 0 : index
    %c0_9 = arith.constant 0 : index
    %7 = vector.load %arg5[%c0_8, %c0_9] : memref<1x768xf32, #tpu.memory_space<vmem>>, vector<1x768xf32>
    %8 = vector.broadcast %7 : vector<1x768xf32> to vector<64x768xf32>
    %9 = arith.addf %6, %8 : vector<64x768xf32>
    %10 = vector.extract_strided_slice %9 {offsets = [0, 0], sizes = [64, 384], strides = [1, 1]} : vector<64x768xf32> to vector<64x384xf32>
    %c0_10 = arith.constant 0 : index
    %c0_11 = arith.constant 0 : index
    %11 = vector.load %arg6[%c0_10, %c0_11] : memref<64x384xf32, #tpu.memory_space<vmem>>, vector<64x384xf32>
    tpu.vector_store %arg6[%c0_10, %c0_11], %10 {strides = array<i32>} : memref<64x384xf32, #tpu.memory_space<vmem>>, vector<64x384xf32>,
    %12 = vector.extract_strided_slice %9 {offsets = [0, 384], sizes = [64, 384], strides = [1, 1]} : vector<64x768xf32> to vector<64x384xf32>
    %c0_12 = arith.constant 0 : index
    %c0_13 = arith.constant 0 : index
    %13 = vector.load %arg7[%c0_12, %c0_13] : memref<64x384xf32, #tpu.memory_space<vmem>>, vector<64x384xf32>
    tpu.vector_store %arg7[%c0_12, %c0_13], %12 {strides = array<i32>} : memref<64x384xf32, #tpu.memory_space<vmem>>, vector<64x384xf32>,
    return
  }
  func.func @transform_0(%arg0: i32) -> (i32, i32) {
    %c0_i32 = arith.constant 0 : i32
    %c0_i32_0 = arith.constant 0 : i32
    return %arg0, %c0_i32 : i32, i32
  }
  func.func @transform_1(%arg0: i32) -> (i32, i32) {
    %c0_i32 = arith.constant 0 : i32
    %c0_i32_0 = arith.constant 0 : i32
    return %arg0, %c0_i32 : i32, i32
  }
  func.func @transform_2(%arg0: i32) -> (i32, i32) {
    %c0_i32 = arith.constant 0 : i32
    %c0_i32_0 = arith.constant 0 : i32
    %c0_i32_1 = arith.constant 0 : i32
    return %c0_i32, %c0_i32_0 : i32, i32
  }
  func.func @transform_3(%arg0: i32) -> (i32, i32) {
    %c0_i32 = arith.constant 0 : i32
    %c0_i32_0 = arith.constant 0 : i32
    %c0_i32_1 = arith.constant 0 : i32
    return %c0_i32, %c0_i32_0 : i32, i32
  }
  func.func @transform_4(%arg0: i32) -> (i32, i32) {
    %c0_i32 = arith.constant 0 : i32
    %c0_i32_0 = arith.constant 0 : i32
    %c0_i32_1 = arith.constant 0 : i32
    return %c0_i32, %c0_i32_0 : i32, i32
  }
  func.func @transform_5(%arg0: i32) -> (i32, i32) {
    %c0_i32 = arith.constant 0 : i32
    %c0_i32_0 = arith.constant 0 : i32
    return %arg0, %c0_i32 : i32, i32
  }
  func.func @transform_6(%arg0: i32) -> (i32, i32) {
    %c0_i32 = arith.constant 0 : i32
    %c0_i32_0 = arith.constant 0 : i32
    return %arg0, %c0_i32 : i32, i32
  }
}

</mosaic_0001>

<bundles_post_ra>
// kernel: encoder_forward.9
= control target key start
LH: loop header
LB: loop body
LE: loop exit
PB: predicated region body
PF: predicated region fallthrough
CT: control target
= control target key end

     0   :  { %s282_s1 = inlined_call_operand.vmem [shape: f32[256,128], index: 1, kind: input, shape index: {}]   ;;  %s283_s2 = inlined_call_operand.vmem [shape: f32[1,128], index: 2, kind: input, shape index: {}]   ;;  %s284_s0 = inlined_call_operand.vmem [shape: f32[16,256], index: 0, kind: input, shape index: {}]   ;;  %s285_s3 = inlined_call_operand.vmem [shape: f32[16,128], index: 3, kind: output, shape index: {}]  }
   0x1   :  { %v33_v0 = vld [vmem:[%s282_s1 + $0x78] sm:$0xff]  ;;  %v32_v1 = vld [vmem:[%s282_s1 + $0x70] sm:$0xff]  ;;  %v31_v4 = vld [vmem:[%s282_s1 + $0x68] sm:$0xff] }
   0x2   :  { %v49_v2 = vld [vmem:[%s282_s1 + $0xf8] sm:$0xff]  ;;  %108 = vmatpush.msra.mxu2 %v33_v0  ;;  %v48_v3 = vld [vmem:[%s282_s1 + $0xf0] sm:$0xff]  ;;  %54 = vmatpush.msra.mxu0 %v33_v0  ;;  %v47_v5 = vld [vmem:[%s282_s1 + $0xe8] sm:$0xff] }
   0x3   :  { %124 = vmatpush.msra.mxu3 %v49_v2  ;;  %77 = vmatpush.msra.mxu1 %v49_v2  ;;  %v30_v6 = vld [vmem:[%s282_s1 + $0x60] sm:$0xff]  ;;  %v29_v8 = vld [vmem:[%s282_s1 + $0x58] sm:$0xff]  ;;  %v28_v10 = vld [vmem:[%s282_s1 + $0x50] sm:$0xff] }
   0x4   :  { %109 = vmatpush.msra.mxu2 %v32_v1  ;;  %55 = vmatpush.msra.mxu0 %v32_v1  ;;  %v46_v7 = vld [vmem:[%s282_s1 + $0xe0] sm:$0xff]  ;;  %v45_v9 = vld [vmem:[%s282_s1 + $0xd8] sm:$0xff]  ;;  %v44_v11 = vld [vmem:[%s282_s1 + $0xd0] sm:$0xff] }
   0x5   :  { %125 = vmatpush.msra.mxu3 %v48_v3  ;;  %78 = vmatpush.msra.mxu1 %v48_v3  ;;  %v27_v12 = vld [vmem:[%s282_s1 + $0x48] sm:$0xff]  ;;  %v26_v14 = vld [vmem:[%s282_s1 + $0x40] sm:$0xff]  ;;  %v25_v16 = vld [vmem:[%s282_s1 + $0x38] sm:$0xff] }
   0x6   :  { %110 = vmatpush.msra.mxu2 %v31_v4  ;;  %56 = vmatpush.msra.mxu0 %v31_v4  ;;  %v43_v13 = vld [vmem:[%s282_s1 + $0xc8] sm:$0xff]  ;;  %v42_v15 = vld [vmem:[%s282_s1 + $0xc0] sm:$0xff]  ;;  %v41_v17 = vld [vmem:[%s282_s1 + $0xb8] sm:$0xff] }
   0x7   :  { %126 = vmatpush.msra.mxu3 %v47_v5  ;;  %79 = vmatpush.msra.mxu1 %v47_v5  ;;  %v24_v18 = vld [vmem:[%s282_s1 + $0x30] sm:$0xff]  ;;  %v23_v20 = vld [vmem:[%s282_s1 + $0x28] sm:$0xff]  ;;  %v22_v22 = vld [vmem:[%s282_s1 + $0x20] sm:$0xff] }
   0x8   :  { %111 = vmatpush.msra.mxu2 %v30_v6  ;;  %57 = vmatpush.msra.mxu0 %v30_v6  ;;  %v40_v19 = vld [vmem:[%s282_s1 + $0xb0] sm:$0xff]  ;;  %v39_v21 = vld [vmem:[%s282_s1 + $0xa8] sm:$0xff]  ;;  %v38_v23 = vld [vmem:[%s282_s1 + $0xa0] sm:$0xff] }
   0x9   :  { %127 = vmatpush.msra.mxu3 %v46_v7  ;;  %80 = vmatpush.msra.mxu1 %v46_v7  ;;  %v21_v24 = vld [vmem:[%s282_s1 + $0x18] sm:$0xff]  ;;  %v20_v26 = vld [vmem:[%s282_s1 + $0x10] sm:$0xff]  ;;  %v19_v28 = vld [vmem:[%s282_s1 + $0x8] sm:$0xff] }
   0xa   :  { %112 = vmatpush.msra.mxu2 %v29_v8  ;;  %58 = vmatpush.msra.mxu0 %v29_v8  ;;  %v37_v25 = vld [vmem:[%s282_s1 + $0x98] sm:$0xff]  ;;  %v36_v27 = vld [vmem:[%s282_s1 + $0x90] sm:$0xff]  ;;  %v35_v29 = vld [vmem:[%s282_s1 + $0x88] sm:$0xff] }
   0xb   :  { %128 = vmatpush.msra.mxu3 %v45_v9  ;;  %81 = vmatpush.msra.mxu1 %v45_v9  ;;  %v18_v30 = vld [vmem:[%s282_s1] sm:$0xff]  ;;  %v16_v32 = vld [vmem:[%s284_s0 + $0x10] sm:$0xff]  ;;  %v17_v33 = vld [vmem:[%s284_s0 + $0x18] sm:$0xff] }
   0xc   :  { %113 = vmatpush.msra.mxu2 %v28_v10  ;;  %59 = vmatpush.msra.mxu0 %v28_v10  ;;  %v34_v31 = vld [vmem:[%s282_s1 + $0x80] sm:$0xff]  ;;  %v15_v35 = vld [vmem:[%s284_s0 + $0x8] sm:$0xff] }
   0xd   :  { %129 = vmatpush.msra.mxu3 %v44_v11  ;;  %82 = vmatpush.msra.mxu1 %v44_v11  ;;  %v14_v34 = vld [vmem:[%s284_s0] sm:$0xff] }
   0xe   :  { %114 = vmatpush.msra.mxu2 %v27_v12  ;;  %60 = vmatpush.msra.mxu0 %v27_v12  ;;  %v140_v36 = vld [vmem:[%s283_s2] ss:$0 sm:$0xff] }
   0xf   :  { %130 = vmatpush.msra.mxu3 %v43_v13  ;;  %83 = vmatpush.msra.mxu1 %v43_v13 }
  0x10   :  { %115 = vmatpush.msra.mxu2 %v26_v14  ;;  %61 = vmatpush.msra.mxu0 %v26_v14 }
  0x11   :  { %131 = vmatpush.msra.mxu3 %v42_v15  ;;  %84 = vmatpush.msra.mxu1 %v42_v15 }
  0x12   :  { %116 = vmatpush.msra.mxu2 %v25_v16  ;;  %62 = vmatpush.msra.mxu0 %v25_v16 }
  0x13   :  { %132 = vmatpush.msra.mxu3 %v41_v17  ;;  %85 = vmatpush.msra.mxu1 %v41_v17 }
  0x14   :  { %117 = vmatpush.msra.mxu2 %v24_v18  ;;  %63 = vmatpush.msra.mxu0 %v24_v18 }
  0x15   :  { %133 = vmatpush.msra.mxu3 %v40_v19  ;;  %86 = vmatpush.msra.mxu1 %v40_v19 }
  0x16   :  { %118 = vmatpush.msra.mxu2 %v23_v20  ;;  %64 = vmatpush.msra.mxu0 %v23_v20 }
  0x17   :  { %134 = vmatpush.msra.mxu3 %v39_v21  ;;  %87 = vmatpush.msra.mxu1 %v39_v21 }
  0x18   :  { %119 = vmatpush.msra.mxu2 %v22_v22  ;;  %65 = vmatpush.msra.mxu0 %v22_v22 }
  0x19   :  { %135 = vmatpush.msra.mxu3 %v38_v23  ;;  %88 = vmatpush.msra.mxu1 %v38_v23 }
  0x1a   :  { %120 = vmatpush.msra.mxu2 %v21_v24  ;;  %66 = vmatpush.msra.mxu0 %v21_v24 }
  0x1b   :  { %136 = vmatpush.msra.mxu3 %v37_v25  ;;  %89 = vmatpush.msra.mxu1 %v37_v25 }
  0x1c   :  { %121 = vmatpush.msra.mxu2 %v20_v26  ;;  %67 = vmatpush.msra.mxu0 %v20_v26 }
  0x1d   :  { %137 = vmatpush.msra.mxu3 %v36_v27  ;;  %90 = vmatpush.msra.mxu1 %v36_v27 }
  0x1e   :  { %122 = vmatpush.msra.mxu2 %v19_v28  ;;  %68 = vmatpush.msra.mxu0 %v19_v28 }
  0x1f   :  { %138 = vmatpush.msra.mxu3 %v35_v29  ;;  %91 = vmatpush.msra.mxu1 %v35_v29 }
  0x20   :  { %123 = vmatpush.msra.mxu2 %v18_v30  ;;  %69 = vmatpush.msra.mxu0 %v18_v30 }
  0x21   :  { %139 = vmatpush.msra.mxu3 %v34_v31  ;;  %73 = vmatmul.f32.vlgmr.msra.gmra.mxu2 %v16_v32 }
  0x22   :  { %96 = vmatmul.f32.vlgmr.msra.gmra.mxu3 %v17_v33  ;;  %92 = vmatpush.msra.mxu1 %v34_v31 }
  0x23   :  { %70 = vmatmul.f32.vlgmr.msra.gmra.mxu0 %v14_v34  ;;  %93 = vmatmul.f32.vlgmr.msra.gmra.mxu1 %v15_v35 }
  0xa0   :  { %v71_v37 = vpop.f32.mrf.mxu0  ;;  %v94_v38 = vpop.f32.mrf.mxu1 }
  0xa1   :  { %v72_v39 = vadd.f32 %v140_v36, %v71_v37 }
  0xa3   :  { %v95_v40 = vadd.f32 %v94_v38, %v72_v39 }
  0xa4   :  { %v74_v41 = vpop.f32.mrf.mxu2 }
  0xa5   :  { %v97_v42 = vpop.f32.mrf.mxu3  ;;  %v75_v43 = vadd.f32 %v140_v36, %v74_v41  ;;  %141 = vtanh.f32 %v95_v40 }
  0xa7   :  { %v98_v44 = vadd.f32 %v97_v42, %v75_v43 }
  0xa9   :  { %143 = vtanh.f32 %v98_v44 }
  0xab   :  { %v142_v45 = vpop.eup %141 }
  0xac   :  { %102 = vst [vmem:[%s285_s3] sm:$0xff] %v142_v45 }
  0xaf   :  { %v144_v46 = vpop.eup %143 }
  0xb0   :  { %103 = vst [vmem:[%s285_s3 + $0x8] sm:$0xff] %v144_v46 }

// kernel: encoder_forward.5
= control target key start
LH: loop header
LB: loop body
LE: loop exit
PB: predicated region body
PF: predicated region fallthrough
CT: control target
= control target key end

     0   :  { %12 = vsyncpa [#allocation3], 0  ;;  %s1174_s0 = inlined_call_operand.vmem [shape: f32[64,4], index: 0, kind: input, shape index: {}]   ;;  %s1175_s1 = inlined_call_operand.hbm [shape: f32[4,128], index: 1, kind: input, shape index: {}]   ;;  %s1176_s2 = inlined_call_operand.hbm [shape: f32[1,128], index: 2, kind: input, shape index: {}]   ;;  %s1177_s3 = inlined_call_operand.hbm [shape: f32[128,768], index: 3, kind: input, shape index: {}]   ;;  %s1178_s4 = inlined_call_operand.hbm [shape: f32[1,768], index: 4, kind: input, shape index: {}]   ;;  %s1179_s5 = inlined_call_operand.vmem [shape: f32[64,384], index: 5, kind: output, shape index: {0}]   ;;  %s1180_s6 = inlined_call_operand.vmem [shape: f32[64,384], index: 6, kind: output, shape index: {1}]  }
   0x1   :  { %13 = vsyncpa [#allocation5], 0  ;;  %s33_s23 = sshll.u32 %s1176_s2, 4  ;;  %s34_s23 = int_to_ptr.hbm [resolvable:$true] %s33_s23 }
   0x2   :  { %14 = vsyncpa [#allocation8], 0  ;;  %s767_s24 = smov [#allocation4]   ;;  %s22_s28 = sshll.u32 %s1175_s1, 4  ;;  %s23_s28 = int_to_ptr.hbm [resolvable:$true] %s22_s28 }
   0x3   :  { %s35_s25 = sshll.u32 %s767_s24, 4  ;;  %s768_s29 = smov [#allocation2]   ;;  %s36_s25 = int_to_ptr.vmem [resolvable:$true] %s35_s25 }
   0x4   :  { %38 = dma.hbm_to_vmem [thread:$0]  %s34_s23, 16, %s36_s25, [#allocation5]  }
   0x5   :  { %s24_s30 = sshll.u32 %s768_s29, 4  ;;  %s43_s9 = sshll.u32 %s1177_s3, 4  ;;  %s25_s30 = int_to_ptr.vmem [resolvable:$true] %s24_s30  ;;  %s44_s9 = int_to_ptr.hbm [resolvable:$true] %s43_s9 }
   0x6   :  { %27 = dma.hbm_to_vmem [thread:$0]  %s23_s28, 64, %s25_s30, [#allocation3]  }
   0x7   :  { %s769_s2 = smov [#allocation6]   ;;  %s57_s13 = sshll.u32 %s1178_s4, 4  ;;  %s58_s13 = int_to_ptr.hbm [resolvable:$true] %s57_s13 }
   0x8   :  { %s45_s10 = sshll.u32 %s769_s2, 4  ;;  %s770_s14 = smov 768   ;;  %s46_s10 = int_to_ptr.vmem [resolvable:$true] %s45_s10 }
   0x9   :  { %s771_s1 = smov 48   ;;  %s772_s15 = smov [#allocation7]  }
   0xa   :  { %51 = dma.hbm_to_vmem [thread:$0]  %s44_s9, 12288, %s46_s10, [#allocation5], %s770_s14, %s770_s14, %s771_s1  }
   0xb   :  { %s59_s16 = sshll.u32 %s772_s15, 4  ;;  %s60_s16 = int_to_ptr.vmem [resolvable:$true] %s59_s16 }
   0xc   :  { %62 = dma.hbm_to_vmem [thread:$0]  %s58_s13, 96, %s60_s16, [#allocation8]  }
   0xd   :  { %761 = dma.done.wait [#allocation3], 64  }
   0xe   :  { %762 = vsyncadd [#allocation3], 4294967232 }
   0xf   :  { %763 = dma.done.wait [#allocation5], 12304  }
  0x10   :  { %764 = vsyncadd [#allocation5], 4294954992 }
  0x11   :  { %765 = dma.done.wait [#allocation8], 96  }
  0x12   :  { %766 = vsyncadd [#allocation8], 4294967200  ;;  %vm117_vm0 = vcmask 1043456   ;;  %vm92_vm1 = vcmask 31744   ;;  %v87_v0 = vld [vmem:[#allocation2] sm:$0xf] }
  0x13   :  { %v79_v1 = vld [vmem:[%s1174_s0] sm:$0xff]  ;;  %585 = vmatpush.msk.msra.mxu0 %vm117_vm0, %v87_v0  ;;  %v80_v2 = vld [vmem:[%s1174_s0 + $0x8] sm:$0xff]  ;;  %v81_v3 = vld [vmem:[%s1174_s0 + $0x10] sm:$0xff] }
  0x14   :  { %586 = vmatmul.msk.f32.vlgmr.msra.gmra.mxu0 %vm92_vm1, %v79_v1  ;;  %v82_v4 = vld [vmem:[%s1174_s0 + $0x18] sm:$0xff]  ;;  %v263_v7 = vld [vmem:[#allocation6 + $0x2e8] sm:$0xff]  ;;  %v254_v8 = vld [vmem:[#allocation6 + $0x2a0] sm:$0xff] }
  0x15   :  { %v260_v5 = vld [vmem:[#allocation6 + $0x2d0] sm:$0xff]  ;;  %v261_v6 = vld [vmem:[#allocation6 + $0x2d8] sm:$0xff]  ;;  %v255_v9 = vld [vmem:[#allocation6 + $0x2a8] sm:$0xff]  ;;  %403 = vmatpush.msrb.mxu0 %v263_v7 }
  0x16   :  { %280 = vmatpush.msra.mxu1 %v260_v5  ;;  %321 = vmatpush.msra.mxu2 %v261_v6  ;;  %v257_v10 = vld [vmem:[#allocation6 + $0x2b8] sm:$0xff]  ;;  %v248_v11 = vld [vmem:[#allocation6 + $0x270] sm:$0xff]  ;;  %v251_v13 = vld [vmem:[#allocation6 + $0x288] sm:$0xff] }
  0x17   :  { %v249_v12 = vld [vmem:[#allocation6 + $0x278] sm:$0xff]  ;;  %594 = vmatpush.msra.mxu3 %v260_v5  ;;  %404 = vmatpush.msrb.mxu0 %v257_v10  ;;  %v242_v14 = vld [vmem:[#allocation6 + $0x240] sm:$0xff]  ;;  %v243_v15 = vld [vmem:[#allocation6 + $0x248] sm:$0xff] }
  0x18   :  { %281 = vmatpush.msra.mxu1 %v254_v8  ;;  %322 = vmatpush.msra.mxu2 %v255_v9  ;;  %v83_v16 = vld [vmem:[%s1174_s0 + $0x20] sm:$0xff]  ;;  %v236_v18 = vld [vmem:[#allocation6 + $0x210] sm:$0xff]  ;;  %v239_v20 = vld [vmem:[#allocation6 + $0x228] sm:$0xff] }
  0x19   :  { %595 = vmatpush.msra.mxu3 %v254_v8  ;;  %405 = vmatpush.msrb.mxu0 %v251_v13  ;;  %v245_v17 = vld [vmem:[#allocation6 + $0x258] sm:$0xff]  ;;  %v230_v21 = vld [vmem:[#allocation6 + $0x1e0] sm:$0xff]  ;;  %v231_v22 = vld [vmem:[#allocation6 + $0x1e8] sm:$0xff] }
  0x1a   :  { %282 = vmatpush.msra.mxu1 %v248_v11  ;;  %323 = vmatpush.msra.mxu2 %v249_v12  ;;  %v237_v19 = vld [vmem:[#allocation6 + $0x218] sm:$0xff]  ;;  %v224_v24 = vld [vmem:[#allocation6 + $0x1b0] sm:$0xff]  ;;  %v227_v26 = vld [vmem:[#allocation6 + $0x1c8] sm:$0xff] }
  0x1b   :  { %596 = vmatpush.msra.mxu3 %v248_v11  ;;  %406 = vmatpush.msrb.mxu0 %v245_v17  ;;  %v233_v23 = vld [vmem:[#allocation6 + $0x1f8] sm:$0xff]  ;;  %v218_v27 = vld [vmem:[#allocation6 + $0x180] sm:$0xff]  ;;  %v219_v29 = vld [vmem:[#allocation6 + $0x188] sm:$0xff] }
  0x1c   :  { %587 = vmatmul.msk.f32.gmra.mxu0 %vm92_vm1, %v80_v2  ;;  %283 = vmatpush.msra.mxu1 %v242_v14  ;;  %v225_v25 = vld [vmem:[#allocation6 + $0x1b8] sm:$0xff]  ;;  %v84_v28 = vld [vmem:[%s1174_s0 + $0x28] sm:$0xff]  ;;  %v212_v31 = vld [vmem:[#allocation6 + $0x150] sm:$0xff] }
  0x1d   :  { %324 = vmatpush.msra.mxu2 %v243_v15  ;;  %597 = vmatpush.msra.mxu3 %v242_v14  ;;  %v221_v30 = vld [vmem:[#allocation6 + $0x198] sm:$0xff]  ;;  %v215_v33 = vld [vmem:[#allocation6 + $0x168] sm:$0xff]  ;;  %v206_v34 = vld [vmem:[#allocation6 + $0x120] sm:$0xff] }
  0x1e   :  { %284 = vmatpush.msra.mxu1 %v236_v18  ;;  %407 = vmatpush.msrb.mxu0 %v239_v20  ;;  %v213_v32 = vld [vmem:[#allocation6 + $0x158] sm:$0xff]  ;;  %v207_v35 = vld [vmem:[#allocation6 + $0x128] sm:$0xff]  ;;  %v200_v37 = vld [vmem:[#allocation6 + $0xf0] sm:$0xff] }
  0x1f   :  { %325 = vmatpush.msra.mxu2 %v237_v19  ;;  %598 = vmatpush.msra.mxu3 %v236_v18  ;;  %v209_v36 = vld [vmem:[#allocation6 + $0x138] sm:$0xff]  ;;  %v203_v39 = vld [vmem:[#allocation6 + $0x108] sm:$0xff]  ;;  %v194_v40 = vld [vmem:[#allocation6 + $0xc0] sm:$0xff] }
  0x20   :  { %285 = vmatpush.msra.mxu1 %v230_v21  ;;  %408 = vmatpush.msrb.mxu0 %v233_v23  ;;  %v201_v38 = vld [vmem:[#allocation6 + $0xf8] sm:$0xff]  ;;  %v85_v41 = vld [vmem:[%s1174_s0 + $0x30] sm:$0xff]  ;;  %v182_v48 = vld [vmem:[#allocation6 + $0x60] sm:$0xff] }
  0x21   :  { %326 = vmatpush.msra.mxu2 %v231_v22  ;;  %599 = vmatpush.msra.mxu3 %v230_v21  ;;  %v195_v42 = vld [vmem:[#allocation6 + $0xc8] sm:$0xff]  ;;  %v197_v43 = vld [vmem:[#allocation6 + $0xd8] sm:$0xff]  ;;  %v188_v44 = vld [vmem:[#allocation6 + $0x90] sm:$0xff] }
  0x22   :  { %286 = vmatpush.msra.mxu1 %v224_v24  ;;  %409 = vmatpush.msrb.mxu0 %v227_v26  ;;  %v189_v45 = vld [vmem:[#allocation6 + $0x98] sm:$0xff]  ;;  %v191_v46 = vld [vmem:[#allocation6 + $0xa8] sm:$0xff]  ;;  %v176_v51 = vld [vmem:[#allocation6 + $0x30] sm:$0xff] }
  0x23   :  { %327 = vmatpush.msra.mxu2 %v225_v25  ;;  %600 = vmatpush.msra.mxu3 %v224_v24  ;;  %v86_v47 = vld [vmem:[%s1174_s0 + $0x38] sm:$0xff]  ;;  %v183_v49 = vld [vmem:[#allocation6 + $0x68] sm:$0xff]  ;;  %v170_v54 = vld [vmem:[#allocation6] sm:$0xff] }
  0x24   :  { %588 = vmatmul.msk.f32.gmra.mxu0 %vm92_vm1, %v81_v3  ;;  %287 = vmatpush.msra.mxu1 %v218_v27  ;;  %v185_v50 = vld [vmem:[#allocation6 + $0x78] sm:$0xff]  ;;  %v179_v53 = vld [vmem:[#allocation6 + $0x48] sm:$0xff]  ;;  %v852_v57 = vld [vmem:[#allocation6 + $0x2f0] sm:$0xff] }
  0x25   :  { %328 = vmatpush.msra.mxu2 %v219_v29  ;;  %410 = vmatpush.msrb.mxu0 %v221_v30  ;;  %v177_v52 = vld [vmem:[#allocation6 + $0x38] sm:$0xff]  ;;  %v171_v55 = vld [vmem:[#allocation6 + $0x8] sm:$0xff]  ;;  %v856_v58 = vld [vmem:[#allocation6 + $0x2c0] sm:$0xff] }
  0x26   :  { %288 = vmatpush.msra.mxu1 %v212_v31  ;;  %601 = vmatpush.msra.mxu3 %v218_v27  ;;  %v173_v56 = vld [vmem:[#allocation6 + $0x18] sm:$0xff]  ;;  %v860_v59 = vld [vmem:[#allocation6 + $0x290] sm:$0xff]  ;;  %v863_v60 = vld [vmem:[#allocation6 + $0x260] sm:$0xff] }
  0x27   :  { %329 = vmatpush.msra.mxu2 %v213_v32  ;;  %411 = vmatpush.msrb.mxu0 %v215_v33  ;;  %v868_v61 = vld [vmem:[#allocation6 + $0x230] sm:$0xff]  ;;  %v872_v62 = vld [vmem:[#allocation6 + $0x200] sm:$0xff]  ;;  %v898_v5 = vld [vmem:[#allocation4] ss:$0 sm:$0xff] }
  0x28   :  { %289 = vmatpush.msra.mxu1 %v206_v34  ;;  %602 = vmatpush.msra.mxu3 %v212_v31  ;;  %v876_v63 = vld [vmem:[#allocation6 + $0x1d0] sm:$0xff]  ;;  %v879_v0 = vld [vmem:[#allocation6 + $0x1a0] sm:$0xff]  ;;  %v265_v14 = vld [vmem:[#allocation6 + $0x2f8] sm:$0xff] }
  0x29   :  { %330 = vmatpush.msra.mxu2 %v207_v35  ;;  %412 = vmatpush.msrb.mxu0 %v209_v36  ;;  %v884_v1 = vld [vmem:[#allocation6 + $0x170] sm:$0xff]  ;;  %v888_v2 = vld [vmem:[#allocation6 + $0x140] sm:$0xff]  ;;  %v259_v17 = vld [vmem:[#allocation6 + $0x2c8] sm:$0xff] }
  0x2a   :  { %290 = vmatpush.msra.mxu1 %v200_v37  ;;  %603 = vmatpush.msra.mxu3 %v206_v34  ;;  %v892_v3 = vld [vmem:[#allocation6 + $0x110] sm:$0xff]  ;;  %v906_v8 = vld [vmem:[#allocation6 + $0x80] sm:$0xff]  ;;  %v253_v20 = vld [vmem:[#allocation6 + $0x298] sm:$0xff] }
  0x2b   :  { %331 = vmatpush.msra.mxu2 %v201_v38  ;;  %413 = vmatpush.msrb.mxu0 %v203_v39  ;;  %v902_v6 = vld [vmem:[#allocation6 + $0xb0] sm:$0xff]  ;;  %v916_v12 = vld [vmem:[#allocation6 + $0x20] sm:$0xff]  ;;  %v247_v23 = vld [vmem:[#allocation6 + $0x268] sm:$0xff] }
  0x2c   :  { %589 = vmatmul.msk.f32.gmra.mxu0 %vm92_vm1, %v82_v4  ;;  %291 = vmatpush.msra.mxu1 %v194_v40  ;;  %v895_v4 = vld [vmem:[#allocation6 + $0xe0] sm:$0xff]  ;;  %v911_v10 = vld [vmem:[#allocation6 + $0x50] sm:$0xff]  ;;  %v241_v25 = vld [vmem:[#allocation6 + $0x238] sm:$0xff] }
  0x2d   :  { %332 = vmatpush.msra.mxu2 %v195_v42  ;;  %414 = vmatpush.msrb.mxu0 %v197_v43  ;;  %v262_v13 = vld [vmem:[#allocation6 + $0x2e0] sm:$0xff]  ;;  %v256_v15 = vld [vmem:[#allocation6 + $0x2b0] sm:$0xff]  ;;  %v229_v32 = vld [vmem:[#allocation6 + $0x1d8] sm:$0xff] }
  0x2e   :  { %292 = vmatpush.msra.mxu1 %v188_v44  ;;  %604 = vmatpush.msra.mxu3 %v200_v37  ;;  %v250_v19 = vld [vmem:[#allocation6 + $0x280] sm:$0xff]  ;;  %v244_v22 = vld [vmem:[#allocation6 + $0x250] sm:$0xff]  ;;  %v223_v34 = vld [vmem:[#allocation6 + $0x1a8] sm:$0xff] }
  0x2f   :  { %333 = vmatpush.msra.mxu2 %v189_v45  ;;  %415 = vmatpush.msrb.mxu0 %v191_v46  ;;  %v238_v24 = vld [vmem:[#allocation6 + $0x220] sm:$0xff]  ;;  %v232_v26 = vld [vmem:[#allocation6 + $0x1f0] sm:$0xff]  ;;  %v217_v36 = vld [vmem:[#allocation6 + $0x178] sm:$0xff] }
  0x30   :  { %605 = vmatpush.msra.mxu3 %v194_v40  ;;  %293 = vmatpush.msra.mxu1 %v182_v48  ;;  %v226_v30 = vld [vmem:[#allocation6 + $0x1c0] sm:$0xff]  ;;  %v220_v33 = vld [vmem:[#allocation6 + $0x190] sm:$0xff]  ;;  %v211_v40 = vld [vmem:[#allocation6 + $0x148] sm:$0xff] }
  0x31   :  { %334 = vmatpush.msra.mxu2 %v183_v49  ;;  %416 = vmatpush.msrb.mxu0 %v185_v50  ;;  %v214_v35 = vld [vmem:[#allocation6 + $0x160] sm:$0xff]  ;;  %v208_v38 = vld [vmem:[#allocation6 + $0x130] sm:$0xff]  ;;  %v205_v43 = vld [vmem:[#allocation6 + $0x118] sm:$0xff] }
  0x32   :  { %606 = vmatpush.msra.mxu3 %v188_v44  ;;  %294 = vmatpush.msra.mxu1 %v176_v51  ;;  %v202_v42 = vld [vmem:[#allocation6 + $0x100] sm:$0xff]  ;;  %v196_v44 = vld [vmem:[#allocation6 + $0xd0] sm:$0xff]  ;;  %v199_v45 = vld [vmem:[#allocation6 + $0xe8] sm:$0xff] }
  0x33   :  { %335 = vmatpush.msra.mxu2 %v177_v52  ;;  %417 = vmatpush.msrb.mxu0 %v179_v53  ;;  %v190_v46 = vld [vmem:[#allocation6 + $0xa0] sm:$0xff]  ;;  %v184_v50 = vld [vmem:[#allocation6 + $0x70] sm:$0xff]  ;;  %v187_v52 = vld [vmem:[#allocation6 + $0x88] sm:$0xff] }
  0x34   :  { %590 = vmatmul.msk.f32.gmra.mxu0 %vm92_vm1, %v83_v16  ;;  %607 = vmatpush.msra.mxu3 %v182_v48  ;;  %v193_v48 = vld [vmem:[#allocation6 + $0xb8] sm:$0xff]  ;;  %v178_v53 = vld [vmem:[#allocation6 + $0x40] sm:$0xff] }
  0x35   :  { %295 = vmatpush.msra.mxu1 %v170_v54  ;;  %336 = vmatpush.msra.mxu2 %v171_v55  ;;  %v172_v55 = vld [vmem:[#allocation6 + $0x10] sm:$0xff] }
  0x36   :  { %608 = vmatpush.msra.mxu3 %v176_v51  ;;  %418 = vmatpush.msrb.mxu0 %v173_v56 }
  0x37   :  { %610 = vmatpush.msrb.mxu1 %v852_v57  ;;  %642 = vmatpush.msrb.mxu2 %v265_v14 }
  0x38   :  { %609 = vmatpush.msra.mxu3 %v170_v54  ;;  %444 = vmatpush.msra.mxu0 %v852_v57  ;;  %v181_v54 = vld [vmem:[#allocation6 + $0x58] sm:$0xff] }
  0x39   :  { %612 = vmatpush.msrb.mxu1 %v856_v58  ;;  %643 = vmatpush.msrb.mxu2 %v259_v17 }
  0x3a   :  { %445 = vmatpush.msra.mxu0 %v856_v58  ;;  %362 = vmatpush.msrb.mxu3 %v262_v13 }
  0x3b   :  { %614 = vmatpush.msrb.mxu1 %v860_v59  ;;  %644 = vmatpush.msrb.mxu2 %v253_v20 }
  0x3c   :  { %591 = vmatmul.msk.f32.gmra.mxu0 %vm92_vm1, %v84_v28  ;;  %363 = vmatpush.msrb.mxu3 %v256_v15  ;;  %v235_v28 = vld [vmem:[#allocation6 + $0x208] sm:$0xff] }
  0x3d   :  { %446 = vmatpush.msra.mxu0 %v860_v59  ;;  %616 = vmatpush.msrb.mxu1 %v863_v60 }
  0x3e   :  { %364 = vmatpush.msrb.mxu3 %v250_v19  ;;  %645 = vmatpush.msrb.mxu2 %v247_v23 }
  0x3f   :  { %447 = vmatpush.msra.mxu0 %v863_v60  ;;  %618 = vmatpush.msrb.mxu1 %v868_v61 }
  0x40   :  { %365 = vmatpush.msrb.mxu3 %v244_v22  ;;  %646 = vmatpush.msrb.mxu2 %v241_v25 }
  0x41   :  { %448 = vmatpush.msra.mxu0 %v868_v61  ;;  %620 = vmatpush.msrb.mxu1 %v872_v62 }
  0x42   :  { %366 = vmatpush.msrb.mxu3 %v238_v24  ;;  %647 = vmatpush.msrb.mxu2 %v235_v28 }
  0x43   :  { %449 = vmatpush.msra.mxu0 %v872_v62  ;;  %622 = vmatpush.msrb.mxu1 %v876_v63 }
  0x44   :  { %592 = vmatmul.msk.f32.gmra.mxu0 %vm92_vm1, %v85_v41  ;;  %367 = vmatpush.msrb.mxu3 %v232_v26 }
  0x45   :  { %450 = vmatpush.msra.mxu0 %v876_v63  ;;  %624 = vmatpush.msrb.mxu1 %v879_v0 }
  0x46   :  { %368 = vmatpush.msrb.mxu3 %v226_v30  ;;  %648 = vmatpush.msrb.mxu2 %v229_v32 }
  0x47   :  { %451 = vmatpush.msra.mxu0 %v879_v0  ;;  %626 = vmatpush.msrb.mxu1 %v884_v1 }
  0x48   :  { %369 = vmatpush.msrb.mxu3 %v220_v33  ;;  %649 = vmatpush.msrb.mxu2 %v223_v34 }
  0x49   :  { %452 = vmatpush.msra.mxu0 %v884_v1  ;;  %628 = vmatpush.msrb.mxu1 %v888_v2 }
  0x4a   :  { %370 = vmatpush.msrb.mxu3 %v214_v35  ;;  %650 = vmatpush.msrb.mxu2 %v217_v36 }
  0x4b   :  { %453 = vmatpush.msra.mxu0 %v888_v2  ;;  %630 = vmatpush.msrb.mxu1 %v892_v3 }
  0x4c   :  { %593 = vmatmul.msk.f32.gmra.mxu0 %vm92_vm1, %v86_v47  ;;  %371 = vmatpush.msrb.mxu3 %v208_v38 }
  0x4d   :  { %454 = vmatpush.msra.mxu0 %v892_v3  ;;  %632 = vmatpush.msrb.mxu1 %v895_v4 }
  0x4e   :  { %651 = vmatpush.msrb.mxu2 %v211_v40  ;;  %372 = vmatpush.msrb.mxu3 %v202_v42 }
  0x4f   :  { %455 = vmatpush.msra.mxu0 %v895_v4  ;;  %634 = vmatpush.msrb.mxu1 %v902_v6 }
  0x50   :  { %652 = vmatpush.msrb.mxu2 %v205_v43  ;;  %373 = vmatpush.msrb.mxu3 %v196_v44 }
  0x51   :  { %456 = vmatpush.msra.mxu0 %v902_v6  ;;  %636 = vmatpush.msrb.mxu1 %v906_v8 }
  0x52   :  { %653 = vmatpush.msrb.mxu2 %v199_v45  ;;  %374 = vmatpush.msrb.mxu3 %v190_v46 }
  0x53   :  { %457 = vmatpush.msra.mxu0 %v906_v8  ;;  %638 = vmatpush.msrb.mxu1 %v911_v10 }
  0x54   :  { %654 = vmatpush.msrb.mxu2 %v193_v48  ;;  %375 = vmatpush.msrb.mxu3 %v184_v50 }
  0x55   :  { %458 = vmatpush.msra.mxu0 %v911_v10  ;;  %640 = vmatpush.msrb.mxu1 %v916_v12 }
  0x56   :  { %655 = vmatpush.msrb.mxu2 %v187_v52  ;;  %376 = vmatpush.msrb.mxu3 %v178_v53 }
  0x57   :  { %459 = vmatpush.msra.mxu0 %v916_v12 }
  0x58   :  { %656 = vmatpush.msrb.mxu2 %v181_v54  ;;  %377 = vmatpush.msrb.mxu3 %v172_v55 }
  0x91   :  { %v138_v7 = vpop.f32.mrf.mxu0 }
  0x92   :  { %v139_v9 = vadd.f32 %v898_v5, %v138_v7  ;;  %v175_v7 = vld [vmem:[#allocation6 + $0x28] sm:$0xff] }
  0x93   :  { %657 = vmatpush.msrb.mxu2 %v175_v7 }
  0x94   :  { %v913_v11 = vmax.f32 %v139_v9, 0.0 }
  0x96   :  { %296 = vmatmul.f32.vlgmr.msra.gmra.mxu1 %v913_v11  ;;  %337 = vmatmul.f32.vlgmr.msra.gmra.mxu2 %v913_v11 }
  0x97   :  { %419 = vmatmul.f32.vlgmr.msrb.gmra.mxu0 %v913_v11  ;;  %485 = vmatpush.msra.mxu1 %v265_v14 }
  0x99   :  { %v141_v16 = vpop.f32.mrf.mxu0  ;;  %486 = vmatpush.msra.mxu1 %v259_v17 }
  0x9a   :  { %v142_v18 = vadd.f32 %v898_v5, %v141_v16 }
  0x9b   :  { %487 = vmatpush.msra.mxu1 %v253_v20 }
  0x9c   :  { %v925_v21 = vmax.f32 %v142_v18, 0.0 }
  0x9d   :  { %488 = vmatpush.msra.mxu1 %v247_v23 }
  0x9e   :  { %299 = vmatmul.f32.gmra.mxu1 %v925_v21  ;;  %340 = vmatmul.f32.gmra.mxu2 %v925_v21 }
  0x9f   :  { %422 = vmatmul.f32.gmra.mxu0 %v925_v21  ;;  %489 = vmatpush.msra.mxu1 %v241_v25 }
  0xa1   :  { %v144_v27 = vpop.f32.mrf.mxu0  ;;  %490 = vmatpush.msra.mxu1 %v235_v28 }
  0xa2   :  { %v145_v29 = vadd.f32 %v898_v5, %v144_v27 }
  0xa3   :  { %491 = vmatpush.msra.mxu1 %v229_v32 }
  0xa4   :  { %v931_v31 = vmax.f32 %v145_v29, 0.0 }
  0xa5   :  { %492 = vmatpush.msra.mxu1 %v223_v34 }
  0xa6   :  { %302 = vmatmul.f32.gmra.mxu1 %v931_v31  ;;  %343 = vmatmul.f32.gmra.mxu2 %v931_v31 }
  0xa7   :  { %425 = vmatmul.f32.gmra.mxu0 %v931_v31  ;;  %493 = vmatpush.msra.mxu1 %v217_v36 }
  0xa9   :  { %v147_v37 = vpop.f32.mrf.mxu0  ;;  %494 = vmatpush.msra.mxu1 %v211_v40 }
  0xaa   :  { %v148_v39 = vadd.f32 %v898_v5, %v147_v37 }
  0xab   :  { %495 = vmatpush.msra.mxu1 %v205_v43 }
  0xac   :  { %v937_v41 = vmax.f32 %v148_v39, 0.0 }
  0xad   :  { %496 = vmatpush.msra.mxu1 %v199_v45 }
  0xae   :  { %305 = vmatmul.f32.gmra.mxu1 %v937_v41  ;;  %346 = vmatmul.f32.gmra.mxu2 %v937_v41 }
  0xaf   :  { %428 = vmatmul.f32.gmra.mxu0 %v937_v41  ;;  %497 = vmatpush.msra.mxu1 %v193_v48 }
  0xb1   :  { %v150_v47 = vpop.f32.mrf.mxu0  ;;  %498 = vmatpush.msra.mxu1 %v187_v52 }
  0xb2   :  { %v151_v49 = vadd.f32 %v898_v5, %v150_v47 }
  0xb3   :  { %499 = vmatpush.msra.mxu1 %v181_v54 }
  0xb4   :  { %v943_v51 = vmax.f32 %v151_v49, 0.0 }
  0xb5   :  { %500 = vmatpush.msra.mxu1 %v175_v7 }
  0xb6   :  { %308 = vmatmul.f32.vlgmr.msra.gmra.mxu3 %v943_v51  ;;  %349 = vmatmul.f32.gmra.mxu2 %v943_v51 }
  0xb7   :  { %431 = vmatmul.f32.gmra.mxu0 %v943_v51  ;;  %463 = vmatmul.f32.vlgmr.msrb.gmra.mxu1 %v925_v21 }
  0xb8   :  { %611 = vmatpush.msra.mxu3 %v852_v57 }
  0xb9   :  { %v153_v56 = vpop.f32.mrf.mxu0 }
  0xba   :  { %v154_v9 = vadd.f32 %v898_v5, %v153_v56  ;;  %613 = vmatpush.msra.mxu3 %v856_v58 }
  0xbc   :  { %v167_v13 = vmax.f32 %v154_v9, 0.0  ;;  %615 = vmatpush.msra.mxu3 %v860_v59 }
  0xbe   :  { %311 = vmatmul.f32.gmra.mxu3 %v167_v13  ;;  %352 = vmatmul.f32.gmra.mxu2 %v167_v13 }
  0xbf   :  { %434 = vmatmul.f32.gmra.mxu0 %v167_v13  ;;  %466 = vmatmul.f32.gmra.mxu1 %v931_v31 }
  0xc0   :  { %617 = vmatpush.msra.mxu3 %v863_v60  ;;  %v982_v60 = vld [vmem:[#allocation7] sm:$0x3f] }
  0xc1   :  { %v156_v14 = vpop.f32.mrf.mxu0  ;;  %v1038_v29 = vperm.slane %v982_v60, 4 }
  0xc2   :  { %v157_v15 = vadd.f32 %v898_v5, %v156_v14  ;;  %619 = vmatpush.msra.mxu3 %v868_v61  ;;  %v985_v61 = vperm.slane %v982_v60, 0 }
  0xc4   :  { %v168_v57 = vmax.f32 %v157_v15, 0.0  ;;  %621 = vmatpush.msra.mxu3 %v872_v62  ;;  %v988_v62 = vperm.slane %v982_v60, 3 }
  0xc6   :  { %314 = vmatmul.f32.gmra.mxu3 %v168_v57  ;;  %355 = vmatmul.f32.gmra.mxu2 %v168_v57 }
  0xc7   :  { %437 = vmatmul.f32.gmra.mxu0 %v168_v57  ;;  %469 = vmatmul.f32.gmra.mxu1 %v937_v41 }
  0xc8   :  { %623 = vmatpush.msra.mxu3 %v876_v63 }
  0xc9   :  { %v159_v58 = vpop.f32.mrf.mxu0 }
  0xca   :  { %v160_v16 = vadd.f32 %v898_v5, %v159_v58  ;;  %625 = vmatpush.msra.mxu3 %v879_v0 }
  0xcc   :  { %v169_v59 = vmax.f32 %v160_v16, 0.0  ;;  %627 = vmatpush.msra.mxu3 %v884_v1 }
  0xce   :  { %317 = vmatmul.f32.gmra.mxu3 %v169_v59  ;;  %358 = vmatmul.f32.gmra.mxu2 %v169_v59 }
  0xcf   :  { %440 = vmatmul.f32.gmra.mxu0 %v169_v59  ;;  %472 = vmatmul.f32.gmra.mxu1 %v943_v51 }
  0xd0   :  { %629 = vmatpush.msra.mxu3 %v888_v2 }
  0xd2   :  { %631 = vmatpush.msra.mxu3 %v892_v3  ;;  %v996_v3 = vperm.slane %v982_v60, 1 }
  0xd4   :  { %633 = vmatpush.msra.mxu3 %v895_v4 }
  0xd6   :  { %378 = vmatmul.f32.vlgmr.msrb.gmra.mxu3 %v913_v11  ;;  %510 = vmatmul.f32.vlgmr.msrb.gmra.mxu2 %v937_v41 }
  0xd7   :  { %460 = vmatmul.f32.vlgmr.msra.gmra.mxu0 %v913_v11  ;;  %475 = vmatmul.f32.gmra.mxu1 %v167_v13 }
  0xd8   :  { %635 = vmatpush.msra.mxu3 %v902_v6 }
  0xda   :  { %637 = vmatpush.msra.mxu3 %v906_v8 }
  0xdc   :  { %639 = vmatpush.msra.mxu3 %v911_v10 }
  0xde   :  { %381 = vmatmul.f32.gmra.mxu3 %v925_v21  ;;  %513 = vmatmul.f32.gmra.mxu2 %v943_v51 }
  0xdf   :  { %478 = vmatmul.f32.gmra.mxu1 %v168_v57  ;;  %641 = vmatpush.msra.mxu3 %v916_v12 }
  0xe6   :  { %384 = vmatmul.f32.gmra.mxu3 %v931_v31  ;;  %516 = vmatmul.f32.gmra.mxu2 %v167_v13 }
  0xe7   :  { %501 = vmatmul.f32.vlgmr.msra.gmra.mxu1 %v913_v11 }
  0xee   :  { %387 = vmatmul.f32.gmra.mxu3 %v937_v41  ;;  %519 = vmatmul.f32.gmra.mxu2 %v168_v57 }
  0xef   :  { %504 = vmatmul.f32.gmra.mxu1 %v925_v21 }
  0xf6   :  { %390 = vmatmul.f32.gmra.mxu3 %v943_v51  ;;  %522 = vmatmul.f32.gmra.mxu2 %v169_v59 }
  0xf7   :  { %507 = vmatmul.f32.gmra.mxu1 %v931_v31 }
  0xfe   :  { %393 = vmatmul.f32.gmra.mxu3 %v167_v13 }
 0x106   :  { %396 = vmatmul.f32.gmra.mxu3 %v168_v57 }
 0x10e   :  { %399 = vmatmul.f32.gmra.mxu3 %v169_v59 }
 0x113   :  { %v297_v63 = vpop.f32.mrf.mxu1 }
 0x114   :  { %v298_v0 = vadd.f32 %v297_v63, %v985_v61  ;;  %v420_v1 = vpop.f32.mrf.mxu0  ;;  %v270_v63 = vperm.slane %v982_v60, 2 }
 0x115   :  { %v421_v2 = vadd.f32 %v420_v1, %v988_v62 }
 0x116   :  { %526 = vst [vmem:[%s1179_s5] sm:$0xff] %v298_v0  ;;  %481 = vmatmul.f32.vlgmr.msra.gmra.mxu3 %v169_v59 }
 0x117   :  { %550 = vst [vmem:[%s1180_s6] sm:$0xff] %v421_v2 }
 0x119   :  { %v338_v4 = vpop.f32.mrf.mxu2 }
 0x11a   :  { %v339_v5 = vadd.f32 %v338_v4, %v996_v3 }
 0x11b   :  { %v300_v6 = vpop.f32.mrf.mxu1 }
 0x11c   :  { %527 = vst [vmem:[%s1179_s5 + $0x8] sm:$0xff] %v339_v5  ;;  %v301_v8 = vadd.f32 %v300_v6, %v985_v61  ;;  %v423_v10 = vpop.f32.mrf.mxu0 }
 0x11d   :  { %v424_v11 = vadd.f32 %v423_v10, %v988_v62 }
 0x11e   :  { %529 = vst [vmem:[%s1179_s5 + $0x18] sm:$0xff] %v301_v8 }
 0x11f   :  { %553 = vst [vmem:[%s1180_s6 + $0x18] sm:$0xff] %v424_v11 }
 0x121   :  { %v341_v12 = vpop.f32.mrf.mxu2 }
 0x122   :  { %v342_v17 = vadd.f32 %v341_v12, %v996_v3 }
 0x123   :  { %v303_v18 = vpop.f32.mrf.mxu1 }
 0x124   :  { %530 = vst [vmem:[%s1179_s5 + $0x20] sm:$0xff] %v342_v17  ;;  %v304_v19 = vadd.f32 %v303_v18, %v985_v61  ;;  %v426_v20 = vpop.f32.mrf.mxu0 }
 0x125   :  { %v427_v21 = vadd.f32 %v426_v20, %v988_v62 }
 0x126   :  { %532 = vst [vmem:[%s1179_s5 + $0x30] sm:$0xff] %v304_v19 }
 0x127   :  { %556 = vst [vmem:[%s1180_s6 + $0x30] sm:$0xff] %v427_v21 }
 0x129   :  { %v344_v22 = vpop.f32.mrf.mxu2 }
 0x12a   :  { %v345_v23 = vadd.f32 %v344_v22, %v996_v3 }
 0x12b   :  { %v306_v24 = vpop.f32.mrf.mxu1 }
 0x12c   :  { %533 = vst [vmem:[%s1179_s5 + $0x38] sm:$0xff] %v345_v23  ;;  %v307_v25 = vadd.f32 %v306_v24, %v985_v61  ;;  %v429_v26 = vpop.f32.mrf.mxu0 }
 0x12d   :  { %v430_v27 = vadd.f32 %v429_v26, %v988_v62 }
 0x12e   :  { %535 = vst [vmem:[%s1179_s5 + $0x48] sm:$0xff] %v307_v25 }
 0x12f   :  { %559 = vst [vmem:[%s1180_s6 + $0x48] sm:$0xff] %v430_v27 }
 0x131   :  { %v347_v28 = vpop.f32.mrf.mxu2 }
 0x132   :  { %v348_v30 = vadd.f32 %v347_v28, %v996_v3 }
 0x134   :  { %536 = vst [vmem:[%s1179_s5 + $0x50] sm:$0xff] %v348_v30  ;;  %v432_v31 = vpop.f32.mrf.mxu0  ;;  %v464_v32 = vpop.f32.mrf.mxu1 }
 0x135   :  { %v433_v33 = vadd.f32 %v432_v31, %v988_v62  ;;  %v465_v34 = vadd.f32 %v464_v32, %v1038_v29 }
 0x137   :  { %562 = vst [vmem:[%s1180_s6 + $0x60] sm:$0xff] %v433_v33 }
 0x138   :  { %554 = vst [vmem:[%s1180_s6 + $0x20] sm:$0xff] %v465_v34 }
 0x139   :  { %v309_v35 = vpop.f32.mrf.mxu3  ;;  %v350_v36 = vpop.f32.mrf.mxu2 }
 0x13a   :  { %v310_v37 = vadd.f32 %v309_v35, %v985_v61  ;;  %v351_v38 = vadd.f32 %v350_v36, %v996_v3 }
 0x13c   :  { %538 = vst [vmem:[%s1179_s5 + $0x60] sm:$0xff] %v310_v37  ;;  %v435_v39 = vpop.f32.mrf.mxu0  ;;  %v467_v40 = vpop.f32.mrf.mxu1 }
 0x13d   :  { %539 = vst [vmem:[%s1179_s5 + $0x68] sm:$0xff] %v351_v38  ;;  %v436_v41 = vadd.f32 %v435_v39, %v988_v62  ;;  %v468_v42 = vadd.f32 %v467_v40, %v1038_v29 }
 0x13f   :  { %565 = vst [vmem:[%s1180_s6 + $0x78] sm:$0xff] %v436_v41 }
 0x140   :  { %557 = vst [vmem:[%s1180_s6 + $0x38] sm:$0xff] %v468_v42 }
 0x141   :  { %v312_v43 = vpop.f32.mrf.mxu3  ;;  %v353_v44 = vpop.f32.mrf.mxu2 }
 0x142   :  { %v313_v45 = vadd.f32 %v312_v43, %v985_v61  ;;  %v354_v46 = vadd.f32 %v353_v44, %v996_v3 }
 0x144   :  { %541 = vst [vmem:[%s1179_s5 + $0x78] sm:$0xff] %v313_v45  ;;  %v438_v47 = vpop.f32.mrf.mxu0  ;;  %v470_v48 = vpop.f32.mrf.mxu1 }
 0x145   :  { %542 = vst [vmem:[%s1179_s5 + $0x80] sm:$0xff] %v354_v46  ;;  %v439_v49 = vadd.f32 %v438_v47, %v988_v62  ;;  %v471_v50 = vadd.f32 %v470_v48, %v1038_v29 }
 0x147   :  { %568 = vst [vmem:[%s1180_s6 + $0x90] sm:$0xff] %v439_v49 }
 0x148   :  { %560 = vst [vmem:[%s1180_s6 + $0x50] sm:$0xff] %v471_v50 }
 0x149   :  { %v315_v51 = vpop.f32.mrf.mxu3  ;;  %v356_v52 = vpop.f32.mrf.mxu2 }
 0x14a   :  { %v316_v53 = vadd.f32 %v315_v51, %v985_v61  ;;  %v357_v54 = vadd.f32 %v356_v52, %v996_v3 }
 0x14c   :  { %544 = vst [vmem:[%s1179_s5 + $0x90] sm:$0xff] %v316_v53  ;;  %v441_v55 = vpop.f32.mrf.mxu0  ;;  %v473_v56 = vpop.f32.mrf.mxu1 }
 0x14d   :  { %545 = vst [vmem:[%s1179_s5 + $0x98] sm:$0xff] %v357_v54  ;;  %v442_v7 = vadd.f32 %v441_v55, %v988_v62  ;;  %v474_v9 = vadd.f32 %v473_v56, %v1038_v29 }
 0x14f   :  { %571 = vst [vmem:[%s1180_s6 + $0xa8] sm:$0xff] %v442_v7 }
 0x150   :  { %563 = vst [vmem:[%s1180_s6 + $0x68] sm:$0xff] %v474_v9 }
 0x151   :  { %v318_v13 = vpop.f32.mrf.mxu3  ;;  %v359_v14 = vpop.f32.mrf.mxu2 }
 0x152   :  { %v319_v15 = vadd.f32 %v318_v13, %v985_v61  ;;  %v360_v57 = vadd.f32 %v359_v14, %v996_v3  ;;  %v273_v61 = vperm.slane %v982_v60, 5 }
 0x154   :  { %547 = vst [vmem:[%s1179_s5 + $0xa8] sm:$0xff] %v319_v15  ;;  %v461_v58 = vpop.f32.mrf.mxu0  ;;  %v476_v16 = vpop.f32.mrf.mxu1 }
 0x155   :  { %548 = vst [vmem:[%s1179_s5 + $0xb0] sm:$0xff] %v360_v57  ;;  %v462_v59 = vadd.f32 %v461_v58, %v1038_v29  ;;  %v477_v62 = vadd.f32 %v476_v16, %v1038_v29 }
 0x157   :  { %551 = vst [vmem:[%s1180_s6 + $0x8] sm:$0xff] %v462_v59 }
 0x158   :  { %566 = vst [vmem:[%s1180_s6 + $0x80] sm:$0xff] %v477_v62 }
 0x159   :  { %v379_v0 = vpop.f32.mrf.mxu3  ;;  %v511_v1 = vpop.f32.mrf.mxu2 }
 0x15a   :  { %v380_v2 = vadd.f32 %v379_v0, %v270_v63  ;;  %v512_v3 = vadd.f32 %v511_v1, %v273_v61 }
 0x15c   :  { %528 = vst [vmem:[%s1179_s5 + $0x10] sm:$0xff] %v380_v2  ;;  %v479_v4 = vpop.f32.mrf.mxu1 }
 0x15d   :  { %561 = vst [vmem:[%s1180_s6 + $0x58] sm:$0xff] %v512_v3  ;;  %v480_v60 = vadd.f32 %v479_v4, %v1038_v29 }
 0x15f   :  { %569 = vst [vmem:[%s1180_s6 + $0x98] sm:$0xff] %v480_v60 }
 0x161   :  { %v382_v5 = vpop.f32.mrf.mxu3  ;;  %v514_v6 = vpop.f32.mrf.mxu2 }
 0x162   :  { %v383_v8 = vadd.f32 %v382_v5, %v270_v63  ;;  %v515_v10 = vadd.f32 %v514_v6, %v273_v61 }
 0x164   :  { %531 = vst [vmem:[%s1179_s5 + $0x28] sm:$0xff] %v383_v8  ;;  %v502_v11 = vpop.f32.mrf.mxu1 }
 0x165   :  { %564 = vst [vmem:[%s1180_s6 + $0x70] sm:$0xff] %v515_v10  ;;  %v503_v12 = vadd.f32 %v502_v11, %v273_v61 }
 0x167   :  { %552 = vst [vmem:[%s1180_s6 + $0x10] sm:$0xff] %v503_v12 }
 0x169   :  { %v385_v17 = vpop.f32.mrf.mxu3  ;;  %v517_v18 = vpop.f32.mrf.mxu2 }
 0x16a   :  { %v386_v19 = vadd.f32 %v385_v17, %v270_v63  ;;  %v518_v20 = vadd.f32 %v517_v18, %v273_v61 }
 0x16c   :  { %534 = vst [vmem:[%s1179_s5 + $0x40] sm:$0xff] %v386_v19  ;;  %v505_v21 = vpop.f32.mrf.mxu1 }
 0x16d   :  { %567 = vst [vmem:[%s1180_s6 + $0x88] sm:$0xff] %v518_v20  ;;  %v506_v22 = vadd.f32 %v505_v21, %v273_v61 }
 0x16f   :  { %555 = vst [vmem:[%s1180_s6 + $0x28] sm:$0xff] %v506_v22 }
 0x171   :  { %v388_v23 = vpop.f32.mrf.mxu3  ;;  %v520_v24 = vpop.f32.mrf.mxu2 }
 0x172   :  { %v389_v25 = vadd.f32 %v388_v23, %v270_v63  ;;  %v521_v26 = vadd.f32 %v520_v24, %v273_v61 }
 0x174   :  { %537 = vst [vmem:[%s1179_s5 + $0x58] sm:$0xff] %v389_v25  ;;  %v508_v27 = vpop.f32.mrf.mxu1 }
 0x175   :  { %570 = vst [vmem:[%s1180_s6 + $0xa0] sm:$0xff] %v521_v26  ;;  %v509_v28 = vadd.f32 %v508_v27, %v273_v61 }
 0x177   :  { %558 = vst [vmem:[%s1180_s6 + $0x40] sm:$0xff] %v509_v28 }
 0x179   :  { %v391_v30 = vpop.f32.mrf.mxu3  ;;  %v523_v31 = vpop.f32.mrf.mxu2 }
 0x17a   :  { %v392_v32 = vadd.f32 %v391_v30, %v270_v63  ;;  %v524_v33 = vadd.f32 %v523_v31, %v273_v61 }
 0x17c   :  { %540 = vst [vmem:[%s1179_s5 + $0x70] sm:$0xff] %v392_v32 }
 0x17d   :  { %573 = vst [vmem:[%s1180_s6 + $0xb8] sm:$0xff] %v524_v33 }
 0x181   :  { %v394_v34 = vpop.f32.mrf.mxu3 }
 0x182   :  { %v395_v35 = vadd.f32 %v394_v34, %v270_v63 }
 0x184   :  { %543 = vst [vmem:[%s1179_s5 + $0x88] sm:$0xff] %v395_v35 }
 0x189   :  { %v397_v36 = vpop.f32.mrf.mxu3 }
 0x18a   :  { %v398_v37 = vadd.f32 %v397_v36, %v270_v63 }
 0x18c   :  { %546 = vst [vmem:[%s1179_s5 + $0xa0] sm:$0xff] %v398_v37 }
 0x191   :  { %v400_v38 = vpop.f32.mrf.mxu3 }
 0x192   :  { %v401_v39 = vadd.f32 %v400_v38, %v270_v63 }
 0x194   :  { %549 = vst [vmem:[%s1179_s5 + $0xb8] sm:$0xff] %v401_v39 }
 0x199   :  { %v482_v40 = vpop.f32.mrf.mxu3 }
 0x19a   :  { %v483_v41 = vadd.f32 %v482_v40, %v1038_v29 }
 0x19c   :  { %572 = vst [vmem:[%s1180_s6 + $0xb0] sm:$0xff] %v483_v41 }
 0x19d   :  { %582 = vsyncpa [#allocation3], 1 }
 0x19e   :  { %583 = vsyncpa [#allocation5], 1 }
 0x19f   :  { %584 = vsyncpa [#allocation8], 1 }

// kernel: encoder_forward.7
= control target key start
LH: loop header
LB: loop body
LE: loop exit
PB: predicated region body
PF: predicated region fallthrough
CT: control target
= control target key end

     0   :  { %12 = vsyncpa [#allocation3], 0  ;;  %s1525_s0 = inlined_call_operand.vmem [shape: f32[64,128], index: 0, kind: input, shape index: {}]   ;;  %s1526_s1 = inlined_call_operand.vmem [shape: f32[64,128], index: 1, kind: input, shape index: {}]   ;;  %s1527_s2 = inlined_call_operand.hbm [shape: f32[128,768], index: 2, kind: input, shape index: {}]   ;;  %s1528_s3 = inlined_call_operand.hbm [shape: f32[128,768], index: 3, kind: input, shape index: {}]   ;;  %s1529_s4 = inlined_call_operand.hbm [shape: f32[1,768], index: 4, kind: input, shape index: {}]   ;;  %s1530_s5 = inlined_call_operand.vmem [shape: f32[64,384], index: 5, kind: output, shape index: {0}]   ;;  %s1531_s6 = inlined_call_operand.vmem [shape: f32[64,384], index: 6, kind: output, shape index: {1}]  }
   0x1   :  { %13 = vsyncpa [#allocation5], 0  ;;  %s35_s23 = sshll.u32 %s1528_s3, 4  ;;  %s968_s24 = smov [#allocation4]   ;;  %s36_s23 = int_to_ptr.hbm [resolvable:$true] %s35_s23 }
   0x2   :  { %s37_s25 = sshll.u32 %s968_s24, 4  ;;  %s22_s28 = sshll.u32 %s1527_s2, 4  ;;  %s38_s25 = int_to_ptr.vmem [resolvable:$true] %s37_s25  ;;  %s23_s28 = int_to_ptr.hbm [resolvable:$true] %s22_s28 }
   0x3   :  { %s969_s29 = smov 768   ;;  %s970_s30 = smov 48  }
   0x4   :  { %43 = dma.hbm_to_vmem [thread:$0]  %s36_s23, 12288, %s38_s25, [#allocation5], %s969_s29, %s969_s29, %s970_s30  }
   0x5   :  { %s971_s7 = smov [#allocation2]   ;;  %s49_s11 = sshll.u32 %s1529_s4, 4  ;;  %s50_s11 = int_to_ptr.hbm [resolvable:$true] %s49_s11 }
   0x6   :  { %s24_s8 = sshll.u32 %s971_s7, 4  ;;  %s972_s3 = smov [#allocation6]   ;;  %s25_s8 = int_to_ptr.vmem [resolvable:$true] %s24_s8 }
   0x7   :  { %30 = dma.hbm_to_vmem [thread:$0]  %s23_s28, 12288, %s25_s8, [#allocation3], %s969_s29, %s969_s29, %s970_s30  }
   0x8   :  { %s51_s12 = sshll.u32 %s972_s3, 4  ;;  %s52_s12 = int_to_ptr.vmem [resolvable:$true] %s51_s12 }
   0x9   :  { %54 = dma.hbm_to_vmem [thread:$0]  %s50_s11, 96, %s52_s12, [#allocation5]  }
   0xa   :  { %964 = dma.done.wait [#allocation3], 12288  }
   0xb   :  { %965 = vsyncadd [#allocation3], 4294955008 }
   0xc   :  { %966 = dma.done.wait [#allocation5], 12384  }
   0xd   :  { %967 = vsyncadd [#allocation5], 4294954912  ;;  %v269_v0 = vld [vmem:[#allocation4 + $0x2d0] sm:$0xff]  ;;  %v270_v1 = vld [vmem:[#allocation4 + $0x2d8] sm:$0xff] }
   0xe   :  { %v271_v2 = vld [vmem:[#allocation4 + $0x2e0] sm:$0xff]  ;;  %275 = vmatpush.msra.mxu0 %v269_v0  ;;  %316 = vmatpush.msra.mxu1 %v270_v1  ;;  %v272_v3 = vld [vmem:[#allocation4 + $0x2e8] sm:$0xff]  ;;  %v265_v6 = vld [vmem:[#allocation4 + $0x2b0] sm:$0xff] }
   0xf   :  { %v263_v4 = vld [vmem:[#allocation4 + $0x2a0] sm:$0xff]  ;;  %v264_v5 = vld [vmem:[#allocation4 + $0x2a8] sm:$0xff]  ;;  %357 = vmatpush.msra.mxu2 %v271_v2  ;;  %398 = vmatpush.msra.mxu3 %v272_v3  ;;  %v266_v7 = vld [vmem:[#allocation4 + $0x2b8] sm:$0xff] }
  0x10   :  { %v257_v8 = vld [vmem:[#allocation4 + $0x270] sm:$0xff]  ;;  %276 = vmatpush.msra.mxu0 %v263_v4  ;;  %317 = vmatpush.msra.mxu1 %v264_v5  ;;  %v258_v9 = vld [vmem:[#allocation4 + $0x278] sm:$0xff]  ;;  %v259_v10 = vld [vmem:[#allocation4 + $0x280] sm:$0xff] }
  0x11   :  { %v260_v11 = vld [vmem:[#allocation4 + $0x288] sm:$0xff]  ;;  %358 = vmatpush.msra.mxu2 %v265_v6  ;;  %399 = vmatpush.msra.mxu3 %v266_v7  ;;  %v251_v12 = vld [vmem:[#allocation4 + $0x240] sm:$0xff]  ;;  %v253_v14 = vld [vmem:[#allocation4 + $0x250] sm:$0xff] }
  0x12   :  { %v252_v13 = vld [vmem:[#allocation4 + $0x248] sm:$0xff]  ;;  %277 = vmatpush.msra.mxu0 %v257_v8  ;;  %318 = vmatpush.msra.mxu1 %v258_v9  ;;  %v254_v15 = vld [vmem:[#allocation4 + $0x258] sm:$0xff]  ;;  %v245_v16 = vld [vmem:[#allocation4 + $0x210] sm:$0xff] }
  0x13   :  { %359 = vmatpush.msra.mxu2 %v259_v10  ;;  %400 = vmatpush.msra.mxu3 %v260_v11  ;;  %v246_v17 = vld [vmem:[#allocation4 + $0x218] sm:$0xff]  ;;  %v247_v18 = vld [vmem:[#allocation4 + $0x220] sm:$0xff]  ;;  %v248_v19 = vld [vmem:[#allocation4 + $0x228] sm:$0xff] }
  0x14   :  { %278 = vmatpush.msra.mxu0 %v251_v12  ;;  %319 = vmatpush.msra.mxu1 %v252_v13  ;;  %v239_v20 = vld [vmem:[#allocation4 + $0x1e0] sm:$0xff]  ;;  %v240_v21 = vld [vmem:[#allocation4 + $0x1e8] sm:$0xff]  ;;  %v241_v22 = vld [vmem:[#allocation4 + $0x1f0] sm:$0xff] }
  0x15   :  { %360 = vmatpush.msra.mxu2 %v253_v14  ;;  %401 = vmatpush.msra.mxu3 %v254_v15  ;;  %v242_v23 = vld [vmem:[#allocation4 + $0x1f8] sm:$0xff]  ;;  %v233_v24 = vld [vmem:[#allocation4 + $0x1b0] sm:$0xff]  ;;  %v235_v26 = vld [vmem:[#allocation4 + $0x1c0] sm:$0xff] }
  0x16   :  { %279 = vmatpush.msra.mxu0 %v245_v16  ;;  %320 = vmatpush.msra.mxu1 %v246_v17  ;;  %v234_v25 = vld [vmem:[#allocation4 + $0x1b8] sm:$0xff]  ;;  %v236_v27 = vld [vmem:[#allocation4 + $0x1c8] sm:$0xff]  ;;  %v227_v28 = vld [vmem:[#allocation4 + $0x180] sm:$0xff] }
  0x17   :  { %361 = vmatpush.msra.mxu2 %v247_v18  ;;  %402 = vmatpush.msra.mxu3 %v248_v19  ;;  %v228_v29 = vld [vmem:[#allocation4 + $0x188] sm:$0xff]  ;;  %v229_v30 = vld [vmem:[#allocation4 + $0x190] sm:$0xff]  ;;  %v230_v31 = vld [vmem:[#allocation4 + $0x198] sm:$0xff] }
  0x18   :  { %280 = vmatpush.msra.mxu0 %v239_v20  ;;  %321 = vmatpush.msra.mxu1 %v240_v21  ;;  %v221_v32 = vld [vmem:[#allocation4 + $0x150] sm:$0xff]  ;;  %v222_v33 = vld [vmem:[#allocation4 + $0x158] sm:$0xff]  ;;  %v223_v34 = vld [vmem:[#allocation4 + $0x160] sm:$0xff] }
  0x19   :  { %362 = vmatpush.msra.mxu2 %v241_v22  ;;  %403 = vmatpush.msra.mxu3 %v242_v23  ;;  %v224_v35 = vld [vmem:[#allocation4 + $0x168] sm:$0xff]  ;;  %v215_v36 = vld [vmem:[#allocation4 + $0x120] sm:$0xff]  ;;  %v217_v38 = vld [vmem:[#allocation4 + $0x130] sm:$0xff] }
  0x1a   :  { %281 = vmatpush.msra.mxu0 %v233_v24  ;;  %322 = vmatpush.msra.mxu1 %v234_v25  ;;  %v216_v37 = vld [vmem:[#allocation4 + $0x128] sm:$0xff]  ;;  %v218_v39 = vld [vmem:[#allocation4 + $0x138] sm:$0xff]  ;;  %v209_v40 = vld [vmem:[#allocation4 + $0xf0] sm:$0xff] }
  0x1b   :  { %363 = vmatpush.msra.mxu2 %v235_v26  ;;  %404 = vmatpush.msra.mxu3 %v236_v27  ;;  %v210_v41 = vld [vmem:[#allocation4 + $0xf8] sm:$0xff]  ;;  %v211_v42 = vld [vmem:[#allocation4 + $0x100] sm:$0xff]  ;;  %v212_v43 = vld [vmem:[#allocation4 + $0x108] sm:$0xff] }
  0x1c   :  { %282 = vmatpush.msra.mxu0 %v227_v28  ;;  %323 = vmatpush.msra.mxu1 %v228_v29  ;;  %v203_v44 = vld [vmem:[#allocation4 + $0xc0] sm:$0xff]  ;;  %v204_v45 = vld [vmem:[#allocation4 + $0xc8] sm:$0xff]  ;;  %v205_v46 = vld [vmem:[#allocation4 + $0xd0] sm:$0xff] }
  0x1d   :  { %364 = vmatpush.msra.mxu2 %v229_v30  ;;  %405 = vmatpush.msra.mxu3 %v230_v31  ;;  %v206_v47 = vld [vmem:[#allocation4 + $0xd8] sm:$0xff]  ;;  %v197_v48 = vld [vmem:[#allocation4 + $0x90] sm:$0xff]  ;;  %v199_v50 = vld [vmem:[#allocation4 + $0xa0] sm:$0xff] }
  0x1e   :  { %283 = vmatpush.msra.mxu0 %v221_v32  ;;  %324 = vmatpush.msra.mxu1 %v222_v33  ;;  %v198_v49 = vld [vmem:[#allocation4 + $0x98] sm:$0xff]  ;;  %v200_v51 = vld [vmem:[#allocation4 + $0xa8] sm:$0xff]  ;;  %v191_v52 = vld [vmem:[#allocation4 + $0x60] sm:$0xff] }
  0x1f   :  { %365 = vmatpush.msra.mxu2 %v223_v34  ;;  %406 = vmatpush.msra.mxu3 %v224_v35  ;;  %v192_v53 = vld [vmem:[#allocation4 + $0x68] sm:$0xff]  ;;  %v193_v54 = vld [vmem:[#allocation4 + $0x70] sm:$0xff]  ;;  %v194_v55 = vld [vmem:[#allocation4 + $0x78] sm:$0xff] }
  0x20   :  { %284 = vmatpush.msra.mxu0 %v215_v36  ;;  %325 = vmatpush.msra.mxu1 %v216_v37  ;;  %v185_v56 = vld [vmem:[#allocation4 + $0x30] sm:$0xff]  ;;  %v186_v57 = vld [vmem:[#allocation4 + $0x38] sm:$0xff]  ;;  %v187_v58 = vld [vmem:[#allocation4 + $0x40] sm:$0xff] }
  0x21   :  { %366 = vmatpush.msra.mxu2 %v217_v38  ;;  %407 = vmatpush.msra.mxu3 %v218_v39  ;;  %v188_v59 = vld [vmem:[#allocation4 + $0x48] sm:$0xff]  ;;  %v179_v60 = vld [vmem:[#allocation4] sm:$0xff]  ;;  %v181_v62 = vld [vmem:[#allocation4 + $0x10] sm:$0xff] }
  0x22   :  { %285 = vmatpush.msra.mxu0 %v209_v40  ;;  %326 = vmatpush.msra.mxu1 %v210_v41  ;;  %v180_v61 = vld [vmem:[#allocation4 + $0x8] sm:$0xff]  ;;  %v182_v63 = vld [vmem:[#allocation4 + $0x18] sm:$0xff]  ;;  %v1020_v0 = vld [vmem:[%s1526_s1] sm:$0xff] }
  0x23   :  { %367 = vmatpush.msra.mxu2 %v211_v42  ;;  %408 = vmatpush.msra.mxu3 %v212_v43  ;;  %v165_v1 = vld [vmem:[#allocation2 + $0x2d0] sm:$0xff]  ;;  %v166_v2 = vld [vmem:[#allocation2 + $0x2d8] sm:$0xff]  ;;  %v159_v5 = vld [vmem:[#allocation2 + $0x2a0] sm:$0xff] }
  0x24   :  { %286 = vmatpush.msra.mxu0 %v203_v44  ;;  %327 = vmatpush.msra.mxu1 %v204_v45  ;;  %v273_v3 = vld [vmem:[#allocation4 + $0x2f0] sm:$0xff]  ;;  %v274_v4 = vld [vmem:[#allocation4 + $0x2f8] sm:$0xff]  ;;  %v160_v6 = vld [vmem:[#allocation2 + $0x2a8] sm:$0xff] }
  0x25   :  { %368 = vmatpush.msra.mxu2 %v205_v46  ;;  %409 = vmatpush.msra.mxu3 %v206_v47  ;;  %v267_v7 = vld [vmem:[#allocation4 + $0x2c0] sm:$0xff]  ;;  %v268_v8 = vld [vmem:[#allocation4 + $0x2c8] sm:$0xff]  ;;  %v153_v9 = vld [vmem:[#allocation2 + $0x270] sm:$0xff] }
  0x26   :  { %287 = vmatpush.msra.mxu0 %v197_v48  ;;  %328 = vmatpush.msra.mxu1 %v198_v49  ;;  %v154_v10 = vld [vmem:[#allocation2 + $0x278] sm:$0xff]  ;;  %v261_v11 = vld [vmem:[#allocation4 + $0x290] sm:$0xff]  ;;  %v1029_v13 = vld [vmem:[%s1526_s1 + $0x8] sm:$0xff] }
  0x27   :  { %369 = vmatpush.msra.mxu2 %v199_v50  ;;  %410 = vmatpush.msra.mxu3 %v200_v51  ;;  %v262_v12 = vld [vmem:[#allocation4 + $0x298] sm:$0xff]  ;;  %v147_v14 = vld [vmem:[#allocation2 + $0x240] sm:$0xff]  ;;  %v148_v15 = vld [vmem:[#allocation2 + $0x248] sm:$0xff] }
  0x28   :  { %288 = vmatpush.msra.mxu0 %v191_v52  ;;  %329 = vmatpush.msra.mxu1 %v192_v53  ;;  %v255_v16 = vld [vmem:[#allocation4 + $0x260] sm:$0xff]  ;;  %v256_v17 = vld [vmem:[#allocation4 + $0x268] sm:$0xff]  ;;  %v141_v18 = vld [vmem:[#allocation2 + $0x210] sm:$0xff] }
  0x29   :  { %370 = vmatpush.msra.mxu2 %v193_v54  ;;  %411 = vmatpush.msra.mxu3 %v194_v55  ;;  %v142_v19 = vld [vmem:[#allocation2 + $0x218] sm:$0xff]  ;;  %v249_v20 = vld [vmem:[#allocation4 + $0x230] sm:$0xff]  ;;  %v135_v22 = vld [vmem:[#allocation2 + $0x1e0] sm:$0xff] }
  0x2a   :  { %289 = vmatpush.msra.mxu0 %v185_v56  ;;  %330 = vmatpush.msra.mxu1 %v186_v57  ;;  %v250_v21 = vld [vmem:[#allocation4 + $0x238] sm:$0xff]  ;;  %v136_v23 = vld [vmem:[#allocation2 + $0x1e8] sm:$0xff]  ;;  %v243_v24 = vld [vmem:[#allocation4 + $0x200] sm:$0xff] }
  0x2b   :  { %371 = vmatpush.msra.mxu2 %v187_v58  ;;  %412 = vmatpush.msra.mxu3 %v188_v59  ;;  %v244_v25 = vld [vmem:[#allocation4 + $0x208] sm:$0xff]  ;;  %v1038_v26 = vld [vmem:[%s1526_s1 + $0x10] sm:$0xff]  ;;  %v130_v28 = vld [vmem:[#allocation2 + $0x1b8] sm:$0xff] }
  0x2c   :  { %290 = vmatpush.msra.mxu0 %v179_v60  ;;  %331 = vmatpush.msra.mxu1 %v180_v61  ;;  %v129_v27 = vld [vmem:[#allocation2 + $0x1b0] sm:$0xff]  ;;  %v238_v30 = vld [vmem:[#allocation4 + $0x1d8] sm:$0xff]  ;;  %v123_v31 = vld [vmem:[#allocation2 + $0x180] sm:$0xff] }
  0x2d   :  { %372 = vmatpush.msra.mxu2 %v181_v62  ;;  %413 = vmatpush.msra.mxu3 %v182_v63  ;;  %v237_v29 = vld [vmem:[#allocation4 + $0x1d0] sm:$0xff]  ;;  %v124_v32 = vld [vmem:[#allocation2 + $0x188] sm:$0xff]  ;;  %v231_v33 = vld [vmem:[#allocation4 + $0x1a0] sm:$0xff] }
  0x2e   :  { %291 = vmatmul.f32.vlgmr.msra.gmra.mxu0 %v1020_v0  ;;  %332 = vmatmul.f32.vlgmr.msra.gmra.mxu1 %v1020_v0  ;;  %v232_v34 = vld [vmem:[#allocation4 + $0x1a8] sm:$0xff]  ;;  %v117_v35 = vld [vmem:[#allocation2 + $0x150] sm:$0xff]  ;;  %v118_v36 = vld [vmem:[#allocation2 + $0x158] sm:$0xff] }
  0x2f   :  { %373 = vmatmul.f32.vlgmr.msra.gmra.mxu2 %v1020_v0  ;;  %414 = vmatmul.f32.vlgmr.msra.gmra.mxu3 %v1020_v0  ;;  %v225_v37 = vld [vmem:[#allocation4 + $0x170] sm:$0xff]  ;;  %v226_v38 = vld [vmem:[#allocation4 + $0x178] sm:$0xff]  ;;  %v111_v40 = vld [vmem:[#allocation2 + $0x120] sm:$0xff] }
  0x30   :  { %521 = vmatpush.msrb.mxu2 %v165_v1  ;;  %562 = vmatpush.msrb.mxu3 %v166_v2  ;;  %v1047_v39 = vld [vmem:[%s1526_s1 + $0x18] sm:$0xff]  ;;  %v112_v41 = vld [vmem:[#allocation2 + $0x128] sm:$0xff]  ;;  %v219_v42 = vld [vmem:[#allocation4 + $0x140] sm:$0xff] }
  0x31   :  { %439 = vmatpush.msrb.mxu0 %v273_v3  ;;  %480 = vmatpush.msrb.mxu1 %v274_v4  ;;  %v220_v43 = vld [vmem:[#allocation4 + $0x148] sm:$0xff]  ;;  %v105_v44 = vld [vmem:[#allocation2 + $0xf0] sm:$0xff]  ;;  %v106_v45 = vld [vmem:[#allocation2 + $0xf8] sm:$0xff] }
  0x32   :  { %522 = vmatpush.msrb.mxu2 %v159_v5  ;;  %563 = vmatpush.msrb.mxu3 %v160_v6  ;;  %v213_v46 = vld [vmem:[#allocation4 + $0x110] sm:$0xff]  ;;  %v214_v47 = vld [vmem:[#allocation4 + $0x118] sm:$0xff]  ;;  %v99_v48 = vld [vmem:[#allocation2 + $0xc0] sm:$0xff] }
  0x33   :  { %440 = vmatpush.msrb.mxu0 %v267_v7  ;;  %481 = vmatpush.msrb.mxu1 %v268_v8  ;;  %v100_v49 = vld [vmem:[#allocation2 + $0xc8] sm:$0xff]  ;;  %v207_v50 = vld [vmem:[#allocation4 + $0xe0] sm:$0xff]  ;;  %v93_v53 = vld [vmem:[#allocation2 + $0x90] sm:$0xff] }
  0x34   :  { %523 = vmatpush.msrb.mxu2 %v153_v9  ;;  %564 = vmatpush.msrb.mxu3 %v154_v10  ;;  %v208_v51 = vld [vmem:[#allocation4 + $0xe8] sm:$0xff]  ;;  %v1056_v52 = vld [vmem:[%s1526_s1 + $0x20] sm:$0xff]  ;;  %v94_v54 = vld [vmem:[#allocation2 + $0x98] sm:$0xff] }
  0x35   :  { %441 = vmatpush.msrb.mxu0 %v261_v11  ;;  %482 = vmatpush.msrb.mxu1 %v262_v12  ;;  %v201_v55 = vld [vmem:[#allocation4 + $0xb0] sm:$0xff]  ;;  %v202_v56 = vld [vmem:[#allocation4 + $0xb8] sm:$0xff]  ;;  %v87_v57 = vld [vmem:[#allocation2 + $0x60] sm:$0xff] }
  0x36   :  { %294 = vmatmul.f32.gmra.mxu0 %v1029_v13  ;;  %335 = vmatmul.f32.gmra.mxu1 %v1029_v13  ;;  %v88_v58 = vld [vmem:[#allocation2 + $0x68] sm:$0xff]  ;;  %v195_v59 = vld [vmem:[#allocation4 + $0x80] sm:$0xff]  ;;  %v81_v61 = vld [vmem:[#allocation2 + $0x30] sm:$0xff] }
  0x37   :  { %376 = vmatmul.f32.gmra.mxu2 %v1029_v13  ;;  %417 = vmatmul.f32.gmra.mxu3 %v1029_v13  ;;  %v196_v60 = vld [vmem:[#allocation4 + $0x88] sm:$0xff]  ;;  %v82_v62 = vld [vmem:[#allocation2 + $0x38] sm:$0xff]  ;;  %v189_v63 = vld [vmem:[#allocation4 + $0x50] sm:$0xff] }
  0x38   :  { %524 = vmatpush.msrb.mxu2 %v147_v14  ;;  %565 = vmatpush.msrb.mxu3 %v148_v15  ;;  %v190_v1 = vld [vmem:[#allocation4 + $0x58] sm:$0xff]  ;;  %v1065_v2 = vld [vmem:[%s1526_s1 + $0x28] sm:$0xff]  ;;  %v75_v3 = vld [vmem:[#allocation2] sm:$0xff] }
  0x39   :  { %442 = vmatpush.msrb.mxu0 %v255_v16  ;;  %483 = vmatpush.msrb.mxu1 %v256_v17  ;;  %v76_v4 = vld [vmem:[#allocation2 + $0x8] sm:$0xff]  ;;  %v183_v5 = vld [vmem:[#allocation4 + $0x20] sm:$0xff]  ;;  %v169_v7 = vld [vmem:[#allocation2 + $0x2f0] sm:$0xff] }
  0x3a   :  { %525 = vmatpush.msrb.mxu2 %v141_v18  ;;  %566 = vmatpush.msrb.mxu3 %v142_v19  ;;  %v184_v6 = vld [vmem:[#allocation4 + $0x28] sm:$0xff]  ;;  %v170_v8 = vld [vmem:[#allocation2 + $0x2f8] sm:$0xff]  ;;  %v167_v9 = vld [vmem:[#allocation2 + $0x2e0] sm:$0xff] }
  0x3b   :  { %443 = vmatpush.msrb.mxu0 %v249_v20  ;;  %484 = vmatpush.msrb.mxu1 %v250_v21  ;;  %v168_v10 = vld [vmem:[#allocation2 + $0x2e8] sm:$0xff]  ;;  %v163_v11 = vld [vmem:[#allocation2 + $0x2c0] sm:$0xff]  ;;  %v161_v14 = vld [vmem:[#allocation2 + $0x2b0] sm:$0xff] }
  0x3c   :  { %526 = vmatpush.msrb.mxu2 %v135_v22  ;;  %567 = vmatpush.msrb.mxu3 %v136_v23  ;;  %v164_v12 = vld [vmem:[#allocation2 + $0x2c8] sm:$0xff]  ;;  %v162_v15 = vld [vmem:[#allocation2 + $0x2b8] sm:$0xff]  ;;  %v1074_v16 = vld [vmem:[%s1526_s1 + $0x30] sm:$0xff] }
  0x3d   :  { %444 = vmatpush.msrb.mxu0 %v243_v24  ;;  %485 = vmatpush.msrb.mxu1 %v244_v25  ;;  %v157_v17 = vld [vmem:[#allocation2 + $0x290] sm:$0xff]  ;;  %v158_v18 = vld [vmem:[#allocation2 + $0x298] sm:$0xff]  ;;  %v155_v19 = vld [vmem:[#allocation2 + $0x280] sm:$0xff] }
  0x3e   :  { %297 = vmatmul.f32.gmra.mxu0 %v1038_v26  ;;  %338 = vmatmul.f32.gmra.mxu1 %v1038_v26  ;;  %v156_v20 = vld [vmem:[#allocation2 + $0x288] sm:$0xff]  ;;  %v151_v21 = vld [vmem:[#allocation2 + $0x260] sm:$0xff]  ;;  %v149_v23 = vld [vmem:[#allocation2 + $0x250] sm:$0xff] }
  0x3f   :  { %379 = vmatmul.f32.gmra.mxu2 %v1038_v26  ;;  %420 = vmatmul.f32.gmra.mxu3 %v1038_v26  ;;  %v152_v22 = vld [vmem:[#allocation2 + $0x268] sm:$0xff]  ;;  %v150_v24 = vld [vmem:[#allocation2 + $0x258] sm:$0xff]  ;;  %v145_v25 = vld [vmem:[#allocation2 + $0x230] sm:$0xff] }
  0x40   :  { %527 = vmatpush.msrb.mxu2 %v129_v27  ;;  %568 = vmatpush.msrb.mxu3 %v130_v28  ;;  %v146_v27 = vld [vmem:[#allocation2 + $0x238] sm:$0xff]  ;;  %v143_v28 = vld [vmem:[#allocation2 + $0x220] sm:$0xff] }
  0x41   :  { %445 = vmatpush.msrb.mxu0 %v237_v29  ;;  %486 = vmatpush.msrb.mxu1 %v238_v30  ;;  %v144_v29 = vld [vmem:[#allocation2 + $0x228] sm:$0xff]  ;;  %v1083_v30 = vld [vmem:[%s1526_s1 + $0x38] sm:$0xff] }
  0x42   :  { %528 = vmatpush.msrb.mxu2 %v123_v31  ;;  %569 = vmatpush.msrb.mxu3 %v124_v32  ;;  %v139_v31 = vld [vmem:[#allocation2 + $0x200] sm:$0xff]  ;;  %v140_v32 = vld [vmem:[#allocation2 + $0x208] sm:$0xff] }
  0x43   :  { %446 = vmatpush.msrb.mxu0 %v231_v33  ;;  %487 = vmatpush.msrb.mxu1 %v232_v34  ;;  %v133_v33 = vld [vmem:[#allocation2 + $0x1d0] sm:$0xff]  ;;  %v134_v34 = vld [vmem:[#allocation2 + $0x1d8] sm:$0xff] }
  0x44   :  { %529 = vmatpush.msrb.mxu2 %v117_v35  ;;  %570 = vmatpush.msrb.mxu3 %v118_v36  ;;  %v137_v35 = vld [vmem:[#allocation2 + $0x1f0] sm:$0xff]  ;;  %v138_v36 = vld [vmem:[#allocation2 + $0x1f8] sm:$0xff] }
  0x45   :  { %447 = vmatpush.msrb.mxu0 %v225_v37  ;;  %488 = vmatpush.msrb.mxu1 %v226_v38  ;;  %v127_v37 = vld [vmem:[#allocation2 + $0x1a0] sm:$0xff]  ;;  %v128_v38 = vld [vmem:[#allocation2 + $0x1a8] sm:$0xff] }
  0x46   :  { %300 = vmatmul.f32.gmra.mxu0 %v1047_v39  ;;  %341 = vmatmul.f32.gmra.mxu1 %v1047_v39 }
  0x47   :  { %382 = vmatmul.f32.gmra.mxu2 %v1047_v39  ;;  %423 = vmatmul.f32.gmra.mxu3 %v1047_v39 }
  0x48   :  { %530 = vmatpush.msrb.mxu2 %v111_v40  ;;  %571 = vmatpush.msrb.mxu3 %v112_v41  ;;  %v131_v40 = vld [vmem:[#allocation2 + $0x1c0] sm:$0xff]  ;;  %v132_v41 = vld [vmem:[#allocation2 + $0x1c8] sm:$0xff] }
  0x49   :  { %448 = vmatpush.msrb.mxu0 %v219_v42  ;;  %489 = vmatpush.msrb.mxu1 %v220_v43  ;;  %v1092_v42 = vld [vmem:[%s1525_s0] sm:$0xff]  ;;  %v121_v43 = vld [vmem:[#allocation2 + $0x170] sm:$0xff] }
  0x4a   :  { %531 = vmatpush.msrb.mxu2 %v105_v44  ;;  %572 = vmatpush.msrb.mxu3 %v106_v45  ;;  %v122_v44 = vld [vmem:[#allocation2 + $0x178] sm:$0xff]  ;;  %v125_v45 = vld [vmem:[#allocation2 + $0x190] sm:$0xff] }
  0x4b   :  { %449 = vmatpush.msrb.mxu0 %v213_v46  ;;  %490 = vmatpush.msrb.mxu1 %v214_v47  ;;  %v126_v46 = vld [vmem:[#allocation2 + $0x198] sm:$0xff]  ;;  %v115_v47 = vld [vmem:[#allocation2 + $0x140] sm:$0xff] }
  0x4c   :  { %532 = vmatpush.msrb.mxu2 %v99_v48  ;;  %573 = vmatpush.msrb.mxu3 %v100_v49  ;;  %v116_v48 = vld [vmem:[#allocation2 + $0x148] sm:$0xff]  ;;  %v119_v49 = vld [vmem:[#allocation2 + $0x160] sm:$0xff] }
  0x4d   :  { %450 = vmatpush.msrb.mxu0 %v207_v50  ;;  %491 = vmatpush.msrb.mxu1 %v208_v51  ;;  %v120_v50 = vld [vmem:[#allocation2 + $0x168] sm:$0xff]  ;;  %v109_v51 = vld [vmem:[#allocation2 + $0x110] sm:$0xff] }
  0x4e   :  { %303 = vmatmul.f32.gmra.mxu0 %v1056_v52  ;;  %344 = vmatmul.f32.gmra.mxu1 %v1056_v52 }
  0x4f   :  { %385 = vmatmul.f32.gmra.mxu2 %v1056_v52  ;;  %426 = vmatmul.f32.gmra.mxu3 %v1056_v52 }
  0x50   :  { %533 = vmatpush.msrb.mxu2 %v93_v53  ;;  %574 = vmatpush.msrb.mxu3 %v94_v54  ;;  %v110_v53 = vld [vmem:[#allocation2 + $0x118] sm:$0xff]  ;;  %v113_v54 = vld [vmem:[#allocation2 + $0x130] sm:$0xff] }
  0x51   :  { %451 = vmatpush.msrb.mxu0 %v201_v55  ;;  %492 = vmatpush.msrb.mxu1 %v202_v56  ;;  %v114_v55 = vld [vmem:[#allocation2 + $0x138] sm:$0xff]  ;;  %v103_v56 = vld [vmem:[#allocation2 + $0xe0] sm:$0xff] }
  0x52   :  { %534 = vmatpush.msrb.mxu2 %v87_v57  ;;  %575 = vmatpush.msrb.mxu3 %v88_v58  ;;  %v104_v57 = vld [vmem:[#allocation2 + $0xe8] sm:$0xff]  ;;  %v107_v58 = vld [vmem:[#allocation2 + $0x100] sm:$0xff] }
  0x53   :  { %452 = vmatpush.msrb.mxu0 %v195_v59  ;;  %493 = vmatpush.msrb.mxu1 %v196_v60  ;;  %v108_v59 = vld [vmem:[#allocation2 + $0x108] sm:$0xff]  ;;  %v97_v60 = vld [vmem:[#allocation2 + $0xb0] sm:$0xff] }
  0x54   :  { %535 = vmatpush.msrb.mxu2 %v81_v61  ;;  %576 = vmatpush.msrb.mxu3 %v82_v62  ;;  %v98_v61 = vld [vmem:[#allocation2 + $0xb8] sm:$0xff]  ;;  %v101_v62 = vld [vmem:[#allocation2 + $0xd0] sm:$0xff] }
  0x55   :  { %453 = vmatpush.msrb.mxu0 %v189_v63  ;;  %494 = vmatpush.msrb.mxu1 %v190_v1  ;;  %v102_v63 = vld [vmem:[#allocation2 + $0xd8] sm:$0xff]  ;;  %v91_v1 = vld [vmem:[#allocation2 + $0x80] sm:$0xff] }
  0x56   :  { %306 = vmatmul.f32.gmra.mxu0 %v1065_v2  ;;  %347 = vmatmul.f32.gmra.mxu1 %v1065_v2 }
  0x57   :  { %388 = vmatmul.f32.gmra.mxu2 %v1065_v2  ;;  %429 = vmatmul.f32.gmra.mxu3 %v1065_v2 }
  0x58   :  { %536 = vmatpush.msrb.mxu2 %v75_v3  ;;  %577 = vmatpush.msrb.mxu3 %v76_v4  ;;  %v92_v3 = vld [vmem:[#allocation2 + $0x88] sm:$0xff]  ;;  %v95_v4 = vld [vmem:[#allocation2 + $0xa0] sm:$0xff] }
  0x59   :  { %454 = vmatpush.msrb.mxu0 %v183_v5  ;;  %495 = vmatpush.msrb.mxu1 %v184_v6  ;;  %v96_v5 = vld [vmem:[#allocation2 + $0xa8] sm:$0xff]  ;;  %v85_v6 = vld [vmem:[#allocation2 + $0x50] sm:$0xff] }
  0x5a   :  { %685 = vmatpush.msra.mxu2 %v169_v7  ;;  %726 = vmatpush.msra.mxu3 %v170_v8  ;;  %v86_v7 = vld [vmem:[#allocation2 + $0x58] sm:$0xff]  ;;  %v89_v8 = vld [vmem:[#allocation2 + $0x70] sm:$0xff] }
  0x5b   :  { %603 = vmatpush.msra.mxu0 %v167_v9  ;;  %644 = vmatpush.msra.mxu1 %v168_v10  ;;  %v90_v9 = vld [vmem:[#allocation2 + $0x78] sm:$0xff]  ;;  %v79_v10 = vld [vmem:[#allocation2 + $0x20] sm:$0xff] }
  0x5c   :  { %686 = vmatpush.msra.mxu2 %v163_v11  ;;  %727 = vmatpush.msra.mxu3 %v164_v12  ;;  %v80_v11 = vld [vmem:[#allocation2 + $0x28] sm:$0xff]  ;;  %v83_v12 = vld [vmem:[#allocation2 + $0x40] sm:$0xff] }
  0x5d   :  { %604 = vmatpush.msra.mxu0 %v161_v14  ;;  %645 = vmatpush.msra.mxu1 %v162_v15  ;;  %v84_v14 = vld [vmem:[#allocation2 + $0x48] sm:$0xff]  ;;  %v77_v15 = vld [vmem:[#allocation2 + $0x10] sm:$0xff] }
  0x5e   :  { %309 = vmatmul.f32.gmra.mxu0 %v1074_v16  ;;  %350 = vmatmul.f32.gmra.mxu1 %v1074_v16 }
  0x5f   :  { %391 = vmatmul.f32.gmra.mxu2 %v1074_v16  ;;  %432 = vmatmul.f32.gmra.mxu3 %v1074_v16 }
  0x60   :  { %687 = vmatpush.msra.mxu2 %v157_v17  ;;  %728 = vmatpush.msra.mxu3 %v158_v18  ;;  %v78_v17 = vld [vmem:[#allocation2 + $0x18] sm:$0xff]  ;;  %v72_v18 = vld [vmem:[%s1525_s0 + $0x28] sm:$0xff] }
  0x61   :  { %605 = vmatpush.msra.mxu0 %v155_v19  ;;  %646 = vmatpush.msra.mxu1 %v156_v20  ;;  %v73_v19 = vld [vmem:[%s1525_s0 + $0x30] sm:$0xff] }
  0x62   :  { %688 = vmatpush.msra.mxu2 %v151_v21  ;;  %729 = vmatpush.msra.mxu3 %v152_v22 }
  0x63   :  { %606 = vmatpush.msra.mxu0 %v149_v23  ;;  %647 = vmatpush.msra.mxu1 %v150_v24 }
  0x64   :  { %689 = vmatpush.msra.mxu2 %v145_v25  ;;  %730 = vmatpush.msra.mxu3 %v146_v27 }
  0x65   :  { %607 = vmatpush.msra.mxu0 %v143_v28  ;;  %648 = vmatpush.msra.mxu1 %v144_v29 }
  0x66   :  { %312 = vmatmul.f32.gmra.mxu0 %v1083_v30  ;;  %353 = vmatmul.f32.gmra.mxu1 %v1083_v30 }
  0x67   :  { %394 = vmatmul.f32.gmra.mxu2 %v1083_v30  ;;  %435 = vmatmul.f32.gmra.mxu3 %v1083_v30 }
  0x68   :  { %690 = vmatpush.msra.mxu2 %v139_v31  ;;  %731 = vmatpush.msra.mxu3 %v140_v32 }
  0x69   :  { %608 = vmatpush.msra.mxu0 %v137_v35  ;;  %649 = vmatpush.msra.mxu1 %v138_v36 }
  0x6a   :  { %691 = vmatpush.msra.mxu2 %v133_v33  ;;  %732 = vmatpush.msra.mxu3 %v134_v34 }
  0x6b   :  { %609 = vmatpush.msra.mxu0 %v131_v40  ;;  %650 = vmatpush.msra.mxu1 %v132_v41 }
  0x6c   :  { %692 = vmatpush.msra.mxu2 %v127_v37  ;;  %733 = vmatpush.msra.mxu3 %v128_v38 }
  0x6d   :  { %610 = vmatpush.msra.mxu0 %v125_v45  ;;  %651 = vmatpush.msra.mxu1 %v126_v46 }
  0x6e   :  { %455 = vmatmul.f32.vlgmr.msrb.gmra.mxu0 %v1020_v0  ;;  %496 = vmatmul.f32.vlgmr.msrb.gmra.mxu1 %v1020_v0  ;;  %v1101_v0 = vld [vmem:[%s1525_s0 + $0x8] sm:$0xff] }
  0x6f   :  { %537 = vmatmul.f32.vlgmr.msrb.gmra.mxu2 %v1092_v42  ;;  %578 = vmatmul.f32.vlgmr.msrb.gmra.mxu3 %v1092_v42 }
  0x70   :  { %693 = vmatpush.msra.mxu2 %v121_v43  ;;  %734 = vmatpush.msra.mxu3 %v122_v44 }
  0x71   :  { %611 = vmatpush.msra.mxu0 %v119_v49  ;;  %652 = vmatpush.msra.mxu1 %v120_v50 }
  0x72   :  { %694 = vmatpush.msra.mxu2 %v115_v47  ;;  %735 = vmatpush.msra.mxu3 %v116_v48 }
  0x73   :  { %612 = vmatpush.msra.mxu0 %v113_v54  ;;  %653 = vmatpush.msra.mxu1 %v114_v55  ;;  %v1237_v54 = vld [vmem:[#allocation6] sm:$0x3f] }
  0x74   :  { %695 = vmatpush.msra.mxu2 %v109_v51  ;;  %736 = vmatpush.msra.mxu3 %v110_v53  ;;  %v1240_v55 = vperm.slane %v1237_v54, 0 }
  0x75   :  { %613 = vmatpush.msra.mxu0 %v107_v58  ;;  %654 = vmatpush.msra.mxu1 %v108_v59 }
  0x76   :  { %458 = vmatmul.f32.gmra.mxu0 %v1029_v13  ;;  %499 = vmatmul.f32.gmra.mxu1 %v1029_v13  ;;  %v1110_v13 = vld [vmem:[%s1525_s0 + $0x10] sm:$0xff] }
  0x77   :  { %540 = vmatmul.f32.gmra.mxu2 %v1101_v0  ;;  %581 = vmatmul.f32.gmra.mxu3 %v1101_v0 }
  0x78   :  { %696 = vmatpush.msra.mxu2 %v103_v56  ;;  %737 = vmatpush.msra.mxu3 %v104_v57  ;;  %v1243_v56 = vperm.slane %v1237_v54, 1 }
  0x79   :  { %614 = vmatpush.msra.mxu0 %v101_v62  ;;  %655 = vmatpush.msra.mxu1 %v102_v63 }
  0x7a   :  { %697 = vmatpush.msra.mxu2 %v97_v60  ;;  %738 = vmatpush.msra.mxu3 %v98_v61 }
  0x7b   :  { %615 = vmatpush.msra.mxu0 %v95_v4  ;;  %656 = vmatpush.msra.mxu1 %v96_v5 }
  0x7c   :  { %698 = vmatpush.msra.mxu2 %v91_v1  ;;  %739 = vmatpush.msra.mxu3 %v92_v3 }
  0x7d   :  { %616 = vmatpush.msra.mxu0 %v89_v8  ;;  %657 = vmatpush.msra.mxu1 %v90_v9 }
  0x7e   :  { %461 = vmatmul.f32.gmra.mxu0 %v1038_v26  ;;  %502 = vmatmul.f32.gmra.mxu1 %v1038_v26  ;;  %v1119_v26 = vld [vmem:[%s1525_s0 + $0x18] sm:$0xff] }
  0x7f   :  { %543 = vmatmul.f32.gmra.mxu2 %v1110_v13  ;;  %584 = vmatmul.f32.gmra.mxu3 %v1110_v13 }
  0x80   :  { %699 = vmatpush.msra.mxu2 %v85_v6  ;;  %740 = vmatpush.msra.mxu3 %v86_v7 }
  0x81   :  { %617 = vmatpush.msra.mxu0 %v83_v12  ;;  %658 = vmatpush.msra.mxu1 %v84_v14 }
  0x82   :  { %700 = vmatpush.msra.mxu2 %v79_v10  ;;  %741 = vmatpush.msra.mxu3 %v80_v11 }
  0x83   :  { %618 = vmatpush.msra.mxu0 %v77_v15  ;;  %659 = vmatpush.msra.mxu1 %v78_v17 }
  0x86   :  { %464 = vmatmul.f32.gmra.mxu0 %v1047_v39  ;;  %505 = vmatmul.f32.gmra.mxu1 %v1047_v39  ;;  %v71_v39 = vld [vmem:[%s1525_s0 + $0x20] sm:$0xff] }
  0x87   :  { %546 = vmatmul.f32.gmra.mxu2 %v1119_v26  ;;  %587 = vmatmul.f32.gmra.mxu3 %v1119_v26 }
  0x8e   :  { %467 = vmatmul.f32.gmra.mxu0 %v1056_v52  ;;  %508 = vmatmul.f32.gmra.mxu1 %v1056_v52  ;;  %v1143_v52 = vld [vmem:[%s1525_s0 + $0x38] sm:$0xff] }
  0x8f   :  { %549 = vmatmul.f32.gmra.mxu2 %v71_v39  ;;  %590 = vmatmul.f32.gmra.mxu3 %v71_v39 }
  0x96   :  { %470 = vmatmul.f32.gmra.mxu0 %v1065_v2  ;;  %511 = vmatmul.f32.gmra.mxu1 %v1065_v2 }
  0x97   :  { %552 = vmatmul.f32.gmra.mxu2 %v72_v18  ;;  %593 = vmatmul.f32.gmra.mxu3 %v72_v18 }
  0x9e   :  { %473 = vmatmul.f32.gmra.mxu0 %v1074_v16  ;;  %514 = vmatmul.f32.gmra.mxu1 %v1074_v16 }
  0x9f   :  { %555 = vmatmul.f32.gmra.mxu2 %v73_v19  ;;  %596 = vmatmul.f32.gmra.mxu3 %v73_v19 }
  0xa6   :  { %476 = vmatmul.f32.gmra.mxu0 %v1083_v30  ;;  %517 = vmatmul.f32.gmra.mxu1 %v1083_v30 }
  0xa7   :  { %558 = vmatmul.f32.gmra.mxu2 %v1143_v52  ;;  %599 = vmatmul.f32.gmra.mxu3 %v1143_v52 }
  0xab   :  { %v1149_v2 = vpop.f32.mrf.mxu0  ;;  %v1151_v20 = vpop.f32.mrf.mxu1 }
  0xae   :  { %619 = vmatmul.f32.vlgmr.msra.gmra.mxu0 %v1092_v42  ;;  %660 = vmatmul.f32.vlgmr.msra.gmra.mxu1 %v1092_v42 }
  0xaf   :  { %701 = vmatmul.f32.vlgmr.msra.gmra.mxu2 %v1092_v42  ;;  %742 = vmatmul.f32.vlgmr.msra.gmra.mxu3 %v1092_v42 }
  0xb2   :  { %v1157_v16 = vpop.f32.mrf.mxu2  ;;  %v1159_v21 = vpop.f32.mrf.mxu3 }
  0xb3   :  { %v1161_v22 = vpop.f32.mrf.mxu0  ;;  %v1163_v23 = vpop.f32.mrf.mxu1 }
  0xb6   :  { %622 = vmatmul.f32.gmra.mxu0 %v1101_v0  ;;  %663 = vmatmul.f32.gmra.mxu1 %v1101_v0 }
  0xb7   :  { %704 = vmatmul.f32.gmra.mxu2 %v1101_v0  ;;  %745 = vmatmul.f32.gmra.mxu3 %v1101_v0 }
  0xba   :  { %v1169_v24 = vpop.f32.mrf.mxu2  ;;  %v1171_v25 = vpop.f32.mrf.mxu3 }
  0xbb   :  { %v1173_v27 = vpop.f32.mrf.mxu0  ;;  %v1175_v28 = vpop.f32.mrf.mxu1 }
  0xbe   :  { %625 = vmatmul.f32.gmra.mxu0 %v1110_v13  ;;  %666 = vmatmul.f32.gmra.mxu1 %v1110_v13 }
  0xbf   :  { %707 = vmatmul.f32.gmra.mxu2 %v1110_v13  ;;  %748 = vmatmul.f32.gmra.mxu3 %v1110_v13 }
  0xc2   :  { %v1181_v29 = vpop.f32.mrf.mxu2  ;;  %v1183_v30 = vpop.f32.mrf.mxu3 }
  0xc3   :  { %v1185_v31 = vpop.f32.mrf.mxu0  ;;  %v1187_v32 = vpop.f32.mrf.mxu1 }
  0xc6   :  { %628 = vmatmul.f32.gmra.mxu0 %v1119_v26  ;;  %669 = vmatmul.f32.gmra.mxu1 %v1119_v26 }
  0xc7   :  { %710 = vmatmul.f32.gmra.mxu2 %v1119_v26  ;;  %751 = vmatmul.f32.gmra.mxu3 %v1119_v26 }
  0xca   :  { %v1193_v33 = vpop.f32.mrf.mxu2  ;;  %v1195_v34 = vpop.f32.mrf.mxu3 }
  0xcb   :  { %v1197_v35 = vpop.f32.mrf.mxu0  ;;  %v1199_v36 = vpop.f32.mrf.mxu1 }
  0xce   :  { %631 = vmatmul.f32.gmra.mxu0 %v71_v39  ;;  %672 = vmatmul.f32.gmra.mxu1 %v71_v39 }
  0xcf   :  { %713 = vmatmul.f32.gmra.mxu2 %v71_v39  ;;  %754 = vmatmul.f32.gmra.mxu3 %v71_v39 }
  0xd2   :  { %v1201_v37 = vpop.f32.mrf.mxu2  ;;  %v1203_v38 = vpop.f32.mrf.mxu3 }
  0xd3   :  { %v1205_v40 = vpop.f32.mrf.mxu0  ;;  %v1207_v41 = vpop.f32.mrf.mxu1 }
  0xd6   :  { %634 = vmatmul.f32.gmra.mxu0 %v72_v18  ;;  %675 = vmatmul.f32.gmra.mxu1 %v72_v18 }
  0xd7   :  { %716 = vmatmul.f32.gmra.mxu2 %v72_v18  ;;  %757 = vmatmul.f32.gmra.mxu3 %v72_v18 }
  0xda   :  { %v1209_v42 = vpop.f32.mrf.mxu2  ;;  %v1211_v43 = vpop.f32.mrf.mxu3 }
  0xdb   :  { %v1213_v44 = vpop.f32.mrf.mxu0  ;;  %v1215_v45 = vpop.f32.mrf.mxu1 }
  0xde   :  { %637 = vmatmul.f32.gmra.mxu0 %v73_v19  ;;  %678 = vmatmul.f32.gmra.mxu1 %v73_v19 }
  0xdf   :  { %719 = vmatmul.f32.gmra.mxu2 %v73_v19  ;;  %760 = vmatmul.f32.gmra.mxu3 %v73_v19 }
  0xe2   :  { %v1217_v46 = vpop.f32.mrf.mxu2  ;;  %v1219_v47 = vpop.f32.mrf.mxu3 }
  0xe3   :  { %v1221_v48 = vpop.f32.mrf.mxu0  ;;  %v1223_v49 = vpop.f32.mrf.mxu1 }
  0xe6   :  { %640 = vmatmul.f32.gmra.mxu0 %v1143_v52  ;;  %681 = vmatmul.f32.gmra.mxu1 %v1143_v52 }
  0xe7   :  { %722 = vmatmul.f32.gmra.mxu2 %v1143_v52  ;;  %763 = vmatmul.f32.gmra.mxu3 %v1143_v52 }
  0xea   :  { %v1229_v50 = vpop.f32.mrf.mxu2  ;;  %v1231_v0 = vpop.f32.mrf.mxu3 }
  0xeb   :  { %v1233_v51 = vpop.f32.mrf.mxu0  ;;  %v1235_v53 = vpop.f32.mrf.mxu1 }
  0xf2   :  { %v538_v57 = vpop.f32.mrf.mxu2  ;;  %v579_v58 = vpop.f32.mrf.mxu3 }
  0xf3   :  { %v539_v59 = vadd.f32 %v538_v57, %v1149_v2  ;;  %v580_v13 = vadd.f32 %v579_v58, %v1151_v20  ;;  %v1247_v60 = vpop.f32.mrf.mxu0  ;;  %v1249_v61 = vpop.f32.mrf.mxu1 }
  0xf5   :  { %v781_v62 = vadd.f32 %v1240_v55, %v539_v59  ;;  %v782_v63 = vadd.f32 %v1243_v56, %v580_v13 }
  0xf7   :  { %829 = vst [vmem:[%s1530_s5] sm:$0xff] %v781_v62 }
  0xf8   :  { %830 = vst [vmem:[%s1530_s5 + $0x8] sm:$0xff] %v782_v63 }
  0xfa   :  { %v541_v1 = vpop.f32.mrf.mxu2  ;;  %v582_v3 = vpop.f32.mrf.mxu3 }
  0xfb   :  { %v542_v4 = vadd.f32 %v541_v1, %v1161_v22  ;;  %v583_v5 = vadd.f32 %v582_v3, %v1163_v23  ;;  %v1261_v26 = vpop.f32.mrf.mxu0  ;;  %v1263_v6 = vpop.f32.mrf.mxu1 }
  0xfd   :  { %v787_v7 = vadd.f32 %v1240_v55, %v542_v4  ;;  %v788_v8 = vadd.f32 %v1243_v56, %v583_v5 }
  0xff   :  { %832 = vst [vmem:[%s1530_s5 + $0x18] sm:$0xff] %v787_v7 }
 0x100   :  { %833 = vst [vmem:[%s1530_s5 + $0x20] sm:$0xff] %v788_v8 }
 0x102   :  { %v544_v9 = vpop.f32.mrf.mxu2  ;;  %v585_v10 = vpop.f32.mrf.mxu3 }
 0x103   :  { %v545_v11 = vadd.f32 %v544_v9, %v1173_v27  ;;  %v586_v12 = vadd.f32 %v585_v10, %v1175_v28  ;;  %v1275_v14 = vpop.f32.mrf.mxu0  ;;  %v1277_v39 = vpop.f32.mrf.mxu1 }
 0x105   :  { %v793_v15 = vadd.f32 %v1240_v55, %v545_v11  ;;  %v794_v17 = vadd.f32 %v1243_v56, %v586_v12 }
 0x107   :  { %835 = vst [vmem:[%s1530_s5 + $0x30] sm:$0xff] %v793_v15 }
 0x108   :  { %836 = vst [vmem:[%s1530_s5 + $0x38] sm:$0xff] %v794_v17 }
 0x10a   :  { %v547_v18 = vpop.f32.mrf.mxu2  ;;  %v588_v19 = vpop.f32.mrf.mxu3 }
 0x10b   :  { %v548_v52 = vadd.f32 %v547_v18, %v1185_v31  ;;  %v589_v2 = vadd.f32 %v588_v19, %v1187_v32  ;;  %v1289_v20 = vpop.f32.mrf.mxu0  ;;  %v1291_v22 = vpop.f32.mrf.mxu1  ;;  %v1347_v18 = vperm.slane %v1237_v54, 3 }
 0x10d   :  { %v799_v23 = vadd.f32 %v1240_v55, %v548_v52  ;;  %v800_v27 = vadd.f32 %v1243_v56, %v589_v2 }
 0x10f   :  { %838 = vst [vmem:[%s1530_s5 + $0x48] sm:$0xff] %v799_v23 }
 0x110   :  { %839 = vst [vmem:[%s1530_s5 + $0x50] sm:$0xff] %v800_v27 }
 0x112   :  { %v550_v28 = vpop.f32.mrf.mxu2  ;;  %v591_v31 = vpop.f32.mrf.mxu3 }
 0x113   :  { %v551_v32 = vadd.f32 %v550_v28, %v1197_v35  ;;  %v592_v57 = vadd.f32 %v591_v31, %v1199_v36  ;;  %v1303_v58 = vpop.f32.mrf.mxu0  ;;  %v1305_v59 = vpop.f32.mrf.mxu1 }
 0x115   :  { %v805_v13 = vadd.f32 %v1240_v55, %v551_v32  ;;  %v806_v62 = vadd.f32 %v1243_v56, %v592_v57 }
 0x117   :  { %841 = vst [vmem:[%s1530_s5 + $0x60] sm:$0xff] %v805_v13 }
 0x118   :  { %842 = vst [vmem:[%s1530_s5 + $0x68] sm:$0xff] %v806_v62 }
 0x11a   :  { %v553_v63 = vpop.f32.mrf.mxu2  ;;  %v594_v35 = vpop.f32.mrf.mxu3 }
 0x11b   :  { %v554_v36 = vadd.f32 %v553_v63, %v1205_v40  ;;  %v595_v1 = vadd.f32 %v594_v35, %v1207_v41  ;;  %v1317_v3 = vpop.f32.mrf.mxu0  ;;  %v1319_v4 = vpop.f32.mrf.mxu1 }
 0x11d   :  { %v811_v5 = vadd.f32 %v1240_v55, %v554_v36  ;;  %v812_v7 = vadd.f32 %v1243_v56, %v595_v1 }
 0x11f   :  { %844 = vst [vmem:[%s1530_s5 + $0x78] sm:$0xff] %v811_v5 }
 0x120   :  { %845 = vst [vmem:[%s1530_s5 + $0x80] sm:$0xff] %v812_v7 }
 0x122   :  { %v556_v8 = vpop.f32.mrf.mxu2  ;;  %v597_v40 = vpop.f32.mrf.mxu3 }
 0x123   :  { %v557_v41 = vadd.f32 %v556_v8, %v1213_v44  ;;  %v598_v9 = vadd.f32 %v597_v40, %v1215_v45  ;;  %v1331_v10 = vpop.f32.mrf.mxu0  ;;  %v1333_v11 = vpop.f32.mrf.mxu1  ;;  %v1344_v45 = vperm.slane %v1237_v54, 2 }
 0x125   :  { %v817_v12 = vadd.f32 %v1240_v55, %v557_v41  ;;  %v818_v15 = vadd.f32 %v1243_v56, %v598_v9 }
 0x127   :  { %847 = vst [vmem:[%s1530_s5 + $0x90] sm:$0xff] %v817_v12 }
 0x128   :  { %848 = vst [vmem:[%s1530_s5 + $0x98] sm:$0xff] %v818_v15 }
 0x12a   :  { %v559_v17 = vpop.f32.mrf.mxu2  ;;  %v600_v44 = vpop.f32.mrf.mxu3 }
 0x12b   :  { %v560_v19 = vadd.f32 %v559_v17, %v1221_v48  ;;  %v601_v52 = vadd.f32 %v600_v44, %v1223_v49  ;;  %v620_v2 = vpop.f32.mrf.mxu0  ;;  %v661_v23 = vpop.f32.mrf.mxu1 }
 0x12c   :  { %v621_v27 = vadd.f32 %v620_v2, %v1157_v16  ;;  %v662_v28 = vadd.f32 %v661_v23, %v1159_v21  ;;  %v1367_v16 = vperm.slane %v1237_v54, 4  ;;  %v1370_v21 = vperm.slane %v1237_v54, 5 }
 0x12d   :  { %v823_v31 = vadd.f32 %v1240_v55, %v560_v19  ;;  %v824_v32 = vadd.f32 %v1243_v56, %v601_v52 }
 0x12e   :  { %v783_v57 = vadd.f32 %v1344_v45, %v621_v27  ;;  %v784_v13 = vadd.f32 %v1347_v18, %v662_v28 }
 0x12f   :  { %850 = vst [vmem:[%s1530_s5 + $0xa8] sm:$0xff] %v823_v31 }
 0x130   :  { %851 = vst [vmem:[%s1530_s5 + $0xb0] sm:$0xff] %v824_v32 }
 0x131   :  { %831 = vst [vmem:[%s1530_s5 + $0x10] sm:$0xff] %v783_v57 }
 0x132   :  { %853 = vst [vmem:[%s1531_s6] sm:$0xff] %v784_v13  ;;  %v702_v48 = vpop.f32.mrf.mxu2  ;;  %v743_v49 = vpop.f32.mrf.mxu3 }
 0x133   :  { %v703_v55 = vadd.f32 %v702_v48, %v1233_v51  ;;  %v744_v56 = vadd.f32 %v743_v49, %v1235_v53  ;;  %v623_v62 = vpop.f32.mrf.mxu0  ;;  %v664_v63 = vpop.f32.mrf.mxu1 }
 0x134   :  { %v624_v35 = vadd.f32 %v623_v62, %v1169_v24  ;;  %v665_v36 = vadd.f32 %v664_v63, %v1171_v25 }
 0x135   :  { %v785_v1 = vadd.f32 %v1367_v16, %v703_v55  ;;  %v786_v54 = vadd.f32 %v1370_v21, %v744_v56 }
 0x136   :  { %v789_v5 = vadd.f32 %v1344_v45, %v624_v35  ;;  %v790_v7 = vadd.f32 %v1347_v18, %v665_v36 }
 0x137   :  { %854 = vst [vmem:[%s1531_s6 + $0x8] sm:$0xff] %v785_v1 }
 0x138   :  { %855 = vst [vmem:[%s1531_s6 + $0x10] sm:$0xff] %v786_v54 }
 0x139   :  { %834 = vst [vmem:[%s1530_s5 + $0x28] sm:$0xff] %v789_v5 }
 0x13a   :  { %856 = vst [vmem:[%s1531_s6 + $0x18] sm:$0xff] %v790_v7  ;;  %v705_v24 = vpop.f32.mrf.mxu2  ;;  %v746_v25 = vpop.f32.mrf.mxu3 }
 0x13b   :  { %v706_v51 = vadd.f32 %v705_v24, %v1247_v60  ;;  %v747_v53 = vadd.f32 %v746_v25, %v1249_v61  ;;  %v626_v8 = vpop.f32.mrf.mxu0  ;;  %v667_v40 = vpop.f32.mrf.mxu1 }
 0x13c   :  { %v627_v41 = vadd.f32 %v626_v8, %v1181_v29  ;;  %v668_v9 = vadd.f32 %v667_v40, %v1183_v30 }
 0x13d   :  { %v791_v12 = vadd.f32 %v1367_v16, %v706_v51  ;;  %v792_v15 = vadd.f32 %v1370_v21, %v747_v53 }
 0x13e   :  { %v795_v17 = vadd.f32 %v1344_v45, %v627_v41  ;;  %v796_v44 = vadd.f32 %v1347_v18, %v668_v9 }
 0x13f   :  { %857 = vst [vmem:[%s1531_s6 + $0x20] sm:$0xff] %v791_v12 }
 0x140   :  { %858 = vst [vmem:[%s1531_s6 + $0x28] sm:$0xff] %v792_v15 }
 0x141   :  { %837 = vst [vmem:[%s1530_s5 + $0x40] sm:$0xff] %v795_v17 }
 0x142   :  { %859 = vst [vmem:[%s1531_s6 + $0x30] sm:$0xff] %v796_v44  ;;  %v708_v29 = vpop.f32.mrf.mxu2  ;;  %v749_v30 = vpop.f32.mrf.mxu3 }
 0x143   :  { %v709_v60 = vadd.f32 %v708_v29, %v1261_v26  ;;  %v750_v61 = vadd.f32 %v749_v30, %v1263_v6  ;;  %v629_v19 = vpop.f32.mrf.mxu0  ;;  %v670_v52 = vpop.f32.mrf.mxu1 }
 0x144   :  { %v630_v2 = vadd.f32 %v629_v19, %v1193_v33  ;;  %v671_v23 = vadd.f32 %v670_v52, %v1195_v34 }
 0x145   :  { %v797_v27 = vadd.f32 %v1367_v16, %v709_v60  ;;  %v798_v28 = vadd.f32 %v1370_v21, %v750_v61 }
 0x146   :  { %v801_v31 = vadd.f32 %v1344_v45, %v630_v2  ;;  %v802_v32 = vadd.f32 %v1347_v18, %v671_v23 }
 0x147   :  { %860 = vst [vmem:[%s1531_s6 + $0x38] sm:$0xff] %v797_v27 }
 0x148   :  { %861 = vst [vmem:[%s1531_s6 + $0x40] sm:$0xff] %v798_v28 }
 0x149   :  { %840 = vst [vmem:[%s1530_s5 + $0x58] sm:$0xff] %v801_v31 }
 0x14a   :  { %862 = vst [vmem:[%s1531_s6 + $0x48] sm:$0xff] %v802_v32  ;;  %v711_v33 = vpop.f32.mrf.mxu2  ;;  %v752_v34 = vpop.f32.mrf.mxu3 }
 0x14b   :  { %v712_v26 = vadd.f32 %v711_v33, %v1275_v14  ;;  %v753_v6 = vadd.f32 %v752_v34, %v1277_v39  ;;  %v632_v57 = vpop.f32.mrf.mxu0  ;;  %v673_v13 = vpop.f32.mrf.mxu1 }
 0x14c   :  { %v633_v48 = vadd.f32 %v632_v57, %v1201_v37  ;;  %v674_v49 = vadd.f32 %v673_v13, %v1203_v38 }
 0x14d   :  { %v803_v55 = vadd.f32 %v1367_v16, %v712_v26  ;;  %v804_v56 = vadd.f32 %v1370_v21, %v753_v6 }
 0x14e   :  { %v807_v62 = vadd.f32 %v1344_v45, %v633_v48  ;;  %v808_v63 = vadd.f32 %v1347_v18, %v674_v49 }
 0x14f   :  { %863 = vst [vmem:[%s1531_s6 + $0x50] sm:$0xff] %v803_v55 }
 0x150   :  { %864 = vst [vmem:[%s1531_s6 + $0x58] sm:$0xff] %v804_v56 }
 0x151   :  { %843 = vst [vmem:[%s1530_s5 + $0x70] sm:$0xff] %v807_v62 }
 0x152   :  { %865 = vst [vmem:[%s1531_s6 + $0x60] sm:$0xff] %v808_v63  ;;  %v714_v37 = vpop.f32.mrf.mxu2  ;;  %v755_v38 = vpop.f32.mrf.mxu3 }
 0x153   :  { %v715_v14 = vadd.f32 %v714_v37, %v1289_v20  ;;  %v756_v39 = vadd.f32 %v755_v38, %v1291_v22  ;;  %v635_v35 = vpop.f32.mrf.mxu0  ;;  %v676_v36 = vpop.f32.mrf.mxu1 }
 0x154   :  { %v636_v1 = vadd.f32 %v635_v35, %v1209_v42  ;;  %v677_v54 = vadd.f32 %v676_v36, %v1211_v43 }
 0x155   :  { %v809_v5 = vadd.f32 %v1367_v16, %v715_v14  ;;  %v810_v7 = vadd.f32 %v1370_v21, %v756_v39 }
 0x156   :  { %v813_v24 = vadd.f32 %v1344_v45, %v636_v1  ;;  %v814_v25 = vadd.f32 %v1347_v18, %v677_v54 }
 0x157   :  { %866 = vst [vmem:[%s1531_s6 + $0x68] sm:$0xff] %v809_v5 }
 0x158   :  { %867 = vst [vmem:[%s1531_s6 + $0x70] sm:$0xff] %v810_v7 }
 0x159   :  { %846 = vst [vmem:[%s1530_s5 + $0x88] sm:$0xff] %v813_v24 }
 0x15a   :  { %868 = vst [vmem:[%s1531_s6 + $0x78] sm:$0xff] %v814_v25  ;;  %v717_v42 = vpop.f32.mrf.mxu2  ;;  %v758_v43 = vpop.f32.mrf.mxu3 }
 0x15b   :  { %v718_v20 = vadd.f32 %v717_v42, %v1303_v58  ;;  %v759_v22 = vadd.f32 %v758_v43, %v1305_v59  ;;  %v638_v51 = vpop.f32.mrf.mxu0  ;;  %v679_v53 = vpop.f32.mrf.mxu1 }
 0x15c   :  { %v639_v8 = vadd.f32 %v638_v51, %v1217_v46  ;;  %v680_v40 = vadd.f32 %v679_v53, %v1219_v47 }
 0x15d   :  { %v815_v41 = vadd.f32 %v1367_v16, %v718_v20  ;;  %v816_v9 = vadd.f32 %v1370_v21, %v759_v22 }
 0x15e   :  { %v819_v12 = vadd.f32 %v1344_v45, %v639_v8  ;;  %v820_v15 = vadd.f32 %v1347_v18, %v680_v40 }
 0x15f   :  { %869 = vst [vmem:[%s1531_s6 + $0x80] sm:$0xff] %v815_v41 }
 0x160   :  { %870 = vst [vmem:[%s1531_s6 + $0x88] sm:$0xff] %v816_v9 }
 0x161   :  { %849 = vst [vmem:[%s1530_s5 + $0xa0] sm:$0xff] %v819_v12 }
 0x162   :  { %871 = vst [vmem:[%s1531_s6 + $0x90] sm:$0xff] %v820_v15  ;;  %v720_v46 = vpop.f32.mrf.mxu2  ;;  %v761_v47 = vpop.f32.mrf.mxu3 }
 0x163   :  { %v721_v58 = vadd.f32 %v720_v46, %v1317_v3  ;;  %v762_v59 = vadd.f32 %v761_v47, %v1319_v4  ;;  %v641_v17 = vpop.f32.mrf.mxu0  ;;  %v682_v44 = vpop.f32.mrf.mxu1 }
 0x164   :  { %v642_v29 = vadd.f32 %v641_v17, %v1229_v50  ;;  %v683_v30 = vadd.f32 %v682_v44, %v1231_v0 }
 0x165   :  { %v821_v60 = vadd.f32 %v1367_v16, %v721_v58  ;;  %v822_v61 = vadd.f32 %v1370_v21, %v762_v59 }
 0x166   :  { %v825_v19 = vadd.f32 %v1344_v45, %v642_v29  ;;  %v826_v52 = vadd.f32 %v1347_v18, %v683_v30 }
 0x167   :  { %872 = vst [vmem:[%s1531_s6 + $0x98] sm:$0xff] %v821_v60 }
 0x168   :  { %873 = vst [vmem:[%s1531_s6 + $0xa0] sm:$0xff] %v822_v61 }
 0x169   :  { %852 = vst [vmem:[%s1530_s5 + $0xb8] sm:$0xff] %v825_v19 }
 0x16a   :  { %874 = vst [vmem:[%s1531_s6 + $0xa8] sm:$0xff] %v826_v52  ;;  %v723_v50 = vpop.f32.mrf.mxu2  ;;  %v764_v0 = vpop.f32.mrf.mxu3 }
 0x16b   :  { %v724_v3 = vadd.f32 %v723_v50, %v1331_v10  ;;  %v765_v4 = vadd.f32 %v764_v0, %v1333_v11 }
 0x16d   :  { %v827_v45 = vadd.f32 %v1367_v16, %v724_v3  ;;  %v828_v18 = vadd.f32 %v1370_v21, %v765_v4 }
 0x16f   :  { %875 = vst [vmem:[%s1531_s6 + $0xb0] sm:$0xff] %v827_v45 }
 0x170   :  { %876 = vst [vmem:[%s1531_s6 + $0xb8] sm:$0xff] %v828_v18 }
 0x171   :  { %885 = vsyncpa [#allocation3], 1 }
 0x172   :  { %886 = vsyncpa [#allocation5], 1 }

// kernel: encoder_forward.6
= control target key start
LH: loop header
LB: loop body
LE: loop exit
PB: predicated region body
PF: predicated region fallthrough
CT: control target
= control target key end

     0   :  { %13 = vsyncpa [#allocation4], 0  ;;  %s4338_s0 = inlined_call_operand.vmem [shape: f32[8,8,384], index: 0, kind: input, shape index: {}]   ;;  %s4339_s1 = inlined_call_operand.vmem [shape: f32[8,8,384], index: 1, kind: input, shape index: {}]   ;;  %s4340_s2 = inlined_call_operand.hbm [shape: f32[128,384], index: 2, kind: input, shape index: {}]   ;;  %s4341_s3 = inlined_call_operand.hbm [shape: f32[128,384], index: 3, kind: input, shape index: {}]   ;;  %s4342_s4 = inlined_call_operand.hbm [shape: f32[1,128], index: 4, kind: input, shape index: {}]   ;;  %s4343_s5 = inlined_call_operand.hbm [shape: f32[1,128], index: 5, kind: input, shape index: {}]   ;;  %s4344_s6 = inlined_call_operand.vmem [shape: f32[8,8,128], index: 6, kind: output, shape index: {0}]   ;;  %s4345_s7 = inlined_call_operand.vmem [shape: f32[8,8,128], index: 7, kind: output, shape index: {1}]  }
   0x1   :  { %14 = vsyncpa [#allocation6], 0 }
   0x2   :  { %15 = vsyncpa [#allocation9], 0  ;;  %s46_s26 = sshll.u32 %s4341_s3, 4  ;;  %s2652_s27 = smov [#allocation5]   ;;  %s47_s26 = int_to_ptr.hbm [resolvable:$true] %s46_s26 }
   0x3   :  { %s48_s28 = sshll.u32 %s2652_s27, 4  ;;  %s33_s8 = sshll.u32 %s4340_s2, 4  ;;  %s49_s28 = int_to_ptr.vmem [resolvable:$true] %s48_s28  ;;  %s34_s8 = int_to_ptr.hbm [resolvable:$true] %s33_s8 }
   0x4   :  { %s2653_s9 = smov 384   ;;  %s2654_s10 = smov 24  }
   0x5   :  { %54 = dma.hbm_to_vmem [thread:$0]  %s47_s26, 6144, %s49_s28, [#allocation6], %s2653_s9, %s2653_s9, %s2654_s10  }
   0x6   :  { %s2655_s11 = smov [#allocation3]   ;;  %s60_s15 = sshll.u32 %s4342_s4, 4  ;;  %s61_s15 = int_to_ptr.hbm [resolvable:$true] %s60_s15 }
   0x7   :  { %s35_s12 = sshll.u32 %s2655_s11, 4  ;;  %s71_s17 = sshll.u32 %s4343_s5, 4  ;;  %s36_s12 = int_to_ptr.vmem [resolvable:$true] %s35_s12  ;;  %s72_s17 = int_to_ptr.hbm [resolvable:$true] %s71_s17 }
   0x8   :  { %41 = dma.hbm_to_vmem [thread:$0]  %s34_s8, 6144, %s36_s12, [#allocation4], %s2653_s9, %s2653_s9, %s2654_s10  }
   0x9   :  { %s2656_s18 = smov [#allocation7]   ;;  %s2657_s2 = smov [#allocation8]  }
   0xa   :  { %s62_s19 = sshll.u32 %s2656_s18, 4  ;;  %s73_s20 = sshll.u32 %s2657_s2, 4  ;;  %s63_s19 = int_to_ptr.vmem [resolvable:$true] %s62_s19  ;;  %s74_s20 = int_to_ptr.vmem [resolvable:$true] %s73_s20 }
   0xb   :  { %65 = dma.hbm_to_vmem [thread:$0]  %s61_s15, 16, %s63_s19, [#allocation6]  }
   0xc   :  { %76 = dma.hbm_to_vmem [thread:$0]  %s72_s17, 16, %s74_s20, [#allocation9]  }
   0xd   :  { %2646 = dma.done.wait [#allocation4], 6144  }
   0xe   :  { %2647 = vsyncadd [#allocation4], 4294961152 }
   0xf   :  { %2648 = dma.done.wait [#allocation6], 6160  }
  0x10   :  { %2649 = vsyncadd [#allocation6], 4294961136 }
  0x11   :  { %2650 = dma.done.wait [#allocation9], 16  }
  0x12   :  { %2651 = vsyncadd [#allocation9], 4294967280  ;;  %v2711_v0 = vld [vmem:[#allocation3 + $0x168] sm:$0xff]  ;;  %v2713_v1 = vld [vmem:[#allocation3 + $0x150] sm:$0xff]  ;;  %v4362_v60 = vmov 0.0  }
  0x13   :  { %4595 = vst [vmem:[#allocation13_spill] sm:$0xff] %v2711_v0  ;;  %v2715_v2 = vld [vmem:[#allocation5 + $0x168] sm:$0xff]  ;;  %239 = vmatpush.msra.mxu0 %v2711_v0  ;;  %v2719_v3 = vld [vmem:[#allocation5 + $0x150] sm:$0xff]  ;;  %v2721_v4 = vld [vmem:[#allocation3 + $0x138] sm:$0xff] }
  0x14   :  { %4596 = vst [vmem:[#allocation14_spill] sm:$0xff] %v2713_v1  ;;  %352 = vmatpush.msra.mxu3 %v2715_v2  ;;  %v2723_v5 = vld [vmem:[#allocation3 + $0x170] sm:$0xff]  ;;  %v2725_v6 = vld [vmem:[#allocation5 + $0x138] sm:$0xff]  ;;  %v2731_v8 = vld [vmem:[#allocation3 + $0x120] sm:$0xff] }
  0x15   :  { %4597 = vst [vmem:[#allocation15_spill] sm:$0xff] %v2721_v4  ;;  %240 = vmatpush.msra.mxu0 %v2713_v1  ;;  %v2729_v7 = vld [vmem:[#allocation3 + $0x158] sm:$0xff]  ;;  %259 = vmatpush.msra.mxu1 %v2723_v5  ;;  %v2734_v9 = vld [vmem:[#allocation5 + $0x120] sm:$0xff]  ;;  %v2740_v11 = vld [vmem:[#allocation3 + $0x108] sm:$0xff] }
  0x16   :  { %4598 = vst [vmem:[#allocation16_spill] sm:$0xff] %v2723_v5  ;;  %353 = vmatpush.msra.mxu3 %v2719_v3  ;;  %v2738_v10 = vld [vmem:[#allocation3 + $0x140] sm:$0xff]  ;;  %v2743_v12 = vld [vmem:[#allocation5 + $0x108] sm:$0xff]  ;;  %v2749_v14 = vld [vmem:[#allocation3 + $0xf0] sm:$0xff] }
  0x17   :  { %4599 = vst [vmem:[#allocation17_spill] sm:$0xff] %v2729_v7  ;;  %241 = vmatpush.msra.mxu0 %v2721_v4  ;;  %260 = vmatpush.msra.mxu1 %v2729_v7  ;;  %v2747_v13 = vld [vmem:[#allocation3 + $0x128] sm:$0xff]  ;;  %v2752_v15 = vld [vmem:[#allocation5 + $0xf0] sm:$0xff]  ;;  %v2758_v17 = vld [vmem:[#allocation3 + $0xd8] sm:$0xff] }
  0x18   :  { %4600 = vst [vmem:[#allocation18_spill] sm:$0xff] %v2731_v8  ;;  %354 = vmatpush.msra.mxu3 %v2725_v6  ;;  %v2756_v16 = vld [vmem:[#allocation3 + $0x110] sm:$0xff]  ;;  %v2761_v18 = vld [vmem:[#allocation5 + $0xd8] sm:$0xff]  ;;  %v2769_v21 = vld [vmem:[#allocation3 + $0x160] sm:$0xff] }
  0x19   :  { %4601 = vst [vmem:[#allocation19_spill] sm:$0xff] %v2738_v10  ;;  %242 = vmatpush.msra.mxu0 %v2731_v8  ;;  %261 = vmatpush.msra.mxu1 %v2738_v10  ;;  %v2763_v19 = vld [vmem:[#allocation3 + $0x178] sm:$0xff]  ;;  %v2771_v22 = vld [vmem:[#allocation3 + $0xc0] sm:$0xff]  ;;  %v2781_v25 = vld [vmem:[#allocation3 + $0x148] sm:$0xff] }
  0x1a   :  { %4602 = vst [vmem:[#allocation20_spill] sm:$0xff] %v2740_v11  ;;  %355 = vmatpush.msra.mxu3 %v2734_v9  ;;  %v2767_v20 = vld [vmem:[#allocation3 + $0xf8] sm:$0xff]  ;;  %v2774_v23 = vld [vmem:[#allocation5 + $0xc0] sm:$0xff]  ;;  %279 = vmatpush.msra.mxu2 %v2763_v19  ;;  %v2783_v26 = vld [vmem:[#allocation3 + $0xa8] sm:$0xff] }
  0x1b   :  { %4603 = vst [vmem:[#allocation21_spill] sm:$0xff] %v2747_v13  ;;  %243 = vmatpush.msra.mxu0 %v2740_v11  ;;  %262 = vmatpush.msra.mxu1 %v2747_v13  ;;  %v2779_v24 = vld [vmem:[#allocation3 + $0xe0] sm:$0xff]  ;;  %v2786_v27 = vld [vmem:[#allocation5 + $0xa8] sm:$0xff]  ;;  %v2793_v29 = vld [vmem:[#allocation3 + $0x130] sm:$0xff] }
  0x1c   :  { %4604 = vst [vmem:[#allocation22_spill] sm:$0xff] %v2749_v14  ;;  %356 = vmatpush.msra.mxu3 %v2743_v12  ;;  %280 = vmatpush.msra.mxu2 %v2769_v21  ;;  %v2791_v28 = vld [vmem:[#allocation3 + $0xc8] sm:$0xff]  ;;  %v2795_v30 = vld [vmem:[#allocation3 + $0x90] sm:$0xff]  ;;  %v2805_v33 = vld [vmem:[#allocation3 + $0x118] sm:$0xff] }
  0x1d   :  { %4605 = vst [vmem:[#allocation23_spill] sm:$0xff] %v2756_v16  ;;  %244 = vmatpush.msra.mxu0 %v2749_v14  ;;  %263 = vmatpush.msra.mxu1 %v2756_v16  ;;  %v2798_v31 = vld [vmem:[#allocation5 + $0x90] sm:$0xff]  ;;  %v2807_v34 = vld [vmem:[#allocation3 + $0x78] sm:$0xff]  ;;  %v2817_v37 = vld [vmem:[#allocation3 + $0x100] sm:$0xff] }
  0x1e   :  { %4606 = vst [vmem:[#allocation24_spill] sm:$0xff] %v2758_v17  ;;  %357 = vmatpush.msra.mxu3 %v2752_v15  ;;  %281 = vmatpush.msra.mxu2 %v2781_v25  ;;  %v2803_v32 = vld [vmem:[#allocation3 + $0xb0] sm:$0xff]  ;;  %v2810_v35 = vld [vmem:[#allocation5 + $0x78] sm:$0xff]  ;;  %v2819_v38 = vld [vmem:[#allocation3 + $0x60] sm:$0xff] }
  0x1f   :  { %4607 = vst [vmem:[#allocation25_spill] sm:$0xff] %v2767_v20  ;;  %245 = vmatpush.msra.mxu0 %v2758_v17  ;;  %264 = vmatpush.msra.mxu1 %v2767_v20  ;;  %v2815_v36 = vld [vmem:[#allocation3 + $0x98] sm:$0xff]  ;;  %v2822_v39 = vld [vmem:[#allocation5 + $0x60] sm:$0xff]  ;;  %v2829_v41 = vld [vmem:[#allocation3 + $0xe8] sm:$0xff] }
  0x20   :  { %4608 = vst [vmem:[#allocation26_spill] sm:$0xff] %v2771_v22  ;;  %358 = vmatpush.msra.mxu3 %v2761_v18  ;;  %282 = vmatpush.msra.mxu2 %v2793_v29  ;;  %v2827_v40 = vld [vmem:[#allocation3 + $0x80] sm:$0xff]  ;;  %v2831_v42 = vld [vmem:[#allocation3 + $0x48] sm:$0xff]  ;;  %v2841_v45 = vld [vmem:[#allocation3 + $0xd0] sm:$0xff] }
  0x21   :  { %4609 = vst [vmem:[#allocation27_spill] sm:$0xff] %v2779_v24  ;;  %246 = vmatpush.msra.mxu0 %v2771_v22  ;;  %265 = vmatpush.msra.mxu1 %v2779_v24  ;;  %v2834_v43 = vld [vmem:[#allocation5 + $0x48] sm:$0xff]  ;;  %v2843_v46 = vld [vmem:[#allocation3 + $0x30] sm:$0xff]  ;;  %v2853_v49 = vld [vmem:[#allocation3 + $0xb8] sm:$0xff] }
  0x22   :  { %4610 = vst [vmem:[#allocation28_spill] sm:$0xff] %v2783_v26  ;;  %359 = vmatpush.msra.mxu3 %v2774_v23  ;;  %283 = vmatpush.msra.mxu2 %v2805_v33  ;;  %v2839_v44 = vld [vmem:[#allocation3 + $0x68] sm:$0xff]  ;;  %v2846_v47 = vld [vmem:[#allocation5 + $0x30] sm:$0xff]  ;;  %v2855_v50 = vld [vmem:[#allocation3 + $0x18] sm:$0xff] }
  0x23   :  { %4611 = vst [vmem:[#allocation29_spill] sm:$0xff] %v2786_v27  ;;  %247 = vmatpush.msra.mxu0 %v2783_v26  ;;  %266 = vmatpush.msra.mxu1 %v2791_v28  ;;  %v2851_v48 = vld [vmem:[#allocation3 + $0x50] sm:$0xff]  ;;  %v2858_v51 = vld [vmem:[#allocation5 + $0x18] sm:$0xff]  ;;  %v2865_v53 = vld [vmem:[#allocation3 + $0xa0] sm:$0xff] }
  0x24   :  { %4612 = vst [vmem:[#allocation30_spill] sm:$0xff] %v2791_v28  ;;  %360 = vmatpush.msra.mxu3 %v2786_v27  ;;  %284 = vmatpush.msra.mxu2 %v2817_v37  ;;  %v2863_v52 = vld [vmem:[#allocation3 + $0x38] sm:$0xff]  ;;  %v2867_v54 = vld [vmem:[#allocation3] sm:$0xff]  ;;  %v2877_v57 = vld [vmem:[#allocation5 + $0x170] sm:$0xff] }
  0x25   :  { %4613 = vst [vmem:[#allocation31_spill] sm:$0xff] %v2795_v30  ;;  %248 = vmatpush.msra.mxu0 %v2795_v30  ;;  %267 = vmatpush.msra.mxu1 %v2803_v32  ;;  %v2870_v55 = vld [vmem:[#allocation5] sm:$0xff]  ;;  %v2880_v58 = vld [vmem:[#allocation3 + $0x8] sm:$0xff]  ;;  %v2888_v61 = vld [vmem:[#allocation5 + $0x158] sm:$0xff] }
  0x26   :  { %4614 = vst [vmem:[#allocation32_spill] sm:$0xff] %v2798_v31  ;;  %361 = vmatpush.msra.mxu3 %v2798_v31  ;;  %285 = vmatpush.msra.mxu2 %v2829_v41  ;;  %v2875_v56 = vld [vmem:[#allocation3 + $0x20] sm:$0xff]  ;;  %v2885_v59 = vld [vmem:[#allocation3 + $0x88] sm:$0xff]  ;;  %v2891_v62 = vld [vmem:[#allocation5 + $0x178] sm:$0xff] }
  0x27   :  { %4615 = vst [vmem:[#allocation33_spill] sm:$0xff] %v2803_v32  ;;  %249 = vmatpush.msra.mxu0 %v2807_v34  ;;  %268 = vmatpush.msra.mxu1 %v2815_v36  ;;  %v2895_v63 = vld [vmem:[#allocation3 + $0x70] sm:$0xff] }
  0x28   :  { %4616 = vst [vmem:[#allocation34_spill] sm:$0xff] %v2807_v34  ;;  %362 = vmatpush.msra.mxu3 %v2810_v35  ;;  %286 = vmatpush.msra.mxu2 %v2841_v45  ;;  %v2917_v31 = vld [vmem:[#allocation5 + $0x110] sm:$0xff] }
  0x29   :  { %4617 = vst [vmem:[#allocation35_spill] sm:$0xff] %v2810_v35  ;;  %250 = vmatpush.msra.mxu0 %v2819_v38  ;;  %269 = vmatpush.msra.mxu1 %v2827_v40  ;;  %v2915_v35 = vld [vmem:[#allocation3 + $0x40] sm:$0xff]  ;;  %v2919_v27 = vld [vmem:[#allocation5 + $0x130] sm:$0xff] }
  0x2a   :  { %4618 = vst [vmem:[#allocation36_spill] sm:$0xff] %v2815_v36  ;;  %363 = vmatpush.msra.mxu3 %v2822_v39  ;;  %287 = vmatpush.msra.mxu2 %v2853_v49 }
  0x2b   :  { %4619 = vst [vmem:[#allocation37_spill] sm:$0xff] %v2819_v38  ;;  %251 = vmatpush.msra.mxu0 %v2831_v42  ;;  %270 = vmatpush.msra.mxu1 %v2839_v44 }
  0x2c   :  { %4620 = vst [vmem:[#allocation38_spill] sm:$0xff] %v2822_v39  ;;  %364 = vmatpush.msra.mxu3 %v2834_v43  ;;  %288 = vmatpush.msra.mxu2 %v2865_v53  ;;  %v2910_v39 = vld [vmem:[#allocation5 + $0x148] sm:$0xff] }
  0x2d   :  { %4621 = vst [vmem:[#allocation39_spill] sm:$0xff] %v2827_v40  ;;  %252 = vmatpush.msra.mxu0 %v2843_v46  ;;  %271 = vmatpush.msra.mxu1 %v2851_v48 }
  0x2e   :  { %4622 = vst [vmem:[#allocation40_spill] sm:$0xff] %v2831_v42  ;;  %365 = vmatpush.msra.mxu3 %v2846_v47  ;;  %289 = vmatpush.msra.mxu2 %v2885_v59 }
  0x2f   :  { %4623 = vst [vmem:[#allocation41_spill] sm:$0xff] %v2834_v43  ;;  %253 = vmatpush.msra.mxu0 %v2855_v50  ;;  %272 = vmatpush.msra.mxu1 %v2863_v52  ;;  %v2907_v43 = vld [vmem:[#allocation5 + $0x128] sm:$0xff] }
  0x30   :  { %4624 = vst [vmem:[#allocation42_spill] sm:$0xff] %v2839_v44  ;;  %366 = vmatpush.msra.mxu3 %v2858_v51  ;;  %290 = vmatpush.msra.mxu2 %v2895_v63 }
  0x31   :  { %4625 = vst [vmem:[#allocation43_spill] sm:$0xff] %v2843_v46  ;;  %254 = vmatpush.msra.mxu0 %v2867_v54  ;;  %273 = vmatpush.msra.mxu1 %v2875_v56 }
  0x32   :  { %4626 = vst [vmem:[#allocation44_spill] sm:$0xff] %v2846_v47  ;;  %367 = vmatpush.msra.mxu3 %v2870_v55  ;;  %255 = vmatmul.f32.vlgmr.msra.gmra.mxu0 %v4362_v60  ;;  %v2905_v47 = vld [vmem:[#allocation3 + $0x58] sm:$0xff] }
  0x33   :  { %4627 = vst [vmem:[#allocation45_spill] sm:$0xff] %v2851_v48  ;;  %372 = vmatpush.msrb.mxu0 %v2877_v57  ;;  %368 = vmatmul.f32.vlgmr.msra.gmra.mxu3 %v4362_v60 }
  0x34   :  { %4628 = vst [vmem:[#allocation46_spill] sm:$0xff] %v2855_v50  ;;  %274 = vmatpush.msra.mxu1 %v2880_v58  ;;  %291 = vmatpush.msra.mxu2 %v2905_v47 }
  0x35   :  { %4629 = vst [vmem:[#allocation47_spill] sm:$0xff] %v2858_v51  ;;  %v2897_v51 = vld [vmem:[#allocation5 + $0x140] sm:$0xff]  ;;  %373 = vmatpush.msrb.mxu0 %v2888_v61  ;;  %275 = vmatmul.f32.vlgmr.msra.gmra.mxu1 %v4362_v60  ;;  %v2925_v60 = vld [vmem:[#allocation3 + $0x28] sm:$0xff] }
  0x36   :  { %4630 = vst [vmem:[#allocation48_spill] sm:$0xff] %v2863_v52  ;;  %392 = vmatpush.msrb.mxu1 %v2891_v62  ;;  %486 = vmatpush.msrb.mxu3 %v2723_v5  ;;  %v2937_v5 = vld [vmem:[#allocation5 + $0xe0] sm:$0xff] }
  0x37   :  { %4631 = vst [vmem:[#allocation49_spill] sm:$0xff] %v2865_v53  ;;  %374 = vmatpush.msrb.mxu0 %v2897_v51  ;;  %292 = vmatpush.msra.mxu2 %v2915_v35 }
  0x38   :  { %4632 = vst [vmem:[#allocation50_spill] sm:$0xff] %v2867_v54  ;;  %487 = vmatpush.msrb.mxu3 %v2729_v7  ;;  %v2947_v7 = vld [vmem:[#allocation5 + $0xe8] sm:$0xff] }
  0x39   :  { %4633 = vst [vmem:[#allocation51_spill] sm:$0xff] %v2870_v55  ;;  %v2900_v55 = vld [vmem:[#allocation5 + $0x160] sm:$0xff]  ;;  %375 = vmatpush.msrb.mxu0 %v2907_v43  ;;  %293 = vmatpush.msra.mxu2 %v2925_v60 }
  0x3a   :  { %4634 = vst [vmem:[#allocation52_spill] sm:$0xff] %v2875_v56  ;;  %393 = vmatpush.msrb.mxu1 %v2900_v55  ;;  %488 = vmatpush.msrb.mxu3 %v2738_v10  ;;  %v4654_v10 = vmov 0.0  }
  0x3b   :  { %4635 = vst [vmem:[#allocation53_spill] sm:$0xff] %v2880_v58  ;;  %376 = vmatpush.msrb.mxu0 %v2917_v31 }
  0x3c   :  { %4636 = vst [vmem:[#allocation54_spill] sm:$0xff] %v2885_v59  ;;  %394 = vmatpush.msrb.mxu1 %v2910_v39  ;;  %v2929_v59 = vld [vmem:[#allocation5 + $0x118] sm:$0xff]  ;;  %489 = vmatpush.msrb.mxu3 %v2747_v13  ;;  %v2969_v13 = vld [vmem:[#allocation5 + $0x80] sm:$0xff] }
  0x3d   :  { %4637 = vst [vmem:[#allocation55_spill] sm:$0xff] %v2891_v62 }
  0x3e   :  { %4638 = vst [vmem:[#allocation56_spill] sm:$0xff] %v2895_v63  ;;  %v2927_v63 = vld [vmem:[#allocation5 + $0xf8] sm:$0xff]  ;;  %395 = vmatpush.msrb.mxu1 %v2919_v27  ;;  %490 = vmatpush.msrb.mxu3 %v2756_v16  ;;  %v2977_v16 = vld [vmem:[#allocation5 + $0x68] sm:$0xff] }
  0x3f   :  { %4639 = vst [vmem:[#allocation57_spill] sm:$0xff] %v2900_v55  ;;  %377 = vmatpush.msrb.mxu0 %v2927_v63 }
  0x40   :  { %4640 = vst [vmem:[#allocation58_spill] sm:$0xff] %v2905_v47  ;;  %v2935_v47 = vld [vmem:[#allocation3 + $0x10] sm:$0xff]  ;;  %396 = vmatpush.msrb.mxu1 %v2929_v59  ;;  %491 = vmatpush.msrb.mxu3 %v2767_v20 }
  0x41   :  { %4641 = vst [vmem:[#allocation59_spill] sm:$0xff] %v2907_v43  ;;  %v2939_v43 = vld [vmem:[#allocation5 + $0x100] sm:$0xff]  ;;  %294 = vmatpush.msra.mxu2 %v2935_v47  ;;  %378 = vmatpush.msrb.mxu0 %v2937_v5  ;;  %v2985_v20 = vld [vmem:[#allocation5 + $0x50] sm:$0xff] }
  0x42   :  { %4642 = vst [vmem:[#allocation60_spill] sm:$0xff] %v2910_v39  ;;  %397 = vmatpush.msrb.mxu1 %v2939_v43  ;;  %295 = vmatmul.f32.vlgmr.msra.gmra.mxu2 %v4654_v10 }
  0x43   :  { %4643 = vst [vmem:[#allocation61_spill] sm:$0xff] %v2915_v35  ;;  %v2945_v35 = vld [vmem:[#allocation5 + $0xc8] sm:$0xff]  ;;  %466 = vmatpush.msrb.mxu2 %v2711_v0  ;;  %492 = vmatpush.msrb.mxu3 %v2779_v24  ;;  %v2993_v24 = vld [vmem:[#allocation5 + $0x38] sm:$0xff] }
  0x44   :  { %4644 = vst [vmem:[#allocation62_spill] sm:$0xff] %v2917_v31  ;;  %v2953_v31 = vld [vmem:[#allocation5 + $0xb0] sm:$0xff]  ;;  %379 = vmatpush.msrb.mxu0 %v2945_v35  ;;  %398 = vmatpush.msrb.mxu1 %v2947_v7  ;;  %v2979_v0 = vld [vmem:[#allocation5 + $0x88] sm:$0xff] }
  0x45   :  { %4645 = vst [vmem:[#allocation63_spill] sm:$0xff] %v2919_v27  ;;  %467 = vmatpush.msrb.mxu2 %v2713_v1  ;;  %493 = vmatpush.msrb.mxu3 %v2791_v28  ;;  %v2987_v1 = vld [vmem:[#allocation5 + $0x70] sm:$0xff]  ;;  %v3001_v28 = vld [vmem:[#allocation5 + $0x20] sm:$0xff] }
  0x46   :  { %4646 = vst [vmem:[#allocation64_spill] sm:$0xff] %v2925_v60  ;;  %v2955_v60 = vld [vmem:[#allocation5 + $0xd0] sm:$0xff]  ;;  %380 = vmatpush.msrb.mxu0 %v2953_v31 }
  0x47   :  { %4647 = vst [vmem:[#allocation65_spill] sm:$0xff] %v2927_v63  ;;  %v2961_v63 = vld [vmem:[#allocation5 + $0x98] sm:$0xff]  ;;  %399 = vmatpush.msrb.mxu1 %v2955_v60  ;;  %468 = vmatpush.msrb.mxu2 %v2721_v4 }
  0x48   :  { %4648 = vst [vmem:[#allocation66_spill] sm:$0xff] %v2929_v59  ;;  %381 = vmatpush.msrb.mxu0 %v2961_v63  ;;  %494 = vmatpush.msrb.mxu3 %v2803_v32  ;;  %v2995_v4 = vld [vmem:[#allocation5 + $0x58] sm:$0xff]  ;;  %v3009_v32 = vld [vmem:[#allocation5 + $0x8] sm:$0xff] }
  0x49   :  { %4649 = vst [vmem:[#allocation67_spill] sm:$0xff] %v2935_v47  ;;  %v2963_v47 = vld [vmem:[#allocation5 + $0xb8] sm:$0xff]  ;;  %469 = vmatpush.msrb.mxu2 %v2731_v8  ;;  %v3003_v8 = vld [vmem:[#allocation5 + $0x40] sm:$0xff] }
  0x4a   :  { %4650 = vst [vmem:[#allocation68_spill] sm:$0xff] %v2937_v5  ;;  %v2971_v5 = vld [vmem:[#allocation5 + $0xa0] sm:$0xff]  ;;  %400 = vmatpush.msrb.mxu1 %v2963_v47  ;;  %382 = vmatpush.msrb.mxu0 %v2969_v13 }
  0x4b   :  { %4651 = vst [vmem:[#allocation69_spill] sm:$0xff] %v2939_v43  ;;  %470 = vmatpush.msrb.mxu2 %v2740_v11  ;;  %495 = vmatpush.msrb.mxu3 %v2815_v36  ;;  %v3011_v11 = vld [vmem:[#allocation5 + $0x28] sm:$0xff]  ;;  %v3017_v36 = vld [vmem:[#allocation5 + $0x10] sm:$0xff] }
  0x4c   :  { %4652 = vst [vmem:[#allocation70_spill] sm:$0xff] %v2947_v7  ;;  %401 = vmatpush.msrb.mxu1 %v2971_v5  ;;  %383 = vmatpush.msrb.mxu0 %v2977_v16 }
  0x4d   :  { %4653 = vst [vmem:[#allocation71_spill] sm:$0xff] %v2955_v60  ;;  %471 = vmatpush.msrb.mxu2 %v2749_v14  ;;  %496 = vmatpush.msrb.mxu3 %v2827_v40 }
  0x4e   :  { %4655 = vst [vmem:[#allocation72_spill] sm:$0xff] %v2963_v47  ;;  %402 = vmatpush.msrb.mxu1 %v2979_v0  ;;  %384 = vmatpush.msrb.mxu0 %v2985_v20 }
  0x4f   :  { %4656 = vst [vmem:[#allocation73_spill] sm:$0xff] %v2971_v5  ;;  %472 = vmatpush.msrb.mxu2 %v2758_v17  ;;  %497 = vmatpush.msrb.mxu3 %v2839_v44 }
  0x50   :  { %4657 = vst [vmem:[#allocation74_spill] sm:$0xff] %v2979_v0  ;;  %403 = vmatpush.msrb.mxu1 %v2987_v1  ;;  %385 = vmatpush.msrb.mxu0 %v2993_v24 }
  0x51   :  { %4658 = vst [vmem:[#allocation75_spill] sm:$0xff] %v2987_v1  ;;  %473 = vmatpush.msrb.mxu2 %v2771_v22  ;;  %498 = vmatpush.msrb.mxu3 %v2851_v48 }
  0x52   :  { %4659 = vst [vmem:[#allocation76_spill] sm:$0xff] %v2995_v4  ;;  %404 = vmatpush.msrb.mxu1 %v2995_v4  ;;  %386 = vmatpush.msrb.mxu0 %v3001_v28 }
  0x53   :  { %4660 = vst [vmem:[#allocation77_spill] sm:$0xff] %v3003_v8  ;;  %474 = vmatpush.msrb.mxu2 %v2783_v26  ;;  %499 = vmatpush.msrb.mxu3 %v2863_v52 }
  0x54   :  { %4661 = vst [vmem:[#allocation78_spill] sm:$0xff] %v3011_v11  ;;  %405 = vmatpush.msrb.mxu1 %v3003_v8  ;;  %387 = vmatpush.msrb.mxu0 %v3009_v32 }
  0x55   :  { %4662 = vst [vmem:[#allocation79_spill] sm:$0xff] %v3017_v36  ;;  %388 = vmatmul.f32.vlgmr.msrb.gmra.mxu0 %v4654_v10  ;;  %475 = vmatpush.msrb.mxu2 %v2795_v30 }
  0x56   :  { %406 = vmatpush.msrb.mxu1 %v3011_v11  ;;  %506 = vmatpush.msra.mxu0 %v2763_v19 }
  0x57   :  { %476 = vmatpush.msrb.mxu2 %v2807_v34  ;;  %500 = vmatpush.msrb.mxu3 %v2875_v56 }
  0x58   :  { %407 = vmatpush.msrb.mxu1 %v3017_v36  ;;  %507 = vmatpush.msra.mxu0 %v2769_v21 }
  0x59   :  { %408 = vmatmul.f32.vlgmr.msrb.gmra.mxu1 %v4654_v10  ;;  %477 = vmatpush.msrb.mxu2 %v2819_v38  ;;  %v4663_v10 = vld [vmem:[#allocation54_spill] sm:$0xff] }
  0x5a   :  { %580 = vmatpush.msra.mxu1 %v2715_v2  ;;  %508 = vmatpush.msra.mxu0 %v2781_v25 }
  0x5b   :  { %501 = vmatpush.msrb.mxu3 %v2880_v58  ;;  %478 = vmatpush.msrb.mxu2 %v2831_v42 }
  0x5c   :  { %581 = vmatpush.msra.mxu1 %v2719_v3  ;;  %509 = vmatpush.msra.mxu0 %v2793_v29 }
  0x5d   :  { %620 = vmatpush.msra.mxu3 %v2891_v62  ;;  %479 = vmatpush.msrb.mxu2 %v2843_v46  ;;  %v4669_v62 = vld [vmem:[#allocation58_spill] sm:$0xff] }
  0x5e   :  { %510 = vmatpush.msra.mxu0 %v2805_v33  ;;  %582 = vmatpush.msra.mxu1 %v2725_v6 }
  0x5f   :  { %621 = vmatpush.msra.mxu3 %v2900_v55  ;;  %480 = vmatpush.msrb.mxu2 %v2855_v50  ;;  %v4668_v55 = vld [vmem:[#allocation32_spill] sm:$0xff] }
  0x60   :  { %511 = vmatpush.msra.mxu0 %v2817_v37  ;;  %583 = vmatpush.msra.mxu1 %v2734_v9 }
  0x61   :  { %622 = vmatpush.msra.mxu3 %v2910_v39  ;;  %481 = vmatpush.msrb.mxu2 %v2867_v54  ;;  %v4666_v39 = vld [vmem:[#allocation56_spill] sm:$0xff] }
  0x62   :  { %512 = vmatpush.msra.mxu0 %v2829_v41  ;;  %584 = vmatpush.msra.mxu1 %v2743_v12 }
  0x63   :  { %623 = vmatpush.msra.mxu3 %v2919_v27  ;;  %600 = vmatpush.msra.mxu2 %v2877_v57  ;;  %v4665_v27 = vld [vmem:[#allocation29_spill] sm:$0xff] }
  0x64   :  { %513 = vmatpush.msra.mxu0 %v2841_v45  ;;  %585 = vmatpush.msra.mxu1 %v2752_v15 }
  0x65   :  { %624 = vmatpush.msra.mxu3 %v2929_v59  ;;  %601 = vmatpush.msra.mxu2 %v2888_v61  ;;  %v4664_v59 = vld [vmem:[#allocation59_spill] sm:$0xff] }
  0x66   :  { %514 = vmatpush.msra.mxu0 %v2853_v49  ;;  %586 = vmatpush.msra.mxu1 %v2761_v18 }
  0x67   :  { %625 = vmatpush.msra.mxu3 %v2939_v43  ;;  %602 = vmatpush.msra.mxu2 %v2897_v51  ;;  %v4667_v43 = vld [vmem:[#allocation62_spill] sm:$0xff] }
  0x68   :  { %515 = vmatpush.msra.mxu0 %v2865_v53  ;;  %587 = vmatpush.msra.mxu1 %v2774_v23  ;;  %v4672_v53 = vld [vmem:[#allocation61_spill] sm:$0xff] }
  0x69   :  { %626 = vmatpush.msra.mxu3 %v2947_v7  ;;  %603 = vmatpush.msra.mxu2 %v4664_v59  ;;  %v4670_v7 = vld [vmem:[#allocation65_spill] sm:$0xff] }
  0x6a   :  { %516 = vmatpush.msra.mxu0 %v4663_v10  ;;  %588 = vmatpush.msra.mxu1 %v4665_v27  ;;  %v4671_v10 = vld [vmem:[#allocation35_spill] sm:$0xff]  ;;  %v4675_v27 = vld [vmem:[#allocation64_spill] sm:$0xff] }
  0x6b   :  { %627 = vmatpush.msra.mxu3 %v2955_v60  ;;  %604 = vmatpush.msra.mxu2 %v4667_v43  ;;  %v4673_v60 = vld [vmem:[#allocation68_spill] sm:$0xff] }
  0x6c   :  { %517 = vmatpush.msra.mxu0 %v4666_v39  ;;  %589 = vmatpush.msra.mxu1 %v4668_v55  ;;  %v4674_v39 = vld [vmem:[#allocation38_spill] sm:$0xff] }
  0x6d   :  { %628 = vmatpush.msra.mxu3 %v2963_v47  ;;  %605 = vmatpush.msra.mxu2 %v4670_v7  ;;  %v4676_v47 = vld [vmem:[#allocation41_spill] sm:$0xff] }
  0x6e   :  { %518 = vmatpush.msra.mxu0 %v4669_v62  ;;  %590 = vmatpush.msra.mxu1 %v4671_v10  ;;  %v4677_v62 = vld [vmem:[#allocation67_spill] sm:$0xff] }
  0x6f   :  { %629 = vmatpush.msra.mxu3 %v2971_v5  ;;  %606 = vmatpush.msra.mxu2 %v4673_v60  ;;  %v4678_v5 = vld [vmem:[#allocation44_spill] sm:$0xff] }
  0x70   :  { %519 = vmatpush.msra.mxu0 %v4672_v53  ;;  %591 = vmatpush.msra.mxu1 %v4674_v39 }
  0x71   :  { %630 = vmatpush.msra.mxu3 %v2979_v0  ;;  %607 = vmatpush.msra.mxu2 %v2945_v35  ;;  %v4679_v0 = vld [vmem:[#allocation13_spill] sm:$0xff] }
  0x72   :  { %520 = vmatpush.msra.mxu0 %v4675_v27  ;;  %592 = vmatpush.msra.mxu1 %v4676_v47  ;;  %v4680_v27 = vld [vmem:[#allocation47_spill] sm:$0xff] }
  0x73   :  { %631 = vmatpush.msra.mxu3 %v2987_v1  ;;  %608 = vmatpush.msra.mxu2 %v2953_v31  ;;  %v4681_v1 = vld [vmem:[#allocation14_spill] sm:$0xff] }
  0x74   :  { %521 = vmatpush.msra.mxu0 %v4677_v62  ;;  %593 = vmatpush.msra.mxu1 %v4678_v5  ;;  %v4682_v62 = vld [vmem:[#allocation51_spill] sm:$0xff] }
  0x75   :  { %632 = vmatpush.msra.mxu3 %v2995_v4  ;;  %609 = vmatpush.msra.mxu2 %v2961_v63  ;;  %v4683_v4 = vld [vmem:[#allocation16_spill] sm:$0xff]  ;;  %v4684_v5 = vld [vmem:[#allocation15_spill] sm:$0xff] }
  0x76   :  { %694 = vmatpush.msrb.mxu0 %v4679_v0  ;;  %594 = vmatpush.msra.mxu1 %v4680_v27  ;;  %v4686_v0 = vld [vmem:[#allocation18_spill] sm:$0xff] }
  0x77   :  { %633 = vmatpush.msra.mxu3 %v3003_v8  ;;  %610 = vmatpush.msra.mxu2 %v2969_v13  ;;  %v4685_v8 = vld [vmem:[#allocation17_spill] sm:$0xff] }
  0x78   :  { %695 = vmatpush.msrb.mxu0 %v4681_v1  ;;  %595 = vmatpush.msra.mxu1 %v4682_v62  ;;  %v4687_v1 = vld [vmem:[#allocation19_spill] sm:$0xff]  ;;  %v4689_v62 = vld [vmem:[#allocation21_spill] sm:$0xff] }
  0x79   :  { %634 = vmatpush.msra.mxu3 %v3011_v11  ;;  %611 = vmatpush.msra.mxu2 %v2977_v16  ;;  %v4688_v11 = vld [vmem:[#allocation20_spill] sm:$0xff] }
  0x7a   :  { %714 = vmatpush.msrb.mxu1 %v4683_v4  ;;  %696 = vmatpush.msrb.mxu0 %v4684_v5  ;;  %v4691_v5 = vld [vmem:[#allocation25_spill] sm:$0xff] }
  0x7b   :  { %635 = vmatpush.msra.mxu3 %v3017_v36  ;;  %612 = vmatpush.msra.mxu2 %v2985_v20  ;;  %v4690_v36 = vld [vmem:[#allocation23_spill] sm:$0xff] }
  0x7c   :  { %715 = vmatpush.msrb.mxu1 %v4685_v8  ;;  %697 = vmatpush.msrb.mxu0 %v4686_v0  ;;  %v4692_v0 = vld [vmem:[#allocation27_spill] sm:$0xff] }
  0x7d   :  { %613 = vmatpush.msra.mxu2 %v2993_v24 }
  0x7e   :  { %716 = vmatpush.msrb.mxu1 %v4687_v1  ;;  %698 = vmatpush.msrb.mxu0 %v4688_v11  ;;  %v4693_v11 = vld [vmem:[#allocation30_spill] sm:$0xff] }
  0x7f   :  { %614 = vmatpush.msra.mxu2 %v3001_v28 }
  0x80   :  { %717 = vmatpush.msrb.mxu1 %v4689_v62  ;;  %699 = vmatpush.msrb.mxu0 %v2749_v14  ;;  %v4694_v62 = vld [vmem:[#allocation33_spill] sm:$0xff]  ;;  %v4695_v14 = vld [vmem:[#allocation36_spill] sm:$0xff] }
  0x81   :  { %615 = vmatpush.msra.mxu2 %v3009_v32 }
  0x82   :  { %718 = vmatpush.msrb.mxu1 %v4690_v36  ;;  %700 = vmatpush.msrb.mxu0 %v2758_v17 }
  0x84   :  { %719 = vmatpush.msrb.mxu1 %v4691_v5  ;;  %701 = vmatpush.msrb.mxu0 %v2771_v22 }
  0x86   :  { %720 = vmatpush.msrb.mxu1 %v4692_v0  ;;  %702 = vmatpush.msrb.mxu0 %v2783_v26  ;;  %v3145_v26 = vld [vmem:[#allocation7] ss:$0 sm:$0xff] }
  0x87   :  { %4696 = vst [vmem:[#allocation59_spill] sm:$0xff] %v3145_v26 }
  0x88   :  { %721 = vmatpush.msrb.mxu1 %v4693_v11  ;;  %703 = vmatpush.msrb.mxu0 %v2795_v30 }
  0x8a   :  { %722 = vmatpush.msrb.mxu1 %v4694_v62  ;;  %704 = vmatpush.msrb.mxu0 %v2807_v34 }
  0x8c   :  { %723 = vmatpush.msrb.mxu1 %v4695_v14  ;;  %705 = vmatpush.msrb.mxu0 %v2819_v38 }
  0x8e   :  { %724 = vmatpush.msrb.mxu1 %v2827_v40  ;;  %706 = vmatpush.msrb.mxu0 %v2831_v42  ;;  %v236_v42 = vld [vmem:[%s4338_s0] sm:$0xff] }
  0x90   :  { %725 = vmatpush.msrb.mxu1 %v2839_v44  ;;  %707 = vmatpush.msrb.mxu0 %v2843_v46  ;;  %v237_v46 = vld [vmem:[%s4338_s0 + $0x8] sm:$0xff] }
  0x92   :  { %726 = vmatpush.msrb.mxu1 %v2851_v48  ;;  %708 = vmatpush.msrb.mxu0 %v2855_v50 }
  0x94   :  { %727 = vmatpush.msrb.mxu1 %v2863_v52  ;;  %709 = vmatpush.msrb.mxu0 %v2867_v54  ;;  %v2099_v54 = vld [vmem:[%s4339_s1 + $0xa8] sm:$0xff] }
  0x96   :  { %728 = vmatpush.msrb.mxu1 %v2875_v56 }
  0x98   :  { %729 = vmatpush.msrb.mxu1 %v2880_v58 }
  0xaf   :  { %v256_v38 = vpop.f32.mrf.mxu0 }
  0xb0   :  { %v299_v44 = vadd.f32 %v256_v38, %v236_v42 }
  0xb2   :  { %v2097_v48 = vmul.f32 -1.442695, %v299_v44  ;;  %v276_v50 = vpop.f32.mrf.mxu1 }
  0xb3   :  { %v319_v52 = vadd.f32 %v276_v50, %v237_v46 }
  0xb4   :  { %2194 = vpow2.f32 %v2097_v48 }
  0xb5   :  { %v2098_v56 = vmul.f32 -1.442695, %v319_v52 }
  0xb6   :  { %v369_v58 = vpop.f32.mrf.mxu3 }
  0xb7   :  { %v412_v40 = vadd.f32 %v2099_v54, %v369_v58  ;;  %2196 = vpow2.f32 %v2098_v56 }
  0xb9   :  { %v2102_v34 = vmul.f32 -1.442695, %v412_v40 }
  0xba   :  { %v2195_v14 = vpop.eup %2194 }
  0xbb   :  { %v303_v30 = vadd.f32 1.0, %v2195_v14  ;;  %2198 = vpow2.f32 %v2102_v34 }
  0xbd   :  { %2200 = vrcp.f32 %v303_v30  ;;  %v2197_v38 = vpop.eup %2196  ;;  %v313_v50 = vand.u32 2147483647, %v303_v30  ;;  %v315_v52 = vand.u32 2147483648, %v303_v30  ;;  %vm309_vm0 = vweird.f32 %v303_v30 }
  0xbe   :  { %v323_v42 = vadd.f32 1.0, %v2197_v38 }
  0xbf   :  { %vm314_vm4 = vcmp.eq.f32.partialorder %v313_v50, 8.507059e+37  ;;  %v2100_v50 = vld [vmem:[%s4339_s1 + $0xb0] sm:$0xff] }
  0xc0   :  { %2202 = vrcp.f32 %v323_v42  ;;  %vm329_vm2 = vweird.f32 %v323_v42  ;;  %v335_v58 = vand.u32 2147483648, %v323_v42  ;;  %v333_v17 = vand.u32 2147483647, %v323_v42 }
  0xc1   :  { %v2199_v62 = vpop.eup %2198 }
  0xc2   :  { %v3142_v44 = vadd.f32 1.0, %v2199_v62  ;;  %v316_v62 = vor.u32 1.1754944e-38, %v315_v52  ;;  %vm334_vm7 = vcmp.eq.f32.partialorder %v333_v17, 8.507059e+37 }
  0xc3   :  { %v2201_v46 = vpop.eup %2200 }
  0xc4   :  { %2204 = vrcp.f32 %v3142_v44  ;;  %v305_v48 = vmul.f32 %v2201_v46, %v303_v30  ;;  %vm310_vm1 = vweird.f32 %v2201_v46  ;;  %vm422_vm8 = vweird.f32 %v3142_v44 }
  0xc5   :  { %v296_v34 = vpop.f32.mrf.mxu2  ;;  %vm311_vm3 = vmor %vm309_vm0, %vm310_vm1 }
  0xc6   :  { %v306_v54 = vsub.f32 1.0, %v305_v48  ;;  %v2203_v14 = vpop.eup %2202  ;;  %v339_v0 = vadd.f32 %v3145_v26, %v296_v34 }
  0xc7   :  { %v325_v40 = vmul.f32 %v2203_v14, %v323_v42  ;;  %vm330_vm5 = vweird.f32 %v2203_v14 }
  0xc8   :  { %v307_v56 = vmul.f32 %v2201_v46, %v306_v54  ;;  %vm331_vm6 = vmor %vm329_vm2, %vm330_vm5  ;;  %v238_v54 = vld [vmem:[%s4338_s0 + $0x10] sm:$0xff] }
  0xc9   :  { %v326_v11 = vsub.f32 1.0, %v325_v40  ;;  %v336_v40 = vor.u32 1.1754944e-38, %v335_v58 }
  0xca   :  { %v2205_v38 = vpop.eup %2204  ;;  %v308_v22 = vadd.f32 %v2201_v46, %v307_v56 }
  0xcb   :  { %v418_v48 = vmul.f32 %v2205_v38, %v3142_v44  ;;  %v327_v30 = vmul.f32 %v2203_v14, %v326_v11  ;;  %vm423_vm9 = vweird.f32 %v2205_v38 }
  0xcc   :  { %v312_v5 = vsel %vm311_vm3, %v2201_v46, %v308_v22  ;;  %vm3158_vm10 = vmor %vm422_vm8, %vm423_vm9 }
  0xcd   :  { %v317_v36 = vsel %vm314_vm4, %v316_v62, %v312_v5  ;;  %v328_v52 = vadd.f32 %v2203_v14, %v327_v30  ;;  %v419_v42 = vsub.f32 1.0, %v418_v48  ;;  %v428_v5 = vand.u32 2147483648, %v3142_v44 }
  0xce   :  { %v340_v56 = vmul.f32 %v339_v0, %v317_v36  ;;  %v426_v0 = vand.u32 2147483647, %v3142_v44 }
  0xcf   :  { %v332_v26 = vsel %vm331_vm6, %v2203_v14, %v328_v52  ;;  %v420_v8 = vmul.f32 %v2205_v38, %v419_v42  ;;  %v429_v30 = vor.u32 1.1754944e-38, %v428_v5  ;;  %v2101_v52 = vld [vmem:[%s4339_s1 + $0xb8] sm:$0xff]  ;;  %v4724_v42 = vld [vmem:[#allocation21_spill] sm:$0xff]  ;;  %v4728_v5 = vld [vmem:[#allocation74_spill] sm:$0xff] }
  0xd0   :  { %v341_v1 = vadd.f32 %v340_v56, %v238_v54  ;;  %v337_v22 = vsel %vm334_vm7, %v336_v40, %v332_v26  ;;  %vm427_vm11 = vcmp.eq.f32.partialorder %v426_v0, 8.507059e+37  ;;  %v4722_v56 = vld [vmem:[#allocation72_spill] sm:$0xff]  ;;  %v4730_v0 = vld [vmem:[#allocation25_spill] sm:$0xff]  ;;  %v4733_v14 = vld [vmem:[#allocation27_spill] sm:$0xff] }
  0xd1   :  { %v343_v4 = vsub.f32 1.0, %v337_v22  ;;  %v421_v62 = vadd.f32 %v2205_v38, %v420_v8  ;;  %v345_v17 = vmul.f32 0.0, %v337_v22  ;;  %v4726_v22 = vld [vmem:[#allocation20_spill] sm:$0xff] }
  0xd2   :  { %v389_v34 = vpop.f32.mrf.mxu0  ;;  %2206 = vtanh.f32 %v341_v1  ;;  %v3162_v1 = vld [vmem:[#allocation8] ss:$0 sm:$0xff] }
  0xd3   :  { %v432_v11 = vadd.f32 %v2100_v50, %v389_v34  ;;  %v425_v50 = vsel %vm3158_vm10, %v2205_v38, %v421_v62  ;;  %v4723_v34 = vld [vmem:[#allocation18_spill] sm:$0xff] }
  0xd4   :  { %v4729_v62 = vld [vmem:[#allocation22_spill] sm:$0xff] }
  0xd5   :  { %v2103_v46 = vmul.f32 -1.442695, %v432_v11  ;;  %v4725_v11 = vld [vmem:[#allocation73_spill] sm:$0xff] }
  0xd6   :  { %v409_v48 = vpop.f32.mrf.mxu1 }
  0xd7   :  { %2208 = vpow2.f32 %v2103_v46  ;;  %v452_v44 = vadd.f32 %v3162_v1, %v409_v48  ;;  %v4727_v46 = vld [vmem:[#allocation23_spill] sm:$0xff]  ;;  %v4736_v48 = vld [vmem:[#allocation30_spill] sm:$0xff] }
  0xd8   :  { %v2207_v36 = vpop.eup %2206 }
  0xd9   :  { %v344_v26 = vmul.f32 %v2207_v36, %v343_v4  ;;  %v430_v4 = vsel %vm427_vm11, %v429_v30, %v425_v50  ;;  %v4732_v36 = vld [vmem:[#allocation24_spill] sm:$0xff]  ;;  %v4737_v30 = vld [vmem:[#allocation77_spill] sm:$0xff] }
  0xda   :  { %v453_v38 = vmul.f32 %v452_v44, %v430_v4  ;;  %v4739_v50 = vld [vmem:[#allocation33_spill] sm:$0xff]  ;;  %v4740_v44 = vld [vmem:[#allocation78_spill] sm:$0xff]  ;;  %v4741_v4 = vld [vmem:[#allocation31_spill] sm:$0xff] }
  0xdb   :  { %v3166_v8 = vadd.f32 %v345_v17, %v344_v26  ;;  %v4731_v17 = vld [vmem:[#allocation75_spill] sm:$0xff]  ;;  %v4734_v26 = vld [vmem:[#allocation76_spill] sm:$0xff] }
  0xdd   :  { %v2209_v58 = vpop.eup %2208  ;;  %347 = vst [vmem:[%s4344_s6] sm:$0xff] %v3166_v8  ;;  %482 = vmatmul.f32.vlgmr.msrb.gmra.mxu2 %v3166_v8  ;;  %502 = vmatmul.f32.vlgmr.msrb.gmra.mxu3 %v3166_v8 }
  0xde   :  { %v436_v54 = vadd.f32 1.0, %v2209_v58  ;;  %522 = vmatmul.f32.vlgmr.msra.gmra.mxu0 %v3166_v8  ;;  %734 = vmatpush.msrb.mxu2 %v2763_v19  ;;  %v454_v19 = vadd.f32 %v2101_v52, %v453_v38  ;;  %v4735_v58 = vld [vmem:[#allocation26_spill] sm:$0xff]  ;;  %v4742_v38 = vld [vmem:[#allocation36_spill] sm:$0xff]  ;;  %v4743_v52 = vld [vmem:[#allocation79_spill] sm:$0xff] }
  0xdf   :  { %808 = vmatpush.msrb.mxu3 %v2715_v2  ;;  %828 = vmatpush.msra.mxu0 %v2877_v57  ;;  %v4708_v57 = vld [vmem:[#allocation63_spill] sm:$0xff] }
  0xe0   :  { %2210 = vrcp.f32 %v436_v54  ;;  %735 = vmatpush.msrb.mxu2 %v2769_v21  ;;  %v448_v21 = vand.u32 2147483648, %v436_v54  ;;  %vm442_vm13 = vweird.f32 %v436_v54 }
  0xe1   :  { %809 = vmatpush.msrb.mxu3 %v2719_v3  ;;  %829 = vmatpush.msra.mxu0 %v2888_v61  ;;  %2212 = vtanh.f32 %v454_v19  ;;  %v4717_v61 = vld [vmem:[#allocation14_spill] sm:$0xff]  ;;  %v4746_v19 = vld [vmem:[#allocation37_spill] sm:$0xff] }
  0xe2   :  { %736 = vmatpush.msrb.mxu2 %v2781_v25 }
  0xe3   :  { %810 = vmatpush.msrb.mxu3 %v2725_v6  ;;  %830 = vmatpush.msra.mxu0 %v2897_v51  ;;  %v446_v6 = vand.u32 2147483647, %v436_v54  ;;  %v4706_v51 = vld [vmem:[#allocation60_spill] sm:$0xff] }
  0xe4   :  { %737 = vmatpush.msrb.mxu2 %v2793_v29  ;;  %v449_v29 = vor.u32 1.1754944e-38, %v448_v21  ;;  %v4748_v21 = vld [vmem:[#allocation40_spill] sm:$0xff] }
  0xe5   :  { %811 = vmatpush.msrb.mxu3 %v2734_v9  ;;  %831 = vmatpush.msra.mxu0 %v4664_v59  ;;  %vm447_vm15 = vcmp.eq.f32.partialorder %v446_v6, 8.507059e+37  ;;  %v4712_v59 = vld [vmem:[#allocation51_spill] sm:$0xff] }
  0xe6   :  { %v2211_v40 = vpop.eup %2210  ;;  %738 = vmatpush.msrb.mxu2 %v2805_v33  ;;  %v4750_v6 = vld [vmem:[#allocation43_spill] sm:$0xff] }
  0xe7   :  { %v438_v2 = vmul.f32 %v2211_v40, %v436_v54  ;;  %812 = vmatpush.msrb.mxu3 %v2743_v12  ;;  %832 = vmatpush.msra.mxu0 %v4667_v43  ;;  %vm443_vm12 = vweird.f32 %v2211_v40  ;;  %v4700_v43 = vld [vmem:[#allocation49_spill] sm:$0xff]  ;;  %v4738_v54 = vld [vmem:[#allocation28_spill] sm:$0xff] }
  0xe8   :  { %739 = vmatpush.msrb.mxu2 %v2817_v37  ;;  %vm444_vm14 = vmor %vm442_vm13, %vm443_vm12  ;;  %v4699_v37 = vld [vmem:[#allocation29_spill] sm:$0xff] }
  0xe9   :  { %v439_v3 = vsub.f32 1.0, %v438_v2  ;;  %813 = vmatpush.msrb.mxu3 %v2752_v15  ;;  %833 = vmatpush.msra.mxu0 %v4670_v7  ;;  %v2213_v15 = vpop.eup %2212  ;;  %v4745_v2 = vld [vmem:[#allocation39_spill] sm:$0xff] }
  0xea   :  { %740 = vmatpush.msrb.mxu2 %v2829_v41 }
  0xeb   :  { %v440_v25 = vmul.f32 %v2211_v40, %v439_v3  ;;  %814 = vmatpush.msrb.mxu3 %v2761_v18  ;;  %834 = vmatpush.msra.mxu0 %v4673_v60  ;;  %v4715_v60 = vld [vmem:[#allocation16_spill] sm:$0xff]  ;;  %v4747_v3 = vld [vmem:[#allocation42_spill] sm:$0xff] }
  0xec   :  { %741 = vmatpush.msrb.mxu2 %v2841_v45 }
  0xed   :  { %v441_v9 = vadd.f32 %v2211_v40, %v440_v25  ;;  %815 = vmatpush.msrb.mxu3 %v2774_v23  ;;  %835 = vmatpush.msra.mxu0 %v2945_v35  ;;  %v4701_v23 = vld [vmem:[#allocation54_spill] sm:$0xff]  ;;  %v4703_v35 = vld [vmem:[#allocation56_spill] sm:$0xff]  ;;  %v4749_v25 = vld [vmem:[#allocation45_spill] sm:$0xff] }
  0xee   :  { %742 = vmatpush.msrb.mxu2 %v2853_v49  ;;  %v4704_v49 = vld [vmem:[#allocation57_spill] sm:$0xff] }
  0xef   :  { %v445_v12 = vsel %vm444_vm14, %v2211_v40, %v441_v9  ;;  %816 = vmatpush.msrb.mxu3 %v4699_v37  ;;  %836 = vmatpush.msra.mxu0 %v2953_v31  ;;  %v4702_v31 = vld [vmem:[#allocation55_spill] sm:$0xff]  ;;  %v4744_v40 = vld [vmem:[#allocation34_spill] sm:$0xff]  ;;  %v4751_v9 = vld [vmem:[#allocation48_spill] sm:$0xff] }
  0xf0   :  { %v450_v33 = vsel %vm447_vm15, %v449_v29, %v445_v12  ;;  %743 = vmatpush.msrb.mxu2 %v4700_v43  ;;  %v4752_v29 = vld [vmem:[#allocation46_spill] sm:$0xff]  ;;  %v4753_v12 = vld [vmem:[#allocation52_spill] sm:$0xff] }
  0xf1   :  { %v456_v7 = vsub.f32 1.0, %v450_v33  ;;  %v458_v41 = vmul.f32 0.0, %v450_v33  ;;  %817 = vmatpush.msrb.mxu3 %v4668_v55  ;;  %837 = vmatpush.msra.mxu0 %v2961_v63  ;;  %v4707_v55 = vld [vmem:[#allocation44_spill] sm:$0xff]  ;;  %v4719_v63 = vld [vmem:[#allocation71_spill] sm:$0xff]  ;;  %v4754_v33 = vld [vmem:[#allocation50_spill] sm:$0xff] }
  0xf2   :  { %744 = vmatpush.msrb.mxu2 %v4701_v23  ;;  %v2106_v37 = vld [vmem:[%s4338_s0 + $0x20] sm:$0xff] }
  0xf3   :  { %v457_v18 = vmul.f32 %v2213_v15, %v456_v7  ;;  %818 = vmatpush.msrb.mxu3 %v4671_v10  ;;  %838 = vmatpush.msra.mxu0 %v2969_v13  ;;  %v4705_v13 = vld [vmem:[#allocation58_spill] sm:$0xff]  ;;  %v4721_v10 = vld [vmem:[#allocation19_spill] sm:$0xff]  ;;  %v4755_v7 = vld [vmem:[#allocation53_spill] sm:$0xff] }
  0xf4   :  { %745 = vmatpush.msrb.mxu2 %v4703_v35  ;;  %v2105_v15 = vld [vmem:[%s4338_s0 + $0x18] sm:$0xff] }
  0xf5   :  { %v3209_v45 = vadd.f32 %v458_v41, %v457_v18  ;;  %819 = vmatpush.msrb.mxu3 %v4674_v39  ;;  %839 = vmatpush.msra.mxu0 %v2977_v16  ;;  %v4709_v39 = vld [vmem:[#allocation64_spill] sm:$0xff]  ;;  %v4710_v16 = vld [vmem:[#allocation66_spill] sm:$0xff] }
  0xf6   :  { %746 = vmatpush.msrb.mxu2 %v4705_v13 }
  0xf7   :  { %2104 = vst [vmem:[%s4345_s7 + $0x38] sm:$0xff] %v3209_v45  ;;  %596 = vmatmul.f32.vlgmr.msra.gmra.mxu1 %v3209_v45  ;;  %616 = vmatmul.f32.vlgmr.msra.gmra.mxu2 %v3209_v45 }
  0xf8   :  { %636 = vmatmul.f32.vlgmr.msra.gmra.mxu3 %v3209_v45  ;;  %848 = vmatpush.msra.mxu1 %v4702_v31 }
  0xf9   :  { %820 = vmatpush.msrb.mxu3 %v4676_v47  ;;  %840 = vmatpush.msra.mxu0 %v2985_v20  ;;  %v4711_v47 = vld [vmem:[#allocation67_spill] sm:$0xff]  ;;  %v4713_v20 = vld [vmem:[#allocation69_spill] sm:$0xff] }
  0xfa   :  { %849 = vmatpush.msra.mxu1 %v4704_v49  ;;  %747 = vmatpush.msrb.mxu2 %v4672_v53  ;;  %v4714_v53 = vld [vmem:[#allocation13_spill] sm:$0xff] }
  0xfb   :  { %821 = vmatpush.msrb.mxu3 %v4707_v55  ;;  %841 = vmatpush.msra.mxu0 %v2993_v24  ;;  %v4716_v24 = vld [vmem:[#allocation70_spill] sm:$0xff] }
  0xfc   :  { %850 = vmatpush.msra.mxu1 %v4706_v51  ;;  %748 = vmatpush.msrb.mxu2 %v4709_v39 }
  0xfd   :  { %822 = vmatpush.msrb.mxu3 %v4680_v27  ;;  %842 = vmatpush.msra.mxu0 %v3001_v28  ;;  %v4718_v27 = vld [vmem:[#allocation17_spill] sm:$0xff]  ;;  %v4720_v28 = vld [vmem:[#allocation15_spill] sm:$0xff] }
  0xfe   :  { %851 = vmatpush.msra.mxu1 %v4708_v57  ;;  %749 = vmatpush.msrb.mxu2 %v4711_v47  ;;  %v2111_v57 = vld [vmem:[%s4339_s1 + $0x90] sm:$0xff] }
  0xff   :  { %823 = vmatpush.msrb.mxu3 %v4712_v59  ;;  %843 = vmatpush.msra.mxu0 %v3009_v32 }
 0x100   :  { %852 = vmatpush.msra.mxu1 %v4710_v16  ;;  %922 = vmatpush.msra.mxu2 %v4714_v53 }
 0x101   :  { %942 = vmatpush.msra.mxu3 %v4715_v60  ;;  %v2112_v60 = vld [vmem:[%s4339_s1 + $0x98] sm:$0xff] }
 0x102   :  { %853 = vmatpush.msra.mxu1 %v4713_v20  ;;  %923 = vmatpush.msra.mxu2 %v4717_v61 }
 0x103   :  { %943 = vmatpush.msra.mxu3 %v4718_v27 }
 0x104   :  { %854 = vmatpush.msra.mxu1 %v4716_v24  ;;  %924 = vmatpush.msra.mxu2 %v4720_v28 }
 0x105   :  { %944 = vmatpush.msra.mxu3 %v4721_v10 }
 0x106   :  { %855 = vmatpush.msra.mxu1 %v4719_v63  ;;  %925 = vmatpush.msra.mxu2 %v4723_v34 }
 0x107   :  { %945 = vmatpush.msra.mxu3 %v4724_v42 }
 0x108   :  { %856 = vmatpush.msra.mxu1 %v4722_v56  ;;  %926 = vmatpush.msra.mxu2 %v4726_v22 }
 0x109   :  { %946 = vmatpush.msra.mxu3 %v4727_v46 }
 0x10a   :  { %857 = vmatpush.msra.mxu1 %v4725_v11  ;;  %927 = vmatpush.msra.mxu2 %v4729_v62 }
 0x10b   :  { %947 = vmatpush.msra.mxu3 %v4730_v0  ;;  %v4756_v0 = vld [vmem:[#allocation59_spill] sm:$0xff] }
 0x10c   :  { %858 = vmatpush.msra.mxu1 %v4728_v5  ;;  %928 = vmatpush.msra.mxu2 %v4732_v36 }
 0x10d   :  { %948 = vmatpush.msra.mxu3 %v4733_v14 }
 0x10e   :  { %859 = vmatpush.msra.mxu1 %v4731_v17  ;;  %929 = vmatpush.msra.mxu2 %v4735_v58 }
 0x10f   :  { %949 = vmatpush.msra.mxu3 %v4736_v48  ;;  %v2107_v48 = vld [vmem:[%s4338_s0 + $0x28] sm:$0xff] }
 0x110   :  { %860 = vmatpush.msra.mxu1 %v4734_v26  ;;  %930 = vmatpush.msra.mxu2 %v4738_v54 }
 0x111   :  { %950 = vmatpush.msra.mxu3 %v4739_v50 }
 0x112   :  { %861 = vmatpush.msra.mxu1 %v4737_v30  ;;  %931 = vmatpush.msra.mxu2 %v4741_v4 }
 0x113   :  { %951 = vmatpush.msra.mxu3 %v4742_v38 }
 0x114   :  { %862 = vmatpush.msra.mxu1 %v4740_v44  ;;  %932 = vmatpush.msra.mxu2 %v4744_v40 }
 0x115   :  { %952 = vmatpush.msra.mxu3 %v4745_v2 }
 0x116   :  { %863 = vmatpush.msra.mxu1 %v4743_v52  ;;  %933 = vmatpush.msra.mxu2 %v4746_v19 }
 0x117   :  { %953 = vmatpush.msra.mxu3 %v4747_v3 }
 0x118   :  { %934 = vmatpush.msra.mxu2 %v4748_v21 }
 0x119   :  { %954 = vmatpush.msra.mxu3 %v4749_v25 }
 0x11a   :  { %935 = vmatpush.msra.mxu2 %v4750_v6 }
 0x11b   :  { %955 = vmatpush.msra.mxu3 %v4751_v9 }
 0x11c   :  { %936 = vmatpush.msra.mxu2 %v4752_v29 }
 0x11d   :  { %956 = vmatpush.msra.mxu3 %v4753_v12 }
 0x11e   :  { %937 = vmatpush.msra.mxu2 %v4754_v33 }
 0x11f   :  { %957 = vmatpush.msra.mxu3 %v4755_v7 }
 0x15b   :  { %v523_v42 = vpop.f32.mrf.mxu0 }
 0x15c   :  { %v566_v17 = vadd.f32 %v4756_v0, %v523_v42 }
 0x160   :  { %v483_v18 = vpop.f32.mrf.mxu2  ;;  %v503_v41 = vpop.f32.mrf.mxu3 }
 0x161   :  { %v526_v43 = vadd.f32 %v2105_v15, %v483_v18  ;;  %v546_v23 = vadd.f32 %v2106_v37, %v503_v41 }
 0x163   :  { %v2108_v31 = vmul.f32 -1.442695, %v526_v43  ;;  %v2109_v35 = vmul.f32 -1.442695, %v546_v23 }
 0x165   :  { %2214 = vpow2.f32 %v2108_v31 }
 0x166   :  { %2216 = vpow2.f32 %v2109_v35 }
 0x16b   :  { %v2215_v49 = vpop.eup %2214 }
 0x16c   :  { %v2217_v13 = vpop.eup %2216  ;;  %v530_v51 = vadd.f32 1.0, %v2215_v49 }
 0x16d   :  { %v550_v55 = vadd.f32 1.0, %v2217_v13 }
 0x16e   :  { %2218 = vrcp.f32 %v530_v51  ;;  %v542_v63 = vand.u32 2147483648, %v530_v51  ;;  %v540_v34 = vand.u32 2147483647, %v530_v51  ;;  %vm536_vm1 = vweird.f32 %v530_v51 }
 0x16f   :  { %2220 = vrcp.f32 %v550_v55  ;;  %v562_v54 = vand.u32 2147483648, %v550_v55  ;;  %vm556_vm5 = vweird.f32 %v550_v55  ;;  %v560_v50 = vand.u32 2147483647, %v550_v55 }
 0x170   :  { %v543_v62 = vor.u32 1.1754944e-38, %v542_v63  ;;  %vm541_vm3 = vcmp.eq.f32.partialorder %v540_v34, 8.507059e+37  ;;  %v3349_v34 = vld [vmem:[#allocation3 + $0x130] sm:$0xff] }
 0x171   :  { %v563_v52 = vor.u32 1.1754944e-38, %v562_v54  ;;  %vm561_vm7 = vcmp.eq.f32.partialorder %v560_v50, 8.507059e+37  ;;  %v3377_v54 = vld [vmem:[#allocation3 + $0xe8] sm:$0xff]  ;;  %v3380_v50 = vld [vmem:[#allocation5 + $0xd8] sm:$0xff] }
 0x174   :  { %v597_v39 = vpop.f32.mrf.mxu1  ;;  %v2219_v47 = vpop.eup %2218 }
 0x175   :  { %v640_v16 = vadd.f32 %v2111_v57, %v597_v39  ;;  %v2221_v20 = vpop.eup %2220  ;;  %v532_v53 = vmul.f32 %v2219_v47, %v530_v51  ;;  %vm537_vm0 = vweird.f32 %v2219_v47  ;;  %v3318_v51 = vld [vmem:[#allocation3 + $0x178] sm:$0xff] }
 0x176   :  { %v552_v24 = vmul.f32 %v2221_v20, %v550_v55  ;;  %vm538_vm2 = vmor %vm536_vm1, %vm537_vm0  ;;  %vm557_vm4 = vweird.f32 %v2221_v20 }
 0x177   :  { %v2114_v59 = vmul.f32 -1.442695, %v640_v16  ;;  %v533_v61 = vsub.f32 1.0, %v532_v53  ;;  %vm558_vm6 = vmor %vm556_vm5, %vm557_vm4  ;;  %v3322_v16 = vld [vmem:[#allocation5 + $0x168] sm:$0xff] }
 0x178   :  { %v553_v28 = vsub.f32 1.0, %v552_v24  ;;  %v3333_v24 = vld [vmem:[#allocation5 + $0x150] sm:$0xff] }
 0x179   :  { %2222 = vpow2.f32 %v2114_v59  ;;  %v534_v56 = vmul.f32 %v2219_v47, %v533_v61  ;;  %v3336_v61 = vld [vmem:[#allocation5 + $0x158] sm:$0xff] }
 0x17a   :  { %v617_v27 = vpop.f32.mrf.mxu2  ;;  %v554_v11 = vmul.f32 %v2221_v20, %v553_v28 }
 0x17b   :  { %v660_v10 = vadd.f32 %v2112_v60, %v617_v27  ;;  %v535_v46 = vadd.f32 %v2219_v47, %v534_v56  ;;  %v637_v37 = vpop.f32.mrf.mxu3  ;;  %v3340_v27 = vld [vmem:[#allocation3 + $0x148] sm:$0xff]  ;;  %v3346_v56 = vld [vmem:[#allocation5 + $0x140] sm:$0xff] }
 0x17c   :  { %v555_v58 = vadd.f32 %v2221_v20, %v554_v11  ;;  %v680_v49 = vadd.f32 %v3162_v1, %v637_v37  ;;  %v3352_v11 = vld [vmem:[#allocation5 + $0x120] sm:$0xff]  ;;  %v3443_v37 = vld [vmem:[#allocation5 + $0x130] sm:$0xff] }
 0x17d   :  { %v2115_v22 = vmul.f32 -1.442695, %v660_v10  ;;  %v539_v36 = vsel %vm538_vm2, %v2219_v47, %v535_v46  ;;  %v3325_v47 = vld [vmem:[#allocation5 + $0x170] sm:$0xff]  ;;  %v3343_v10 = vld [vmem:[#allocation5 + $0x138] sm:$0xff]  ;;  %4758 = vst [vmem:[#allocation32_spill] sm:$0xff] %v3443_v37 }
 0x17e   :  { %v544_v26 = vsel %vm541_vm3, %v543_v62, %v539_v36  ;;  %v559_v38 = vsel %vm558_vm6, %v2221_v20, %v555_v58  ;;  %v3329_v20 = vld [vmem:[#allocation3 + $0x160] sm:$0xff]  ;;  %v3358_v46 = vld [vmem:[#allocation3 + $0x118] sm:$0xff]  ;;  %v3364_v62 = vld [vmem:[#allocation5 + $0x110] sm:$0xff] }
 0x17f   :  { %v2223_v5 = vpop.eup %2222  ;;  %2224 = vpow2.f32 %v2115_v22  ;;  %v567_v30 = vmul.f32 %v566_v17, %v544_v26  ;;  %v564_v19 = vsel %vm561_vm7, %v563_v52, %v559_v38  ;;  %v3355_v22 = vld [vmem:[#allocation5 + $0x128] sm:$0xff]  ;;  %v3367_v36 = vld [vmem:[#allocation3 + $0x100] sm:$0xff]  ;;  %v3370_v26 = vld [vmem:[#allocation5 + $0xf0] sm:$0xff] }
 0x180   :  { %v644_v14 = vadd.f32 1.0, %v2223_v5  ;;  %v570_v25 = vsub.f32 1.0, %v564_v19  ;;  %v572_v7 = vmul.f32 %v564_v19, %v3166_v8  ;;  %v2113_v8 = vld [vmem:[%s4339_s1 + $0xa0] sm:$0xff]  ;;  %v3361_v5 = vld [vmem:[#allocation5 + $0x108] sm:$0xff]  ;;  %v3373_v58 = vld [vmem:[#allocation5 + $0xf8] sm:$0xff] }
 0x181   :  { %v568_v44 = vadd.f32 %v2107_v48, %v567_v30  ;;  %v3388_v38 = vld [vmem:[#allocation3 + $0xd0] sm:$0xff]  ;;  %v3391_v52 = vld [vmem:[#allocation5 + $0xc0] sm:$0xff]  ;;  %v3410_v19 = vld [vmem:[#allocation5 + $0xa8] sm:$0xff] }
 0x182   :  { %2226 = vrcp.f32 %v644_v14  ;;  %v654_v9 = vand.u32 2147483647, %v644_v14  ;;  %v656_v29 = vand.u32 2147483648, %v644_v14  ;;  %vm650_vm9 = vweird.f32 %v644_v14 }
 0x183   :  { %2228 = vtanh.f32 %v568_v44  ;;  %v3383_v44 = vld [vmem:[#allocation5 + $0xe0] sm:$0xff] }
 0x184   :  { %v657_v23 = vor.u32 1.1754944e-38, %v656_v29  ;;  %vm655_vm11 = vcmp.eq.f32.partialorder %v654_v9, 8.507059e+37  ;;  %v3425_v9 = vld [vmem:[#allocation3 + $0x88] sm:$0xff]  ;;  %v3428_v29 = vld [vmem:[#allocation5 + $0x98] sm:$0xff] }
 0x185   :  { %v2225_v4 = vpop.eup %2224 }
 0x186   :  { %v3300_v40 = vadd.f32 1.0, %v2225_v4 }
 0x188   :  { %v2227_v2 = vpop.eup %2226  ;;  %2230 = vrcp.f32 %v3300_v40  ;;  %v676_v57 = vand.u32 2147483648, %v3300_v40  ;;  %v674_v59 = vand.u32 2147483647, %v3300_v40  ;;  %vm670_vm13 = vweird.f32 %v3300_v40 }
 0x189   :  { %v646_v3 = vmul.f32 %v2227_v2, %v644_v14  ;;  %v2229_v6 = vpop.eup %2228  ;;  %vm651_vm8 = vweird.f32 %v2227_v2 }
 0x18a   :  { %v571_v33 = vmul.f32 %v2229_v6, %v570_v25  ;;  %vm652_vm10 = vmor %vm650_vm9, %vm651_vm8  ;;  %v677_v63 = vor.u32 1.1754944e-38, %v676_v57  ;;  %vm675_vm15 = vcmp.eq.f32.partialorder %v674_v59, 8.507059e+37  ;;  %v3419_v25 = vld [vmem:[#allocation5 + $0x160] sm:$0xff]  ;;  %v3422_v6 = vld [vmem:[#allocation5 + $0x90] sm:$0xff] }
 0x18b   :  { %v647_v21 = vsub.f32 1.0, %v646_v3  ;;  %v3413_v3 = vld [vmem:[#allocation3 + $0xa0] sm:$0xff]  ;;  %v3473_v57 = vld [vmem:[#allocation3 + $0x28] sm:$0xff] }
 0x18c   :  { %v3305_v43 = vadd.f32 %v572_v7, %v571_v33  ;;  %v3434_v33 = vld [vmem:[#allocation5 + $0x78] sm:$0xff]  ;;  %v3437_v7 = vld [vmem:[#allocation3 + $0x70] sm:$0xff]  ;;  %4767 = vst [vmem:[#allocation49_spill] sm:$0xff] %v3473_v57  ;;  %v3479_v59 = vld [vmem:[#allocation5 + $0xe8] sm:$0xff] }
 0x18d   :  { %v648_v12 = vmul.f32 %v2227_v2, %v647_v21  ;;  %v3416_v21 = vld [vmem:[#allocation5 + $0xb0] sm:$0xff]  ;;  %4769 = vst [vmem:[#allocation55_spill] sm:$0xff] %v3479_v59 }
 0x18e   :  { %v2231_v15 = vpop.eup %2230  ;;  %2110 = vst [vmem:[%s4344_s6 + $0x8] sm:$0xff] %v3305_v43  ;;  %710 = vmatmul.f32.vlgmr.msrb.gmra.mxu0 %v3305_v43  ;;  %730 = vmatmul.f32.vlgmr.msrb.gmra.mxu1 %v3305_v43 }
 0x18f   :  { %v666_v18 = vmul.f32 %v2231_v15, %v3300_v40  ;;  %v649_v41 = vadd.f32 %v2227_v2, %v648_v12  ;;  %750 = vmatmul.f32.vlgmr.msrb.gmra.mxu2 %v3305_v43  ;;  %962 = vmatpush.msrb.mxu0 %v3318_v51  ;;  %vm671_vm12 = vweird.f32 %v2231_v15  ;;  %v3404_v40 = vld [vmem:[#allocation3 + $0xb8] sm:$0xff]  ;;  %v3431_v12 = vld [vmem:[#allocation5 + $0x148] sm:$0xff] }
 0x190   :  { %1036 = vmatpush.msrb.mxu1 %v3322_v16  ;;  %1056 = vmatpush.msrb.mxu2 %v3325_v47  ;;  %vm672_vm14 = vmor %vm670_vm13, %vm671_vm12  ;;  %4757 = vst [vmem:[#allocation62_spill] sm:$0xff] %v3431_v12 }
 0x191   :  { %v667_v31 = vsub.f32 1.0, %v666_v18  ;;  %v653_v35 = vsel %vm652_vm10, %v2227_v2, %v649_v41  ;;  %963 = vmatpush.msrb.mxu0 %v3329_v20  ;;  %v3407_v2 = vld [vmem:[#allocation5 + $0x178] sm:$0xff]  ;;  %v3446_v18 = vld [vmem:[#allocation5 + $0x60] sm:$0xff] }
 0x192   :  { %v658_v13 = vsel %vm655_vm11, %v657_v23, %v653_v35  ;;  %1037 = vmatpush.msrb.mxu1 %v3333_v24  ;;  %1057 = vmatpush.msrb.mxu2 %v3336_v61  ;;  %v3449_v41 = vld [vmem:[#allocation3 + $0x58] sm:$0xff]  ;;  %v3452_v23 = vld [vmem:[#allocation5 + $0x68] sm:$0xff] }
 0x193   :  { %v668_v55 = vmul.f32 %v2231_v15, %v667_v31  ;;  %v681_v39 = vmul.f32 %v680_v49, %v658_v13  ;;  %964 = vmatpush.msrb.mxu0 %v3340_v27  ;;  %4759 = vst [vmem:[#allocation65_spill] sm:$0xff] %v3449_v41  ;;  %v3455_v31 = vld [vmem:[#allocation5 + $0x118] sm:$0xff]  ;;  %v3458_v35 = vld [vmem:[#allocation5 + $0x48] sm:$0xff]  ;;  %v3461_v49 = vld [vmem:[#allocation3 + $0x40] sm:$0xff] }
 0x194   :  { %1038 = vmatpush.msrb.mxu1 %v3343_v10  ;;  %1058 = vmatpush.msrb.mxu2 %v3346_v56  ;;  %4760 = vst [vmem:[#allocation35_spill] sm:$0xff] %v3452_v23  ;;  %v3467_v13 = vld [vmem:[#allocation5 + $0x100] sm:$0xff] }
 0x195   :  { %v669_v53 = vadd.f32 %v2231_v15, %v668_v55  ;;  %v682_v60 = vadd.f32 %v2113_v8, %v681_v39  ;;  %965 = vmatpush.msrb.mxu0 %v3349_v34  ;;  %4761 = vst [vmem:[#allocation61_spill] sm:$0xff] %v3455_v31  ;;  %v3464_v8 = vld [vmem:[#allocation5 + $0x50] sm:$0xff]  ;;  %v3476_v39 = vld [vmem:[#allocation5 + $0x38] sm:$0xff] }
 0x196   :  { %1039 = vmatpush.msrb.mxu1 %v3352_v11  ;;  %1059 = vmatpush.msrb.mxu2 %v3355_v22  ;;  %4762 = vst [vmem:[#allocation68_spill] sm:$0xff] %v3458_v35  ;;  %v3470_v55 = vld [vmem:[#allocation5 + $0x30] sm:$0xff] }
 0x197   :  { %v673_v28 = vsel %vm672_vm14, %v2231_v15, %v669_v53  ;;  %2232 = vtanh.f32 %v682_v60  ;;  %966 = vmatpush.msrb.mxu0 %v3358_v46  ;;  %v3440_v15 = vld [vmem:[#allocation5 + $0x80] sm:$0xff]  ;;  %4763 = vst [vmem:[#allocation38_spill] sm:$0xff] %v3461_v49  ;;  %v3482_v53 = vld [vmem:[#allocation5 + $0x18] sm:$0xff]  ;;  %v3485_v60 = vld [vmem:[#allocation3 + $0x10] sm:$0xff] }
 0x198   :  { %v678_v42 = vsel %vm675_vm15, %v677_v63, %v673_v28  ;;  %1040 = vmatpush.msrb.mxu1 %v3361_v5  ;;  %1060 = vmatpush.msrb.mxu2 %v3364_v62  ;;  %4764 = vst [vmem:[#allocation41_spill] sm:$0xff] %v3464_v8  ;;  %v3488_v63 = vld [vmem:[#allocation5 + $0x20] sm:$0xff]  ;;  %v3491_v28 = vld [vmem:[#allocation5 + $0xd0] sm:$0xff] }
 0x199   :  { %v684_v17 = vsub.f32 1.0, %v678_v42  ;;  %967 = vmatpush.msrb.mxu0 %v3367_v36  ;;  %v686_v30 = vmul.f32 %v678_v42, %v3209_v45  ;;  %v3394_v45 = vld [vmem:[#allocation5 + $0xc8] sm:$0xff]  ;;  %4765 = vst [vmem:[#allocation47_spill] sm:$0xff] %v3467_v13  ;;  %v3494_v42 = vld [vmem:[#allocation5] sm:$0xff] }
 0x19a   :  { %1041 = vmatpush.msrb.mxu1 %v3370_v26  ;;  %1061 = vmatpush.msrb.mxu2 %v3373_v58  ;;  %4766 = vst [vmem:[#allocation29_spill] sm:$0xff] %v3470_v55 }
 0x19b   :  { %968 = vmatpush.msrb.mxu0 %v3377_v54  ;;  %4768 = vst [vmem:[#allocation54_spill] sm:$0xff] %v3476_v39 }
 0x19c   :  { %1042 = vmatpush.msrb.mxu1 %v3380_v50  ;;  %1062 = vmatpush.msrb.mxu2 %v3383_v44  ;;  %4770 = vst [vmem:[#allocation56_spill] sm:$0xff] %v3482_v53 }
 0x19d   :  { %v2233_v14 = vpop.eup %2232  ;;  %969 = vmatpush.msrb.mxu0 %v3388_v38  ;;  %4771 = vst [vmem:[#allocation57_spill] sm:$0xff] %v3485_v60 }
 0x19e   :  { %v685_v48 = vmul.f32 %v2233_v14, %v684_v17  ;;  %1043 = vmatpush.msrb.mxu1 %v3391_v52  ;;  %1063 = vmatpush.msrb.mxu2 %v3394_v45  ;;  %4772 = vst [vmem:[#allocation58_spill] sm:$0xff] %v3488_v63  ;;  %v3498_v17 = vld [vmem:[#allocation3 + $0x168] sm:$0xff]  ;;  %v3501_v14 = vld [vmem:[#allocation5 + $0xb8] sm:$0xff] }
 0x19f   :  { %970 = vmatpush.msrb.mxu0 %v3404_v40  ;;  %4773 = vst [vmem:[#allocation60_spill] sm:$0xff] %v3491_v28 }
 0x1a0   :  { %v3386_v4 = vadd.f32 %v686_v30, %v685_v48  ;;  %1044 = vmatpush.msrb.mxu1 %v3410_v19  ;;  %1064 = vmatpush.msrb.mxu2 %v3416_v21  ;;  %4774 = vst [vmem:[#allocation44_spill] sm:$0xff] %v3494_v42  ;;  %v3504_v48 = vld [vmem:[#allocation3 + $0x170] sm:$0xff] }
 0x1a1   :  { %971 = vmatpush.msrb.mxu0 %v3413_v3  ;;  %4775 = vst [vmem:[#allocation63_spill] sm:$0xff] %v3498_v17  ;;  %v3507_v30 = vld [vmem:[#allocation3 + $0x150] sm:$0xff] }
 0x1a2   :  { %2116 = vst [vmem:[%s4345_s7 + $0x30] sm:$0xff] %v3386_v4  ;;  %824 = vmatmul.f32.vlgmr.msrb.gmra.mxu3 %v3386_v4  ;;  %844 = vmatmul.f32.vlgmr.msra.gmra.mxu0 %v3386_v4 }
 0x1a3   :  { %864 = vmatmul.f32.vlgmr.msra.gmra.mxu1 %v3386_v4  ;;  %1076 = vmatpush.msrb.mxu3 %v3407_v2  ;;  %4776 = vst [vmem:[#allocation64_spill] sm:$0xff] %v3501_v14 }
 0x1a4   :  { %1045 = vmatpush.msrb.mxu1 %v3422_v6  ;;  %972 = vmatpush.msrb.mxu0 %v3425_v9  ;;  %4777 = vst [vmem:[#allocation66_spill] sm:$0xff] %v3504_v48 }
 0x1a5   :  { %1077 = vmatpush.msrb.mxu3 %v3419_v25  ;;  %1065 = vmatpush.msrb.mxu2 %v3428_v29  ;;  %4778 = vst [vmem:[#allocation67_spill] sm:$0xff] %v3507_v30 }
 0x1a6   :  { %1046 = vmatpush.msrb.mxu1 %v3434_v33  ;;  %973 = vmatpush.msrb.mxu0 %v3437_v7 }
 0x1a7   :  { %1078 = vmatpush.msrb.mxu3 %v3431_v12  ;;  %1066 = vmatpush.msrb.mxu2 %v3440_v15 }
 0x1a8   :  { %1047 = vmatpush.msrb.mxu1 %v3446_v18  ;;  %974 = vmatpush.msrb.mxu0 %v3449_v41 }
 0x1a9   :  { %1079 = vmatpush.msrb.mxu3 %v3443_v37  ;;  %1067 = vmatpush.msrb.mxu2 %v3452_v23 }
 0x1aa   :  { %1048 = vmatpush.msrb.mxu1 %v3458_v35  ;;  %975 = vmatpush.msrb.mxu0 %v3461_v49 }
 0x1ab   :  { %1080 = vmatpush.msrb.mxu3 %v3455_v31  ;;  %1068 = vmatpush.msrb.mxu2 %v3464_v8 }
 0x1ac   :  { %1049 = vmatpush.msrb.mxu1 %v3470_v55  ;;  %976 = vmatpush.msrb.mxu0 %v3473_v57 }
 0x1ad   :  { %1081 = vmatpush.msrb.mxu3 %v3467_v13  ;;  %1069 = vmatpush.msrb.mxu2 %v3476_v39 }
 0x1ae   :  { %1050 = vmatpush.msrb.mxu1 %v3482_v53  ;;  %977 = vmatpush.msrb.mxu0 %v3485_v60  ;;  %v2124_v53 = vld [vmem:[%s4339_s1 + $0x80] sm:$0xff] }
 0x1af   :  { %1082 = vmatpush.msrb.mxu3 %v3479_v59  ;;  %1070 = vmatpush.msrb.mxu2 %v3488_v63  ;;  %v3516_v59 = vld [vmem:[#allocation3 + $0x138] sm:$0xff] }
 0x1b0   :  { %1051 = vmatpush.msrb.mxu1 %v3494_v42  ;;  %1150 = vmatpush.msra.mxu0 %v3498_v17  ;;  %4781 = vst [vmem:[#allocation13_spill] sm:$0xff] %v3516_v59 }
 0x1b1   :  { %1083 = vmatpush.msrb.mxu3 %v3491_v28  ;;  %1071 = vmatpush.msrb.mxu2 %v3009_v32  ;;  %v3510_v28 = vld [vmem:[#allocation5 + $0xa0] sm:$0xff]  ;;  %v3513_v32 = vld [vmem:[#allocation3 + $0x158] sm:$0xff] }
 0x1b2   :  { %1170 = vmatpush.msra.mxu1 %v3504_v48  ;;  %1151 = vmatpush.msra.mxu0 %v3507_v30  ;;  %4779 = vst [vmem:[#allocation51_spill] sm:$0xff] %v3510_v28  ;;  %v3522_v48 = vld [vmem:[#allocation3 + $0x140] sm:$0xff] }
 0x1b3   :  { %1084 = vmatpush.msrb.mxu3 %v3501_v14  ;;  %4780 = vst [vmem:[#allocation69_spill] sm:$0xff] %v3513_v32  ;;  %v3519_v14 = vld [vmem:[#allocation5 + $0x88] sm:$0xff]  ;;  %v3525_v30 = vld [vmem:[#allocation3 + $0x120] sm:$0xff] }
 0x1b4   :  { %1171 = vmatpush.msra.mxu1 %v3513_v32  ;;  %1152 = vmatpush.msra.mxu0 %v3516_v59  ;;  %4782 = vst [vmem:[#allocation16_spill] sm:$0xff] %v3519_v14  ;;  %v3531_v32 = vld [vmem:[#allocation3 + $0x128] sm:$0xff] }
 0x1b5   :  { %1085 = vmatpush.msrb.mxu3 %v3510_v28  ;;  %4783 = vst [vmem:[#allocation70_spill] sm:$0xff] %v3522_v48  ;;  %v3528_v28 = vld [vmem:[#allocation5 + $0x70] sm:$0xff]  ;;  %v3534_v59 = vld [vmem:[#allocation3 + $0x108] sm:$0xff] }
 0x1b6   :  { %1172 = vmatpush.msra.mxu1 %v3522_v48  ;;  %4784 = vst [vmem:[#allocation14_spill] sm:$0xff] %v3525_v30  ;;  %1153 = vmatpush.msra.mxu0 %v3525_v30  ;;  %v3540_v48 = vld [vmem:[#allocation3 + $0x110] sm:$0xff] }
 0x1b7   :  { %1086 = vmatpush.msrb.mxu3 %v3519_v14  ;;  %4785 = vst [vmem:[#allocation17_spill] sm:$0xff] %v3528_v28  ;;  %v3537_v14 = vld [vmem:[#allocation5 + $0x58] sm:$0xff]  ;;  %v3543_v30 = vld [vmem:[#allocation3 + $0xf0] sm:$0xff] }
 0x1b8   :  { %4786 = vst [vmem:[#allocation71_spill] sm:$0xff] %v3531_v32  ;;  %1173 = vmatpush.msra.mxu1 %v3531_v32  ;;  %1154 = vmatpush.msra.mxu0 %v3534_v59  ;;  %v3549_v32 = vld [vmem:[#allocation3 + $0xf8] sm:$0xff] }
 0x1b9   :  { %1087 = vmatpush.msrb.mxu3 %v3528_v28  ;;  %4787 = vst [vmem:[#allocation15_spill] sm:$0xff] %v3534_v59  ;;  %v3546_v28 = vld [vmem:[#allocation5 + $0x40] sm:$0xff]  ;;  %v3552_v59 = vld [vmem:[#allocation3 + $0xd8] sm:$0xff] }
 0x1ba   :  { %4788 = vst [vmem:[#allocation19_spill] sm:$0xff] %v3537_v14  ;;  %1174 = vmatpush.msra.mxu1 %v3540_v48  ;;  %1155 = vmatpush.msra.mxu0 %v3543_v30 }
 0x1bb   :  { %1088 = vmatpush.msrb.mxu3 %v3537_v14  ;;  %4789 = vst [vmem:[#allocation72_spill] sm:$0xff] %v3540_v48  ;;  %v3555_v14 = vld [vmem:[#allocation5 + $0x28] sm:$0xff]  ;;  %v3558_v48 = vld [vmem:[#allocation3 + $0xe0] sm:$0xff] }
 0x1bc   :  { %4790 = vst [vmem:[#allocation18_spill] sm:$0xff] %v3543_v30  ;;  %1175 = vmatpush.msra.mxu1 %v3549_v32  ;;  %1156 = vmatpush.msra.mxu0 %v3552_v59  ;;  %v3561_v30 = vld [vmem:[#allocation3 + $0xc0] sm:$0xff] }
 0x1bd   :  { %4791 = vst [vmem:[#allocation21_spill] sm:$0xff] %v3546_v28  ;;  %1089 = vmatpush.msrb.mxu3 %v3546_v28  ;;  %v3564_v28 = vld [vmem:[#allocation5 + $0x10] sm:$0xff] }
 0x1be   :  { %4792 = vst [vmem:[#allocation73_spill] sm:$0xff] %v3549_v32  ;;  %1176 = vmatpush.msra.mxu1 %v3558_v48  ;;  %1157 = vmatpush.msra.mxu0 %v3561_v30  ;;  %v3567_v32 = vld [vmem:[#allocation3 + $0xc8] sm:$0xff] }
 0x1bf   :  { %4793 = vst [vmem:[#allocation20_spill] sm:$0xff] %v3552_v59  ;;  %1090 = vmatpush.msrb.mxu3 %v3555_v14  ;;  %v3570_v59 = vld [vmem:[#allocation3 + $0xa8] sm:$0xff] }
 0x1c0   :  { %4794 = vst [vmem:[#allocation23_spill] sm:$0xff] %v3555_v14  ;;  %1177 = vmatpush.msra.mxu1 %v3567_v32  ;;  %1158 = vmatpush.msra.mxu0 %v3570_v59  ;;  %v3573_v14 = vld [vmem:[#allocation3 + $0xb0] sm:$0xff] }
 0x1c1   :  { %4795 = vst [vmem:[#allocation74_spill] sm:$0xff] %v3558_v48  ;;  %1091 = vmatpush.msrb.mxu3 %v3564_v28  ;;  %v3576_v48 = vld [vmem:[#allocation3 + $0x90] sm:$0xff] }
 0x1c2   :  { %4796 = vst [vmem:[#allocation22_spill] sm:$0xff] %v3561_v30  ;;  %1178 = vmatpush.msra.mxu1 %v3573_v14  ;;  %1159 = vmatpush.msra.mxu0 %v3576_v48  ;;  %v3579_v30 = vld [vmem:[#allocation3 + $0x98] sm:$0xff] }
 0x1c3   :  { %4797 = vst [vmem:[#allocation25_spill] sm:$0xff] %v3564_v28  ;;  %v3582_v28 = vld [vmem:[#allocation3 + $0x78] sm:$0xff] }
 0x1c4   :  { %4798 = vst [vmem:[#allocation75_spill] sm:$0xff] %v3567_v32  ;;  %1179 = vmatpush.msra.mxu1 %v3579_v30  ;;  %1160 = vmatpush.msra.mxu0 %v3582_v28  ;;  %v3585_v32 = vld [vmem:[#allocation3 + $0x80] sm:$0xff] }
 0x1c5   :  { %4799 = vst [vmem:[#allocation24_spill] sm:$0xff] %v3570_v59  ;;  %v3588_v59 = vld [vmem:[#allocation3 + $0x60] sm:$0xff] }
 0x1c6   :  { %4800 = vst [vmem:[#allocation27_spill] sm:$0xff] %v3573_v14  ;;  %1180 = vmatpush.msra.mxu1 %v3585_v32  ;;  %1161 = vmatpush.msra.mxu0 %v3588_v59  ;;  %v3591_v14 = vld [vmem:[#allocation3 + $0x68] sm:$0xff] }
 0x1c7   :  { %4801 = vst [vmem:[#allocation76_spill] sm:$0xff] %v3576_v48  ;;  %v3594_v48 = vld [vmem:[#allocation3 + $0x48] sm:$0xff] }
 0x1c8   :  { %4802 = vst [vmem:[#allocation26_spill] sm:$0xff] %v3579_v30  ;;  %1181 = vmatpush.msra.mxu1 %v3591_v14  ;;  %1162 = vmatpush.msra.mxu0 %v3594_v48  ;;  %v3597_v30 = vld [vmem:[#allocation3 + $0x50] sm:$0xff] }
 0x1c9   :  { %4803 = vst [vmem:[#allocation30_spill] sm:$0xff] %v3582_v28  ;;  %v3600_v28 = vld [vmem:[#allocation3 + $0x30] sm:$0xff] }
 0x1ca   :  { %4804 = vst [vmem:[#allocation77_spill] sm:$0xff] %v3585_v32  ;;  %1182 = vmatpush.msra.mxu1 %v3597_v30  ;;  %1163 = vmatpush.msra.mxu0 %v3600_v28  ;;  %v3603_v32 = vld [vmem:[#allocation3 + $0x38] sm:$0xff] }
 0x1cb   :  { %4805 = vst [vmem:[#allocation28_spill] sm:$0xff] %v3588_v59  ;;  %v3606_v59 = vld [vmem:[#allocation3 + $0x18] sm:$0xff] }
 0x1cc   :  { %4806 = vst [vmem:[#allocation33_spill] sm:$0xff] %v3591_v14  ;;  %1183 = vmatpush.msra.mxu1 %v3603_v32  ;;  %1164 = vmatpush.msra.mxu0 %v3606_v59  ;;  %v3609_v14 = vld [vmem:[#allocation3 + $0x20] sm:$0xff] }
 0x1cd   :  { %4807 = vst [vmem:[#allocation78_spill] sm:$0xff] %v3594_v48  ;;  %v3612_v48 = vld [vmem:[#allocation3] sm:$0xff] }
 0x1ce   :  { %4808 = vst [vmem:[#allocation31_spill] sm:$0xff] %v3597_v30  ;;  %1184 = vmatpush.msra.mxu1 %v3609_v14  ;;  %1165 = vmatpush.msra.mxu0 %v3612_v48  ;;  %v3615_v30 = vld [vmem:[#allocation3 + $0x8] sm:$0xff] }
 0x1cf   :  { %4809 = vst [vmem:[#allocation36_spill] sm:$0xff] %v3600_v28 }
 0x1d0   :  { %4810 = vst [vmem:[#allocation79_spill] sm:$0xff] %v3603_v32  ;;  %1185 = vmatpush.msra.mxu1 %v3615_v30  ;;  %v2117_v32 = vld [vmem:[%s4338_s0 + $0x30] sm:$0xff] }
 0x1d1   :  { %4811 = vst [vmem:[#allocation34_spill] sm:$0xff] %v3606_v59  ;;  %v2118_v59 = vld [vmem:[%s4338_s0 + $0x38] sm:$0xff] }
 0x1d2   :  { %4812 = vst [vmem:[#allocation39_spill] sm:$0xff] %v3609_v14 }
 0x1d3   :  { %4813 = vst [vmem:[#allocation37_spill] sm:$0xff] %v3612_v48 }
 0x1d4   :  { %4814 = vst [vmem:[#allocation42_spill] sm:$0xff] %v3615_v30 }
 0x20b   :  { %v711_v28 = vpop.f32.mrf.mxu0  ;;  %v731_v17 = vpop.f32.mrf.mxu1 }
 0x20c   :  { %v754_v13 = vadd.f32 %v2117_v32, %v711_v28  ;;  %v774_v14 = vadd.f32 %v2118_v59, %v731_v17 }
 0x20e   :  { %v2120_v42 = vmul.f32 -1.442695, %v754_v13  ;;  %v2121_v60 = vmul.f32 -1.442695, %v774_v14  ;;  %v2123_v13 = vld [vmem:[%s4339_s1 + $0x78] sm:$0xff] }
 0x210   :  { %2234 = vpow2.f32 %v2120_v42 }
 0x211   :  { %2236 = vpow2.f32 %v2121_v60 }
 0x216   :  { %v2235_v48 = vpop.eup %2234 }
 0x217   :  { %v2237_v63 = vpop.eup %2236  ;;  %v758_v31 = vadd.f32 1.0, %v2235_v48 }
 0x218   :  { %v778_v30 = vadd.f32 1.0, %v2237_v63 }
 0x219   :  { %2238 = vrcp.f32 %v758_v31  ;;  %v770_v14 = vand.u32 2147483648, %v758_v31  ;;  %v768_v49 = vand.u32 2147483647, %v758_v31  ;;  %vm764_vm1 = vweird.f32 %v758_v31 }
 0x21a   :  { %2240 = vrcp.f32 %v778_v30  ;;  %vm784_vm5 = vweird.f32 %v778_v30 }
 0x21b   :  { %v771_v35 = vor.u32 1.1754944e-38, %v770_v14  ;;  %vm769_vm3 = vcmp.eq.f32.partialorder %v768_v49, 8.507059e+37 }
 0x21f   :  { %v845_v57 = vpop.f32.mrf.mxu0  ;;  %v2239_v37 = vpop.eup %2238 }
 0x220   :  { %v888_v39 = vadd.f32 %v2124_v53, %v845_v57  ;;  %v2241_v28 = vpop.eup %2240  ;;  %v760_v59 = vmul.f32 %v2239_v37, %v758_v31  ;;  %vm765_vm0 = vweird.f32 %v2239_v37  ;;  %v751_v57 = vpop.f32.mrf.mxu2  ;;  %v788_v31 = vand.u32 2147483647, %v778_v30 }
 0x221   :  { %v780_v60 = vmul.f32 %v2241_v28, %v778_v30  ;;  %vm766_vm2 = vmor %vm764_vm1, %vm765_vm0  ;;  %vm785_vm4 = vweird.f32 %v2241_v28 }
 0x222   :  { %v2127_v55 = vmul.f32 -1.442695, %v888_v39  ;;  %v761_v42 = vsub.f32 1.0, %v760_v59  ;;  %vm786_vm6 = vmor %vm784_vm5, %vm785_vm4  ;;  %vm789_vm7 = vcmp.eq.f32.partialorder %v788_v31, 8.507059e+37 }
 0x223   :  { %v781_v17 = vsub.f32 1.0, %v780_v60 }
 0x224   :  { %2242 = vpow2.f32 %v2127_v55  ;;  %v762_v32 = vmul.f32 %v2239_v37, %v761_v42  ;;  %v794_v55 = vadd.f32 %v4756_v0, %v751_v57 }
 0x225   :  { %v825_v63 = vpop.f32.mrf.mxu3  ;;  %v782_v8 = vmul.f32 %v2241_v28, %v781_v17 }
 0x226   :  { %v868_v48 = vadd.f32 %v2123_v13, %v825_v63  ;;  %v763_v39 = vadd.f32 %v2239_v37, %v762_v32  ;;  %v2119_v13 = vld [vmem:[%s4338_s0 + $0x40] sm:$0xff]  ;;  %v790_v63 = vand.u32 2147483648, %v778_v30 }
 0x227   :  { %v783_v60 = vadd.f32 %v2241_v28, %v782_v8 }
 0x228   :  { %v2126_v53 = vmul.f32 -1.442695, %v868_v48  ;;  %v767_v41 = vsel %vm766_vm2, %v2239_v37, %v763_v39  ;;  %v791_v0 = vor.u32 1.1754944e-38, %v790_v63 }
 0x229   :  { %v772_v42 = vsel %vm769_vm3, %v771_v35, %v767_v41  ;;  %v787_v14 = vsel %vm786_vm6, %v2241_v28, %v783_v60 }
 0x22a   :  { %v2243_v12 = vpop.eup %2242  ;;  %2244 = vpow2.f32 %v2126_v53  ;;  %v795_v17 = vmul.f32 %v794_v55, %v772_v42  ;;  %v792_v8 = vsel %vm789_vm7, %v791_v0, %v787_v14 }
 0x22b   :  { %v3631_v59 = vadd.f32 1.0, %v2243_v12  ;;  %v798_v32 = vsub.f32 1.0, %v792_v8  ;;  %v800_v57 = vmul.f32 %v792_v8, %v3305_v43  ;;  %v2125_v8 = vld [vmem:[%s4339_s1 + $0x88] sm:$0xff] }
 0x22c   :  { %v796_v37 = vadd.f32 %v2119_v13, %v795_v17  ;;  %v865_v17 = vpop.f32.mrf.mxu1 }
 0x22d   :  { %2246 = vrcp.f32 %v3631_v59  ;;  %vm898_vm13 = vweird.f32 %v3631_v59 }
 0x22e   :  { %2248 = vtanh.f32 %v796_v37 }
 0x230   :  { %v2245_v49 = vpop.eup %2244 }
 0x231   :  { %v872_v12 = vadd.f32 1.0, %v2245_v49  ;;  %v908_v49 = vadd.f32 %v3162_v1, %v865_v17  ;;  %v4820_v17 = vld [vmem:[#allocation29_spill] sm:$0xff] }
 0x233   :  { %2250 = vrcp.f32 %v872_v12  ;;  %v3637_v48 = vpop.eup %2246  ;;  %v884_v13 = vand.u32 2147483648, %v872_v12  ;;  %v882_v42 = vand.u32 2147483647, %v872_v12  ;;  %vm878_vm9 = vweird.f32 %v872_v12 }
 0x234   :  { %v2249_v41 = vpop.eup %2248  ;;  %v894_v35 = vmul.f32 %v3637_v48, %v3631_v59  ;;  %vm899_vm12 = vweird.f32 %v3637_v48 }
 0x235   :  { %v799_v30 = vmul.f32 %v2249_v41, %v798_v32  ;;  %v885_v37 = vor.u32 1.1754944e-38, %v884_v13  ;;  %vm883_vm11 = vcmp.eq.f32.partialorder %v882_v42, 8.507059e+37  ;;  %v904_v32 = vand.u32 2147483648, %v3631_v59  ;;  %vm900_vm14 = vmor %vm898_vm13, %vm899_vm12  ;;  %v4816_v13 = vld [vmem:[#allocation68_spill] sm:$0xff]  ;;  %v4818_v42 = vld [vmem:[#allocation41_spill] sm:$0xff] }
 0x236   :  { %v895_v28 = vsub.f32 1.0, %v894_v35  ;;  %v902_v41 = vand.u32 2147483647, %v3631_v59 }
 0x237   :  { %v3642_v55 = vadd.f32 %v800_v57, %v799_v30  ;;  %v905_v57 = vor.u32 1.1754944e-38, %v904_v32  ;;  %v4828_v32 = vld [vmem:[#allocation44_spill] sm:$0xff] }
 0x238   :  { %v896_v63 = vmul.f32 %v3637_v48, %v895_v28  ;;  %vm903_vm15 = vcmp.eq.f32.partialorder %v902_v41, 8.507059e+37  ;;  %v3725_v41 = vld [vmem:[#allocation5 + $0x8] sm:$0xff] }
 0x239   :  { %v2251_v53 = vpop.eup %2250  ;;  %2122 = vst [vmem:[%s4344_s6 + $0x10] sm:$0xff] %v3642_v55  ;;  %938 = vmatmul.f32.vlgmr.msra.gmra.mxu2 %v3642_v55  ;;  %958 = vmatmul.f32.vlgmr.msra.gmra.mxu3 %v3642_v55 }
 0x23a   :  { %v874_v39 = vmul.f32 %v2251_v53, %v872_v12  ;;  %978 = vmatmul.f32.vlgmr.msrb.gmra.mxu0 %v3642_v55  ;;  %1190 = vmatpush.msra.mxu2 %v3318_v51  ;;  %vm879_vm8 = vweird.f32 %v2251_v53  ;;  %v897_v0 = vadd.f32 %v3637_v48, %v896_v63  ;;  %v4819_v63 = vld [vmem:[#allocation38_spill] sm:$0xff]  ;;  %4830 = vst [vmem:[#allocation40_spill] sm:$0xff] %v3725_v41 }
 0x23b   :  { %1264 = vmatpush.msra.mxu3 %v3322_v16  ;;  %1284 = vmatpush.msrb.mxu0 %v3325_v47  ;;  %vm880_vm10 = vmor %vm878_vm9, %vm879_vm8 }
 0x23c   :  { %v875_v60 = vsub.f32 1.0, %v874_v39  ;;  %1191 = vmatpush.msra.mxu2 %v3329_v20  ;;  %v901_v30 = vsel %vm900_vm14, %v3637_v48, %v897_v0  ;;  %v4825_v0 = vld [vmem:[#allocation61_spill] sm:$0xff] }
 0x23d   :  { %1265 = vmatpush.msra.mxu3 %v3333_v24  ;;  %1285 = vmatpush.msrb.mxu0 %v3336_v61  ;;  %v906_v59 = vsel %vm903_vm15, %v905_v57, %v901_v30  ;;  %v4832_v30 = vld [vmem:[#allocation66_spill] sm:$0xff]  ;;  %v4833_v57 = vld [vmem:[#allocation55_spill] sm:$0xff] }
 0x23e   :  { %v876_v43 = vmul.f32 %v2251_v53, %v875_v60  ;;  %1192 = vmatpush.msra.mxu2 %v3340_v27  ;;  %v912_v48 = vsub.f32 1.0, %v906_v59  ;;  %v914_v28 = vmul.f32 %v906_v59, %v3386_v4  ;;  %v4815_v4 = vld [vmem:[#allocation65_spill] sm:$0xff]  ;;  %v4834_v59 = vld [vmem:[#allocation67_spill] sm:$0xff] }
 0x23f   :  { %1266 = vmatpush.msra.mxu3 %v3343_v10  ;;  %1286 = vmatpush.msrb.mxu0 %v3346_v56 }
 0x240   :  { %v877_v31 = vadd.f32 %v2251_v53, %v876_v43  ;;  %1193 = vmatpush.msra.mxu2 %v3349_v34  ;;  %v4817_v43 = vld [vmem:[#allocation62_spill] sm:$0xff] }
 0x241   :  { %1267 = vmatpush.msra.mxu3 %v3352_v11  ;;  %1287 = vmatpush.msrb.mxu0 %v3355_v22 }
 0x242   :  { %v881_v14 = vsel %vm880_vm10, %v2251_v53, %v877_v31  ;;  %1194 = vmatpush.msra.mxu2 %v3358_v46  ;;  %v4821_v31 = vld [vmem:[#allocation32_spill] sm:$0xff] }
 0x243   :  { %v886_v12 = vsel %vm883_vm11, %v885_v37, %v881_v14  ;;  %1268 = vmatpush.msra.mxu3 %v3361_v5  ;;  %1288 = vmatpush.msrb.mxu0 %v3364_v62  ;;  %v4822_v37 = vld [vmem:[#allocation54_spill] sm:$0xff]  ;;  %v4824_v14 = vld [vmem:[#allocation56_spill] sm:$0xff] }
 0x244   :  { %v909_v1 = vmul.f32 %v908_v49, %v886_v12  ;;  %1195 = vmatpush.msra.mxu2 %v3367_v36  ;;  %v4823_v49 = vld [vmem:[#allocation49_spill] sm:$0xff]  ;;  %v4826_v12 = vld [vmem:[#allocation58_spill] sm:$0xff] }
 0x245   :  { %1269 = vmatpush.msra.mxu3 %v3370_v26  ;;  %1289 = vmatpush.msrb.mxu0 %v3373_v58 }
 0x246   :  { %v910_v35 = vadd.f32 %v2125_v8, %v909_v1  ;;  %1196 = vmatpush.msra.mxu2 %v3377_v54  ;;  %v4827_v8 = vld [vmem:[#allocation57_spill] sm:$0xff]  ;;  %v4829_v1 = vld [vmem:[#allocation47_spill] sm:$0xff] }
 0x247   :  { %1270 = vmatpush.msra.mxu3 %v3380_v50  ;;  %1290 = vmatpush.msrb.mxu0 %v3383_v44 }
 0x248   :  { %2252 = vtanh.f32 %v910_v35  ;;  %1197 = vmatpush.msra.mxu2 %v3388_v38  ;;  %v4831_v35 = vld [vmem:[#allocation63_spill] sm:$0xff] }
 0x249   :  { %1271 = vmatpush.msra.mxu3 %v3391_v52  ;;  %1291 = vmatpush.msrb.mxu0 %v3394_v45 }
 0x24a   :  { %1198 = vmatpush.msra.mxu2 %v3404_v40 }
 0x24b   :  { %1272 = vmatpush.msra.mxu3 %v3410_v19  ;;  %1292 = vmatpush.msrb.mxu0 %v3416_v21 }
 0x24c   :  { %1199 = vmatpush.msra.mxu2 %v3413_v3 }
 0x24d   :  { %1273 = vmatpush.msra.mxu3 %v3422_v6  ;;  %1293 = vmatpush.msrb.mxu0 %v3428_v29 }
 0x24e   :  { %v2253_v53 = vpop.eup %2252  ;;  %1200 = vmatpush.msra.mxu2 %v3425_v9 }
 0x24f   :  { %v913_v39 = vmul.f32 %v2253_v53, %v912_v48  ;;  %1274 = vmatpush.msra.mxu3 %v3434_v33  ;;  %1294 = vmatpush.msrb.mxu0 %v3440_v15  ;;  %v4835_v48 = vld [vmem:[#allocation69_spill] sm:$0xff]  ;;  %v4836_v53 = vld [vmem:[#allocation60_spill] sm:$0xff] }
 0x250   :  { %1201 = vmatpush.msra.mxu2 %v3437_v7 }
 0x251   :  { %v3693_v60 = vadd.f32 %v914_v28, %v913_v39  ;;  %1275 = vmatpush.msra.mxu3 %v3446_v18  ;;  %1295 = vmatpush.msrb.mxu0 %v3452_v23  ;;  %v4837_v39 = vld [vmem:[#allocation13_spill] sm:$0xff]  ;;  %v4838_v28 = vld [vmem:[#allocation70_spill] sm:$0xff]  ;;  %v3782_v23 = vld [vmem:[#allocation7] ss:$0 sm:$0xff] }
 0x252   :  { %1202 = vmatpush.msra.mxu2 %v4815_v4  ;;  %4873 = vst [vmem:[#allocation45_spill] sm:$0xff] %v3782_v23 }
 0x253   :  { %2128 = vst [vmem:[%s4345_s7 + $0x28] sm:$0xff] %v3693_v60  ;;  %1052 = vmatmul.f32.vlgmr.msrb.gmra.mxu1 %v3693_v60  ;;  %1072 = vmatmul.f32.vlgmr.msrb.gmra.mxu2 %v3693_v60 }
 0x254   :  { %1092 = vmatmul.f32.vlgmr.msrb.gmra.mxu3 %v3693_v60  ;;  %1304 = vmatpush.msrb.mxu1 %v3407_v2 }
 0x255   :  { %1276 = vmatpush.msra.mxu3 %v4816_v13  ;;  %1296 = vmatpush.msrb.mxu0 %v4818_v42 }
 0x256   :  { %1305 = vmatpush.msrb.mxu1 %v3419_v25  ;;  %1203 = vmatpush.msra.mxu2 %v4819_v63 }
 0x257   :  { %1277 = vmatpush.msra.mxu3 %v4820_v17  ;;  %1297 = vmatpush.msrb.mxu0 %v4822_v37 }
 0x258   :  { %1306 = vmatpush.msrb.mxu1 %v4817_v43  ;;  %1204 = vmatpush.msra.mxu2 %v4823_v49 }
 0x259   :  { %1278 = vmatpush.msra.mxu3 %v4824_v14  ;;  %1298 = vmatpush.msrb.mxu0 %v4826_v12  ;;  %v4840_v12 = vld [vmem:[#allocation14_spill] sm:$0xff] }
 0x25a   :  { %1307 = vmatpush.msrb.mxu1 %v4821_v31  ;;  %1205 = vmatpush.msra.mxu2 %v4827_v8  ;;  %v4844_v8 = vld [vmem:[#allocation72_spill] sm:$0xff] }
 0x25b   :  { %1279 = vmatpush.msra.mxu3 %v4828_v32  ;;  %1299 = vmatpush.msrb.mxu0 %v3725_v41  ;;  %v4839_v32 = vld [vmem:[#allocation64_spill] sm:$0xff]  ;;  %v4841_v41 = vld [vmem:[#allocation71_spill] sm:$0xff] }
 0x25c   :  { %1308 = vmatpush.msrb.mxu1 %v4825_v0  ;;  %1378 = vmatpush.msrb.mxu2 %v4831_v35  ;;  %v4842_v35 = vld [vmem:[#allocation51_spill] sm:$0xff] }
 0x25d   :  { %1398 = vmatpush.msrb.mxu3 %v4832_v30  ;;  %v4843_v30 = vld [vmem:[#allocation15_spill] sm:$0xff] }
 0x25e   :  { %1309 = vmatpush.msrb.mxu1 %v4829_v1  ;;  %1379 = vmatpush.msrb.mxu2 %v4834_v59  ;;  %v4845_v59 = vld [vmem:[#allocation16_spill] sm:$0xff] }
 0x25f   :  { %1399 = vmatpush.msrb.mxu3 %v4835_v48  ;;  %v4846_v48 = vld [vmem:[#allocation18_spill] sm:$0xff] }
 0x260   :  { %1310 = vmatpush.msrb.mxu1 %v4833_v57  ;;  %1380 = vmatpush.msrb.mxu2 %v4837_v39  ;;  %v4848_v39 = vld [vmem:[#allocation17_spill] sm:$0xff] }
 0x261   :  { %1400 = vmatpush.msrb.mxu3 %v4838_v28  ;;  %v4849_v28 = vld [vmem:[#allocation20_spill] sm:$0xff] }
 0x262   :  { %1311 = vmatpush.msrb.mxu1 %v4836_v53  ;;  %1381 = vmatpush.msrb.mxu2 %v4840_v12  ;;  %v4847_v53 = vld [vmem:[#allocation73_spill] sm:$0xff]  ;;  %v4851_v12 = vld [vmem:[#allocation19_spill] sm:$0xff] }
 0x263   :  { %1401 = vmatpush.msrb.mxu3 %v4841_v41  ;;  %v4852_v41 = vld [vmem:[#allocation22_spill] sm:$0xff]  ;;  %v2135_v57 = vld [vmem:[%s4339_s1 + $0x60] sm:$0xff] }
 0x264   :  { %1312 = vmatpush.msrb.mxu1 %v4839_v32  ;;  %1382 = vmatpush.msrb.mxu2 %v4843_v30  ;;  %v4850_v32 = vld [vmem:[#allocation74_spill] sm:$0xff]  ;;  %v4854_v30 = vld [vmem:[#allocation21_spill] sm:$0xff] }
 0x265   :  { %1402 = vmatpush.msrb.mxu3 %v4844_v8  ;;  %v4855_v8 = vld [vmem:[#allocation24_spill] sm:$0xff] }
 0x266   :  { %1313 = vmatpush.msrb.mxu1 %v4842_v35  ;;  %1383 = vmatpush.msrb.mxu2 %v4846_v48  ;;  %v4853_v35 = vld [vmem:[#allocation75_spill] sm:$0xff] }
 0x267   :  { %1403 = vmatpush.msrb.mxu3 %v4847_v53  ;;  %v4857_v48 = vld [vmem:[#allocation23_spill] sm:$0xff]  ;;  %v4858_v53 = vld [vmem:[#allocation76_spill] sm:$0xff] }
 0x268   :  { %1314 = vmatpush.msrb.mxu1 %v4845_v59  ;;  %1384 = vmatpush.msrb.mxu2 %v4849_v28  ;;  %v4856_v59 = vld [vmem:[#allocation27_spill] sm:$0xff]  ;;  %v4860_v28 = vld [vmem:[#allocation25_spill] sm:$0xff] }
 0x269   :  { %1404 = vmatpush.msrb.mxu3 %v4850_v32  ;;  %v4861_v32 = vld [vmem:[#allocation30_spill] sm:$0xff] }
 0x26a   :  { %1315 = vmatpush.msrb.mxu1 %v4848_v39  ;;  %1385 = vmatpush.msrb.mxu2 %v4852_v41  ;;  %v4859_v39 = vld [vmem:[#allocation26_spill] sm:$0xff]  ;;  %v4863_v41 = vld [vmem:[#allocation28_spill] sm:$0xff] }
 0x26b   :  { %1405 = vmatpush.msrb.mxu3 %v4853_v35  ;;  %v4864_v35 = vld [vmem:[#allocation33_spill] sm:$0xff] }
 0x26c   :  { %1316 = vmatpush.msrb.mxu1 %v4851_v12  ;;  %1386 = vmatpush.msrb.mxu2 %v4855_v8  ;;  %v4862_v12 = vld [vmem:[#allocation77_spill] sm:$0xff]  ;;  %v4866_v8 = vld [vmem:[#allocation31_spill] sm:$0xff] }
 0x26d   :  { %1406 = vmatpush.msrb.mxu3 %v4856_v59  ;;  %v4867_v59 = vld [vmem:[#allocation36_spill] sm:$0xff] }
 0x26e   :  { %1317 = vmatpush.msrb.mxu1 %v4854_v30  ;;  %1387 = vmatpush.msrb.mxu2 %v4858_v53  ;;  %v4865_v30 = vld [vmem:[#allocation78_spill] sm:$0xff] }
 0x26f   :  { %1407 = vmatpush.msrb.mxu3 %v4859_v39  ;;  %v4869_v53 = vld [vmem:[#allocation34_spill] sm:$0xff]  ;;  %v4870_v39 = vld [vmem:[#allocation39_spill] sm:$0xff] }
 0x270   :  { %1318 = vmatpush.msrb.mxu1 %v4857_v48  ;;  %1388 = vmatpush.msrb.mxu2 %v4861_v32  ;;  %v4868_v48 = vld [vmem:[#allocation79_spill] sm:$0xff]  ;;  %v4872_v32 = vld [vmem:[#allocation42_spill] sm:$0xff] }
 0x271   :  { %1408 = vmatpush.msrb.mxu3 %v4862_v12 }
 0x272   :  { %1319 = vmatpush.msrb.mxu1 %v4860_v28  ;;  %1389 = vmatpush.msrb.mxu2 %v4863_v41  ;;  %v4871_v28 = vld [vmem:[#allocation37_spill] sm:$0xff] }
 0x273   :  { %1409 = vmatpush.msrb.mxu3 %v4864_v35  ;;  %v2129_v35 = vld [vmem:[%s4338_s0 + $0x48] sm:$0xff] }
 0x274   :  { %1390 = vmatpush.msrb.mxu2 %v4865_v30 }
 0x275   :  { %1410 = vmatpush.msrb.mxu3 %v4866_v8  ;;  %v2130_v8 = vld [vmem:[%s4338_s0 + $0x50] sm:$0xff] }
 0x276   :  { %1391 = vmatpush.msrb.mxu2 %v4867_v59 }
 0x277   :  { %1411 = vmatpush.msrb.mxu3 %v4868_v48 }
 0x278   :  { %1392 = vmatpush.msrb.mxu2 %v4869_v53 }
 0x279   :  { %1412 = vmatpush.msrb.mxu3 %v4870_v39 }
 0x27a   :  { %1393 = vmatpush.msrb.mxu2 %v4871_v28 }
 0x27b   :  { %1413 = vmatpush.msrb.mxu3 %v4872_v32 }
 0x2b7   :  { %v979_v63 = vpop.f32.mrf.mxu0 }
 0x2bc   :  { %v939_v30 = vpop.f32.mrf.mxu2  ;;  %v959_v59 = vpop.f32.mrf.mxu3 }
 0x2bd   :  { %v982_v41 = vadd.f32 %v2129_v35, %v939_v30  ;;  %v1002_v48 = vadd.f32 %v2130_v8, %v959_v59 }
 0x2bf   :  { %v2132_v12 = vmul.f32 -1.442695, %v982_v41  ;;  %v2133_v53 = vmul.f32 -1.442695, %v1002_v48 }
 0x2c1   :  { %2254 = vpow2.f32 %v2132_v12  ;;  %v2136_v12 = vld [vmem:[%s4339_s1 + $0x68] sm:$0xff] }
 0x2c2   :  { %2256 = vpow2.f32 %v2133_v53 }
 0x2c7   :  { %v2255_v39 = vpop.eup %2254 }
 0x2c8   :  { %v2257_v28 = vpop.eup %2256  ;;  %v986_v14 = vadd.f32 1.0, %v2255_v39 }
 0x2c9   :  { %v1006_v32 = vadd.f32 1.0, %v2257_v28 }
 0x2ca   :  { %2258 = vrcp.f32 %v986_v14  ;;  %v998_v48 = vand.u32 2147483648, %v986_v14  ;;  %v996_v42 = vand.u32 2147483647, %v986_v14  ;;  %vm992_vm1 = vweird.f32 %v986_v14 }
 0x2cb   :  { %2260 = vrcp.f32 %v1006_v32  ;;  %vm1012_vm5 = vweird.f32 %v1006_v32 }
 0x2cc   :  { %v999_v0 = vor.u32 1.1754944e-38, %v998_v48  ;;  %vm997_vm3 = vcmp.eq.f32.partialorder %v996_v42, 8.507059e+37  ;;  %v1016_v48 = vand.u32 2147483647, %v1006_v32 }
 0x2ce   :  { %vm1017_vm7 = vcmp.eq.f32.partialorder %v1016_v48, 8.507059e+37 }
 0x2d0   :  { %v1053_v37 = vpop.f32.mrf.mxu1  ;;  %v2259_v17 = vpop.eup %2258 }
 0x2d1   :  { %v1096_v49 = vadd.f32 %v2135_v57, %v1053_v37  ;;  %v2261_v35 = vpop.eup %2260  ;;  %v988_v8 = vmul.f32 %v2259_v17, %v986_v14  ;;  %vm993_vm0 = vweird.f32 %v2259_v17  ;;  %v1018_v14 = vand.u32 2147483648, %v1006_v32 }
 0x2d2   :  { %v1008_v41 = vmul.f32 %v2261_v35, %v1006_v32  ;;  %vm994_vm2 = vmor %vm992_vm1, %vm993_vm0  ;;  %vm1013_vm4 = vweird.f32 %v2261_v35 }
 0x2d3   :  { %v2138_v1 = vmul.f32 -1.442695, %v1096_v49  ;;  %v989_v30 = vsub.f32 1.0, %v988_v8  ;;  %vm1014_vm6 = vmor %vm1012_vm5, %vm1013_vm4 }
 0x2d4   :  { %v1009_v53 = vsub.f32 1.0, %v1008_v41 }
 0x2d5   :  { %2262 = vpow2.f32 %v2138_v1  ;;  %v990_v28 = vmul.f32 %v2259_v17, %v989_v30  ;;  %v1022_v1 = vadd.f32 %v3782_v23, %v979_v63  ;;  %v1019_v63 = vor.u32 1.1754944e-38, %v1018_v14 }
 0x2d6   :  { %v1073_v59 = vpop.f32.mrf.mxu2  ;;  %v1010_v37 = vmul.f32 %v2261_v35, %v1009_v53 }
 0x2d7   :  { %v1116_v39 = vadd.f32 %v2136_v12, %v1073_v59  ;;  %v991_v49 = vadd.f32 %v2259_v17, %v990_v28  ;;  %v2131_v59 = vld [vmem:[%s4338_s0 + $0x58] sm:$0xff] }
 0x2d8   :  { %v1011_v30 = vadd.f32 %v2261_v35, %v1010_v37 }
 0x2d9   :  { %v2139_v57 = vmul.f32 -1.442695, %v1116_v39  ;;  %v995_v8 = vsel %vm994_vm2, %v2259_v17, %v991_v49 }
 0x2da   :  { %v1000_v12 = vsel %vm997_vm3, %v999_v0, %v995_v8 }
 0x2db   :  { %v2263_v13 = vpop.eup %2262  ;;  %2264 = vpow2.f32 %v2139_v57  ;;  %v1023_v53 = vmul.f32 %v1022_v1, %v1000_v12  ;;  %v1015_v57 = vsel %vm1014_vm6, %v2261_v35, %v1011_v30  ;;  %v1093_v35 = vpop.f32.mrf.mxu3 }
 0x2dc   :  { %v1100_v41 = vadd.f32 1.0, %v2263_v13  ;;  %v1020_v42 = vsel %vm1017_vm7, %v1019_v63, %v1015_v57  ;;  %v3791_v63 = vld [vmem:[#allocation8] ss:$0 sm:$0xff] }
 0x2dd   :  { %v1024_v39 = vadd.f32 %v2131_v59, %v1023_v53  ;;  %v1026_v49 = vsub.f32 1.0, %v1020_v42  ;;  %v1028_v59 = vmul.f32 %v1020_v42, %v3642_v55 }
 0x2de   :  { %2266 = vrcp.f32 %v1100_v41  ;;  %v1110_v1 = vand.u32 2147483647, %v1100_v41  ;;  %v1112_v12 = vand.u32 2147483648, %v1100_v41  ;;  %vm1106_vm9 = vweird.f32 %v1100_v41 }
 0x2df   :  { %2268 = vtanh.f32 %v1024_v39 }
 0x2e0   :  { %v1113_v39 = vor.u32 1.1754944e-38, %v1112_v12  ;;  %vm1111_vm11 = vcmp.eq.f32.partialorder %v1110_v1, 8.507059e+37  ;;  %v4909_v12 = vld [vmem:[#allocation23_spill] sm:$0xff] }
 0x2e1   :  { %v2265_v28 = vpop.eup %2264 }
 0x2e2   :  { %v1120_v17 = vadd.f32 1.0, %v2265_v28 }
 0x2e4   :  { %v2267_v13 = vpop.eup %2266  ;;  %2270 = vrcp.f32 %v1120_v17  ;;  %vm1126_vm13 = vweird.f32 %v1120_v17 }
 0x2e5   :  { %v1102_v0 = vmul.f32 %v2267_v13, %v1100_v41  ;;  %v2269_v8 = vpop.eup %2268  ;;  %vm1107_vm8 = vweird.f32 %v2267_v13 }
 0x2e6   :  { %v1027_v32 = vmul.f32 %v2269_v8, %v1026_v49  ;;  %vm1108_vm10 = vmor %vm1106_vm9, %vm1107_vm8 }
 0x2e7   :  { %v1103_v37 = vsub.f32 1.0, %v1102_v0  ;;  %v1136_v0 = vadd.f32 %v3791_v63, %v1093_v35  ;;  %v4913_v35 = vld [vmem:[#allocation75_spill] sm:$0xff] }
 0x2e8   :  { %v3789_v48 = vadd.f32 %v1028_v59, %v1027_v32  ;;  %v4910_v32 = vld [vmem:[#allocation74_spill] sm:$0xff] }
 0x2e9   :  { %v1104_v23 = vmul.f32 %v2267_v13, %v1103_v37  ;;  %v1130_v37 = vand.u32 2147483647, %v1120_v17  ;;  %v4911_v59 = vld [vmem:[#allocation22_spill] sm:$0xff] }
 0x2ea   :  { %v2271_v53 = vpop.eup %2270  ;;  %2134 = vst [vmem:[%s4344_s6 + $0x18] sm:$0xff] %v3789_v48  ;;  %1166 = vmatmul.f32.vlgmr.msra.gmra.mxu0 %v3789_v48  ;;  %1186 = vmatmul.f32.vlgmr.msra.gmra.mxu1 %v3789_v48 }
 0x2eb   :  { %v1122_v30 = vmul.f32 %v2271_v53, %v1120_v17  ;;  %v1105_v14 = vadd.f32 %v2267_v13, %v1104_v23  ;;  %v2137_v23 = vld [vmem:[%s4339_s1 + $0x70] sm:$0xff]  ;;  %1206 = vmatmul.f32.vlgmr.msra.gmra.mxu2 %v3789_v48  ;;  %1418 = vmatpush.msra.mxu0 %v3318_v51  ;;  %vm1127_vm12 = vweird.f32 %v2271_v53  ;;  %vm1131_vm15 = vcmp.eq.f32.partialorder %v1130_v37, 8.507059e+37 }
 0x2ec   :  { %1492 = vmatpush.msra.mxu1 %v3322_v16  ;;  %1512 = vmatpush.msra.mxu2 %v3325_v47  ;;  %vm1128_vm14 = vmor %vm1126_vm13, %vm1127_vm12  ;;  %v4925_v37 = vld [vmem:[#allocation79_spill] sm:$0xff] }
 0x2ed   :  { %v1123_v28 = vsub.f32 1.0, %v1122_v30  ;;  %v1109_v57 = vsel %vm1108_vm10, %v2267_v13, %v1105_v14  ;;  %v1132_v13 = vand.u32 2147483648, %v1120_v17  ;;  %1419 = vmatpush.msra.mxu0 %v3329_v20  ;;  %v4908_v17 = vld [vmem:[#allocation20_spill] sm:$0xff]  ;;  %v4915_v14 = vld [vmem:[#allocation27_spill] sm:$0xff] }
 0x2ee   :  { %v1114_v55 = vsel %vm1111_vm11, %v1113_v39, %v1109_v57  ;;  %1493 = vmatpush.msra.mxu1 %v3333_v24  ;;  %1513 = vmatpush.msra.mxu2 %v3336_v61  ;;  %v4914_v30 = vld [vmem:[#allocation24_spill] sm:$0xff]  ;;  %v4918_v57 = vld [vmem:[#allocation30_spill] sm:$0xff] }
 0x2ef   :  { %v1124_v41 = vmul.f32 %v2271_v53, %v1123_v28  ;;  %v1137_v42 = vmul.f32 %v1136_v0, %v1114_v55  ;;  %1420 = vmatpush.msra.mxu0 %v3340_v27  ;;  %v1133_v51 = vor.u32 1.1754944e-38, %v1132_v13  ;;  %v4916_v39 = vld [vmem:[#allocation76_spill] sm:$0xff]  ;;  %v4917_v28 = vld [vmem:[#allocation26_spill] sm:$0xff]  ;;  %v4919_v0 = vld [vmem:[#allocation77_spill] sm:$0xff] }
 0x2f0   :  { %1494 = vmatpush.msra.mxu1 %v3343_v10  ;;  %1514 = vmatpush.msra.mxu2 %v3346_v56  ;;  %v4874_v10 = vld [vmem:[#allocation35_spill] sm:$0xff]  ;;  %v4875_v56 = vld [vmem:[#allocation61_spill] sm:$0xff] }
 0x2f1   :  { %v1125_v49 = vadd.f32 %v2271_v53, %v1124_v41  ;;  %v1138_v8 = vadd.f32 %v2137_v23, %v1137_v42  ;;  %1421 = vmatpush.msra.mxu0 %v3349_v34  ;;  %v4876_v34 = vld [vmem:[#allocation68_spill] sm:$0xff]  ;;  %v4921_v55 = vld [vmem:[#allocation33_spill] sm:$0xff]  ;;  %v4922_v41 = vld [vmem:[#allocation78_spill] sm:$0xff] }
 0x2f2   :  { %1495 = vmatpush.msra.mxu1 %v3352_v11  ;;  %1515 = vmatpush.msra.mxu2 %v3355_v22  ;;  %v4877_v11 = vld [vmem:[#allocation38_spill] sm:$0xff]  ;;  %v4878_v22 = vld [vmem:[#allocation41_spill] sm:$0xff]  ;;  %v4920_v23 = vld [vmem:[#allocation28_spill] sm:$0xff] }
 0x2f3   :  { %v1129_v1 = vsel %vm1128_vm14, %v2271_v53, %v1125_v49  ;;  %2272 = vtanh.f32 %v1138_v8  ;;  %1422 = vmatpush.msra.mxu0 %v3358_v46  ;;  %v4879_v46 = vld [vmem:[#allocation47_spill] sm:$0xff]  ;;  %v4912_v53 = vld [vmem:[#allocation25_spill] sm:$0xff]  ;;  %v4924_v42 = vld [vmem:[#allocation36_spill] sm:$0xff] }
 0x2f4   :  { %v1134_v16 = vsel %vm1131_vm15, %v1133_v51, %v1129_v1  ;;  %1496 = vmatpush.msra.mxu1 %v3361_v5  ;;  %1516 = vmatpush.msra.mxu2 %v3364_v62  ;;  %v4880_v5 = vld [vmem:[#allocation29_spill] sm:$0xff]  ;;  %v4923_v13 = vld [vmem:[#allocation31_spill] sm:$0xff]  ;;  %v4926_v49 = vld [vmem:[#allocation34_spill] sm:$0xff] }
 0x2f5   :  { %v1140_v47 = vsub.f32 1.0, %v1134_v16  ;;  %1423 = vmatpush.msra.mxu0 %v3367_v36  ;;  %v1142_v61 = vmul.f32 %v1134_v16, %v3693_v60  ;;  %v4881_v62 = vld [vmem:[#allocation49_spill] sm:$0xff]  ;;  %v4882_v36 = vld [vmem:[#allocation54_spill] sm:$0xff]  ;;  %v4904_v60 = vld [vmem:[#allocation72_spill] sm:$0xff] }
 0x2f6   :  { %1497 = vmatpush.msra.mxu1 %v3370_v26  ;;  %1517 = vmatpush.msra.mxu2 %v3373_v58  ;;  %v4883_v26 = vld [vmem:[#allocation55_spill] sm:$0xff]  ;;  %v4884_v58 = vld [vmem:[#allocation56_spill] sm:$0xff]  ;;  %v4928_v51 = vld [vmem:[#allocation37_spill] sm:$0xff] }
 0x2f7   :  { %1424 = vmatpush.msra.mxu0 %v3377_v54  ;;  %v4885_v54 = vld [vmem:[#allocation57_spill] sm:$0xff]  ;;  %v4927_v8 = vld [vmem:[#allocation39_spill] sm:$0xff]  ;;  %v4929_v1 = vld [vmem:[#allocation42_spill] sm:$0xff] }
 0x2f8   :  { %1498 = vmatpush.msra.mxu1 %v3380_v50  ;;  %1518 = vmatpush.msra.mxu2 %v3383_v44  ;;  %v4886_v50 = vld [vmem:[#allocation58_spill] sm:$0xff]  ;;  %v4887_v44 = vld [vmem:[#allocation60_spill] sm:$0xff] }
 0x2f9   :  { %v2273_v20 = vpop.eup %2272  ;;  %1425 = vmatpush.msra.mxu0 %v3388_v38  ;;  %v4888_v38 = vld [vmem:[#allocation44_spill] sm:$0xff] }
 0x2fa   :  { %v1141_v24 = vmul.f32 %v2273_v20, %v1140_v47  ;;  %1499 = vmatpush.msra.mxu1 %v3391_v52  ;;  %1519 = vmatpush.msra.mxu2 %v3394_v45  ;;  %v4889_v52 = vld [vmem:[#allocation40_spill] sm:$0xff]  ;;  %v4890_v45 = vld [vmem:[#allocation63_spill] sm:$0xff]  ;;  %v2142_v47 = vld [vmem:[%s4338_s0 + $0x68] sm:$0xff] }
 0x2fb   :  { %1426 = vmatpush.msra.mxu0 %v3404_v40  ;;  %v4891_v40 = vld [vmem:[#allocation64_spill] sm:$0xff] }
 0x2fc   :  { %v3826_v27 = vadd.f32 %v1142_v61, %v1141_v24  ;;  %1500 = vmatpush.msra.mxu1 %v3410_v19  ;;  %1520 = vmatpush.msra.mxu2 %v3416_v21  ;;  %v4893_v19 = vld [vmem:[#allocation67_spill] sm:$0xff]  ;;  %v4895_v21 = vld [vmem:[#allocation69_spill] sm:$0xff] }
 0x2fd   :  { %1427 = vmatpush.msra.mxu0 %v3413_v3  ;;  %v4894_v3 = vld [vmem:[#allocation51_spill] sm:$0xff]  ;;  %v2141_v16 = vld [vmem:[%s4338_s0 + $0x60] sm:$0xff] }
 0x2fe   :  { %2140 = vst [vmem:[%s4345_s7 + $0x20] sm:$0xff] %v3826_v27  ;;  %1280 = vmatmul.f32.vlgmr.msra.gmra.mxu3 %v3826_v27  ;;  %1300 = vmatmul.f32.vlgmr.msrb.gmra.mxu0 %v3826_v27 }
 0x2ff   :  { %1320 = vmatmul.f32.vlgmr.msrb.gmra.mxu1 %v3826_v27  ;;  %1532 = vmatpush.msra.mxu3 %v3407_v2  ;;  %v4892_v2 = vld [vmem:[#allocation66_spill] sm:$0xff] }
 0x300   :  { %1501 = vmatpush.msra.mxu1 %v3422_v6  ;;  %1428 = vmatpush.msra.mxu0 %v3425_v9  ;;  %v4897_v6 = vld [vmem:[#allocation16_spill] sm:$0xff]  ;;  %v4898_v9 = vld [vmem:[#allocation70_spill] sm:$0xff] }
 0x301   :  { %1533 = vmatpush.msra.mxu3 %v3419_v25  ;;  %1521 = vmatpush.msra.mxu2 %v3428_v29  ;;  %v4896_v25 = vld [vmem:[#allocation13_spill] sm:$0xff]  ;;  %v4899_v29 = vld [vmem:[#allocation14_spill] sm:$0xff] }
 0x302   :  { %1502 = vmatpush.msra.mxu1 %v3434_v33  ;;  %1429 = vmatpush.msra.mxu0 %v3437_v7  ;;  %v4900_v33 = vld [vmem:[#allocation17_spill] sm:$0xff]  ;;  %v4901_v7 = vld [vmem:[#allocation71_spill] sm:$0xff] }
 0x303   :  { %1534 = vmatpush.msra.mxu3 %v4817_v43  ;;  %1522 = vmatpush.msra.mxu2 %v3440_v15  ;;  %v4902_v15 = vld [vmem:[#allocation15_spill] sm:$0xff]  ;;  %v4906_v43 = vld [vmem:[#allocation21_spill] sm:$0xff] }
 0x304   :  { %1503 = vmatpush.msra.mxu1 %v3446_v18  ;;  %1430 = vmatpush.msra.mxu0 %v4815_v4  ;;  %v4903_v18 = vld [vmem:[#allocation19_spill] sm:$0xff]  ;;  %v4905_v4 = vld [vmem:[#allocation18_spill] sm:$0xff] }
 0x305   :  { %1535 = vmatpush.msra.mxu3 %v4821_v31  ;;  %1523 = vmatpush.msra.mxu2 %v4874_v10  ;;  %v4907_v31 = vld [vmem:[#allocation73_spill] sm:$0xff] }
 0x306   :  { %1504 = vmatpush.msra.mxu1 %v4876_v34  ;;  %1431 = vmatpush.msra.mxu0 %v4877_v11 }
 0x307   :  { %1536 = vmatpush.msra.mxu3 %v4875_v56  ;;  %1524 = vmatpush.msra.mxu2 %v4878_v22 }
 0x308   :  { %1505 = vmatpush.msra.mxu1 %v4880_v5  ;;  %1432 = vmatpush.msra.mxu0 %v4881_v62  ;;  %v2148_v62 = vld [vmem:[%s4339_s1 + $0x50] sm:$0xff] }
 0x309   :  { %1537 = vmatpush.msra.mxu3 %v4879_v46  ;;  %1525 = vmatpush.msra.mxu2 %v4882_v36 }
 0x30a   :  { %1506 = vmatpush.msra.mxu1 %v4884_v58  ;;  %1433 = vmatpush.msra.mxu0 %v4885_v54 }
 0x30b   :  { %1538 = vmatpush.msra.mxu3 %v4883_v26  ;;  %1526 = vmatpush.msra.mxu2 %v4886_v50 }
 0x30c   :  { %1507 = vmatpush.msra.mxu1 %v4888_v38  ;;  %1606 = vmatpush.msrb.mxu0 %v4890_v45  ;;  %v2147_v38 = vld [vmem:[%s4339_s1 + $0x48] sm:$0xff] }
 0x30d   :  { %1539 = vmatpush.msra.mxu3 %v4887_v44  ;;  %1527 = vmatpush.msra.mxu2 %v4889_v52 }
 0x30e   :  { %1626 = vmatpush.msrb.mxu1 %v4892_v2  ;;  %1607 = vmatpush.msrb.mxu0 %v4893_v19 }
 0x30f   :  { %1540 = vmatpush.msra.mxu3 %v4891_v40 }
 0x310   :  { %1627 = vmatpush.msrb.mxu1 %v4895_v21  ;;  %1608 = vmatpush.msrb.mxu0 %v4896_v25 }
 0x311   :  { %1541 = vmatpush.msra.mxu3 %v4894_v3 }
 0x312   :  { %1628 = vmatpush.msrb.mxu1 %v4898_v9  ;;  %1609 = vmatpush.msrb.mxu0 %v4899_v29 }
 0x313   :  { %1542 = vmatpush.msra.mxu3 %v4897_v6 }
 0x314   :  { %1629 = vmatpush.msrb.mxu1 %v4901_v7  ;;  %1610 = vmatpush.msrb.mxu0 %v4902_v15 }
 0x315   :  { %1543 = vmatpush.msra.mxu3 %v4900_v33 }
 0x316   :  { %1630 = vmatpush.msrb.mxu1 %v4904_v60  ;;  %1611 = vmatpush.msrb.mxu0 %v4905_v4  ;;  %v4930_v4 = vld [vmem:[#allocation45_spill] sm:$0xff] }
 0x317   :  { %1544 = vmatpush.msra.mxu3 %v4903_v18 }
 0x318   :  { %1631 = vmatpush.msrb.mxu1 %v4907_v31  ;;  %1612 = vmatpush.msrb.mxu0 %v4908_v17 }
 0x319   :  { %1545 = vmatpush.msra.mxu3 %v4906_v43 }
 0x31a   :  { %1632 = vmatpush.msrb.mxu1 %v4910_v32  ;;  %1613 = vmatpush.msrb.mxu0 %v4911_v59 }
 0x31b   :  { %1546 = vmatpush.msra.mxu3 %v4909_v12  ;;  %v2143_v12 = vld [vmem:[%s4338_s0 + $0x70] sm:$0xff] }
 0x31c   :  { %1633 = vmatpush.msrb.mxu1 %v4913_v35  ;;  %1614 = vmatpush.msrb.mxu0 %v4914_v30 }
 0x31d   :  { %1547 = vmatpush.msra.mxu3 %v4912_v53 }
 0x31e   :  { %1634 = vmatpush.msrb.mxu1 %v4915_v14  ;;  %1615 = vmatpush.msrb.mxu0 %v4916_v39 }
 0x320   :  { %1635 = vmatpush.msrb.mxu1 %v4917_v28  ;;  %1616 = vmatpush.msrb.mxu0 %v4918_v57 }
 0x322   :  { %1636 = vmatpush.msrb.mxu1 %v4919_v0  ;;  %1617 = vmatpush.msrb.mxu0 %v4920_v23 }
 0x324   :  { %1637 = vmatpush.msrb.mxu1 %v4921_v55  ;;  %1618 = vmatpush.msrb.mxu0 %v4922_v41 }
 0x326   :  { %1638 = vmatpush.msrb.mxu1 %v4923_v13  ;;  %1619 = vmatpush.msrb.mxu0 %v4924_v42 }
 0x328   :  { %1639 = vmatpush.msrb.mxu1 %v4925_v37  ;;  %1620 = vmatpush.msrb.mxu0 %v4926_v49 }
 0x32a   :  { %1640 = vmatpush.msrb.mxu1 %v4927_v8  ;;  %1621 = vmatpush.msrb.mxu0 %v4928_v51 }
 0x32c   :  { %1641 = vmatpush.msrb.mxu1 %v4929_v1 }
 0x367   :  { %v1167_v20 = vpop.f32.mrf.mxu0  ;;  %v1187_v24 = vpop.f32.mrf.mxu1 }
 0x368   :  { %v1210_v61 = vadd.f32 %v2141_v16, %v1167_v20  ;;  %v1230_v10 = vadd.f32 %v2142_v47, %v1187_v24  ;;  %v3943_v20 = vld [vmem:[#allocation3 + $0x178] sm:$0xff] }
 0x36a   :  { %v2144_v56 = vmul.f32 -1.442695, %v1210_v61  ;;  %v2145_v34 = vmul.f32 -1.442695, %v1230_v10  ;;  %v3946_v61 = vld [vmem:[#allocation5 + $0x168] sm:$0xff]  ;;  %v3949_v10 = vld [vmem:[#allocation5 + $0x170] sm:$0xff] }
 0x36c   :  { %2274 = vpow2.f32 %v2144_v56 }
 0x36d   :  { %2276 = vpow2.f32 %v2145_v34 }
 0x36e   :  { %v1207_v29 = vpop.f32.mrf.mxu2 }
 0x36f   :  { %v1250_v43 = vadd.f32 %v4930_v4, %v1207_v29 }
 0x372   :  { %v2275_v11 = vpop.eup %2274 }
 0x373   :  { %v2277_v22 = vpop.eup %2276  ;;  %v1214_v46 = vadd.f32 1.0, %v2275_v11  ;;  %v3953_v11 = vld [vmem:[#allocation3 + $0x160] sm:$0xff] }
 0x374   :  { %v1234_v5 = vadd.f32 1.0, %v2277_v22 }
 0x375   :  { %2278 = vrcp.f32 %v1214_v46  ;;  %v1226_v3 = vand.u32 2147483648, %v1214_v46  ;;  %v1224_v6 = vand.u32 2147483647, %v1214_v46  ;;  %vm1220_vm1 = vweird.f32 %v1214_v46 }
 0x376   :  { %2280 = vrcp.f32 %v1234_v5  ;;  %v1246_v59 = vand.u32 2147483648, %v1234_v5  ;;  %vm1240_vm5 = vweird.f32 %v1234_v5  ;;  %v1244_v35 = vand.u32 2147483647, %v1234_v5 }
 0x377   :  { %v1227_v18 = vor.u32 1.1754944e-38, %v1226_v3  ;;  %vm1225_vm3 = vcmp.eq.f32.partialorder %v1224_v6, 8.507059e+37  ;;  %v3982_v3 = vld [vmem:[#allocation5 + $0x120] sm:$0xff]  ;;  %v3990_v6 = vld [vmem:[#allocation3 + $0x118] sm:$0xff] }
 0x378   :  { %v1247_v28 = vor.u32 1.1754944e-38, %v1246_v59  ;;  %vm1245_vm7 = vcmp.eq.f32.partialorder %v1244_v35, 8.507059e+37  ;;  %v4023_v59 = vld [vmem:[#allocation5 + $0xe0] sm:$0xff] }
 0x379   :  { %v4029_v35 = vld [vmem:[#allocation5 + $0xc0] sm:$0xff] }
 0x37b   :  { %v1301_v36 = vpop.f32.mrf.mxu0  ;;  %v2279_v58 = vpop.eup %2278 }
 0x37c   :  { %v1344_v26 = vadd.f32 %v2148_v62, %v1301_v36  ;;  %v2281_v50 = vpop.eup %2280  ;;  %v1216_v44 = vmul.f32 %v2279_v58, %v1214_v46  ;;  %vm1221_vm0 = vweird.f32 %v2279_v58  ;;  %v1321_v34 = vpop.f32.mrf.mxu1  ;;  %v3956_v46 = vld [vmem:[#allocation5 + $0x150] sm:$0xff]  ;;  %v3963_v36 = vld [vmem:[#allocation3 + $0x148] sm:$0xff] }
 0x37d   :  { %v1236_v45 = vmul.f32 %v2281_v50, %v1234_v5  ;;  %vm1222_vm2 = vmor %vm1220_vm1, %vm1221_vm0  ;;  %vm1241_vm4 = vweird.f32 %v2281_v50  ;;  %v3959_v5 = vld [vmem:[#allocation5 + $0x158] sm:$0xff] }
 0x37e   :  { %v2151_v54 = vmul.f32 -1.442695, %v1344_v26  ;;  %v1217_v40 = vsub.f32 1.0, %v1216_v44  ;;  %vm1242_vm6 = vmor %vm1240_vm5, %vm1241_vm4  ;;  %v1364_v26 = vadd.f32 %v3791_v63, %v1321_v34  ;;  %v4090_v34 = vld [vmem:[#allocation5 + $0x48] sm:$0xff] }
 0x37f   :  { %v1237_v19 = vsub.f32 1.0, %v1236_v45  ;;  %v2149_v45 = vld [vmem:[%s4339_s1 + $0x58] sm:$0xff]  ;;  %4936 = vst [vmem:[#allocation52_spill] sm:$0xff] %v4090_v34 }
 0x380   :  { %2282 = vpow2.f32 %v2151_v54  ;;  %v1218_v25 = vmul.f32 %v2279_v58, %v1217_v40  ;;  %v3967_v54 = vld [vmem:[#allocation5 + $0x138] sm:$0xff]  ;;  %v3978_v40 = vld [vmem:[#allocation3 + $0x130] sm:$0xff] }
 0x381   :  { %v1281_v2 = vpop.f32.mrf.mxu3  ;;  %v1238_v9 = vmul.f32 %v2281_v50, %v1237_v19 }
 0x382   :  { %v1324_v21 = vadd.f32 %v2147_v38, %v1281_v2  ;;  %v1219_v7 = vadd.f32 %v2279_v58, %v1218_v25 }
 0x383   :  { %v1239_v17 = vadd.f32 %v2281_v50, %v1238_v9  ;;  %v4123_v9 = vld [vmem:[#allocation3 + $0x10] sm:$0xff] }
 0x384   :  { %v2150_v33 = vmul.f32 -1.442695, %v1324_v21  ;;  %v1223_v60 = vsel %vm1222_vm2, %v2279_v58, %v1219_v7  ;;  %v3985_v21 = vld [vmem:[#allocation5 + $0x128] sm:$0xff]  ;;  %v4002_v7 = vld [vmem:[#allocation5 + $0x110] sm:$0xff]  ;;  %4946 = vst [vmem:[#allocation38_spill] sm:$0xff] %v4123_v9 }
 0x385   :  { %v1228_v32 = vsel %vm1225_vm3, %v1227_v18, %v1223_v60  ;;  %v1243_v39 = vsel %vm1242_vm6, %v2281_v50, %v1239_v17  ;;  %v3970_v50 = vld [vmem:[#allocation5 + $0x140] sm:$0xff]  ;;  %v4017_v17 = vld [vmem:[#allocation3 + $0xe8] sm:$0xff] }
 0x386   :  { %v2283_v15 = vpop.eup %2282  ;;  %2284 = vpow2.f32 %v2150_v33  ;;  %v1251_v53 = vmul.f32 %v1250_v43, %v1228_v32  ;;  %v1248_v0 = vsel %vm1245_vm7, %v1247_v28, %v1243_v39  ;;  %v3999_v33 = vld [vmem:[#allocation5 + $0x108] sm:$0xff]  ;;  %v4008_v18 = vld [vmem:[#allocation3 + $0x100] sm:$0xff]  ;;  %v4011_v43 = vld [vmem:[#allocation5 + $0xf0] sm:$0xff] }
 0x387   :  { %v3923_v31 = vadd.f32 1.0, %v2283_v15  ;;  %v1254_v55 = vsub.f32 1.0, %v1248_v0  ;;  %v1256_v37 = vmul.f32 %v1248_v0, %v3789_v48  ;;  %v4020_v32 = vld [vmem:[#allocation5 + $0xd8] sm:$0xff]  ;;  %v4041_v0 = vld [vmem:[#allocation5 + $0xb0] sm:$0xff] }
 0x388   :  { %v1252_v30 = vadd.f32 %v2143_v12, %v1251_v53  ;;  %v4026_v53 = vld [vmem:[#allocation3 + $0xd0] sm:$0xff]  ;;  %v4035_v39 = vld [vmem:[#allocation3 + $0xb8] sm:$0xff] }
 0x389   :  { %2286 = vrcp.f32 %v3923_v31  ;;  %v1360_v2 = vand.u32 2147483648, %v3923_v31  ;;  %vm1354_vm13 = vweird.f32 %v3923_v31  ;;  %v1358_v25 = vand.u32 2147483647, %v3923_v31 }
 0x38a   :  { %2288 = vtanh.f32 %v1252_v30  ;;  %v4032_v30 = vld [vmem:[#allocation5 + $0xc8] sm:$0xff] }
 0x38b   :  { %v1361_v60 = vor.u32 1.1754944e-38, %v1360_v2  ;;  %vm1359_vm15 = vcmp.eq.f32.partialorder %v1358_v25, 8.507059e+37  ;;  %v4114_v2 = vld [vmem:[#allocation5 + $0x18] sm:$0xff]  ;;  %v4120_v25 = vld [vmem:[#allocation5 + $0x20] sm:$0xff] }
 0x38c   :  { %v2285_v14 = vpop.eup %2284  ;;  %4943 = vst [vmem:[#allocation35_spill] sm:$0xff] %v4114_v2 }
 0x38d   :  { %v1328_v57 = vadd.f32 1.0, %v2285_v14  ;;  %4945 = vst [vmem:[#allocation68_spill] sm:$0xff] %v4120_v25 }
 0x38f   :  { %2290 = vrcp.f32 %v1328_v57  ;;  %v3929_v23 = vpop.eup %2286  ;;  %v1340_v47 = vand.u32 2147483648, %v1328_v57  ;;  %v1338_v24 = vand.u32 2147483647, %v1328_v57  ;;  %vm1334_vm9 = vweird.f32 %v1328_v57 }
 0x390   :  { %v2289_v41 = vpop.eup %2288  ;;  %v1350_v13 = vmul.f32 %v3929_v23, %v3923_v31  ;;  %vm1355_vm12 = vweird.f32 %v3929_v23  ;;  %v4014_v31 = vld [vmem:[#allocation5 + $0xf8] sm:$0xff] }
 0x391   :  { %v1255_v42 = vmul.f32 %v2289_v41, %v1254_v55  ;;  %v1341_v62 = vor.u32 1.1754944e-38, %v1340_v47  ;;  %vm1339_vm11 = vcmp.eq.f32.partialorder %v1338_v24, 8.507059e+37  ;;  %vm3995_vm14 = vmor %vm1354_vm13, %vm1355_vm12  ;;  %v4045_v41 = vld [vmem:[#allocation3 + $0xa0] sm:$0xff]  ;;  %v4084_v24 = vld [vmem:[#allocation5 + $0x68] sm:$0xff] }
 0x392   :  { %v1351_v1 = vsub.f32 1.0, %v1350_v13  ;;  %v4048_v13 = vld [vmem:[#allocation5 + $0x90] sm:$0xff]  ;;  %v4078_v47 = vld [vmem:[#allocation5 + $0x60] sm:$0xff]  ;;  %4934 = vst [vmem:[#allocation48_spill] sm:$0xff] %v4084_v24 }
 0x393   :  { %v3934_v51 = vadd.f32 %v1256_v37, %v1255_v42  ;;  %v4051_v42 = vld [vmem:[#allocation5 + $0x98] sm:$0xff]  ;;  %4933 = vst [vmem:[#allocation43_spill] sm:$0xff] %v4078_v47 }
 0x394   :  { %v1352_v56 = vmul.f32 %v3929_v23, %v1351_v1  ;;  %v4072_v1 = vld [vmem:[#allocation5 + $0x178] sm:$0xff] }
 0x395   :  { %v2291_v49 = vpop.eup %2290  ;;  %2146 = vst [vmem:[%s4344_s6 + $0x20] sm:$0xff] %v3934_v51  ;;  %1394 = vmatmul.f32.vlgmr.msrb.gmra.mxu2 %v3934_v51  ;;  %1414 = vmatmul.f32.vlgmr.msrb.gmra.mxu3 %v3934_v51 }
 0x396   :  { %v1330_v8 = vmul.f32 %v2291_v49, %v1328_v57  ;;  %1434 = vmatmul.f32.vlgmr.msra.gmra.mxu0 %v3934_v51  ;;  %1646 = vmatpush.msrb.mxu2 %v3943_v20  ;;  %vm1335_vm8 = vweird.f32 %v2291_v49  ;;  %v1353_v44 = vadd.f32 %v3929_v23, %v1352_v56  ;;  %v4038_v57 = vld [vmem:[#allocation5 + $0xa8] sm:$0xff]  ;;  %v4087_v56 = vld [vmem:[#allocation3 + $0x58] sm:$0xff] }
 0x397   :  { %1720 = vmatpush.msrb.mxu3 %v3946_v61  ;;  %1740 = vmatpush.msra.mxu0 %v3949_v10  ;;  %vm1336_vm10 = vmor %vm1334_vm9, %vm1335_vm8  ;;  %4935 = vst [vmem:[#allocation46_spill] sm:$0xff] %v4087_v56 }
 0x398   :  { %v1331_v16 = vsub.f32 1.0, %v1330_v8  ;;  %1647 = vmatpush.msrb.mxu2 %v3953_v11  ;;  %v1357_v15 = vsel %vm3995_vm14, %v3929_v23, %v1353_v44  ;;  %v4059_v8 = vld [vmem:[#allocation5 + $0x78] sm:$0xff]  ;;  %v4105_v44 = vld [vmem:[#allocation5 + $0x130] sm:$0xff] }
 0x399   :  { %1721 = vmatpush.msrb.mxu3 %v3956_v46  ;;  %1741 = vmatpush.msra.mxu0 %v3959_v5  ;;  %v1362_v12 = vsel %vm1359_vm15, %v1361_v60, %v1357_v15  ;;  %4940 = vst [vmem:[#allocation65_spill] sm:$0xff] %v4105_v44  ;;  %v4129_v15 = vld [vmem:[#allocation5 + $0x100] sm:$0xff]  ;;  %v2505_v60 = vld [vmem:[#allocation3 + $0x168] sm:$0xff] }
 0x39a   :  { %v1332_v48 = vmul.f32 %v2291_v49, %v1331_v16  ;;  %1648 = vmatpush.msrb.mxu2 %v3963_v36  ;;  %v1368_v14 = vsub.f32 1.0, %v1362_v12  ;;  %v1370_v55 = vmul.f32 %v1362_v12, %v3826_v27  ;;  %v4062_v27 = vld [vmem:[#allocation5 + $0x80] sm:$0xff]  ;;  %v4075_v16 = vld [vmem:[#allocation3 + $0x70] sm:$0xff]  ;;  %4948 = vst [vmem:[#allocation47_spill] sm:$0xff] %v4129_v15 }
 0x39b   :  { %1722 = vmatpush.msrb.mxu3 %v3967_v54  ;;  %1742 = vmatpush.msra.mxu0 %v3970_v50  ;;  %v2506_v12 = vld [vmem:[#allocation3 + $0x170] sm:$0xff] }
 0x39c   :  { %v1333_v22 = vadd.f32 %v2291_v49, %v1332_v48  ;;  %1649 = vmatpush.msrb.mxu2 %v3978_v40  ;;  %v4081_v48 = vld [vmem:[#allocation5 + $0x160] sm:$0xff] }
 0x39d   :  { %1723 = vmatpush.msrb.mxu3 %v3982_v3  ;;  %1743 = vmatpush.msra.mxu0 %v3985_v21 }
 0x39e   :  { %v1337_v58 = vsel %vm1336_vm10, %v2291_v49, %v1333_v22  ;;  %1650 = vmatpush.msrb.mxu2 %v3990_v6  ;;  %v4056_v49 = vld [vmem:[#allocation3 + $0x88] sm:$0xff] }
 0x39f   :  { %v1342_v38 = vsel %vm1339_vm11, %v1341_v62, %v1337_v58  ;;  %1724 = vmatpush.msrb.mxu3 %v3999_v33  ;;  %1744 = vmatpush.msra.mxu0 %v4002_v7  ;;  %v4093_v22 = vld [vmem:[#allocation5 + $0x148] sm:$0xff]  ;;  %v4096_v62 = vld [vmem:[#allocation5 + $0x50] sm:$0xff] }
 0x3a0   :  { %v1365_v19 = vmul.f32 %v1364_v26, %v1342_v38  ;;  %1651 = vmatpush.msrb.mxu2 %v4008_v18  ;;  %4937 = vst [vmem:[#allocation50_spill] sm:$0xff] %v4096_v62  ;;  %v4099_v26 = vld [vmem:[#allocation3 + $0x40] sm:$0xff]  ;;  %v4102_v58 = vld [vmem:[#allocation5 + $0x30] sm:$0xff]  ;;  %v4108_v38 = vld [vmem:[#allocation5 + $0x38] sm:$0xff] }
 0x3a1   :  { %1725 = vmatpush.msrb.mxu3 %v4011_v43  ;;  %1745 = vmatpush.msra.mxu0 %v4014_v31  ;;  %4938 = vst [vmem:[#allocation53_spill] sm:$0xff] %v4099_v26 }
 0x3a2   :  { %v1366_v29 = vadd.f32 %v2149_v45, %v1365_v19  ;;  %1652 = vmatpush.msrb.mxu2 %v4017_v17  ;;  %4939 = vst [vmem:[#allocation59_spill] sm:$0xff] %v4102_v58  ;;  %v4111_v45 = vld [vmem:[#allocation3 + $0x28] sm:$0xff]  ;;  %v4117_v19 = vld [vmem:[#allocation5 + $0x118] sm:$0xff] }
 0x3a3   :  { %1726 = vmatpush.msrb.mxu3 %v4020_v32  ;;  %1746 = vmatpush.msra.mxu0 %v4023_v59  ;;  %4941 = vst [vmem:[#allocation62_spill] sm:$0xff] %v4108_v38 }
 0x3a4   :  { %2292 = vtanh.f32 %v1366_v29  ;;  %1653 = vmatpush.msrb.mxu2 %v4026_v53  ;;  %4942 = vst [vmem:[#allocation32_spill] sm:$0xff] %v4111_v45  ;;  %v4126_v29 = vld [vmem:[#allocation5] sm:$0xff] }
 0x3a5   :  { %1727 = vmatpush.msrb.mxu3 %v4029_v35  ;;  %1747 = vmatpush.msra.mxu0 %v4032_v30  ;;  %4944 = vst [vmem:[#allocation61_spill] sm:$0xff] %v4117_v19 }
 0x3a6   :  { %1654 = vmatpush.msrb.mxu2 %v4035_v39  ;;  %4947 = vst [vmem:[#allocation41_spill] sm:$0xff] %v4126_v29 }
 0x3a7   :  { %1728 = vmatpush.msrb.mxu3 %v4038_v57  ;;  %1748 = vmatpush.msra.mxu0 %v4041_v0 }
 0x3a8   :  { %1655 = vmatpush.msrb.mxu2 %v4045_v41 }
 0x3a9   :  { %1729 = vmatpush.msrb.mxu3 %v4048_v13  ;;  %1749 = vmatpush.msra.mxu0 %v4051_v42 }
 0x3aa   :  { %v2293_v28 = vpop.eup %2292  ;;  %1656 = vmatpush.msrb.mxu2 %v4056_v49 }
 0x3ab   :  { %v1369_v23 = vmul.f32 %v2293_v28, %v1368_v14  ;;  %1730 = vmatpush.msrb.mxu3 %v4059_v8  ;;  %1750 = vmatpush.msra.mxu0 %v4062_v27  ;;  %v4133_v14 = vld [vmem:[#allocation5 + $0xe8] sm:$0xff]  ;;  %v2508_v28 = vld [vmem:[#allocation3 + $0x150] sm:$0xff] }
 0x3ac   :  { %1657 = vmatpush.msrb.mxu2 %v4075_v16  ;;  %4949 = vst [vmem:[#allocation29_spill] sm:$0xff] %v4133_v14 }
 0x3ad   :  { %v4054_v37 = vadd.f32 %v1370_v55, %v1369_v23  ;;  %1731 = vmatpush.msrb.mxu3 %v4078_v47  ;;  %1751 = vmatpush.msra.mxu0 %v4084_v24  ;;  %v2509_v23 = vld [vmem:[#allocation3 + $0x158] sm:$0xff]  ;;  %v4136_v55 = vld [vmem:[#allocation5 + $0xd0] sm:$0xff] }
 0x3ae   :  { %1658 = vmatpush.msrb.mxu2 %v4087_v56  ;;  %4950 = vst [vmem:[#allocation49_spill] sm:$0xff] %v4136_v55 }
 0x3af   :  { %2152 = vst [vmem:[%s4345_s7 + $0x18] sm:$0xff] %v4054_v37  ;;  %1508 = vmatmul.f32.vlgmr.msra.gmra.mxu1 %v4054_v37  ;;  %1528 = vmatmul.f32.vlgmr.msra.gmra.mxu2 %v4054_v37 }
 0x3b0   :  { %1548 = vmatmul.f32.vlgmr.msra.gmra.mxu3 %v4054_v37  ;;  %1760 = vmatpush.msra.mxu1 %v4072_v1 }
 0x3b1   :  { %1732 = vmatpush.msrb.mxu3 %v4090_v34  ;;  %1752 = vmatpush.msra.mxu0 %v4096_v62 }
 0x3b2   :  { %1761 = vmatpush.msra.mxu1 %v4081_v48  ;;  %1659 = vmatpush.msrb.mxu2 %v4099_v26 }
 0x3b3   :  { %1733 = vmatpush.msrb.mxu3 %v4102_v58  ;;  %1753 = vmatpush.msra.mxu0 %v4108_v38 }
 0x3b4   :  { %1762 = vmatpush.msra.mxu1 %v4093_v22  ;;  %1660 = vmatpush.msrb.mxu2 %v4111_v45  ;;  %v2159_v45 = vld [vmem:[%s4339_s1 + $0x30] sm:$0xff] }
 0x3b5   :  { %1734 = vmatpush.msrb.mxu3 %v4114_v2  ;;  %1754 = vmatpush.msra.mxu0 %v4120_v25  ;;  %v2512_v25 = vld [vmem:[#allocation3 + $0x140] sm:$0xff]  ;;  %v2540_v2 = vld [vmem:[#allocation3 + $0x50] sm:$0xff] }
 0x3b6   :  { %1763 = vmatpush.msra.mxu1 %v4105_v44  ;;  %1661 = vmatpush.msrb.mxu2 %v4123_v9  ;;  %v4142_v9 = vld [vmem:[#allocation5 + $0xa0] sm:$0xff] }
 0x3b7   :  { %1735 = vmatpush.msrb.mxu3 %v4126_v29  ;;  %1755 = vmatpush.msra.mxu0 %v4889_v52  ;;  %v2511_v29 = vld [vmem:[#allocation3 + $0x138] sm:$0xff]  ;;  %4952 = vst [vmem:[#allocation55_spill] sm:$0xff] %v4142_v9 }
 0x3b8   :  { %1764 = vmatpush.msra.mxu1 %v4117_v19  ;;  %1834 = vmatpush.msra.mxu2 %v2505_v60  ;;  %v4139_v52 = vld [vmem:[#allocation5 + $0xb8] sm:$0xff]  ;;  %v2514_v60 = vld [vmem:[#allocation3 + $0x120] sm:$0xff] }
 0x3b9   :  { %1854 = vmatpush.msra.mxu3 %v2506_v12  ;;  %4951 = vst [vmem:[#allocation54_spill] sm:$0xff] %v4139_v52  ;;  %v2515_v12 = vld [vmem:[#allocation3 + $0x128] sm:$0xff] }
 0x3ba   :  { %1765 = vmatpush.msra.mxu1 %v4129_v15  ;;  %1835 = vmatpush.msra.mxu2 %v2508_v28  ;;  %v2517_v28 = vld [vmem:[#allocation3 + $0x108] sm:$0xff] }
 0x3bb   :  { %1855 = vmatpush.msra.mxu3 %v2509_v23  ;;  %v2518_v23 = vld [vmem:[#allocation3 + $0x110] sm:$0xff] }
 0x3bc   :  { %1766 = vmatpush.msra.mxu1 %v4133_v14  ;;  %1836 = vmatpush.msra.mxu2 %v2511_v29  ;;  %v2521_v29 = vld [vmem:[#allocation3 + $0xf8] sm:$0xff]  ;;  %v2544_v14 = vld [vmem:[#allocation3 + $0x20] sm:$0xff] }
 0x3bd   :  { %1856 = vmatpush.msra.mxu3 %v2512_v25  ;;  %v2520_v25 = vld [vmem:[#allocation3 + $0xf0] sm:$0xff] }
 0x3be   :  { %1767 = vmatpush.msra.mxu1 %v4136_v55  ;;  %1837 = vmatpush.msra.mxu2 %v2514_v60  ;;  %v4145_v55 = vld [vmem:[#allocation5 + $0x88] sm:$0xff]  ;;  %v2523_v60 = vld [vmem:[#allocation3 + $0xd8] sm:$0xff] }
 0x3bf   :  { %1857 = vmatpush.msra.mxu3 %v2515_v12  ;;  %4953 = vst [vmem:[#allocation56_spill] sm:$0xff] %v4145_v55  ;;  %v2524_v12 = vld [vmem:[#allocation3 + $0xe0] sm:$0xff] }
 0x3c0   :  { %1768 = vmatpush.msra.mxu1 %v4139_v52  ;;  %1838 = vmatpush.msra.mxu2 %v2517_v28  ;;  %v4148_v52 = vld [vmem:[#allocation5 + $0x70] sm:$0xff]  ;;  %v2526_v28 = vld [vmem:[#allocation3 + $0xc0] sm:$0xff] }
 0x3c1   :  { %1858 = vmatpush.msra.mxu3 %v2518_v23  ;;  %4954 = vst [vmem:[#allocation57_spill] sm:$0xff] %v4148_v52  ;;  %v2527_v23 = vld [vmem:[#allocation3 + $0xc8] sm:$0xff] }
 0x3c2   :  { %1769 = vmatpush.msra.mxu1 %v4142_v9  ;;  %1839 = vmatpush.msra.mxu2 %v2520_v25  ;;  %v4151_v9 = vld [vmem:[#allocation5 + $0x58] sm:$0xff]  ;;  %v2529_v25 = vld [vmem:[#allocation3 + $0xa8] sm:$0xff] }
 0x3c3   :  { %1859 = vmatpush.msra.mxu3 %v2521_v29  ;;  %4955 = vst [vmem:[#allocation58_spill] sm:$0xff] %v4151_v9  ;;  %v2530_v29 = vld [vmem:[#allocation3 + $0xb0] sm:$0xff] }
 0x3c4   :  { %1770 = vmatpush.msra.mxu1 %v4145_v55  ;;  %1840 = vmatpush.msra.mxu2 %v2523_v60  ;;  %v4154_v55 = vld [vmem:[#allocation5 + $0x40] sm:$0xff]  ;;  %v2532_v60 = vld [vmem:[#allocation3 + $0x90] sm:$0xff] }
 0x3c5   :  { %1860 = vmatpush.msra.mxu3 %v2524_v12  ;;  %4956 = vst [vmem:[#allocation60_spill] sm:$0xff] %v4154_v55  ;;  %v2533_v12 = vld [vmem:[#allocation3 + $0x98] sm:$0xff] }
 0x3c6   :  { %1771 = vmatpush.msra.mxu1 %v4148_v52  ;;  %1841 = vmatpush.msra.mxu2 %v2526_v28  ;;  %v4157_v52 = vld [vmem:[#allocation5 + $0x28] sm:$0xff]  ;;  %v2535_v28 = vld [vmem:[#allocation3 + $0x78] sm:$0xff] }
 0x3c7   :  { %1861 = vmatpush.msra.mxu3 %v2527_v23  ;;  %4957 = vst [vmem:[#allocation44_spill] sm:$0xff] %v4157_v52  ;;  %v2536_v23 = vld [vmem:[#allocation3 + $0x80] sm:$0xff] }
 0x3c8   :  { %1772 = vmatpush.msra.mxu1 %v4151_v9  ;;  %1842 = vmatpush.msra.mxu2 %v2529_v25  ;;  %v4160_v9 = vld [vmem:[#allocation5 + $0x10] sm:$0xff]  ;;  %v2538_v25 = vld [vmem:[#allocation3 + $0x68] sm:$0xff] }
 0x3c9   :  { %1862 = vmatpush.msra.mxu3 %v2530_v29  ;;  %4958 = vst [vmem:[#allocation40_spill] sm:$0xff] %v4160_v9  ;;  %v2539_v29 = vld [vmem:[#allocation3 + $0x48] sm:$0xff] }
 0x3ca   :  { %1773 = vmatpush.msra.mxu1 %v4154_v55  ;;  %1843 = vmatpush.msra.mxu2 %v2532_v60  ;;  %v2537_v55 = vld [vmem:[#allocation3 + $0x60] sm:$0xff]  ;;  %v2542_v60 = vld [vmem:[#allocation3 + $0x38] sm:$0xff] }
 0x3cb   :  { %1863 = vmatpush.msra.mxu3 %v2533_v12  ;;  %v2543_v12 = vld [vmem:[#allocation3 + $0x18] sm:$0xff] }
 0x3cc   :  { %1774 = vmatpush.msra.mxu1 %v4157_v52  ;;  %1844 = vmatpush.msra.mxu2 %v2535_v28  ;;  %v2541_v52 = vld [vmem:[#allocation3 + $0x30] sm:$0xff]  ;;  %v2546_v28 = vld [vmem:[#allocation3 + $0x8] sm:$0xff] }
 0x3cd   :  { %1864 = vmatpush.msra.mxu3 %v2536_v23 }
 0x3ce   :  { %1775 = vmatpush.msra.mxu1 %v4160_v9  ;;  %1845 = vmatpush.msra.mxu2 %v2537_v55  ;;  %v2545_v9 = vld [vmem:[#allocation3] sm:$0xff]  ;;  %v2153_v55 = vld [vmem:[%s4338_s0 + $0x78] sm:$0xff] }
 0x3cf   :  { %1865 = vmatpush.msra.mxu3 %v2538_v25 }
 0x3d0   :  { %1846 = vmatpush.msra.mxu2 %v2539_v29 }
 0x3d1   :  { %1866 = vmatpush.msra.mxu3 %v2540_v2  ;;  %v2154_v2 = vld [vmem:[%s4338_s0 + $0x80] sm:$0xff] }
 0x3d2   :  { %1847 = vmatpush.msra.mxu2 %v2541_v52 }
 0x3d3   :  { %1867 = vmatpush.msra.mxu3 %v2542_v60 }
 0x3d4   :  { %1848 = vmatpush.msra.mxu2 %v2543_v12 }
 0x3d5   :  { %1868 = vmatpush.msra.mxu3 %v2544_v14 }
 0x3d6   :  { %1849 = vmatpush.msra.mxu2 %v2545_v9 }
 0x3d7   :  { %1869 = vmatpush.msra.mxu3 %v2546_v28 }
 0x413   :  { %v1435_v19 = vpop.f32.mrf.mxu0 }
 0x414   :  { %v1478_v47 = vadd.f32 %v4930_v4, %v1435_v19 }
 0x418   :  { %v1395_v23 = vpop.f32.mrf.mxu2  ;;  %v1415_v52 = vpop.f32.mrf.mxu3 }
 0x419   :  { %v1438_v25 = vadd.f32 %v2153_v55, %v1395_v23  ;;  %v1458_v29 = vadd.f32 %v2154_v2, %v1415_v52  ;;  %v2160_v23 = vld [vmem:[%s4339_s1 + $0x38] sm:$0xff] }
 0x41b   :  { %v2156_v60 = vmul.f32 -1.442695, %v1438_v25  ;;  %v2157_v12 = vmul.f32 -1.442695, %v1458_v29 }
 0x41d   :  { %2294 = vpow2.f32 %v2156_v60 }
 0x41e   :  { %2296 = vpow2.f32 %v2157_v12 }
 0x423   :  { %v2295_v14 = vpop.eup %2294 }
 0x424   :  { %v2297_v9 = vpop.eup %2296  ;;  %v1442_v38 = vadd.f32 1.0, %v2295_v14 }
 0x425   :  { %v1462_v28 = vadd.f32 1.0, %v2297_v9 }
 0x426   :  { %2298 = vrcp.f32 %v1442_v38  ;;  %v1454_v60 = vand.u32 2147483648, %v1442_v38  ;;  %v1452_v34 = vand.u32 2147483647, %v1442_v38  ;;  %vm1448_vm1 = vweird.f32 %v1442_v38 }
 0x427   :  { %2300 = vrcp.f32 %v1462_v28  ;;  %vm1468_vm5 = vweird.f32 %v1462_v28 }
 0x428   :  { %v1455_v56 = vor.u32 1.1754944e-38, %v1454_v60  ;;  %vm1453_vm3 = vcmp.eq.f32.partialorder %v1452_v34, 8.507059e+37 }
 0x42c   :  { %v1509_v58 = vpop.f32.mrf.mxu1  ;;  %v2299_v62 = vpop.eup %2298 }
 0x42d   :  { %v1552_v15 = vadd.f32 %v2159_v45, %v1509_v58  ;;  %v2301_v55 = vpop.eup %2300  ;;  %v1444_v2 = vmul.f32 %v2299_v62, %v1442_v38  ;;  %vm1449_vm0 = vweird.f32 %v2299_v62  ;;  %v1472_v38 = vand.u32 2147483647, %v1462_v28 }
 0x42e   :  { %v1464_v52 = vmul.f32 %v2301_v55, %v1462_v28  ;;  %vm1450_vm2 = vmor %vm1448_vm1, %vm1449_vm0  ;;  %vm1469_vm4 = vweird.f32 %v2301_v55 }
 0x42f   :  { %v2162_v26 = vmul.f32 -1.442695, %v1552_v15  ;;  %v1445_v25 = vsub.f32 1.0, %v1444_v2  ;;  %vm1470_vm6 = vmor %vm1468_vm5, %vm1469_vm4  ;;  %vm1473_vm7 = vcmp.eq.f32.partialorder %v1472_v38, 8.507059e+37 }
 0x430   :  { %v1465_v12 = vsub.f32 1.0, %v1464_v52 }
 0x431   :  { %2302 = vpow2.f32 %v2162_v26  ;;  %v1446_v9 = vmul.f32 %v2299_v62, %v1445_v25 }
 0x432   :  { %v1529_v29 = vpop.f32.mrf.mxu2  ;;  %v1466_v58 = vmul.f32 %v2301_v55, %v1465_v12 }
 0x433   :  { %v1572_v14 = vadd.f32 %v2160_v23, %v1529_v29  ;;  %v1447_v15 = vadd.f32 %v2299_v62, %v1446_v9  ;;  %v2155_v23 = vld [vmem:[%s4338_s0 + $0x88] sm:$0xff]  ;;  %v1474_v29 = vand.u32 2147483648, %v1462_v28 }
 0x434   :  { %v1467_v52 = vadd.f32 %v2301_v55, %v1466_v58 }
 0x435   :  { %v2163_v45 = vmul.f32 -1.442695, %v1572_v14  ;;  %v1451_v26 = vsel %vm1450_vm2, %v2299_v62, %v1447_v15  ;;  %v1475_v4 = vor.u32 1.1754944e-38, %v1474_v29 }
 0x436   :  { %v1456_v44 = vsel %vm1453_vm3, %v1455_v56, %v1451_v26  ;;  %v1471_v14 = vsel %vm1470_vm6, %v2301_v55, %v1467_v52  ;;  %v1549_v55 = vpop.f32.mrf.mxu3 }
 0x437   :  { %v2303_v24 = vpop.eup %2302  ;;  %2304 = vpow2.f32 %v2163_v45  ;;  %v1479_v25 = vmul.f32 %v1478_v47, %v1456_v44  ;;  %v1476_v56 = vsel %vm1473_vm7, %v1475_v4, %v1471_v14 }
 0x438   :  { %v1556_v2 = vadd.f32 1.0, %v2303_v24  ;;  %v1482_v9 = vsub.f32 1.0, %v1476_v56  ;;  %v1484_v15 = vmul.f32 %v1476_v56, %v3934_v51  ;;  %v2161_v51 = vld [vmem:[%s4339_s1 + $0x40] sm:$0xff] }
 0x439   :  { %v1480_v60 = vadd.f32 %v2155_v23, %v1479_v25 }
 0x43a   :  { %2306 = vrcp.f32 %v1556_v2  ;;  %v1566_v47 = vand.u32 2147483647, %v1556_v2  ;;  %v1568_v44 = vand.u32 2147483648, %v1556_v2  ;;  %vm1562_vm9 = vweird.f32 %v1556_v2 }
 0x43b   :  { %2308 = vtanh.f32 %v1480_v60 }
 0x43c   :  { %v1569_v29 = vor.u32 1.1754944e-38, %v1568_v44  ;;  %vm1567_vm11 = vcmp.eq.f32.partialorder %v1566_v47, 8.507059e+37 }
 0x43d   :  { %v2305_v12 = vpop.eup %2304 }
 0x43e   :  { %v1576_v62 = vadd.f32 1.0, %v2305_v12  ;;  %v1592_v12 = vadd.f32 %v3791_v63, %v1549_v55 }
 0x440   :  { %v2307_v24 = vpop.eup %2306  ;;  %2310 = vrcp.f32 %v1576_v62  ;;  %v1588_v63 = vand.u32 2147483648, %v1576_v62  ;;  %vm1582_vm13 = vweird.f32 %v1576_v62 }
 0x441   :  { %v1558_v34 = vmul.f32 %v2307_v24, %v1556_v2  ;;  %v2309_v58 = vpop.eup %2308  ;;  %vm1563_vm8 = vweird.f32 %v2307_v24 }
 0x442   :  { %v1483_v28 = vmul.f32 %v2309_v58, %v1482_v9  ;;  %vm1564_vm10 = vmor %vm1562_vm9, %vm1563_vm8 }
 0x443   :  { %v1559_v19 = vsub.f32 1.0, %v1558_v34 }
 0x444   :  { %v4180_v25 = vadd.f32 %v1484_v15, %v1483_v28 }
 0x445   :  { %v1560_v45 = vmul.f32 %v2307_v24, %v1559_v19 }
 0x446   :  { %v2311_v26 = vpop.eup %2310  ;;  %2158 = vst [vmem:[%s4344_s6 + $0x28] sm:$0xff] %v4180_v25  ;;  %1622 = vmatmul.f32.vlgmr.msrb.gmra.mxu0 %v4180_v25  ;;  %1642 = vmatmul.f32.vlgmr.msrb.gmra.mxu1 %v4180_v25 }
 0x447   :  { %v1578_v52 = vmul.f32 %v2311_v26, %v1576_v62  ;;  %v1561_v23 = vadd.f32 %v2307_v24, %v1560_v45  ;;  %1662 = vmatmul.f32.vlgmr.msrb.gmra.mxu2 %v4180_v25  ;;  %1874 = vmatpush.msrb.mxu0 %v3943_v20  ;;  %vm1583_vm12 = vweird.f32 %v2311_v26  ;;  %v1589_v20 = vor.u32 1.1754944e-38, %v1588_v63 }
 0x448   :  { %1947 = vmatpush.msrb.mxu1 %v3946_v61  ;;  %1967 = vmatpush.msrb.mxu2 %v3949_v10  ;;  %vm1584_vm14 = vmor %vm1582_vm13, %vm1583_vm12 }
 0x449   :  { %v1579_v38 = vsub.f32 1.0, %v1578_v52  ;;  %v1565_v60 = vsel %vm1564_vm10, %v2307_v24, %v1561_v23  ;;  %v1586_v24 = vand.u32 2147483647, %v1576_v62  ;;  %1875 = vmatpush.msrb.mxu0 %v3953_v11 }
 0x44a   :  { %v1570_v2 = vsel %vm1567_vm11, %v1569_v29, %v1565_v60  ;;  %1948 = vmatpush.msrb.mxu1 %v3956_v46  ;;  %1968 = vmatpush.msrb.mxu2 %v3959_v5 }
 0x44b   :  { %v1580_v14 = vmul.f32 %v2311_v26, %v1579_v38  ;;  %v1593_v4 = vmul.f32 %v1592_v12, %v1570_v2  ;;  %1876 = vmatpush.msrb.mxu0 %v3963_v36  ;;  %vm1587_vm15 = vcmp.eq.f32.partialorder %v1586_v24, 8.507059e+37  ;;  %v2171_v12 = vld [vmem:[%s4339_s1 + $0x18] sm:$0xff] }
 0x44c   :  { %1949 = vmatpush.msrb.mxu1 %v3967_v54  ;;  %1969 = vmatpush.msrb.mxu2 %v3970_v50  ;;  %v4959_v54 = vld [vmem:[#allocation65_spill] sm:$0xff]  ;;  %v4960_v50 = vld [vmem:[#allocation43_spill] sm:$0xff] }
 0x44d   :  { %v1581_v56 = vadd.f32 %v2311_v26, %v1580_v14  ;;  %v1594_v34 = vadd.f32 %v2161_v51, %v1593_v4  ;;  %1877 = vmatpush.msrb.mxu0 %v3978_v40  ;;  %v4961_v40 = vld [vmem:[#allocation46_spill] sm:$0xff] }
 0x44e   :  { %1950 = vmatpush.msrb.mxu1 %v3982_v3  ;;  %1970 = vmatpush.msrb.mxu2 %v3985_v21  ;;  %v4962_v3 = vld [vmem:[#allocation48_spill] sm:$0xff]  ;;  %v4963_v21 = vld [vmem:[#allocation61_spill] sm:$0xff] }
 0x44f   :  { %v1585_v19 = vsel %vm1584_vm14, %v2311_v26, %v1581_v56  ;;  %2312 = vtanh.f32 %v1594_v34  ;;  %1878 = vmatpush.msrb.mxu0 %v3990_v6  ;;  %v4964_v6 = vld [vmem:[#allocation52_spill] sm:$0xff] }
 0x450   :  { %v1590_v61 = vsel %vm1587_vm15, %v1589_v20, %v1585_v19  ;;  %1951 = vmatpush.msrb.mxu1 %v3999_v33  ;;  %1971 = vmatpush.msrb.mxu2 %v4002_v7  ;;  %v4965_v33 = vld [vmem:[#allocation53_spill] sm:$0xff]  ;;  %v4966_v7 = vld [vmem:[#allocation50_spill] sm:$0xff] }
 0x451   :  { %v1596_v10 = vsub.f32 1.0, %v1590_v61  ;;  %1879 = vmatpush.msrb.mxu0 %v4008_v18  ;;  %v1598_v5 = vmul.f32 %v1590_v61, %v4054_v37  ;;  %v4967_v18 = vld [vmem:[#allocation47_spill] sm:$0xff]  ;;  %v4981_v37 = vld [vmem:[#allocation58_spill] sm:$0xff]  ;;  %v2172_v26 = vld [vmem:[%s4339_s1 + $0x20] sm:$0xff] }
 0x452   :  { %1952 = vmatpush.msrb.mxu1 %v4011_v43  ;;  %1972 = vmatpush.msrb.mxu2 %v4014_v31  ;;  %v4968_v43 = vld [vmem:[#allocation59_spill] sm:$0xff]  ;;  %v4969_v31 = vld [vmem:[#allocation32_spill] sm:$0xff] }
 0x453   :  { %1880 = vmatpush.msrb.mxu0 %v4017_v17  ;;  %v4970_v17 = vld [vmem:[#allocation62_spill] sm:$0xff] }
 0x454   :  { %1953 = vmatpush.msrb.mxu1 %v4020_v32  ;;  %1973 = vmatpush.msrb.mxu2 %v4023_v59  ;;  %v4971_v32 = vld [vmem:[#allocation29_spill] sm:$0xff]  ;;  %v4972_v59 = vld [vmem:[#allocation35_spill] sm:$0xff] }
 0x455   :  { %v2313_v11 = vpop.eup %2312  ;;  %1881 = vmatpush.msrb.mxu0 %v4026_v53  ;;  %v4973_v53 = vld [vmem:[#allocation38_spill] sm:$0xff] }
 0x456   :  { %v1597_v46 = vmul.f32 %v2313_v11, %v1596_v10  ;;  %1954 = vmatpush.msrb.mxu1 %v4029_v35  ;;  %1974 = vmatpush.msrb.mxu2 %v4032_v30  ;;  %v4974_v35 = vld [vmem:[#allocation68_spill] sm:$0xff]  ;;  %v4975_v30 = vld [vmem:[#allocation49_spill] sm:$0xff] }
 0x457   :  { %1882 = vmatpush.msrb.mxu0 %v4035_v39  ;;  %v4976_v39 = vld [vmem:[#allocation41_spill] sm:$0xff] }
 0x458   :  { %v4215_v36 = vadd.f32 %v1598_v5, %v1597_v46  ;;  %1955 = vmatpush.msrb.mxu1 %v4038_v57  ;;  %1975 = vmatpush.msrb.mxu2 %v4041_v0  ;;  %v2547_v57 = vld [vmem:[#allocation5 + $0x8] sm:$0xff] }
 0x459   :  { %1883 = vmatpush.msrb.mxu0 %v4045_v41  ;;  %v4977_v0 = vld [vmem:[#allocation54_spill] sm:$0xff]  ;;  %v4978_v41 = vld [vmem:[#allocation55_spill] sm:$0xff] }
 0x45a   :  { %2164 = vst [vmem:[%s4345_s7 + $0x10] sm:$0xff] %v4215_v36  ;;  %1736 = vmatmul.f32.vlgmr.msrb.gmra.mxu3 %v4215_v36  ;;  %1756 = vmatmul.f32.vlgmr.msra.gmra.mxu0 %v4215_v36 }
 0x45b   :  { %1776 = vmatmul.f32.vlgmr.msra.gmra.mxu1 %v4215_v36  ;;  %1987 = vmatpush.msrb.mxu3 %v4072_v1  ;;  %v2165_v1 = vld [vmem:[%s4338_s0 + $0x90] sm:$0xff] }
 0x45c   :  { %1956 = vmatpush.msrb.mxu1 %v4048_v13  ;;  %1884 = vmatpush.msrb.mxu0 %v4056_v49  ;;  %v4979_v13 = vld [vmem:[#allocation56_spill] sm:$0xff] }
 0x45d   :  { %1988 = vmatpush.msrb.mxu3 %v4081_v48  ;;  %1976 = vmatpush.msrb.mxu2 %v4051_v42  ;;  %v4980_v42 = vld [vmem:[#allocation57_spill] sm:$0xff]  ;;  %v4982_v49 = vld [vmem:[#allocation60_spill] sm:$0xff] }
 0x45e   :  { %1957 = vmatpush.msrb.mxu1 %v4059_v8  ;;  %1885 = vmatpush.msrb.mxu0 %v4075_v16  ;;  %v4983_v8 = vld [vmem:[#allocation44_spill] sm:$0xff] }
 0x45f   :  { %1989 = vmatpush.msrb.mxu3 %v4093_v22  ;;  %1977 = vmatpush.msrb.mxu2 %v4062_v27  ;;  %v4984_v27 = vld [vmem:[#allocation40_spill] sm:$0xff] }
 0x460   :  { %1958 = vmatpush.msrb.mxu1 %v4960_v50  ;;  %1886 = vmatpush.msrb.mxu0 %v4961_v40  ;;  %v2166_v16 = vld [vmem:[%s4338_s0 + $0x98] sm:$0xff] }
 0x461   :  { %1990 = vmatpush.msrb.mxu3 %v4959_v54  ;;  %1978 = vmatpush.msrb.mxu2 %v4962_v3  ;;  %v4278_v54 = vld [vmem:[#allocation7] ss:$0 sm:$0xff] }
 0x462   :  { %1959 = vmatpush.msrb.mxu1 %v4964_v6  ;;  %1887 = vmatpush.msrb.mxu0 %v4965_v33 }
 0x463   :  { %1991 = vmatpush.msrb.mxu3 %v4963_v21  ;;  %1979 = vmatpush.msrb.mxu2 %v4966_v7  ;;  %v2167_v21 = vld [vmem:[%s4338_s0 + $0xa0] sm:$0xff] }
 0x464   :  { %1960 = vmatpush.msrb.mxu1 %v4968_v43  ;;  %1888 = vmatpush.msrb.mxu0 %v4969_v31 }
 0x465   :  { %1992 = vmatpush.msrb.mxu3 %v4967_v18  ;;  %1980 = vmatpush.msrb.mxu2 %v4970_v17 }
 0x466   :  { %1961 = vmatpush.msrb.mxu1 %v4972_v59  ;;  %1889 = vmatpush.msrb.mxu0 %v4973_v53 }
 0x467   :  { %1993 = vmatpush.msrb.mxu3 %v4971_v32  ;;  %1981 = vmatpush.msrb.mxu2 %v4974_v35 }
 0x468   :  { %1962 = vmatpush.msrb.mxu1 %v4976_v39 }
 0x469   :  { %1994 = vmatpush.msrb.mxu3 %v4975_v30  ;;  %1982 = vmatpush.msrb.mxu2 %v2547_v57 }
 0x46b   :  { %1995 = vmatpush.msrb.mxu3 %v4977_v0 }
 0x46d   :  { %1996 = vmatpush.msrb.mxu3 %v4978_v41 }
 0x46f   :  { %1997 = vmatpush.msrb.mxu3 %v4979_v13 }
 0x471   :  { %1998 = vmatpush.msrb.mxu3 %v4980_v42 }
 0x473   :  { %1999 = vmatpush.msrb.mxu3 %v4981_v37 }
 0x475   :  { %2000 = vmatpush.msrb.mxu3 %v4982_v49 }
 0x477   :  { %2001 = vmatpush.msrb.mxu3 %v4983_v8 }
 0x479   :  { %2002 = vmatpush.msrb.mxu3 %v4984_v27 }
 0x4c3   :  { %v1623_v48 = vpop.f32.mrf.mxu0  ;;  %v1643_v22 = vpop.f32.mrf.mxu1 }
 0x4c4   :  { %v1666_v62 = vadd.f32 %v2165_v1, %v1623_v48  ;;  %v1686_v9 = vadd.f32 %v2166_v16, %v1643_v22 }
 0x4c6   :  { %v2168_v58 = vmul.f32 -1.442695, %v1666_v62  ;;  %v2169_v47 = vmul.f32 -1.442695, %v1686_v9  ;;  %v4294_v9 = vld [vmem:[#allocation8] ss:$0 sm:$0xff] }
 0x4c8   :  { %2314 = vpow2.f32 %v2168_v58 }
 0x4c9   :  { %2316 = vpow2.f32 %v2169_v47 }
 0x4ca   :  { %v1663_v19 = vpop.f32.mrf.mxu2 }
 0x4cb   :  { %v1706_v50 = vadd.f32 %v4278_v54, %v1663_v19 }
 0x4ce   :  { %v2315_v44 = vpop.eup %2314 }
 0x4cf   :  { %v2317_v45 = vpop.eup %2316  ;;  %v1670_v28 = vadd.f32 1.0, %v2315_v44 }
 0x4d0   :  { %v1690_v15 = vadd.f32 1.0, %v2317_v45 }
 0x4d1   :  { %2318 = vrcp.f32 %v1670_v28  ;;  %v1682_v4 = vand.u32 2147483648, %v1670_v28  ;;  %v1680_v34 = vand.u32 2147483647, %v1670_v28  ;;  %vm1676_vm1 = vweird.f32 %v1670_v28 }
 0x4d2   :  { %2320 = vrcp.f32 %v1690_v15  ;;  %v1702_v33 = vand.u32 2147483648, %v1690_v15  ;;  %vm1696_vm5 = vweird.f32 %v1690_v15  ;;  %v1700_v18 = vand.u32 2147483647, %v1690_v15 }
 0x4d3   :  { %v1683_v46 = vor.u32 1.1754944e-38, %v1682_v4  ;;  %vm1681_vm3 = vcmp.eq.f32.partialorder %v1680_v34, 8.507059e+37 }
 0x4d4   :  { %v1703_v32 = vor.u32 1.1754944e-38, %v1702_v33  ;;  %vm1701_vm7 = vcmp.eq.f32.partialorder %v1700_v18, 8.507059e+37 }
 0x4d7   :  { %v1757_v55 = vpop.f32.mrf.mxu0  ;;  %v2319_v23 = vpop.eup %2318 }
 0x4d8   :  { %v1800_v52 = vadd.f32 %v2172_v26, %v1757_v55  ;;  %v2321_v38 = vpop.eup %2320  ;;  %v1672_v60 = vmul.f32 %v2319_v23, %v1670_v28  ;;  %vm1677_vm0 = vweird.f32 %v2319_v23  ;;  %v1777_v48 = vpop.f32.mrf.mxu1  ;;  %v2173_v28 = vld [vmem:[%s4339_s1 + $0x28] sm:$0xff] }
 0x4d9   :  { %v1692_v51 = vmul.f32 %v2321_v38, %v1690_v15  ;;  %vm1678_vm2 = vmor %vm1676_vm1, %vm1677_vm0  ;;  %vm1697_vm4 = vweird.f32 %v2321_v38  ;;  %v1820_v58 = vadd.f32 %v4294_v9, %v1777_v48 }
 0x4da   :  { %v2175_v29 = vmul.f32 -1.442695, %v1800_v52  ;;  %v1673_v2 = vsub.f32 1.0, %v1672_v60  ;;  %vm1698_vm6 = vmor %vm1696_vm5, %vm1697_vm4 }
 0x4db   :  { %v1693_v63 = vsub.f32 1.0, %v1692_v51 }
 0x4dc   :  { %2322 = vpow2.f32 %v2175_v29  ;;  %v1674_v56 = vmul.f32 %v2319_v23, %v1673_v2 }
 0x4dd   :  { %v1737_v14 = vpop.f32.mrf.mxu3  ;;  %v1694_v20 = vmul.f32 %v2321_v38, %v1693_v63  ;;  %v2177_v63 = vld [vmem:[%s4338_s0 + $0xa8] sm:$0xff] }
 0x4de   :  { %v1780_v24 = vadd.f32 %v2171_v12, %v1737_v14  ;;  %v1675_v10 = vadd.f32 %v2319_v23, %v1674_v56 }
 0x4df   :  { %v1695_v3 = vadd.f32 %v2321_v38, %v1694_v20 }
 0x4e0   :  { %v2174_v61 = vmul.f32 -1.442695, %v1780_v24  ;;  %v1679_v5 = vsel %vm1678_vm2, %v2319_v23, %v1675_v10 }
 0x4e1   :  { %v1684_v6 = vsel %vm1681_vm3, %v1683_v46, %v1679_v5  ;;  %v1699_v17 = vsel %vm1698_vm6, %v2321_v38, %v1695_v3  ;;  %v1944_v5 = vld [vmem:[%s4339_s1] sm:$0xff] }
 0x4e2   :  { %v2323_v11 = vpop.eup %2322  ;;  %2324 = vpow2.f32 %v2174_v61  ;;  %v1707_v7 = vmul.f32 %v1706_v50, %v1684_v6  ;;  %v1704_v53 = vsel %vm1701_vm7, %v1703_v32, %v1699_v17 }
 0x4e3   :  { %v1804_v40 = vadd.f32 1.0, %v2323_v11  ;;  %v1710_v30 = vsub.f32 1.0, %v1704_v53  ;;  %v1712_v41 = vmul.f32 %v1704_v53, %v4180_v25 }
 0x4e4   :  { %v1708_v43 = vadd.f32 %v2167_v21, %v1707_v7  ;;  %v1945_v7 = vld [vmem:[%s4339_s1 + $0x8] sm:$0xff] }
 0x4e5   :  { %2326 = vrcp.f32 %v1804_v40  ;;  %v1816_v15 = vand.u32 2147483648, %v1804_v40  ;;  %vm1810_vm13 = vweird.f32 %v1804_v40  ;;  %v1814_v55 = vand.u32 2147483647, %v1804_v40 }
 0x4e6   :  { %2328 = vtanh.f32 %v1708_v43 }
 0x4e7   :  { %v1817_v29 = vor.u32 1.1754944e-38, %v1816_v15  ;;  %vm1815_vm15 = vcmp.eq.f32.partialorder %v1814_v55, 8.507059e+37 }
 0x4e8   :  { %v2325_v31 = vpop.eup %2324 }
 0x4e9   :  { %v1784_v59 = vadd.f32 1.0, %v2325_v31 }
 0x4eb   :  { %2330 = vrcp.f32 %v1784_v59  ;;  %v2327_v35 = vpop.eup %2326  ;;  %v1796_v27 = vand.u32 2147483648, %v1784_v59  ;;  %v1794_v25 = vand.u32 2147483647, %v1784_v59  ;;  %vm1790_vm9 = vweird.f32 %v1784_v59 }
 0x4ec   :  { %v2329_v39 = vpop.eup %2328  ;;  %v1806_v57 = vmul.f32 %v2327_v35, %v1804_v40  ;;  %vm1811_vm12 = vweird.f32 %v2327_v35 }
 0x4ed   :  { %v1711_v0 = vmul.f32 %v2329_v39, %v1710_v30  ;;  %v1797_v62 = vor.u32 1.1754944e-38, %v1796_v27  ;;  %vm1795_vm11 = vcmp.eq.f32.partialorder %v1794_v25, 8.507059e+37  ;;  %vm1812_vm14 = vmor %vm1810_vm13, %vm1811_vm12  ;;  %v2179_v27 = vld [vmem:[%s4338_s0 + $0xb8] sm:$0xff] }
 0x4ee   :  { %v1807_v49 = vsub.f32 1.0, %v1806_v57 }
 0x4ef   :  { %v4285_v37 = vadd.f32 %v1712_v41, %v1711_v0 }
 0x4f0   :  { %v1808_v16 = vmul.f32 %v2327_v35, %v1807_v49 }
 0x4f1   :  { %v2331_v13 = vpop.eup %2330  ;;  %2170 = vst [vmem:[%s4344_s6 + $0x30] sm:$0xff] %v4285_v37  ;;  %1850 = vmatmul.f32.vlgmr.msra.gmra.mxu2 %v4285_v37  ;;  %1870 = vmatmul.f32.vlgmr.msra.gmra.mxu3 %v4285_v37 }
 0x4f2   :  { %v1786_v42 = vmul.f32 %v2331_v13, %v1784_v59  ;;  %1890 = vmatmul.f32.vlgmr.msrb.gmra.mxu0 %v4285_v37  ;;  %vm1791_vm8 = vweird.f32 %v2331_v13  ;;  %v1809_v44 = vadd.f32 %v2327_v35, %v1808_v16 }
 0x4f3   :  { %vm1792_vm10 = vmor %vm1790_vm9, %vm1791_vm8 }
 0x4f4   :  { %v1787_v8 = vsub.f32 1.0, %v1786_v42  ;;  %v1813_v23 = vsel %vm1812_vm14, %v2327_v35, %v1809_v44 }
 0x4f5   :  { %v1818_v38 = vsel %vm1815_vm15, %v1817_v29, %v1813_v23 }
 0x4f6   :  { %v1788_v1 = vmul.f32 %v2331_v13, %v1787_v8  ;;  %v1824_v60 = vsub.f32 1.0, %v1818_v38  ;;  %v1826_v2 = vmul.f32 %v1818_v38, %v4215_v36  ;;  %v2178_v36 = vld [vmem:[%s4338_s0 + $0xb0] sm:$0xff] }
 0x4f8   :  { %v1789_v22 = vadd.f32 %v2331_v13, %v1788_v1 }
 0x4fa   :  { %v1793_v47 = vsel %vm1792_vm10, %v2331_v13, %v1789_v22 }
 0x4fb   :  { %v1798_v45 = vsel %vm1795_vm11, %v1797_v62, %v1793_v47 }
 0x4fc   :  { %v1821_v26 = vmul.f32 %v1820_v58, %v1798_v45 }
 0x4fe   :  { %v1822_v52 = vadd.f32 %v2173_v28, %v1821_v26 }
 0x500   :  { %2332 = vtanh.f32 %v1822_v52 }
 0x506   :  { %v2333_v12 = vpop.eup %2332 }
 0x507   :  { %v1825_v51 = vmul.f32 %v2333_v12, %v1824_v60 }
 0x509   :  { %v4301_v14 = vadd.f32 %v1826_v2, %v1825_v51 }
 0x50b   :  { %2176 = vst [vmem:[%s4345_s7 + $0x8] sm:$0xff] %v4301_v14  ;;  %1963 = vmatmul.f32.vlgmr.msrb.gmra.mxu1 %v4301_v14  ;;  %1983 = vmatmul.f32.vlgmr.msrb.gmra.mxu2 %v4301_v14 }
 0x50c   :  { %2003 = vmatmul.f32.vlgmr.msrb.gmra.mxu3 %v4301_v14 }
 0x56f   :  { %v1891_v30 = vpop.f32.mrf.mxu0 }
 0x570   :  { %v1934_v42 = vadd.f32 %v4278_v54, %v1891_v30 }
 0x574   :  { %v1851_v4 = vpop.f32.mrf.mxu2  ;;  %v1871_v24 = vpop.f32.mrf.mxu3 }
 0x575   :  { %v1894_v56 = vadd.f32 %v2177_v63, %v1851_v4  ;;  %v1914_v34 = vadd.f32 %v2178_v36, %v1871_v24 }
 0x577   :  { %v2180_v20 = vmul.f32 -1.442695, %v1894_v56  ;;  %v2181_v19 = vmul.f32 -1.442695, %v1914_v34 }
 0x579   :  { %2334 = vpow2.f32 %v2180_v20  ;;  %v1946_v20 = vld [vmem:[%s4339_s1 + $0x10] sm:$0xff] }
 0x57a   :  { %2336 = vpow2.f32 %v2181_v19 }
 0x57f   :  { %v2335_v61 = vpop.eup %2334 }
 0x580   :  { %v2337_v10 = vpop.eup %2336  ;;  %v1898_v11 = vadd.f32 1.0, %v2335_v61 }
 0x581   :  { %v1918_v46 = vadd.f32 1.0, %v2337_v10 }
 0x582   :  { %2338 = vrcp.f32 %v1898_v11  ;;  %v1910_v17 = vand.u32 2147483648, %v1898_v11  ;;  %v1908_v35 = vand.u32 2147483647, %v1898_v11  ;;  %vm1904_vm1 = vweird.f32 %v1898_v11 }
 0x583   :  { %2340 = vrcp.f32 %v1918_v46  ;;  %v1930_v48 = vand.u32 2147483648, %v1918_v46  ;;  %vm1924_vm5 = vweird.f32 %v1918_v46  ;;  %v1928_v22 = vand.u32 2147483647, %v1918_v46 }
 0x584   :  { %v1911_v13 = vor.u32 1.1754944e-38, %v1910_v17  ;;  %vm1909_vm3 = vcmp.eq.f32.partialorder %v1908_v35, 8.507059e+37 }
 0x585   :  { %v1931_v54 = vor.u32 1.1754944e-38, %v1930_v48  ;;  %vm1929_vm7 = vcmp.eq.f32.partialorder %v1928_v22, 8.507059e+37 }
 0x588   :  { %v1964_v50 = vpop.f32.mrf.mxu1  ;;  %v2339_v3 = vpop.eup %2338 }
 0x589   :  { %v2007_v40 = vadd.f32 %v1964_v50, %v1944_v5  ;;  %v2341_v6 = vpop.eup %2340  ;;  %v1900_v33 = vmul.f32 %v2339_v3, %v1898_v11  ;;  %vm1905_vm0 = vweird.f32 %v2339_v3 }
 0x58a   :  { %v1920_v18 = vmul.f32 %v2341_v6, %v1918_v46  ;;  %vm1906_vm2 = vmor %vm1904_vm1, %vm1905_vm0  ;;  %vm1925_vm4 = vweird.f32 %v2341_v6 }
 0x58b   :  { %v2183_v21 = vmul.f32 -1.442695, %v2007_v40  ;;  %v1901_v43 = vsub.f32 1.0, %v1900_v33  ;;  %vm1926_vm6 = vmor %vm1924_vm5, %vm1925_vm4 }
 0x58c   :  { %v1921_v32 = vsub.f32 1.0, %v1920_v18 }
 0x58d   :  { %2342 = vpow2.f32 %v2183_v21  ;;  %v1902_v53 = vmul.f32 %v2339_v3, %v1901_v43 }
 0x58e   :  { %v1984_v31 = vpop.f32.mrf.mxu2  ;;  %v1922_v39 = vmul.f32 %v2341_v6, %v1921_v32 }
 0x58f   :  { %v2027_v59 = vadd.f32 %v1984_v31, %v1945_v7  ;;  %v1903_v0 = vadd.f32 %v2339_v3, %v1902_v53  ;;  %v2004_v2 = vpop.f32.mrf.mxu3 }
 0x590   :  { %v1923_v25 = vadd.f32 %v2341_v6, %v1922_v39 }
 0x591   :  { %v2184_v57 = vmul.f32 -1.442695, %v2027_v59  ;;  %v1907_v49 = vsel %vm1906_vm2, %v2339_v3, %v1903_v0 }
 0x592   :  { %v1912_v1 = vsel %vm1909_vm3, %v1911_v13, %v1907_v49  ;;  %v1927_v47 = vsel %vm1926_vm6, %v2341_v6, %v1923_v25 }
 0x593   :  { %v2343_v41 = vpop.eup %2342  ;;  %2344 = vpow2.f32 %v2184_v57  ;;  %v1935_v16 = vmul.f32 %v1934_v42, %v1912_v1  ;;  %v1932_v28 = vsel %vm1929_vm7, %v1931_v54, %v1927_v47 }
 0x594   :  { %v2011_v8 = vadd.f32 1.0, %v2343_v41  ;;  %v1938_v26 = vsub.f32 1.0, %v1932_v28  ;;  %v1940_v23 = vmul.f32 %v1932_v28, %v4285_v37  ;;  %v2047_v37 = vadd.f32 %v4294_v9, %v2004_v2 }
 0x595   :  { %v1936_v62 = vadd.f32 %v2179_v27, %v1935_v16 }
 0x596   :  { %2346 = vrcp.f32 %v2011_v8  ;;  %v2023_v29 = vand.u32 2147483648, %v2011_v8  ;;  %v2021_v12 = vand.u32 2147483647, %v2011_v8  ;;  %vm2017_vm9 = vweird.f32 %v2011_v8 }
 0x597   :  { %2348 = vtanh.f32 %v1936_v62 }
 0x598   :  { %v2024_v24 = vor.u32 1.1754944e-38, %v2023_v29  ;;  %vm2022_vm11 = vcmp.eq.f32.partialorder %v2021_v12, 8.507059e+37 }
 0x599   :  { %v2345_v58 = vpop.eup %2344 }
 0x59a   :  { %v2031_v44 = vadd.f32 1.0, %v2345_v58 }
 0x59c   :  { %v2347_v45 = vpop.eup %2346  ;;  %2350 = vrcp.f32 %v2031_v44  ;;  %v2043_v10 = vand.u32 2147483648, %v2031_v44  ;;  %v2041_v46 = vand.u32 2147483647, %v2031_v44  ;;  %vm2037_vm13 = vweird.f32 %v2031_v44 }
 0x59d   :  { %v2013_v15 = vmul.f32 %v2347_v45, %v2011_v8  ;;  %v2349_v52 = vpop.eup %2348  ;;  %vm2018_vm8 = vweird.f32 %v2347_v45 }
 0x59e   :  { %v1939_v38 = vmul.f32 %v2349_v52, %v1938_v26  ;;  %vm2019_vm10 = vmor %vm2017_vm9, %vm2018_vm8  ;;  %v2044_v40 = vor.u32 1.1754944e-38, %v2043_v10  ;;  %vm2042_vm15 = vcmp.eq.f32.partialorder %v2041_v46, 8.507059e+37 }
 0x59f   :  { %v2014_v55 = vsub.f32 1.0, %v2013_v15 }
 0x5a0   :  { %v1941_v63 = vadd.f32 %v1940_v23, %v1939_v38 }
 0x5a1   :  { %v2015_v60 = vmul.f32 %v2347_v45, %v2014_v55 }
 0x5a2   :  { %v2351_v51 = vpop.eup %2350  ;;  %2182 = vst [vmem:[%s4344_s6 + $0x38] sm:$0xff] %v1941_v63 }
 0x5a3   :  { %v2033_v36 = vmul.f32 %v2351_v51, %v2031_v44  ;;  %v2016_v4 = vadd.f32 %v2347_v45, %v2015_v60  ;;  %vm2038_vm12 = vweird.f32 %v2351_v51 }
 0x5a4   :  { %vm2039_vm14 = vmor %vm2037_vm13, %vm2038_vm12 }
 0x5a5   :  { %v2034_v56 = vsub.f32 1.0, %v2033_v36  ;;  %v2020_v34 = vsel %vm2019_vm10, %v2347_v45, %v2016_v4 }
 0x5a6   :  { %v2025_v19 = vsel %vm2022_vm11, %v2024_v24, %v2020_v34 }
 0x5a7   :  { %v2035_v61 = vmul.f32 %v2351_v51, %v2034_v56  ;;  %v2048_v11 = vmul.f32 %v2047_v37, %v2025_v19 }
 0x5a9   :  { %v2036_v5 = vadd.f32 %v2351_v51, %v2035_v61  ;;  %v2049_v50 = vadd.f32 %v2048_v11, %v1946_v20 }
 0x5ab   :  { %v2040_v3 = vsel %vm2039_vm14, %v2351_v51, %v2036_v5  ;;  %2352 = vtanh.f32 %v2049_v50 }
 0x5ac   :  { %v2045_v21 = vsel %vm2042_vm15, %v2044_v40, %v2040_v3 }
 0x5ad   :  { %v2051_v9 = vsub.f32 1.0, %v2045_v21  ;;  %v2053_v7 = vmul.f32 %v2045_v21, %v4301_v14 }
 0x5b1   :  { %v2353_v6 = vpop.eup %2352 }
 0x5b2   :  { %v2052_v33 = vmul.f32 %v2353_v6, %v2051_v9 }
 0x5b4   :  { %v2054_v18 = vadd.f32 %v2053_v7, %v2052_v33 }
 0x5b6   :  { %2055 = vst [vmem:[%s4345_s7] sm:$0xff] %v2054_v18 }
 0x5b7   :  { %2080 = vsyncpa [#allocation4], 1 }
 0x5b8   :  { %2081 = vsyncpa [#allocation6], 1 }
 0x5b9   :  { %2082 = vsyncpa [#allocation9], 1 }

</bundles_post_ra>
